<compile_context>
chip_gen: v7x
topology: tpu7x:2x2x1
jax: 0.10.0
libtpu: 0.0.40
codegen_flags: <defaults>
</compile_context>

<pallas_src>
import jax
import jax.numpy as jnp
from jax import lax
from jax.experimental import pallas as pl
from jax.experimental.pallas import tpu as pltpu


# --------------------------------------------------------------- helpers ----

def _vmem_limit_bytes():
    """Generation-aware scoped-VMEM budget: ~75% of physical VMEM, capped at 100 MiB."""
    cap = 128 * 1024 * 1024
    try:
        info = pltpu.get_tpu_info()
        cap = int(getattr(info, "vmem_capacity_bytes", cap))
    except Exception:
        pass
    return int(min(cap * 3 // 4, 100 * 1024 * 1024))


def _single_buffered_spec(block_shape, index_map):
    """Grid-invariant operand (constant index_map): request single-buffering."""
    try:
        return pl.BlockSpec(block_shape, index_map, pipeline_mode=pl.Buffered(1))
    except Exception:  # pl.Buffered / pipeline_mode unavailable -> default buffering
        return pl.BlockSpec(block_shape, index_map)


def _pick_batch_block(N, Ho, Wo, C, Ci, budget):
    """Largest divisor B of N fitting the VMEM budget; stop once M = B*Ho*Wo >= 256."""
    Hs, Ws = Ho + 1, Wo + 1
    best = 1
    for b in range(1, N + 1):
        if N % b:
            continue
        xs_b = b * Hs * Ws * 4 * C * 2                       # bf16 input block
        y_b = b * Ho * 2 * Wo * 2 * C * 2                    # bf16 output block
        hpad = b * (Ho + 2) * (Wo + 2) * Ci * 2              # bf16 scratch
        wts = (16 * C * Ci + 16 * Ci * C) * 2                # single-buffered weights
        live = b * Ho * Wo * (4 * C + 2 * Ci + 2 * C) * 4    # rough f32 values in flight
        if 2 * (xs_b + y_b) + hpad + wts + live <= budget:
            best = b
            if b * Ho * Wo >= 256:                           # M tall enough for the MXU
                break
    return best


# ---------------------------------------------------------------- kernels ---

def _fused_down_up_kernel(xs_ref, wd_ref, wu_ref, y_ref, st_ref, hpad_ref):
    """Fused LeakyReLU + Conv2d(4,2,1) + ReLU + ConvTranspose2d(4,2,1) for B batch
    items (stacked into the matmul M dim), plus BatchNorm partial sums.

      xs_ref : (B, Ho+1, Wo+1, 4C)  padded, space-to-depth'ed input (bf16)
      wd_ref : (4, 4C, Ci)          downconv as 2x2 stride-1 conv taps (bf16)
      wu_ref : (4, 4, Ci, C)        upconv sub-pixel (phase) taps (bf16)
      y_ref  : (B, Ho, 2, Wo, 2C)   un-normalized upconv output (bf16; free NHWC reshape)
      st_ref : (1, 2, C)            per-step BN partial sums (sum, sum of squares, f32)
      hpad_ref: (B, Ho+2, Wo+2, Ci) VMEM scratch: zero-padded ReLU(h), bf16
    """
    B, Hs, Ws, K4 = xs_ref.shape
    Ho, Wo = Hs - 1, Ws - 1
    Ci = wd_ref.shape[2]
    C = wu_ref.shape[3]
    M = B * Ho * Wo

    # LeakyReLU(0.2) in f32, single bf16 cast of the whole block (the four shifted
    # slices overlap ~75%, so per-slice casting would redo most of the work).
    xv = xs_ref[...].astype(jnp.float32)
    xv = jnp.where(xv >= 0.0, xv, 0.2 * xv).astype(jnp.bfloat16)

    # down path: 2x2 stride-1 conv over the s2d input; batch folded into M.
    acc = jnp.zeros((M, Ci), jnp.float32)
    for bi in range(2):
        for bj in range(2):
            lhs = xv[:, bi:bi + Ho, bj:bj + Wo, :].reshape(M, K4)
            acc = acc + jnp.dot(lhs, wd_ref[bi * 2 + bj],
                                preferred_element_type=jnp.float32)
    h = jnp.maximum(acc, 0.0)                       # uprelu (f32 accumulator)

    # Stage zero-padded ReLU(h) in bf16 VMEM scratch; zero only the 1-wide border
    # (the interior is fully overwritten every step).
    zrow = jnp.zeros((B, 1, Wo + 2, Ci), jnp.bfloat16)
    zcol = jnp.zeros((B, Ho, 1, Ci), jnp.bfloat16)
    hpad_ref[:, 0:1, :, :] = zrow
    hpad_ref[:, Ho + 1:Ho + 2, :, :] = zrow
    hpad_ref[:, 1:Ho + 1, 0:1, :] = zcol
    hpad_ref[:, 1:Ho + 1, Wo + 1:Wo + 2, :] = zcol
    hpad_ref[:, 1:Ho + 1, 1:Wo + 1, :] = h.reshape(B, Ho, Wo, Ci).astype(jnp.bfloat16)

    # up path: 4 output phases x 2x2 taps; taps re-sliced per phase so at most 4
    # (M, Ci) views are live at once (bounds vreg/spill pressure).
    s1 = jnp.zeros((1, C), jnp.float32)
    s2 = jnp.zeros((1, C), jnp.float32)
    for pi in range(2):
        for pj in range(2):
            ph = jnp.zeros((M, C), jnp.float32)
            for a in range(2):
                for b in range(2):
                    tap = hpad_ref[:, pi + a:pi + a + Ho,
                                   pj + b:pj + b + Wo, :].reshape(M, Ci)
                    ph = ph + jnp.dot(tap, wu_ref[pi * 2 + pj, a * 2 + b],
                                      preferred_element_type=jnp.float32)
            # phase-structured bf16 store; HBM layout is exactly NHWC after a free reshape
            y_ref[:, :, pi, :, pj * C:(pj + 1) * C] = (
                ph.reshape(B, Ho, Wo, C).astype(y_ref.dtype))
            # BN partials from the f32 accumulator (before the bf16 store cast)
            s1 = s1 + jnp.sum(ph, axis=0, keepdims=True)
            s2 = s2 + jnp.sum(ph * ph, axis=0, keepdims=True)
    st_ref[0, 0:1, :] = s1
    st_ref[0, 1:2, :] = s2


def _bn_concat_kernel(x_ref, y_ref, dscale_ref, shift_ref, o_ref):
    """BatchNorm affine + NHWC->NCHW + skip-concat, one lane-dense pass.

      x_ref     : (1, C, T)    original input (NCHW, spatial tile, f32)
      y_ref     : (1, T, C)    un-normalized upconv output (NHWC tile, bf16)
      dscale_ref: (C, C)       diag(gamma * rsqrt(var+eps))        (f32)
      shift_ref : (C, 1)       beta - mean*scale                   (f32)
      o_ref     : (1, 2C, T)   [x ; y_norm]  (lane-dense last dim, f32)
    """
    C = x_ref.shape[1]
    # (C,C) @ (T,C)^T -> (C,T): per-channel scale and the layout transpose are
    # folded into a single MXU dot (no standalone XLU transpose).
    yt = lax.dot_general(dscale_ref[...], y_ref[0].astype(jnp.float32),
                         (((1,), (1,)), ((), ())),
                         preferred_element_type=jnp.float32)
    o_ref[0, 0:C, :] = x_ref[0]
    o_ref[0, C:2 * C, :] = yt + shift_ref[...]


# ------------------------------------------------------------------- glue ---

def unet_innermost_forward(x, w_down, w_up, gamma, beta):
    """x: (N, C, H, W) f32 -> (N, 2C, H, W) f32 (PyTorch NCHW semantics)."""
    N, C, H, W = x.shape
    Ci = w_down.shape[0]
    assert H % 2 == 0 and W % 2 == 0
    Ho, Wo = H // 2, W // 2
    Hs, Ws = Ho + 1, Wo + 1
    HW = H * W

    vmem_limit = _vmem_limit_bytes()

    # Layout plumbing (single XLA pass) in bf16: pad + space-to-depth, channels
    # ordered (pi, pj, c).  bf16 halves this pass's HBM traffic and kernel-1's DMA.
    xb = x.astype(jnp.bfloat16)
    xp = jnp.pad(xb, ((0, 0), (0, 0), (1, 1), (1, 1)))
    xs = (xp.reshape(N, C, Hs, 2, Ws, 2)
            .transpose(0, 2, 4, 3, 5, 1)              # n, i, j, pi, pj, c
            .reshape(N, Hs, Ws, 4 * C))

    # Downconv taps: Conv2d(k=4,s=2,p=1) == 2x2 stride-1 conv on the s2d input.
    wd_taps = []
    for bi in range(2):
        for bj in range(2):
            blk = w_down[:, :, 2 * bi:2 * bi + 2, 2 * bj:2 * bj + 2]   # (Ci,C,2,2)
            wd_taps.append(blk.transpose(2, 3, 1, 0).reshape(4 * C, Ci))
    wd_mat = jnp.stack(wd_taps).astype(jnp.bfloat16)                    # (4, 4C, Ci)

    # Upconv taps: ConvTranspose2d(k=4,s=2,p=1) == 4 output phases x 2x2 taps.
    wu_rows = []
    for pi in range(2):
        for pj in range(2):
            t = []
            for a in range(2):
                for b in range(2):
                    t.append(w_up[:, :, 3 - 2 * a - pi, 3 - 2 * b - pj])  # (Ci, C)
            wu_rows.append(jnp.stack(t))
    wu_mat = jnp.stack(wu_rows).astype(jnp.bfloat16)                    # (4, 4, Ci, C)

    # ---- kernel 1: fused down+up conv, batch-blocked grid ("parallel") --------
    B = _pick_batch_block(N, Ho, Wo, C, Ci, budget=int(vmem_limit * 0.8))
    nb = N // B

    y_raw, stats = pl.pallas_call(
        _fused_down_up_kernel,
        out_shape=(jax.ShapeDtypeStruct((N, Ho, 2, Wo, 2 * C), jnp.bfloat16),
                   jax.ShapeDtypeStruct((nb, 2, C), jnp.float32)),
        grid=(nb,),
        in_specs=[pl.BlockSpec((B, Hs, Ws, 4 * C), lambda n: (n, 0, 0, 0)),
                  _single_buffered_spec((4, 4 * C, Ci), lambda n: (0, 0, 0)),
                  _single_buffered_spec((4, 4, Ci, C), lambda n: (0, 0, 0, 0))],
        out_specs=(pl.BlockSpec((B, Ho, 2, Wo, 2 * C), lambda n: (n, 0, 0, 0, 0)),
                   pl.BlockSpec((1, 2, C), lambda n: (n, 0, 0))),
        scratch_shapes=[pltpu.VMEM((B, Ho + 2, Wo + 2, Ci), jnp.bfloat16)],
        compiler_params=pltpu.CompilerParams(
            dimension_semantics=("parallel",),
            vmem_limit_bytes=vmem_limit),
    )(xs, wd_mat, wu_mat)

    # ---- BatchNorm batch statistics (training mode) from f32 partial sums ----
    cnt = jnp.float32(N * H * W)
    s = jnp.sum(stats, axis=0)                        # (2, C) -- tiny reduction
    mean = s[0] / cnt
    # TODO(synk): E[y^2]-E[y]^2 can cancel if |mean| >> std; acceptable here since
    # the zero-mean conv weights keep the upconv output roughly zero-centered.
    var = jnp.maximum(s[1] / cnt - mean * mean, 0.0)  # biased variance (torch BN)
    scale = gamma * lax.rsqrt(var + 1e-5)
    shift = beta - mean * scale
    dscale = jnp.diag(scale).astype(jnp.float32)      # (C, C)
    shift_col = shift[:, None].astype(jnp.float32)    # (C, 1)

    # ---- kernel 2: normalize + NHWC->NCHW + skip concat, tiled over N x HW ----
    T = HW
    if HW > 4096:                                     # bound VMEM (v7x), keep lane-dense
        for cand in (4096, 2048, 1024, 512):
            if HW % cand == 0:
                T = cand
                break
    nt = HW // T

    out = pl.pallas_call(
        _bn_concat_kernel,
        out_shape=jax.ShapeDtypeStruct((N, 2 * C, HW), jnp.float32),
        grid=(N, nt),
        in_specs=[pl.BlockSpec((1, C, T), lambda n, t: (n, 0, t)),
                  pl.BlockSpec((1, T, C), lambda n, t: (n, t, 0)),
                  _single_buffered_spec((C, C), lambda n, t: (0, 0)),
                  _single_buffered_spec((C, 1), lambda n, t: (0, 0))],
        out_specs=pl.BlockSpec((1, 2 * C, T), lambda n, t: (n, 0, t)),
        compiler_params=pltpu.CompilerParams(
            dimension_semantics=("parallel", "parallel"),
            vmem_limit_bytes=vmem_limit),
    )(x.reshape(N, C, HW), y_raw.reshape(N, HW, C), dscale, shift_col)

    return out.reshape(N, 2 * C, H, W)


# ------------------------------------------------------------- reference ----

def _reference(x, w_down, w_up, gamma, beta):
    # Mirrors the kernel's deliberate bf16-storage / f32-accumulation precision;
    # semantics otherwise identical to the PyTorch module (training-mode BN).
    xb = x.astype(jnp.bfloat16).astype(jnp.float32)
    xl = jnp.where(xb >= 0, xb, 0.2 * xb).astype(jnp.bfloat16)
    h = lax.conv_general_dilated(xl, w_down.astype(jnp.bfloat16),
                                 (2, 2), ((1, 1), (1, 1)),
                                 dimension_numbers=('NCHW', 'OIHW', 'NCHW'),
                                 preferred_element_type=jnp.float32)
    h = jnp.maximum(h, 0.0).astype(jnp.bfloat16)
    w_eq = jnp.flip(w_up, axis=(2, 3)).transpose(1, 0, 2, 3)
    y = lax.conv_general_dilated(h, w_eq.astype(jnp.bfloat16),
                                 (1, 1), ((2, 2), (2, 2)), lhs_dilation=(2, 2),
                                 dimension_numbers=('NCHW', 'OIHW', 'NCHW'),
                                 preferred_element_type=jnp.float32)
    y = y.astype(jnp.bfloat16).astype(jnp.float32)    # kernel stores y_raw in bf16
    mean = y.mean(axis=(0, 2, 3), keepdims=True)
    var = ((y - mean) ** 2).mean(axis=(0, 2, 3), keepdims=True)
    yn = (y - mean) * lax.rsqrt(var + 1e-5) * gamma.reshape(1, -1, 1, 1) \
        + beta.reshape(1, -1, 1, 1)
    return jnp.concatenate([x, yn], axis=1)


# ----------------------------------------------------------------- driver ---

if __name__ == "__main__":
    # TODO(synk): BatchNorm running_mean/running_var buffer updates are not modeled
    # (forward output uses batch statistics, matching torch training-mode forward).
    N, outer_nc, inner_nc, H, W = 2, 4, 8, 16, 16     # input_nc = outer_nc
    key = jax.random.PRNGKey(0)
    kx, kd, ku = jax.random.split(key, 3)

    x = jax.random.normal(kx, (N, outer_nc, H, W), jnp.float32)
    # Conv2d weight: (inner_nc, outer_nc, 4, 4); ConvTranspose2d: (inner_nc, outer_nc, 4, 4)
    w_down = 0.02 * jax.random.normal(kd, (inner_nc, outer_nc, 4, 4), jnp.float32)
    w_up = 0.02 * jax.random.normal(ku, (inner_nc, outer_nc, 4, 4), jnp.float32)
    gamma = jnp.ones((outer_nc,), jnp.float32)        # BatchNorm2d default init
    beta = jnp.zeros((outer_nc,), jnp.float32)

    fwd = jax.jit(unet_innermost_forward)
    out = jax.block_until_ready(fwd(x, w_down, w_up, gamma, beta))

    ref = _reference(x, w_down, w_up, gamma, beta)
    assert out.shape == (N, 2 * outer_nc, H, W)
    max_err = float(jnp.max(jnp.abs(out - ref)))
    assert jnp.allclose(out, ref, atol=1e-2, rtol=1e-2), \
        f"mismatch vs reference (max abs err {max_err})"

    print("KERNEL_OK")
</pallas_src>

<mosaic_0001>
module attributes {stable_mosaic.version = 11 : i64} {
  func.func @_fused_down_up_kernel(%arg0: i32, %arg1: memref<2x9x9x16xbf16, #tpu.memory_space<vmem>>, %arg2: memref<4x16x8xbf16, #tpu.memory_space<vmem>>, %arg3: memref<4x4x8x4xbf16, #tpu.memory_space<vmem>>, %arg4: memref<2x8x2x8x8xbf16, #tpu.memory_space<vmem>>, %arg5: memref<1x2x4xf32, #tpu.memory_space<vmem>>, %arg6: memref<2x10x10x8xbf16, #tpu.memory_space<vmem>>) attributes {dimension_semantics = [#tpu.dimension_semantics<parallel>], iteration_bounds = array<i64: 1>, scalar_prefetch = 0 : i64, scratch_operands = 1 : i64, tpu.core_type = #tpu.core_type<tc>, window_params = [{transform_indices = @transform_0, window_bounds = array<i64: 2, 9, 9, 16>}, {pipeline_mode = #tpu.pipeline_mode<synchronous>, transform_indices = @transform_1, window_bounds = array<i64: 4, 16, 8>}, {pipeline_mode = #tpu.pipeline_mode<synchronous>, transform_indices = @transform_2, window_bounds = array<i64: 4, 4, 8, 4>}, {transform_indices = @transform_3, window_bounds = array<i64: 2, 8, 2, 8, 8>}, {transform_indices = @transform_4, window_bounds = array<i64: 1, 2, 4>}]} {
    %c0 = arith.constant 0 : index
    %c0_0 = arith.constant 0 : index
    %c0_1 = arith.constant 0 : index
    %c0_2 = arith.constant 0 : index
    %0 = vector.load %arg1[%c0, %c0_0, %c0_1, %c0_2] : memref<2x9x9x16xbf16, #tpu.memory_space<vmem>>, vector<2x9x9x16xbf16>
    %1 = arith.extf %0 : vector<2x9x9x16xbf16> to vector<2x9x9x16xf32>
    %cst = arith.constant 0.000000e+00 : f32
    %2 = vector.broadcast %cst : f32 to vector<2x9x9x16xf32>
    %3 = arith.cmpf oge, %1, %2 : vector<2x9x9x16xf32>
    %cst_3 = arith.constant 2.000000e-01 : f32
    %4 = vector.broadcast %cst_3 : f32 to vector<2x9x9x16xf32>
    %5 = arith.mulf %4, %1 : vector<2x9x9x16xf32>
    %6 = arith.select %3, %1, %5 : vector<2x9x9x16xi1>, vector<2x9x9x16xf32>
    %7 = arith.truncf %6 : vector<2x9x9x16xf32> to vector<2x9x9x16xbf16>
    %cst_4 = arith.constant 0.000000e+00 : f32
    %8 = vector.broadcast %cst_4 : f32 to vector<128x8xf32>
    %9 = vector.extract_strided_slice %7 {offsets = [0, 0, 0, 0], sizes = [2, 8, 8, 16], strides = [1, 1, 1, 1]} : vector<2x9x9x16xbf16> to vector<2x8x8x16xbf16>
    %10 = vector.shape_cast %9 : vector<2x8x8x16xbf16> to vector<128x16xbf16>
    %c0_5 = arith.constant 0 : index
    %c0_6 = arith.constant 0 : index
    %c0_7 = arith.constant 0 : index
    %11 = vector.load %arg2[%c0_5, %c0_6, %c0_7] : memref<4x16x8xbf16, #tpu.memory_space<vmem>>, vector<1x16x8xbf16>
    %12 = vector.shape_cast %11 : vector<1x16x8xbf16> to vector<16x8xbf16>
    %cst_8 = arith.constant dense<0.000000e+00> : vector<128x8xf32>
    %13 = tpu.matmul %10, %12, %cst_8 {dimension_numbers = #tpu.dot_dimension_numbers<[1], [0], [0], [1], [0, 0, 1, 1], [], []>} : vector<128x16xbf16>, vector<16x8xbf16>, vector<128x8xf32> -> vector<128x8xf32>
    %14 = arith.addf %8, %13 : vector<128x8xf32>
    %15 = vector.extract_strided_slice %7 {offsets = [0, 0, 1, 0], sizes = [2, 8, 8, 16], strides = [1, 1, 1, 1]} : vector<2x9x9x16xbf16> to vector<2x8x8x16xbf16>
    %16 = vector.shape_cast %15 : vector<2x8x8x16xbf16> to vector<128x16xbf16>
    %c1 = arith.constant 1 : index
    %c0_9 = arith.constant 0 : index
    %c0_10 = arith.constant 0 : index
    %17 = vector.load %arg2[%c1, %c0_9, %c0_10] : memref<4x16x8xbf16, #tpu.memory_space<vmem>>, vector<1x16x8xbf16>
    %18 = vector.shape_cast %17 : vector<1x16x8xbf16> to vector<16x8xbf16>
    %cst_11 = arith.constant dense<0.000000e+00> : vector<128x8xf32>
    %19 = tpu.matmul %16, %18, %cst_11 {dimension_numbers = #tpu.dot_dimension_numbers<[1], [0], [0], [1], [0, 0, 1, 1], [], []>} : vector<128x16xbf16>, vector<16x8xbf16>, vector<128x8xf32> -> vector<128x8xf32>
    %20 = arith.addf %14, %19 : vector<128x8xf32>
    %21 = vector.extract_strided_slice %7 {offsets = [0, 1, 0, 0], sizes = [2, 8, 8, 16], strides = [1, 1, 1, 1]} : vector<2x9x9x16xbf16> to vector<2x8x8x16xbf16>
    %22 = vector.shape_cast %21 : vector<2x8x8x16xbf16> to vector<128x16xbf16>
    %c2 = arith.constant 2 : index
    %c0_12 = arith.constant 0 : index
    %c0_13 = arith.constant 0 : index
    %23 = vector.load %arg2[%c2, %c0_12, %c0_13] : memref<4x16x8xbf16, #tpu.memory_space<vmem>>, vector<1x16x8xbf16>
    %24 = vector.shape_cast %23 : vector<1x16x8xbf16> to vector<16x8xbf16>
    %cst_14 = arith.constant dense<0.000000e+00> : vector<128x8xf32>
    %25 = tpu.matmul %22, %24, %cst_14 {dimension_numbers = #tpu.dot_dimension_numbers<[1], [0], [0], [1], [0, 0, 1, 1], [], []>} : vector<128x16xbf16>, vector<16x8xbf16>, vector<128x8xf32> -> vector<128x8xf32>
    %26 = arith.addf %20, %25 : vector<128x8xf32>
    %27 = vector.extract_strided_slice %7 {offsets = [0, 1, 1, 0], sizes = [2, 8, 8, 16], strides = [1, 1, 1, 1]} : vector<2x9x9x16xbf16> to vector<2x8x8x16xbf16>
    %28 = vector.shape_cast %27 : vector<2x8x8x16xbf16> to vector<128x16xbf16>
    %c3 = arith.constant 3 : index
    %c0_15 = arith.constant 0 : index
    %c0_16 = arith.constant 0 : index
    %29 = vector.load %arg2[%c3, %c0_15, %c0_16] : memref<4x16x8xbf16, #tpu.memory_space<vmem>>, vector<1x16x8xbf16>
    %30 = vector.shape_cast %29 : vector<1x16x8xbf16> to vector<16x8xbf16>
    %cst_17 = arith.constant dense<0.000000e+00> : vector<128x8xf32>
    %31 = tpu.matmul %28, %30, %cst_17 {dimension_numbers = #tpu.dot_dimension_numbers<[1], [0], [0], [1], [0, 0, 1, 1], [], []>} : vector<128x16xbf16>, vector<16x8xbf16>, vector<128x8xf32> -> vector<128x8xf32>
    %32 = arith.addf %26, %31 : vector<128x8xf32>
    %cst_18 = arith.constant 0.000000e+00 : f32
    %33 = vector.broadcast %cst_18 : f32 to vector<128x8xf32>
    %34 = arith.maximumf %32, %33 : vector<128x8xf32>
    %cst_19 = arith.constant 0.000000e+00 : bf16
    %35 = vector.broadcast %cst_19 : bf16 to vector<2x1x10x8xbf16>
    %cst_20 = arith.constant 0.000000e+00 : bf16
    %36 = vector.broadcast %cst_20 : bf16 to vector<2x8x1x8xbf16>
    %c0_21 = arith.constant 0 : index
    %c0_22 = arith.constant 0 : index
    %c0_23 = arith.constant 0 : index
    %c0_24 = arith.constant 0 : index
    %37 = vector.load %arg6[%c0_21, %c0_22, %c0_23, %c0_24] : memref<2x10x10x8xbf16, #tpu.memory_space<vmem>>, vector<2x1x10x8xbf16>
    tpu.vector_store %arg6[%c0_21, %c0_22, %c0_23, %c0_24], %35 {strides = array<i32>} : memref<2x10x10x8xbf16, #tpu.memory_space<vmem>>, vector<2x1x10x8xbf16>,
    %c0_25 = arith.constant 0 : index
    %c9 = arith.constant 9 : index
    %c0_26 = arith.constant 0 : index
    %c0_27 = arith.constant 0 : index
    %38 = vector.load %arg6[%c0_25, %c9, %c0_26, %c0_27] : memref<2x10x10x8xbf16, #tpu.memory_space<vmem>>, vector<2x1x10x8xbf16>
    tpu.vector_store %arg6[%c0_25, %c9, %c0_26, %c0_27], %35 {strides = array<i32>} : memref<2x10x10x8xbf16, #tpu.memory_space<vmem>>, vector<2x1x10x8xbf16>,
    %c0_28 = arith.constant 0 : index
    %c1_29 = arith.constant 1 : index
    %c0_30 = arith.constant 0 : index
    %c0_31 = arith.constant 0 : index
    %39 = vector.load %arg6[%c0_28, %c1_29, %c0_30, %c0_31] : memref<2x10x10x8xbf16, #tpu.memory_space<vmem>>, vector<2x8x1x8xbf16>
    tpu.vector_store %arg6[%c0_28, %c1_29, %c0_30, %c0_31], %36 {strides = array<i32>} : memref<2x10x10x8xbf16, #tpu.memory_space<vmem>>, vector<2x8x1x8xbf16>,
    %c0_32 = arith.constant 0 : index
    %c1_33 = arith.constant 1 : index
    %c9_34 = arith.constant 9 : index
    %c0_35 = arith.constant 0 : index
    %40 = vector.load %arg6[%c0_32, %c1_33, %c9_34, %c0_35] : memref<2x10x10x8xbf16, #tpu.memory_space<vmem>>, vector<2x8x1x8xbf16>
    tpu.vector_store %arg6[%c0_32, %c1_33, %c9_34, %c0_35], %36 {strides = array<i32>} : memref<2x10x10x8xbf16, #tpu.memory_space<vmem>>, vector<2x8x1x8xbf16>,
    %41 = vector.shape_cast %34 : vector<128x8xf32> to vector<2x8x8x8xf32>
    %42 = arith.truncf %41 : vector<2x8x8x8xf32> to vector<2x8x8x8xbf16>
    %c0_36 = arith.constant 0 : index
    %c1_37 = arith.constant 1 : index
    %c1_38 = arith.constant 1 : index
    %c0_39 = arith.constant 0 : index
    %43 = vector.load %arg6[%c0_36, %c1_37, %c1_38, %c0_39] : memref<2x10x10x8xbf16, #tpu.memory_space<vmem>>, vector<2x8x8x8xbf16>
    tpu.vector_store %arg6[%c0_36, %c1_37, %c1_38, %c0_39], %42 {strides = array<i32>} : memref<2x10x10x8xbf16, #tpu.memory_space<vmem>>, vector<2x8x8x8xbf16>,
    %cst_40 = arith.constant 0.000000e+00 : f32
    %44 = vector.broadcast %cst_40 : f32 to vector<1x4xf32>
    %cst_41 = arith.constant 0.000000e+00 : f32
    %45 = vector.broadcast %cst_41 : f32 to vector<1x4xf32>
    %cst_42 = arith.constant 0.000000e+00 : f32
    %46 = vector.broadcast %cst_42 : f32 to vector<128x4xf32>
    %c0_43 = arith.constant 0 : index
    %c0_44 = arith.constant 0 : index
    %c0_45 = arith.constant 0 : index
    %c0_46 = arith.constant 0 : index
    %47 = vector.load %arg6[%c0_43, %c0_44, %c0_45, %c0_46] : memref<2x10x10x8xbf16, #tpu.memory_space<vmem>>, vector<2x8x8x8xbf16>
    %48 = vector.shape_cast %47 : vector<2x8x8x8xbf16> to vector<128x8xbf16>
    %c0_47 = arith.constant 0 : index
    %c0_48 = arith.constant 0 : index
    %c0_49 = arith.constant 0 : index
    %c0_50 = arith.constant 0 : index
    %49 = vector.load %arg3[%c0_47, %c0_48, %c0_49, %c0_50] : memref<4x4x8x4xbf16, #tpu.memory_space<vmem>>, vector<1x1x8x4xbf16>
    %50 = vector.shape_cast %49 : vector<1x1x8x4xbf16> to vector<8x4xbf16>
    %cst_51 = arith.constant dense<0.000000e+00> : vector<128x4xf32>
    %51 = tpu.matmul %48, %50, %cst_51 {dimension_numbers = #tpu.dot_dimension_numbers<[1], [0], [0], [1], [0, 0, 1, 1], [], []>} : vector<128x8xbf16>, vector<8x4xbf16>, vector<128x4xf32> -> vector<128x4xf32>
    %52 = arith.addf %46, %51 : vector<128x4xf32>
    %c0_52 = arith.constant 0 : index
    %c0_53 = arith.constant 0 : index
    %c1_54 = arith.constant 1 : index
    %c0_55 = arith.constant 0 : index
    %53 = vector.load %arg6[%c0_52, %c0_53, %c1_54, %c0_55] : memref<2x10x10x8xbf16, #tpu.memory_space<vmem>>, vector<2x8x8x8xbf16>
    %54 = vector.shape_cast %53 : vector<2x8x8x8xbf16> to vector<128x8xbf16>
    %c0_56 = arith.constant 0 : index
    %c1_57 = arith.constant 1 : index
    %c0_58 = arith.constant 0 : index
    %c0_59 = arith.constant 0 : index
    %55 = vector.load %arg3[%c0_56, %c1_57, %c0_58, %c0_59] : memref<4x4x8x4xbf16, #tpu.memory_space<vmem>>, vector<1x1x8x4xbf16>
    %56 = vector.shape_cast %55 : vector<1x1x8x4xbf16> to vector<8x4xbf16>
    %cst_60 = arith.constant dense<0.000000e+00> : vector<128x4xf32>
    %57 = tpu.matmul %54, %56, %cst_60 {dimension_numbers = #tpu.dot_dimension_numbers<[1], [0], [0], [1], [0, 0, 1, 1], [], []>} : vector<128x8xbf16>, vector<8x4xbf16>, vector<128x4xf32> -> vector<128x4xf32>
    %58 = arith.addf %52, %57 : vector<128x4xf32>
    %c0_61 = arith.constant 0 : index
    %c1_62 = arith.constant 1 : index
    %c0_63 = arith.constant 0 : index
    %c0_64 = arith.constant 0 : index
    %59 = vector.load %arg6[%c0_61, %c1_62, %c0_63, %c0_64] : memref<2x10x10x8xbf16, #tpu.memory_space<vmem>>, vector<2x8x8x8xbf16>
    %60 = vector.shape_cast %59 : vector<2x8x8x8xbf16> to vector<128x8xbf16>
    %c0_65 = arith.constant 0 : index
    %c2_66 = arith.constant 2 : index
    %c0_67 = arith.constant 0 : index
    %c0_68 = arith.constant 0 : index
    %61 = vector.load %arg3[%c0_65, %c2_66, %c0_67, %c0_68] : memref<4x4x8x4xbf16, #tpu.memory_space<vmem>>, vector<1x1x8x4xbf16>
    %62 = vector.shape_cast %61 : vector<1x1x8x4xbf16> to vector<8x4xbf16>
    %cst_69 = arith.constant dense<0.000000e+00> : vector<128x4xf32>
    %63 = tpu.matmul %60, %62, %cst_69 {dimension_numbers = #tpu.dot_dimension_numbers<[1], [0], [0], [1], [0, 0, 1, 1], [], []>} : vector<128x8xbf16>, vector<8x4xbf16>, vector<128x4xf32> -> vector<128x4xf32>
    %64 = arith.addf %58, %63 : vector<128x4xf32>
    %c0_70 = arith.constant 0 : index
    %c1_71 = arith.constant 1 : index
    %c1_72 = arith.constant 1 : index
    %c0_73 = arith.constant 0 : index
    %65 = vector.load %arg6[%c0_70, %c1_71, %c1_72, %c0_73] : memref<2x10x10x8xbf16, #tpu.memory_space<vmem>>, vector<2x8x8x8xbf16>
    %66 = vector.shape_cast %65 : vector<2x8x8x8xbf16> to vector<128x8xbf16>
    %c0_74 = arith.constant 0 : index
    %c3_75 = arith.constant 3 : index
    %c0_76 = arith.constant 0 : index
    %c0_77 = arith.constant 0 : index
    %67 = vector.load %arg3[%c0_74, %c3_75, %c0_76, %c0_77] : memref<4x4x8x4xbf16, #tpu.memory_space<vmem>>, vector<1x1x8x4xbf16>
    %68 = vector.shape_cast %67 : vector<1x1x8x4xbf16> to vector<8x4xbf16>
    %cst_78 = arith.constant dense<0.000000e+00> : vector<128x4xf32>
    %69 = tpu.matmul %66, %68, %cst_78 {dimension_numbers = #tpu.dot_dimension_numbers<[1], [0], [0], [1], [0, 0, 1, 1], [], []>} : vector<128x8xbf16>, vector<8x4xbf16>, vector<128x4xf32> -> vector<128x4xf32>
    %70 = arith.addf %64, %69 : vector<128x4xf32>
    %71 = vector.shape_cast %70 : vector<128x4xf32> to vector<2x8x8x4xf32>
    %72 = arith.truncf %71 : vector<2x8x8x4xf32> to vector<2x8x8x4xbf16>
    %c0_79 = arith.constant 0 : index
    %c0_80 = arith.constant 0 : index
    %c0_81 = arith.constant 0 : index
    %c0_82 = arith.constant 0 : index
    %c0_83 = arith.constant 0 : index
    %73 = vector.load %arg4[%c0_79, %c0_80, %c0_81, %c0_82, %c0_83] : memref<2x8x2x8x8xbf16, #tpu.memory_space<vmem>>, vector<2x8x1x8x4xbf16>
    %74 = vector.shape_cast %73 : vector<2x8x1x8x4xbf16> to vector<2x8x8x4xbf16>
    %75 = vector.shape_cast %72 : vector<2x8x8x4xbf16> to vector<2x8x1x8x4xbf16>
    tpu.vector_store %arg4[%c0_79, %c0_80, %c0_81, %c0_82, %c0_83], %75 {strides = array<i32>} : memref<2x8x2x8x8xbf16, #tpu.memory_space<vmem>>, vector<2x8x1x8x4xbf16>,
    %cst_84 = arith.constant dense<0.000000e+00> : vector<4xf32>
    %76 = vector.multi_reduction <add>, %70, %cst_84 [0] : vector<128x4xf32> to vector<4xf32>
    %77 = vector.shape_cast %76 : vector<4xf32> to vector<1x4xf32>
    %78 = arith.addf %44, %77 : vector<1x4xf32>
    %79 = arith.mulf %70, %70 : vector<128x4xf32>
    %cst_85 = arith.constant dense<0.000000e+00> : vector<4xf32>
    %80 = vector.multi_reduction <add>, %79, %cst_85 [0] : vector<128x4xf32> to vector<4xf32>
    %81 = vector.shape_cast %80 : vector<4xf32> to vector<1x4xf32>
    %82 = arith.addf %45, %81 : vector<1x4xf32>
    %cst_86 = arith.constant 0.000000e+00 : f32
    %83 = vector.broadcast %cst_86 : f32 to vector<128x4xf32>
    %c0_87 = arith.constant 0 : index
    %c0_88 = arith.constant 0 : index
    %c1_89 = arith.constant 1 : index
    %c0_90 = arith.constant 0 : index
    %84 = vector.load %arg6[%c0_87, %c0_88, %c1_89, %c0_90] : memref<2x10x10x8xbf16, #tpu.memory_space<vmem>>, vector<2x8x8x8xbf16>
    %85 = vector.shape_cast %84 : vector<2x8x8x8xbf16> to vector<128x8xbf16>
    %c1_91 = arith.constant 1 : index
    %c0_92 = arith.constant 0 : index
    %c0_93 = arith.constant 0 : index
    %c0_94 = arith.constant 0 : index
    %86 = vector.load %arg3[%c1_91, %c0_92, %c0_93, %c0_94] : memref<4x4x8x4xbf16, #tpu.memory_space<vmem>>, vector<1x1x8x4xbf16>
    %87 = vector.shape_cast %86 : vector<1x1x8x4xbf16> to vector<8x4xbf16>
    %cst_95 = arith.constant dense<0.000000e+00> : vector<128x4xf32>
    %88 = tpu.matmul %85, %87, %cst_95 {dimension_numbers = #tpu.dot_dimension_numbers<[1], [0], [0], [1], [0, 0, 1, 1], [], []>} : vector<128x8xbf16>, vector<8x4xbf16>, vector<128x4xf32> -> vector<128x4xf32>
    %89 = arith.addf %83, %88 : vector<128x4xf32>
    %c0_96 = arith.constant 0 : index
    %c0_97 = arith.constant 0 : index
    %c2_98 = arith.constant 2 : index
    %c0_99 = arith.constant 0 : index
    %90 = vector.load %arg6[%c0_96, %c0_97, %c2_98, %c0_99] : memref<2x10x10x8xbf16, #tpu.memory_space<vmem>>, vector<2x8x8x8xbf16>
    %91 = vector.shape_cast %90 : vector<2x8x8x8xbf16> to vector<128x8xbf16>
    %c1_100 = arith.constant 1 : index
    %c1_101 = arith.constant 1 : index
    %c0_102 = arith.constant 0 : index
    %c0_103 = arith.constant 0 : index
    %92 = vector.load %arg3[%c1_100, %c1_101, %c0_102, %c0_103] : memref<4x4x8x4xbf16, #tpu.memory_space<vmem>>, vector<1x1x8x4xbf16>
    %93 = vector.shape_cast %92 : vector<1x1x8x4xbf16> to vector<8x4xbf16>
    %cst_104 = arith.constant dense<0.000000e+00> : vector<128x4xf32>
    %94 = tpu.matmul %91, %93, %cst_104 {dimension_numbers = #tpu.dot_dimension_numbers<[1], [0], [0], [1], [0, 0, 1, 1], [], []>} : vector<128x8xbf16>, vector<8x4xbf16>, vector<128x4xf32> -> vector<128x4xf32>
    %95 = arith.addf %89, %94 : vector<128x4xf32>
    %c0_105 = arith.constant 0 : index
    %c1_106 = arith.constant 1 : index
    %c1_107 = arith.constant 1 : index
    %c0_108 = arith.constant 0 : index
    %96 = vector.load %arg6[%c0_105, %c1_106, %c1_107, %c0_108] : memref<2x10x10x8xbf16, #tpu.memory_space<vmem>>, vector<2x8x8x8xbf16>
    %97 = vector.shape_cast %96 : vector<2x8x8x8xbf16> to vector<128x8xbf16>
    %c1_109 = arith.constant 1 : index
    %c2_110 = arith.constant 2 : index
    %c0_111 = arith.constant 0 : index
    %c0_112 = arith.constant 0 : index
    %98 = vector.load %arg3[%c1_109, %c2_110, %c0_111, %c0_112] : memref<4x4x8x4xbf16, #tpu.memory_space<vmem>>, vector<1x1x8x4xbf16>
    %99 = vector.shape_cast %98 : vector<1x1x8x4xbf16> to vector<8x4xbf16>
    %cst_113 = arith.constant dense<0.000000e+00> : vector<128x4xf32>
    %100 = tpu.matmul %97, %99, %cst_113 {dimension_numbers = #tpu.dot_dimension_numbers<[1], [0], [0], [1], [0, 0, 1, 1], [], []>} : vector<128x8xbf16>, vector<8x4xbf16>, vector<128x4xf32> -> vector<128x4xf32>
    %101 = arith.addf %95, %100 : vector<128x4xf32>
    %c0_114 = arith.constant 0 : index
    %c1_115 = arith.constant 1 : index
    %c2_116 = arith.constant 2 : index
    %c0_117 = arith.constant 0 : index
    %102 = vector.load %arg6[%c0_114, %c1_115, %c2_116, %c0_117] : memref<2x10x10x8xbf16, #tpu.memory_space<vmem>>, vector<2x8x8x8xbf16>
    %103 = vector.shape_cast %102 : vector<2x8x8x8xbf16> to vector<128x8xbf16>
    %c1_118 = arith.constant 1 : index
    %c3_119 = arith.constant 3 : index
    %c0_120 = arith.constant 0 : index
    %c0_121 = arith.constant 0 : index
    %104 = vector.load %arg3[%c1_118, %c3_119, %c0_120, %c0_121] : memref<4x4x8x4xbf16, #tpu.memory_space<vmem>>, vector<1x1x8x4xbf16>
    %105 = vector.shape_cast %104 : vector<1x1x8x4xbf16> to vector<8x4xbf16>
    %cst_122 = arith.constant dense<0.000000e+00> : vector<128x4xf32>
    %106 = tpu.matmul %103, %105, %cst_122 {dimension_numbers = #tpu.dot_dimension_numbers<[1], [0], [0], [1], [0, 0, 1, 1], [], []>} : vector<128x8xbf16>, vector<8x4xbf16>, vector<128x4xf32> -> vector<128x4xf32>
    %107 = arith.addf %101, %106 : vector<128x4xf32>
    %108 = vector.shape_cast %107 : vector<128x4xf32> to vector<2x8x8x4xf32>
    %109 = arith.truncf %108 : vector<2x8x8x4xf32> to vector<2x8x8x4xbf16>
    %c0_123 = arith.constant 0 : index
    %c0_124 = arith.constant 0 : index
    %c0_125 = arith.constant 0 : index
    %c0_126 = arith.constant 0 : index
    %c4 = arith.constant 4 : index
    %110 = vector.load %arg4[%c0_123, %c0_124, %c0_125, %c0_126, %c4] : memref<2x8x2x8x8xbf16, #tpu.memory_space<vmem>>, vector<2x8x1x8x4xbf16>
    %111 = vector.shape_cast %110 : vector<2x8x1x8x4xbf16> to vector<2x8x8x4xbf16>
    %112 = vector.shape_cast %109 : vector<2x8x8x4xbf16> to vector<2x8x1x8x4xbf16>
    tpu.vector_store %arg4[%c0_123, %c0_124, %c0_125, %c0_126, %c4], %112 {strides = array<i32>} : memref<2x8x2x8x8xbf16, #tpu.memory_space<vmem>>, vector<2x8x1x8x4xbf16>,
    %cst_127 = arith.constant dense<0.000000e+00> : vector<4xf32>
    %113 = vector.multi_reduction <add>, %107, %cst_127 [0] : vector<128x4xf32> to vector<4xf32>
    %114 = vector.shape_cast %113 : vector<4xf32> to vector<1x4xf32>
    %115 = arith.addf %78, %114 : vector<1x4xf32>
    %116 = arith.mulf %107, %107 : vector<128x4xf32>
    %cst_128 = arith.constant dense<0.000000e+00> : vector<4xf32>
    %117 = vector.multi_reduction <add>, %116, %cst_128 [0] : vector<128x4xf32> to vector<4xf32>
    %118 = vector.shape_cast %117 : vector<4xf32> to vector<1x4xf32>
    %119 = arith.addf %82, %118 : vector<1x4xf32>
    %cst_129 = arith.constant 0.000000e+00 : f32
    %120 = vector.broadcast %cst_129 : f32 to vector<128x4xf32>
    %c0_130 = arith.constant 0 : index
    %c1_131 = arith.constant 1 : index
    %c0_132 = arith.constant 0 : index
    %c0_133 = arith.constant 0 : index
    %121 = vector.load %arg6[%c0_130, %c1_131, %c0_132, %c0_133] : memref<2x10x10x8xbf16, #tpu.memory_space<vmem>>, vector<2x8x8x8xbf16>
    %122 = vector.shape_cast %121 : vector<2x8x8x8xbf16> to vector<128x8xbf16>
    %c2_134 = arith.constant 2 : index
    %c0_135 = arith.constant 0 : index
    %c0_136 = arith.constant 0 : index
    %c0_137 = arith.constant 0 : index
    %123 = vector.load %arg3[%c2_134, %c0_135, %c0_136, %c0_137] : memref<4x4x8x4xbf16, #tpu.memory_space<vmem>>, vector<1x1x8x4xbf16>
    %124 = vector.shape_cast %123 : vector<1x1x8x4xbf16> to vector<8x4xbf16>
    %cst_138 = arith.constant dense<0.000000e+00> : vector<128x4xf32>
    %125 = tpu.matmul %122, %124, %cst_138 {dimension_numbers = #tpu.dot_dimension_numbers<[1], [0], [0], [1], [0, 0, 1, 1], [], []>} : vector<128x8xbf16>, vector<8x4xbf16>, vector<128x4xf32> -> vector<128x4xf32>
    %126 = arith.addf %120, %125 : vector<128x4xf32>
    %c0_139 = arith.constant 0 : index
    %c1_140 = arith.constant 1 : index
    %c1_141 = arith.constant 1 : index
    %c0_142 = arith.constant 0 : index
    %127 = vector.load %arg6[%c0_139, %c1_140, %c1_141, %c0_142] : memref<2x10x10x8xbf16, #tpu.memory_space<vmem>>, vector<2x8x8x8xbf16>
    %128 = vector.shape_cast %127 : vector<2x8x8x8xbf16> to vector<128x8xbf16>
    %c2_143 = arith.constant 2 : index
    %c1_144 = arith.constant 1 : index
    %c0_145 = arith.constant 0 : index
    %c0_146 = arith.constant 0 : index
    %129 = vector.load %arg3[%c2_143, %c1_144, %c0_145, %c0_146] : memref<4x4x8x4xbf16, #tpu.memory_space<vmem>>, vector<1x1x8x4xbf16>
    %130 = vector.shape_cast %129 : vector<1x1x8x4xbf16> to vector<8x4xbf16>
    %cst_147 = arith.constant dense<0.000000e+00> : vector<128x4xf32>
    %131 = tpu.matmul %128, %130, %cst_147 {dimension_numbers = #tpu.dot_dimension_numbers<[1], [0], [0], [1], [0, 0, 1, 1], [], []>} : vector<128x8xbf16>, vector<8x4xbf16>, vector<128x4xf32> -> vector<128x4xf32>
    %132 = arith.addf %126, %131 : vector<128x4xf32>
    %c0_148 = arith.constant 0 : index
    %c2_149 = arith.constant 2 : index
    %c0_150 = arith.constant 0 : index
    %c0_151 = arith.constant 0 : index
    %133 = vector.load %arg6[%c0_148, %c2_149, %c0_150, %c0_151] : memref<2x10x10x8xbf16, #tpu.memory_space<vmem>>, vector<2x8x8x8xbf16>
    %134 = vector.shape_cast %133 : vector<2x8x8x8xbf16> to vector<128x8xbf16>
    %c2_152 = arith.constant 2 : index
    %c2_153 = arith.constant 2 : index
    %c0_154 = arith.constant 0 : index
    %c0_155 = arith.constant 0 : index
    %135 = vector.load %arg3[%c2_152, %c2_153, %c0_154, %c0_155] : memref<4x4x8x4xbf16, #tpu.memory_space<vmem>>, vector<1x1x8x4xbf16>
    %136 = vector.shape_cast %135 : vector<1x1x8x4xbf16> to vector<8x4xbf16>
    %cst_156 = arith.constant dense<0.000000e+00> : vector<128x4xf32>
    %137 = tpu.matmul %134, %136, %cst_156 {dimension_numbers = #tpu.dot_dimension_numbers<[1], [0], [0], [1], [0, 0, 1, 1], [], []>} : vector<128x8xbf16>, vector<8x4xbf16>, vector<128x4xf32> -> vector<128x4xf32>
    %138 = arith.addf %132, %137 : vector<128x4xf32>
    %c0_157 = arith.constant 0 : index
    %c2_158 = arith.constant 2 : index
    %c1_159 = arith.constant 1 : index
    %c0_160 = arith.constant 0 : index
    %139 = vector.load %arg6[%c0_157, %c2_158, %c1_159, %c0_160] : memref<2x10x10x8xbf16, #tpu.memory_space<vmem>>, vector<2x8x8x8xbf16>
    %140 = vector.shape_cast %139 : vector<2x8x8x8xbf16> to vector<128x8xbf16>
    %c2_161 = arith.constant 2 : index
    %c3_162 = arith.constant 3 : index
    %c0_163 = arith.constant 0 : index
    %c0_164 = arith.constant 0 : index
    %141 = vector.load %arg3[%c2_161, %c3_162, %c0_163, %c0_164] : memref<4x4x8x4xbf16, #tpu.memory_space<vmem>>, vector<1x1x8x4xbf16>
    %142 = vector.shape_cast %141 : vector<1x1x8x4xbf16> to vector<8x4xbf16>
    %cst_165 = arith.constant dense<0.000000e+00> : vector<128x4xf32>
    %143 = tpu.matmul %140, %142, %cst_165 {dimension_numbers = #tpu.dot_dimension_numbers<[1], [0], [0], [1], [0, 0, 1, 1], [], []>} : vector<128x8xbf16>, vector<8x4xbf16>, vector<128x4xf32> -> vector<128x4xf32>
    %144 = arith.addf %138, %143 : vector<128x4xf32>
    %145 = vector.shape_cast %144 : vector<128x4xf32> to vector<2x8x8x4xf32>
    %146 = arith.truncf %145 : vector<2x8x8x4xf32> to vector<2x8x8x4xbf16>
    %c0_166 = arith.constant 0 : index
    %c0_167 = arith.constant 0 : index
    %c1_168 = arith.constant 1 : index
    %c0_169 = arith.constant 0 : index
    %c0_170 = arith.constant 0 : index
    %147 = vector.load %arg4[%c0_166, %c0_167, %c1_168, %c0_169, %c0_170] : memref<2x8x2x8x8xbf16, #tpu.memory_space<vmem>>, vector<2x8x1x8x4xbf16>
    %148 = vector.shape_cast %147 : vector<2x8x1x8x4xbf16> to vector<2x8x8x4xbf16>
    %149 = vector.shape_cast %146 : vector<2x8x8x4xbf16> to vector<2x8x1x8x4xbf16>
    tpu.vector_store %arg4[%c0_166, %c0_167, %c1_168, %c0_169, %c0_170], %149 {strides = array<i32>} : memref<2x8x2x8x8xbf16, #tpu.memory_space<vmem>>, vector<2x8x1x8x4xbf16>,
    %cst_171 = arith.constant dense<0.000000e+00> : vector<4xf32>
    %150 = vector.multi_reduction <add>, %144, %cst_171 [0] : vector<128x4xf32> to vector<4xf32>
    %151 = vector.shape_cast %150 : vector<4xf32> to vector<1x4xf32>
    %152 = arith.addf %115, %151 : vector<1x4xf32>
    %153 = arith.mulf %144, %144 : vector<128x4xf32>
    %cst_172 = arith.constant dense<0.000000e+00> : vector<4xf32>
    %154 = vector.multi_reduction <add>, %153, %cst_172 [0] : vector<128x4xf32> to vector<4xf32>
    %155 = vector.shape_cast %154 : vector<4xf32> to vector<1x4xf32>
    %156 = arith.addf %119, %155 : vector<1x4xf32>
    %cst_173 = arith.constant 0.000000e+00 : f32
    %157 = vector.broadcast %cst_173 : f32 to vector<128x4xf32>
    %c0_174 = arith.constant 0 : index
    %c1_175 = arith.constant 1 : index
    %c1_176 = arith.constant 1 : index
    %c0_177 = arith.constant 0 : index
    %158 = vector.load %arg6[%c0_174, %c1_175, %c1_176, %c0_177] : memref<2x10x10x8xbf16, #tpu.memory_space<vmem>>, vector<2x8x8x8xbf16>
    %159 = vector.shape_cast %158 : vector<2x8x8x8xbf16> to vector<128x8xbf16>
    %c3_178 = arith.constant 3 : index
    %c0_179 = arith.constant 0 : index
    %c0_180 = arith.constant 0 : index
    %c0_181 = arith.constant 0 : index
    %160 = vector.load %arg3[%c3_178, %c0_179, %c0_180, %c0_181] : memref<4x4x8x4xbf16, #tpu.memory_space<vmem>>, vector<1x1x8x4xbf16>
    %161 = vector.shape_cast %160 : vector<1x1x8x4xbf16> to vector<8x4xbf16>
    %cst_182 = arith.constant dense<0.000000e+00> : vector<128x4xf32>
    %162 = tpu.matmul %159, %161, %cst_182 {dimension_numbers = #tpu.dot_dimension_numbers<[1], [0], [0], [1], [0, 0, 1, 1], [], []>} : vector<128x8xbf16>, vector<8x4xbf16>, vector<128x4xf32> -> vector<128x4xf32>
    %163 = arith.addf %157, %162 : vector<128x4xf32>
    %c0_183 = arith.constant 0 : index
    %c1_184 = arith.constant 1 : index
    %c2_185 = arith.constant 2 : index
    %c0_186 = arith.constant 0 : index
    %164 = vector.load %arg6[%c0_183, %c1_184, %c2_185, %c0_186] : memref<2x10x10x8xbf16, #tpu.memory_space<vmem>>, vector<2x8x8x8xbf16>
    %165 = vector.shape_cast %164 : vector<2x8x8x8xbf16> to vector<128x8xbf16>
    %c3_187 = arith.constant 3 : index
    %c1_188 = arith.constant 1 : index
    %c0_189 = arith.constant 0 : index
    %c0_190 = arith.constant 0 : index
    %166 = vector.load %arg3[%c3_187, %c1_188, %c0_189, %c0_190] : memref<4x4x8x4xbf16, #tpu.memory_space<vmem>>, vector<1x1x8x4xbf16>
    %167 = vector.shape_cast %166 : vector<1x1x8x4xbf16> to vector<8x4xbf16>
    %cst_191 = arith.constant dense<0.000000e+00> : vector<128x4xf32>
    %168 = tpu.matmul %165, %167, %cst_191 {dimension_numbers = #tpu.dot_dimension_numbers<[1], [0], [0], [1], [0, 0, 1, 1], [], []>} : vector<128x8xbf16>, vector<8x4xbf16>, vector<128x4xf32> -> vector<128x4xf32>
    %169 = arith.addf %163, %168 : vector<128x4xf32>
    %c0_192 = arith.constant 0 : index
    %c2_193 = arith.constant 2 : index
    %c1_194 = arith.constant 1 : index
    %c0_195 = arith.constant 0 : index
    %170 = vector.load %arg6[%c0_192, %c2_193, %c1_194, %c0_195] : memref<2x10x10x8xbf16, #tpu.memory_space<vmem>>, vector<2x8x8x8xbf16>
    %171 = vector.shape_cast %170 : vector<2x8x8x8xbf16> to vector<128x8xbf16>
    %c3_196 = arith.constant 3 : index
    %c2_197 = arith.constant 2 : index
    %c0_198 = arith.constant 0 : index
    %c0_199 = arith.constant 0 : index
    %172 = vector.load %arg3[%c3_196, %c2_197, %c0_198, %c0_199] : memref<4x4x8x4xbf16, #tpu.memory_space<vmem>>, vector<1x1x8x4xbf16>
    %173 = vector.shape_cast %172 : vector<1x1x8x4xbf16> to vector<8x4xbf16>
    %cst_200 = arith.constant dense<0.000000e+00> : vector<128x4xf32>
    %174 = tpu.matmul %171, %173, %cst_200 {dimension_numbers = #tpu.dot_dimension_numbers<[1], [0], [0], [1], [0, 0, 1, 1], [], []>} : vector<128x8xbf16>, vector<8x4xbf16>, vector<128x4xf32> -> vector<128x4xf32>
    %175 = arith.addf %169, %174 : vector<128x4xf32>
    %c0_201 = arith.constant 0 : index
    %c2_202 = arith.constant 2 : index
    %c2_203 = arith.constant 2 : index
    %c0_204 = arith.constant 0 : index
    %176 = vector.load %arg6[%c0_201, %c2_202, %c2_203, %c0_204] : memref<2x10x10x8xbf16, #tpu.memory_space<vmem>>, vector<2x8x8x8xbf16>
    %177 = vector.shape_cast %176 : vector<2x8x8x8xbf16> to vector<128x8xbf16>
    %c3_205 = arith.constant 3 : index
    %c3_206 = arith.constant 3 : index
    %c0_207 = arith.constant 0 : index
    %c0_208 = arith.constant 0 : index
    %178 = vector.load %arg3[%c3_205, %c3_206, %c0_207, %c0_208] : memref<4x4x8x4xbf16, #tpu.memory_space<vmem>>, vector<1x1x8x4xbf16>
    %179 = vector.shape_cast %178 : vector<1x1x8x4xbf16> to vector<8x4xbf16>
    %cst_209 = arith.constant dense<0.000000e+00> : vector<128x4xf32>
    %180 = tpu.matmul %177, %179, %cst_209 {dimension_numbers = #tpu.dot_dimension_numbers<[1], [0], [0], [1], [0, 0, 1, 1], [], []>} : vector<128x8xbf16>, vector<8x4xbf16>, vector<128x4xf32> -> vector<128x4xf32>
    %181 = arith.addf %175, %180 : vector<128x4xf32>
    %182 = vector.shape_cast %181 : vector<128x4xf32> to vector<2x8x8x4xf32>
    %183 = arith.truncf %182 : vector<2x8x8x4xf32> to vector<2x8x8x4xbf16>
    %c0_210 = arith.constant 0 : index
    %c0_211 = arith.constant 0 : index
    %c1_212 = arith.constant 1 : index
    %c0_213 = arith.constant 0 : index
    %c4_214 = arith.constant 4 : index
    %184 = vector.load %arg4[%c0_210, %c0_211, %c1_212, %c0_213, %c4_214] : memref<2x8x2x8x8xbf16, #tpu.memory_space<vmem>>, vector<2x8x1x8x4xbf16>
    %185 = vector.shape_cast %184 : vector<2x8x1x8x4xbf16> to vector<2x8x8x4xbf16>
    %186 = vector.shape_cast %183 : vector<2x8x8x4xbf16> to vector<2x8x1x8x4xbf16>
    tpu.vector_store %arg4[%c0_210, %c0_211, %c1_212, %c0_213, %c4_214], %186 {strides = array<i32>} : memref<2x8x2x8x8xbf16, #tpu.memory_space<vmem>>, vector<2x8x1x8x4xbf16>,
    %cst_215 = arith.constant dense<0.000000e+00> : vector<4xf32>
    %187 = vector.multi_reduction <add>, %181, %cst_215 [0] : vector<128x4xf32> to vector<4xf32>
    %188 = vector.shape_cast %187 : vector<4xf32> to vector<1x4xf32>
    %189 = arith.addf %152, %188 : vector<1x4xf32>
    %190 = arith.mulf %181, %181 : vector<128x4xf32>
    %cst_216 = arith.constant dense<0.000000e+00> : vector<4xf32>
    %191 = vector.multi_reduction <add>, %190, %cst_216 [0] : vector<128x4xf32> to vector<4xf32>
    %192 = vector.shape_cast %191 : vector<4xf32> to vector<1x4xf32>
    %193 = arith.addf %156, %192 : vector<1x4xf32>
    %c0_217 = arith.constant 0 : index
    %c0_218 = arith.constant 0 : index
    %c0_219 = arith.constant 0 : index
    %194 = vector.load %arg5[%c0_217, %c0_218, %c0_219] : memref<1x2x4xf32, #tpu.memory_space<vmem>>, vector<1x1x4xf32>
    %195 = vector.shape_cast %194 : vector<1x1x4xf32> to vector<1x4xf32>
    %196 = vector.shape_cast %189 : vector<1x4xf32> to vector<1x1x4xf32>
    tpu.vector_store %arg5[%c0_217, %c0_218, %c0_219], %196 {strides = array<i32>} : memref<1x2x4xf32, #tpu.memory_space<vmem>>, vector<1x1x4xf32>,
    %c0_220 = arith.constant 0 : index
    %c1_221 = arith.constant 1 : index
    %c0_222 = arith.constant 0 : index
    %197 = vector.load %arg5[%c0_220, %c1_221, %c0_222] : memref<1x2x4xf32, #tpu.memory_space<vmem>>, vector<1x1x4xf32>
    %198 = vector.shape_cast %197 : vector<1x1x4xf32> to vector<1x4xf32>
    %199 = vector.shape_cast %193 : vector<1x4xf32> to vector<1x1x4xf32>
    tpu.vector_store %arg5[%c0_220, %c1_221, %c0_222], %199 {strides = array<i32>} : memref<1x2x4xf32, #tpu.memory_space<vmem>>, vector<1x1x4xf32>,
    return
  }
  func.func @transform_0(%arg0: i32) -> (i32, i32, i32, i32) {
    %c0_i32 = arith.constant 0 : i32
    %c0_i32_0 = arith.constant 0 : i32
    %c0_i32_1 = arith.constant 0 : i32
    %c0_i32_2 = arith.constant 0 : i32
    return %arg0, %c0_i32, %c0_i32_0, %c0_i32_1 : i32, i32, i32, i32
  }
  func.func @transform_1(%arg0: i32) -> (i32, i32, i32) {
    %c0_i32 = arith.constant 0 : i32
    %c0_i32_0 = arith.constant 0 : i32
    %c0_i32_1 = arith.constant 0 : i32
    %c0_i32_2 = arith.constant 0 : i32
    return %c0_i32, %c0_i32_0, %c0_i32_1 : i32, i32, i32
  }
  func.func @transform_2(%arg0: i32) -> (i32, i32, i32, i32) {
    %c0_i32 = arith.constant 0 : i32
    %c0_i32_0 = arith.constant 0 : i32
    %c0_i32_1 = arith.constant 0 : i32
    %c0_i32_2 = arith.constant 0 : i32
    %c0_i32_3 = arith.constant 0 : i32
    return %c0_i32, %c0_i32_0, %c0_i32_1, %c0_i32_2 : i32, i32, i32, i32
  }
  func.func @transform_3(%arg0: i32) -> (i32, i32, i32, i32, i32) {
    %c0_i32 = arith.constant 0 : i32
    %c0_i32_0 = arith.constant 0 : i32
    %c0_i32_1 = arith.constant 0 : i32
    %c0_i32_2 = arith.constant 0 : i32
    %c0_i32_3 = arith.constant 0 : i32
    return %arg0, %c0_i32, %c0_i32_0, %c0_i32_1, %c0_i32_2 : i32, i32, i32, i32, i32
  }
  func.func @transform_4(%arg0: i32) -> (i32, i32, i32) {
    %c0_i32 = arith.constant 0 : i32
    %c0_i32_0 = arith.constant 0 : i32
    %c0_i32_1 = arith.constant 0 : i32
    return %arg0, %c0_i32, %c0_i32_0 : i32, i32, i32
  }
}

module attributes {stable_mosaic.version = 11 : i64} {
  func.func @_bn_concat_kernel(%arg0: i32, %arg1: i32, %arg2: memref<1x4x256xf32, #tpu.memory_space<vmem>>, %arg3: memref<1x256x4xbf16, #tpu.memory_space<vmem>>, %arg4: memref<4x4xf32, #tpu.memory_space<vmem>>, %arg5: memref<4x1xf32, #tpu.memory_space<vmem>>, %arg6: memref<1x8x256xf32, #tpu.memory_space<vmem>>) attributes {dimension_semantics = [#tpu.dimension_semantics<parallel>, #tpu.dimension_semantics<parallel>], iteration_bounds = array<i64: 2, 1>, scalar_prefetch = 0 : i64, scratch_operands = 0 : i64, tpu.core_type = #tpu.core_type<tc>, window_params = [{transform_indices = @transform_0, window_bounds = array<i64: 1, 4, 256>}, {transform_indices = @transform_1, window_bounds = array<i64: 1, 256, 4>}, {pipeline_mode = #tpu.pipeline_mode<synchronous>, transform_indices = @transform_2, window_bounds = array<i64: 4, 4>}, {pipeline_mode = #tpu.pipeline_mode<synchronous>, transform_indices = @transform_3, window_bounds = array<i64: 4, 1>}, {transform_indices = @transform_4, window_bounds = array<i64: 1, 8, 256>}]} {
    %c0 = arith.constant 0 : index
    %c0_0 = arith.constant 0 : index
    %0 = vector.load %arg4[%c0, %c0_0] : memref<4x4xf32, #tpu.memory_space<vmem>>, vector<4x4xf32>
    %c0_1 = arith.constant 0 : index
    %c0_2 = arith.constant 0 : index
    %c0_3 = arith.constant 0 : index
    %1 = vector.load %arg3[%c0_1, %c0_2, %c0_3] : memref<1x256x4xbf16, #tpu.memory_space<vmem>>, vector<1x256x4xbf16>
    %2 = vector.shape_cast %1 : vector<1x256x4xbf16> to vector<256x4xbf16>
    %3 = arith.extf %2 : vector<256x4xbf16> to vector<256x4xf32>
    %cst = arith.constant dense<0.000000e+00> : vector<4x256xf32>
    %4 = tpu.matmul %0, %3, %cst {dimension_numbers = #tpu.dot_dimension_numbers<[1], [1], [0], [0], [0, 0, 1, 0], [], []>} : vector<4x4xf32>, vector<256x4xf32>, vector<4x256xf32> -> vector<4x256xf32>
    %c0_4 = arith.constant 0 : index
    %c0_5 = arith.constant 0 : index
    %c0_6 = arith.constant 0 : index
    %5 = vector.load %arg2[%c0_4, %c0_5, %c0_6] : memref<1x4x256xf32, #tpu.memory_space<vmem>>, vector<1x4x256xf32>
    %6 = vector.shape_cast %5 : vector<1x4x256xf32> to vector<4x256xf32>
    %c0_7 = arith.constant 0 : index
    %c0_8 = arith.constant 0 : index
    %c0_9 = arith.constant 0 : index
    %7 = vector.load %arg6[%c0_7, %c0_8, %c0_9] : memref<1x8x256xf32, #tpu.memory_space<vmem>>, vector<1x4x256xf32>
    %8 = vector.shape_cast %7 : vector<1x4x256xf32> to vector<4x256xf32>
    %9 = vector.shape_cast %6 : vector<4x256xf32> to vector<1x4x256xf32>
    tpu.vector_store %arg6[%c0_7, %c0_8, %c0_9], %9 {strides = array<i32>} : memref<1x8x256xf32, #tpu.memory_space<vmem>>, vector<1x4x256xf32>,
    %c0_10 = arith.constant 0 : index
    %c0_11 = arith.constant 0 : index
    %10 = vector.load %arg5[%c0_10, %c0_11] : memref<4x1xf32, #tpu.memory_space<vmem>>, vector<4x1xf32>
    %11 = vector.broadcast %10 : vector<4x1xf32> to vector<4x256xf32>
    %12 = arith.addf %4, %11 : vector<4x256xf32>
    %c0_12 = arith.constant 0 : index
    %c4 = arith.constant 4 : index
    %c0_13 = arith.constant 0 : index
    %13 = vector.load %arg6[%c0_12, %c4, %c0_13] : memref<1x8x256xf32, #tpu.memory_space<vmem>>, vector<1x4x256xf32>
    %14 = vector.shape_cast %13 : vector<1x4x256xf32> to vector<4x256xf32>
    %15 = vector.shape_cast %12 : vector<4x256xf32> to vector<1x4x256xf32>
    tpu.vector_store %arg6[%c0_12, %c4, %c0_13], %15 {strides = array<i32>} : memref<1x8x256xf32, #tpu.memory_space<vmem>>, vector<1x4x256xf32>,
    return
  }
  func.func @transform_0(%arg0: i32, %arg1: i32) -> (i32, i32, i32) {
    %c0_i32 = arith.constant 0 : i32
    %c0_i32_0 = arith.constant 0 : i32
    return %arg0, %c0_i32, %arg1 : i32, i32, i32
  }
  func.func @transform_1(%arg0: i32, %arg1: i32) -> (i32, i32, i32) {
    %c0_i32 = arith.constant 0 : i32
    %c0_i32_0 = arith.constant 0 : i32
    return %arg0, %arg1, %c0_i32 : i32, i32, i32
  }
  func.func @transform_2(%arg0: i32, %arg1: i32) -> (i32, i32) {
    %c0_i32 = arith.constant 0 : i32
    %c0_i32_0 = arith.constant 0 : i32
    %c0_i32_1 = arith.constant 0 : i32
    return %c0_i32, %c0_i32_0 : i32, i32
  }
  func.func @transform_3(%arg0: i32, %arg1: i32) -> (i32, i32) {
    %c0_i32 = arith.constant 0 : i32
    %c0_i32_0 = arith.constant 0 : i32
    %c0_i32_1 = arith.constant 0 : i32
    return %c0_i32, %c0_i32_0 : i32, i32
  }
  func.func @transform_4(%arg0: i32, %arg1: i32) -> (i32, i32, i32) {
    %c0_i32 = arith.constant 0 : i32
    %c0_i32_0 = arith.constant 0 : i32
    return %arg0, %c0_i32, %arg1 : i32, i32, i32
  }
}

</mosaic_0001>

<bundles_post_ra>
// kernel: unet_innermost_forward.3
= control target key start
LH: loop header
LB: loop body
LE: loop exit
PB: predicated region body
PF: predicated region fallthrough
CT: control target
= control target key end

     0   :  { %s1617_s0 = inlined_call_operand.hbm [shape: f32[2,4,256], index: 0, kind: input, shape index: {}]   ;;  %s1618_s1 = inlined_call_operand.hbm [shape: bf16[2,256,4], index: 1, kind: input, shape index: {}]   ;;  %s1619_s2 = inlined_call_operand.hbm [shape: f32[4,4], index: 2, kind: input, shape index: {}]   ;;  %s1620_s3 = inlined_call_operand.hbm [shape: f32[4,1], index: 3, kind: input, shape index: {}]   ;;  %s1621_s4 = inlined_call_operand.hbm [shape: f32[2,8,256], index: 4, kind: output, shape index: {}]  }
   0x1   :  { %1625 = sst [smem:[#allocation16_spill]] %s1617_s0 }
   0x2   :  { %1626 = sst [smem:[#allocation17_spill]] %s1619_s2 }
   0x3   :  { %9 = vsyncpa [#allocation3], 0 }
   0x4   :  { %11 = vsyncpa [#allocation3 + $0x1], 0 }
   0x5   :  { %12 = vsyncpa [#allocation6], 0 }
   0x6   :  { %14 = vsyncpa [#allocation6 + $0x1], 0 }
   0x7   :  { %15 = vsyncpa [#allocation9], 0 }
   0x8   :  { %16 = vsyncpa [#allocation4], 0 }
   0x9   :  { %18 = vsyncpa [#allocation4 + $0x1], 0  ;;  %s1264_s15 = smov 0   ;;  %s1266_s16 = smov 0  }
   0xa   :  { %s1268_s17 = smov 0   ;;  %s1270_s18 = smov 0  }
   0xb   :  { %s1272_s19 = smov 0   ;;  %s1274_s20 = smov 0  }
   0xc LB: > { %s1295_s21 = sadd.s32 4294967295, %s1229_s20   ;;  %s707_s22 = sadd.s32 4294967294, %s1229_s20   ;;  %s1229_s20 = sphi %s1274_s20, %s24_s20   ;;  %s1225_s19 = sphi %s1272_s19, %s1650_s19   ;;  %s1221_s18 = sphi %s1270_s18, %s1649_s18   ;;  %s1217_s17 = sphi %s1268_s17, %s1648_s17   ;;  %s1213_s16 = sphi %s1266_s16, %s1647_s16   ;;  %s1209_s15 = sphi %s1264_s15, %s1646_s15  }
   0xd   : > { %p58_p0 = scmp.ne.s32.totalorder %s1213_s16, %s1209_s15  ;;  %p1622_p1 = scmp.eq.s32.totalorder %s1295_s21, 0 }
   0xe   : > { %p160_p3 = scmp.eq.s32.totalorder %s707_s22, 1  ;;  %p708_p5 = scmp.ge.s32.totalorder %s1229_s20, 1 }
   0xf   : > { %p1304_p4 = por %p1622_p1, %p58_p0  ;;  %p167_p7 = scmp.lt.s32.totalorder %s1229_s20, 3 }
  0x10   : > { %p1309_p6 = por %p160_p3, %p58_p0  ;;  %s1231_s26 = smov [#allocation7]  }
  0x11   : > { %s1627_s23 = scalar_select %p1304_p4, 1, 0 }
  0x12   : > { %s1628_s24 = scalar_select %p1309_p6, 1, 0 }
  0x13   : > { %p1314_p8 = pnand %p708_p5, %p167_p7  ;;  %s180_s27 = sshll.u32 %s1231_s26, 4  ;;  %s181_s27 = int_to_ptr.vmem [resolvable:$true] %s180_s27 }
  0x14   : > { %s1232_s28 = smov [#allocation8]   ;;  %s1631_s2 = sld [smem:[#allocation17_spill]] }
  0x15   : > { %s1629_s25 = scalar_select %p1314_p8, 1, 0 }
  0x16   : > { %p940_p10 = pneg %p1314_p8  ;;  %s191_s29 = sshll.u32 %s1232_s28, 4  ;;  %s1327_s29 = int_to_ptr.vmem [resolvable:$true] %s191_s29 }
  0x18   : > { %p1323_p11 = pnand %p940_p10, %p1622_p1 }
  0x1a   : > { %s1019_s7 = scalar_lea.hbm %s1631_s2, 64  ;;  %p1021_p13 = pneg %p1323_p11 }
  0x1b   : > { %p1020_p12 = scmp.ne.s32.totalorder %s1631_s2, %s1019_s7  ;;  %p1026_p5 = scmp.lt.u32.totalorder %s1019_s7, %s1631_s2 }
  0x1d   : > { %p1022_p0 = pnand %p1021_p13, %p1020_p12 }
  0x1f   : > { %p1023_p3 = pneg %p1022_p0 }
  0x21   : > { %p1028_p7 = pnand %p1026_p5, %p1023_p3 }
  0x23   : > { %1031 = shalt.err (!%p1028_p7)
}
  0x24   : > { %s1032_s12 = scalar_lea.vmem %s181_s27, 64  ;;  %p1040_p2 = scmp.lt.s32.totalorder %s181_s27, %s181_s27 }
  0x25   : > { %p1033_p10 = scmp.ne.s32.totalorder %s181_s27, %s1032_s12  ;;  %p1041_p6 = scmp.lt.s32.totalorder %s1032_s12, %s1032_s12 }
  0x27   : > { %p1035_p9 = pnand %p1033_p10, %p1021_p13  ;;  %p1042_p4 = por %p1041_p6, %p1040_p2 }
  0x29   : > { %p1036_p1 = pneg %p1035_p9 }
  0x2b   : > { %p1043_p8 = pnand %p1042_p4, %p1036_p1 }
  0x2d   : > { %1046 = shalt.err (!%p1043_p8)
}
  0x2e   : > { %943 = dma.hbm_to_vmem [thread:$0]  (!%p1323_p11), %s1631_s2, 64, %s181_s27, [#allocation6]  }
  0x2f   : > { %s1047_s28 = scalar_lea.hbm %s1620_s3, 64 }
  0x30   : > { %p1048_p9 = scmp.ne.s32.totalorder %s1620_s3, %s1047_s28  ;;  %p1054_p4 = scmp.lt.u32.totalorder %s1047_s28, %s1620_s3 }
  0x32   : > { %p1050_p2 = pnand %p1048_p9, %p1021_p13 }
  0x34   : > { %p1051_p1 = pneg %p1050_p2 }
  0x36   : > { %p1056_p6 = pnand %p1054_p4, %p1051_p1 }
  0x38   : > { %1059 = shalt.err (!%p1056_p6)
}
  0x39   : > { %s1060_s27 = scalar_lea.vmem %s1327_s29, 64  ;;  %p1068_p3 = scmp.lt.s32.totalorder %s1327_s29, %s1327_s29 }
  0x3a   : > { %p1061_p8 = scmp.ne.s32.totalorder %s1327_s29, %s1060_s27  ;;  %p1069_p5 = scmp.lt.s32.totalorder %s1060_s27, %s1060_s27 }
  0x3c   : > { %p1063_p12 = pnand %p1061_p8, %p1021_p13  ;;  %p1070_p7 = por %p1069_p5, %p1068_p3 }
  0x3e   : > { %p1064_p0 = pneg %p1063_p12 }
  0x40   : > { %p1071_p10 = pnand %p1070_p7, %p1064_p0 }
  0x42   : > { %1074 = shalt.err (!%p1071_p10)
}
  0x43   : > { %946 = dma.hbm_to_vmem [thread:$0]  (!%p1323_p11), %s1620_s3, 64, %s1327_s29, [#allocation9]  }
  0x44   : > { %s36_s11 = sadd.s32 1, %s1225_s19  ;;  %s45_s12 = sadd.s32 1, %s1217_s17 }
  0x45   : > { %p38_p13 = scmp.ge.s32.totalorder %s36_s11, 2  ;;  %p52_p9 = scmp.ne.s32.totalorder %s1217_s17, %s1213_s16 }
  0x46   : > { %p53_p2 = scmp.eq.s32.totalorder %s1229_s20, 0  ;;  %p960_p1 = scmp.lt.s32.totalorder %s1229_s20, 2 }
  0x47   : > { %s1652_s11 = smov (%p38_p13, %s36_s11), 0  ;;  %p1632_p6 = scmp.eq.s32.totalorder %s1295_s21, 1 }
  0x48   : > { %p54_p4 = por %p53_p2, %p52_p9  ;;  %s40_s13 = ssub.s32 %s1225_s19, %s1652_s11 }
  0x49   : > { %p1386_p8 = por %p1632_p6, %p52_p9  ;;  %s1393_s14 = sand.u32 1, %s1217_s17  }
  0x4a   : > { %p43_p11 = scmp.eq.s32.totalorder %s40_s13, 0  ;;  %s712_s29 = sshll.u32 %s1393_s14, 3 }
  0x4b   : > { %s762_s22 = sshll.u32 %s1225_s19, 7  ;;  %s1634_s0 = sld [smem:[#allocation16_spill]] }
  0x4c   : > { %s1398_s26 = scalar_select %p43_p11, %s1217_s17, %s45_s12  }
  0x4d   : > { %s206_s7 = scalar_lea.vmem [#allocation2], %s712_s29  ;;  %p1407_p12 = pnand %p960_p1, %p54_p4 }
  0x4e   : > { %s216_s8 = sshll.u32 %s206_s7, 4  ;;  %s715_s9 = sshll.u32 %s1393_s14, 7  ;;  %s1411_s8 = int_to_ptr.vmem [resolvable:$true] %s216_s8 }
  0x4f   : > { %s203_s10 = scalar_lea.sflag [#allocation3], %s1393_s14  ;;  %p1077_p3 = pneg %p1407_p12 }
  0x51   : > { %s1403_s6 = scalar_lea.hbm %s1634_s0, %s762_s22  ;;  %s1080_s22 = scalar_lea.hbm %s1634_s0, 256 }
  0x52   : > { %s1075_s12 = scalar_lea.hbm %s1403_s6, 128  ;;  %p1081_p10 = scmp.lt.u32.totalorder %s1403_s6, %s1634_s0 }
  0x53   : > { %p1076_p0 = scmp.ne.s32.totalorder %s1403_s6, %s1075_s12  ;;  %p1082_p13 = scmp.lt.u32.totalorder %s1080_s22, %s1075_s12 }
  0x54   : > { %p1084_p2 = scmp.lt.u32.totalorder %s1075_s12, %s1403_s6 }
  0x55   : > { %p1078_p5 = pnand %p1077_p3, %p1076_p0  ;;  %p1083_p9 = por %p1082_p13, %p1081_p10 }
  0x57   : > { %p1079_p7 = pneg %p1078_p5  ;;  %p1085_p1 = por %p1084_p2, %p1083_p9 }
  0x59   : > { %p1086_p4 = pnand %p1085_p1, %p1079_p7 }
  0x5b   : > { %1089 = shalt.err (!%p1086_p4)
}
  0x5c   : > { %s1090_s7 = scalar_lea.vmem %s1411_s8, 128  ;;  %s1233_s13 = smov [#allocation2]  }
  0x5d   : > { %p1091_p6 = scmp.ne.s32.totalorder %s1411_s8, %s1090_s7  ;;  %s1095_s29 = sshll.u32 %s1233_s13, 4  ;;  %s1096_s29 = int_to_ptr.vmem [resolvable:$false] %s1095_s29 }
  0x5e   : > { %s1097_s28 = scalar_lea.vmem %s1096_s29, 256  ;;  %p1098_p5 = scmp.lt.s32.totalorder %s1411_s8, %s1096_s29 }
  0x5f   : > { %p1093_p11 = pnand %p1091_p6, %p1077_p3  ;;  %p1099_p10 = scmp.lt.s32.totalorder %s1097_s28, %s1090_s7 }
  0x61   : > { %p1094_p0 = pneg %p1093_p11  ;;  %p1100_p13 = por %p1099_p10, %p1098_p5 }
  0x63   : > { %p1101_p9 = pnand %p1100_p13, %p1094_p0 }
  0x65   : > { %1104 = shalt.err (!%p1101_p9)
}
  0x66   : > { %950 = dma.hbm_to_vmem [thread:$0]  (!%p1407_p12), %s1403_s6, 128, %s1411_s8, %s203_s10  }
  0x67   : > { %s763_s12 = sshll.u32 %s1225_s19, 11  ;;  %s227_s22 = scalar_lea.vmem [#allocation5], %s715_s9 }
  0x68   : > { %s236_s5 = sshll.u32 %s227_s22, 4  ;;  %s223_s13 = sand.u32 1, %s1229_s20   ;;  %s1443_s5 = int_to_ptr.vmem [resolvable:$true] %s236_s5 }
  0x69   : > { %s1449_s28 = scalar_lea.hbm %s1618_s1, %s763_s12  ;;  %s1451_s0 = scalar_lea.sflag [#allocation6], %s223_s13 }
  0x6a   : > { %s1105_s2 = scalar_lea.hbm %s1449_s28, 2048  ;;  %s1110_s8 = scalar_lea.hbm %s1618_s1, 4096 }
  0x6b   : > { %p1106_p7 = scmp.ne.s32.totalorder %s1449_s28, %s1105_s2  ;;  %p1111_p4 = scmp.lt.u32.totalorder %s1449_s28, %s1618_s1 }
  0x6c   : > { %p1112_p6 = scmp.lt.u32.totalorder %s1110_s8, %s1105_s2  ;;  %p1114_p0 = scmp.lt.u32.totalorder %s1105_s2, %s1449_s28 }
  0x6d   : > { %p1108_p2 = pnand %p1106_p7, %p1077_p3 }
  0x6e   : > { %p1113_p11 = por %p1112_p6, %p1111_p4 }
  0x6f   : > { %p1109_p1 = pneg %p1108_p2 }
  0x70   : > { %p1115_p5 = por %p1114_p0, %p1113_p11 }
  0x72   : > { %p1116_p10 = pnand %p1115_p5, %p1109_p1 }
  0x74   : > { %1119 = shalt.err (!%p1116_p10)
}
  0x75   : > { %s1120_s12 = scalar_lea.vmem %s1443_s5, 2048  ;;  %s1234_s22 = smov [#allocation5]  }
  0x76   : > { %p1121_p13 = scmp.ne.s32.totalorder %s1443_s5, %s1120_s12  ;;  %s1125_s13 = sshll.u32 %s1234_s22, 4  ;;  %s1126_s13 = int_to_ptr.vmem [resolvable:$false] %s1125_s13 }
  0x77   : > { %s1127_s7 = scalar_lea.vmem %s1126_s13, 4096  ;;  %p1128_p2 = scmp.lt.s32.totalorder %s1443_s5, %s1126_s13 }
  0x78   : > { %p1123_p9 = pnand %p1121_p13, %p1077_p3  ;;  %p1129_p4 = scmp.lt.s32.totalorder %s1127_s7, %s1120_s12 }
  0x7a   : > { %p1124_p7 = pneg %p1123_p9  ;;  %p1130_p6 = por %p1129_p4, %p1128_p2 }
  0x7c   : > { %p1131_p11 = pnand %p1130_p6, %p1124_p7 }
  0x7e   : > { %1134 = shalt.err (!%p1131_p11)
}
  0x7f   : > { %s1235_s2 = smov 64   ;;  %s1236_s29 = smov 4  }
  0x80   : > { %953 = dma.hbm_to_vmem [thread:$0]  (!%p1407_p12), %s1449_s28, 2048, %s1443_s5, %s1451_s0, %s1235_s2, %s1235_s2, %s1236_s29  }
  0x81   : > { %p1636_p3 = scmp.ne.s32.totalorder %s1629_s25, 0 }
  0x82   : > { %s1480_s14 = sand.u32 (!%p1636_p3), 1, %s1213_s16   ;;  %p1637_p1 = scmp.ne.s32.totalorder (!%p1636_p3), %s1627_s23, 0 }
  0x83   : > { %248 = sbr.rel (%p1636_p3) target bundleno = 446 (0x1be), region = 36  ;;  %s719_s6 = sshll.u32 (!%p1636_p3), %s1480_s14, 3 }
  0x84   : > { %s251_s8 = scalar_lea.sflag (!%p1636_p3), [#allocation3], %s1480_s14  ;;  %s1484_s9 = scalar_lea.vmem (!%p1636_p3), [#allocation2], %s719_s6 }
  0x8a   : > { %1188 = dma.done.wait (%p1637_p1), %s251_s8, 128  }
  0x8b   : > { %1190 = vsyncadd (%p1637_p1), %s251_s8, 4294967168  ;;  %s259_s0 = sand.u32 1, %s1295_s21   ;;  %s720_s25 = sshll.u32 %s1480_s14, 7 }
  0x8c   : > { %s260_s27 = scalar_lea.sflag [#allocation6], %s259_s0  ;;  %s1492_s5 = scalar_lea.vmem [#allocation5], %s720_s25 }
  0x8d   : > { %1192 = dma.done.wait (%p1637_p1), %s260_s27, 2048  }
  0x8e   : > { %1194 = vsyncadd (%p1637_p1), %s260_s27, 4294965248  ;;  %p1638_p12 = scmp.eq.s32.totalorder %s1295_s21, 0 }
  0x90   : > { %1196 = dma.done.wait (%p1638_p12), [#allocation6], 64   ;;  %p1639_p0 = pmov %p1638_p12 }
  0x92   : > { %1198 = vsyncadd (%p1639_p0), [#allocation6], 4294967232  ;;  %p1640_p5 = pmov %p1639_p0 }
  0x93   : > { %p1641_p10 = pmov %p1639_p0 }
  0x94   : > { %1200 = dma.done.wait (%p1640_p5), [#allocation9], 64  }
  0x95   : > { %1202 = vsyncadd (%p1641_p10), [#allocation9], 4294967232  ;;  %v1237_v0 = vmov 0   ;;  %vm381_vm0 = vcmask 31744   ;;  %v836_v2 = vld [vmem:[%s1492_s5 + $0x40] sm:$0xff]   ;;  %v837_v4 = vld [vmem:[%s1492_s5 + $0x48] sm:$0xff]  }
  0x96   : > { %1017 = vset.pattern.permute.xlu0 %v1237_v0  ;;  %vm1508_vm1 = vmpackc.low %vm381_vm0, %vm381_vm0  ;;  %v766_v3 = vld [vmem:[%s1492_s5] sm:$0xff]   ;;  %v829_v7 = vld [vmem:[%s1492_s5 + $0x8] sm:$0xff]   ;;  %s723_s21 = sshll.u32 %s1480_s14, 4  ;;  %s764_s28 = sshll.u32 %s1221_s18, 8 }
  0x97   : > { %880 = vmatprep.subr.msk.bf16.mxu0 %vm1508_vm1, %v836_v2  ;;  %v304_v5 = vld [vmem:[#allocation7] sm:$0xf]  ;;  %v375_v6 = vld [vmem:[#allocation8] sm:$0xf]  ;;  %v838_v8 = vld [vmem:[%s1492_s5 + $0x50] sm:$0xff]   ;;  %s300_s23 = scalar_lea.vmem [#allocation10], %s723_s21  ;;  %s1568_s13 = scalar_lea.hbm %s1621_s4, %s764_s28 }
  0x98   : > { %883 = vmatpush3.bf16.xpose.msk.msra.mxu0 %vm1508_vm1, %v766_v3  ;;  %876 = vmatprep.mubr.msk.f32.mxu0 %vm381_vm0, %v304_v5  ;;  %v830_v9 = vld [vmem:[%s1492_s5 + $0x10] sm:$0xff]   ;;  %v839_v10 = vld [vmem:[%s1492_s5 + $0x58] sm:$0xff]   ;;  %v840_v12 = vld [vmem:[%s1492_s5 + $0x60] sm:$0xff]   ;;  %s577_s10 = sshll.u32 %s300_s23, 4  ;;  %s561_s7 = scalar_lea.sflag [#allocation4], %s1480_s14  ;;  %s1570_s10 = int_to_ptr.vmem [resolvable:$true] %s577_s10 }
  0x99   : > { %886 = vmatprep.subr.msk.bf16.mxu0 %vm1508_vm1, %v837_v4  ;;  %378 = vperm.xlu0 %1017, %v375_v6   ;;  %v831_v11 = vld [vmem:[%s1492_s5 + $0x18] sm:$0xff]   ;;  %v832_v13 = vld [vmem:[%s1492_s5 + $0x20] sm:$0xff]   ;;  %v841_v14 = vld [vmem:[%s1492_s5 + $0x68] sm:$0xff]   ;;  %s1135_s2 = scalar_lea.vmem %s1570_s10, 256  ;;  %s1238_s18 = smov [#allocation10]  }
  0x9a   : > { %v833_v15 = vld [vmem:[%s1492_s5 + $0x28] sm:$0xff]   ;;  %v842_v16 = vld [vmem:[%s1492_s5 + $0x70] sm:$0xff]   ;;  %v843_v18 = vld [vmem:[%s1492_s5 + $0x78] sm:$0xff]   ;;  %p1136_p13 = scmp.ne.s32.totalorder %s1570_s10, %s1135_s2  ;;  %s1139_s29 = sshll.u32 %s1238_s18, 4  ;;  %s1140_s29 = int_to_ptr.vmem [resolvable:$false] %s1139_s29 }
  0x9b   : > { %v834_v17 = vld [vmem:[%s1492_s5 + $0x30] sm:$0xff]   ;;  %v835_v19 = vld [vmem:[%s1492_s5 + $0x38] sm:$0xff]   ;;  %s1141_s6 = scalar_lea.vmem %s1140_s29, 512  ;;  %p1142_p2 = scmp.lt.s32.totalorder %s1570_s10, %s1140_s29 }
  0x9c   : > { %v369_v20 = vld [vmem:[%s1484_s9] sm:$0xff]  ;;  %p1137_p9 = pnand %p1136_p13, %p1386_p8  ;;  %p1143_p4 = scmp.lt.s32.totalorder %s1141_s6, %s1135_s2 }
  0x9d   : > { %v371_v21 = vcombine.high %v369_v20, %v369_v20  ;;  %373 = vst [vmem:[%s300_s23] sm:$0xf] %v369_v20 }
  0x9e   : > { %p1138_p7 = pneg %p1137_p9  ;;  %p1144_p6 = por %p1143_p4, %p1142_p2 }
  0x9f   : > { %374 = vst [vmem:[%s300_s23 + $0x8] sm:$0xf] %v371_v21 }
  0xa0   : > { %889 = vmatpush3.bf16.xpose.msk.msra.mxu0 %vm1508_vm1, %v829_v7  ;;  %p1145_p11 = pnand %p1144_p6, %p1138_p7 }
  0xa1   : > { %892 = vmatprep.subr.msk.bf16.mxu0 %vm1508_vm1, %v838_v8 }
  0xa8   : > { %895 = vmatpush3.bf16.xpose.msk.msra.mxu0 %vm1508_vm1, %v830_v9 }
  0xa9   : > { %898 = vmatprep.subr.msk.bf16.mxu0 %vm1508_vm1, %v839_v10 }
  0xb0   : > { %901 = vmatpush3.bf16.xpose.msk.msra.mxu0 %vm1508_vm1, %v831_v11 }
  0xb1   : > { %904 = vmatprep.subr.msk.bf16.mxu0 %vm1508_vm1, %v840_v12 }
  0xb8   : > { %907 = vmatpush3.bf16.xpose.msk.msra.mxu0 %vm1508_vm1, %v832_v13 }
  0xb9   : > { %910 = vmatprep.subr.msk.bf16.mxu0 %vm1508_vm1, %v841_v14 }
  0xc0   : > { %913 = vmatpush3.bf16.xpose.msk.msra.mxu0 %vm1508_vm1, %v833_v15 }
  0xc1   : > { %916 = vmatprep.subr.msk.bf16.mxu0 %vm1508_vm1, %v842_v16 }
  0xc8   : > { %919 = vmatpush3.bf16.xpose.msk.msra.mxu0 %vm1508_vm1, %v834_v17 }
  0xc9   : > { %922 = vmatprep.subr.msk.bf16.mxu0 %vm1508_vm1, %v843_v18 }
  0xd0   : > { %925 = vmatpush3.bf16.xpose.msk.msra.mxu0 %vm1508_vm1, %v835_v19 }
  0xd7   : > { %877 = vmatmul.mubr.msk.f32.vlgmr.msra.gmra.mrb[0].mxu0 %vm381_vm0, %v304_v5 }
 0x118   : > { %v379_v22 = vpop.permute.xlu0 %378 }
 0x1aa   : > { %v547_v23 = vpop.f32.mrb[0].mxu0 }
 0x1ab   : > { %v548_v24 = vadd.f32 %v547_v23, %v379_v22  ;;  %v549_v25 = vpop.f32.mrb[1].mxu0 }
 0x1ac   : > { %v550_v26 = vadd.f32 %v549_v25, %v379_v22 }
 0x1ad   : > { %v554_v27 = vrot.slane %v548_v24, 4 }
 0x1ae   : > { %v555_v28 = vrot.slane %v550_v26, 4 }
 0x1af   : > { %558 = vst [vmem:[%s300_s23] sm:$0xf0] %v554_v27 }
 0x1b0   : > { %559 = vst [vmem:[%s300_s23 + $0x8] sm:$0xf0] %v555_v28 }
 0x1b1   : > { %1148 = shalt.err (!%p1145_p11)
}
 0x1b2   : > { %s1149_s14 = scalar_lea.hbm %s1568_s13, 256  ;;  %s1153_s0 = scalar_lea.hbm %s1621_s4, 512 }
 0x1b3   : > { %p1150_p3 = scmp.ne.s32.totalorder %s1568_s13, %s1149_s14  ;;  %p1154_p0 = scmp.lt.u32.totalorder %s1568_s13, %s1621_s4 }
 0x1b4   : > { %p1155_p5 = scmp.lt.u32.totalorder %s1153_s0, %s1149_s14  ;;  %p1157_p13 = scmp.lt.u32.totalorder %s1149_s14, %s1568_s13 }
 0x1b5   : > { %p1151_p1 = pnand %p1150_p3, %p1386_p8 }
 0x1b6   : > { %p1156_p10 = por %p1155_p5, %p1154_p0 }
 0x1b7   : > { %p1152_p12 = pneg %p1151_p1 }
 0x1b8   : > { %p1158_p9 = por %p1157_p13, %p1156_p10 }
 0x1ba   : > { %p1159_p7 = pnand %p1158_p9, %p1152_p12 }
 0x1bc   : > { %1162 = shalt.err (!%p1159_p7)
}
 0x1bd   : > { %938 = dma.vmem_to_hbm [thread:$0]  (%p1386_p8), %s1570_s10, 256, %s1568_s13, %s561_s7  }
 0x1be PF: > { %s589_s5 = sand.u32 1, %s1209_s15   ;;  %p1644_p2 = scmp.ne.s32.totalorder %s1628_s24, 0 }
 0x1bf   : > { %p1645_p4 = scmp.ge.s32.totalorder %s1229_s20, 2  ;;  %s590_s21 = scalar_lea.sflag [#allocation4], %s589_s5 }
 0x1c1   : > { %p955_p6 = pnand %p1645_p4, %p1644_p2 }
 0x1c3   : > { %1204 = dma.done.wait (!%p955_p6), %s590_s21, 256  }
 0x1c4   : > { %1206 = vsyncadd (!%p955_p6), %s590_s21, 4294967040  ;;  %s24_s20 = sadd.s32 1, %s1229_s20   ;;  %s1646_s15 = smov %s1213_s16 }
 0x1c5   : > { %p21_p11 = scmp.ge.s32.totalorder %s24_s20, 4   ;;  %s1647_s16 = smov %s1217_s17 }
 0x1c6   : > { %s1648_s17 = smov %s1398_s26  ;;  %s1649_s18 = smov %s1225_s19 }
 0x1c7   : > { %s1650_s19 = smov %s1652_s11  ;;  %23 = sbr.rel (!%p21_p11) target bundleno = 12 (0xc), region = 102 }
 0x1ce   :  { %595 = vsyncpa [#allocation3], 1 }
 0x1cf   :  { %597 = vsyncpa [#allocation3 + $0x1], 1 }
 0x1d0   :  { %598 = vsyncpa [#allocation6], 1 }
 0x1d1   :  { %600 = vsyncpa [#allocation6 + $0x1], 1 }
 0x1d2   :  { %601 = vsyncpa [#allocation9], 1 }
 0x1d3   :  { %602 = vsyncpa [#allocation4], 1 }
 0x1d4   :  { %604 = vsyncpa [#allocation4 + $0x1], 1 }

// kernel: unet_innermost_forward.2
= control target key start
LH: loop header
LB: loop body
LE: loop exit
PB: predicated region body
PF: predicated region fallthrough
CT: control target
= control target key end

     0   :  { %10 = vsyncpa [#allocation4], 0  ;;  %s11287_s0 = inlined_call_operand.hbm [shape: bf16[2,9,9,16], index: 0, kind: input, shape index: {}]   ;;  %s11288_s1 = inlined_call_operand.hbm [shape: bf16[4,16,8], index: 1, kind: input, shape index: {}]   ;;  %s11289_s2 = inlined_call_operand.hbm [shape: bf16[4,4,8,4], index: 2, kind: input, shape index: {}]   ;;  %s11290_s3 = inlined_call_operand.hbm [shape: bf16[2,8,2,8,8], index: 3, kind: output, shape index: {0}]   ;;  %s11291_s4 = inlined_call_operand.hbm [shape: f32[1,2,4], index: 4, kind: output, shape index: {1}]  }
   0x1   :  { %11 = vsyncpa [#allocation7], 0 }
   0x2   :  { %12 = vsyncpa [#allocation5], 0 }
   0x3   :  { %13 = vsyncpa [#allocation11], 0  ;;  %s9041_s15 = smov [#allocation6]   ;;  %s9042_s17 = smov [#allocation3]  }
   0x4   :  { %s31_s16 = sshll.u32 %s9041_s15, 4  ;;  %s19_s18 = sshll.u32 %s9042_s17, 4  ;;  %s32_s16 = int_to_ptr.vmem [resolvable:$true] %s31_s16  ;;  %s9074_s18 = int_to_ptr.vmem [resolvable:$true] %s19_s18 }
   0x5   :  { %s8923_s21 = scalar_lea.hbm %s11288_s1, 512 }
   0x6   :  { %p8924_p0 = scmp.ne.s32.totalorder %s11288_s1, %s8923_s21  ;;  %p8927_p1 = scmp.lt.u32.totalorder %s8923_s21, %s11288_s1 }
   0x8   :  { %p8929_p2 = pnand %p8927_p1, %p8924_p0 }
   0xa   :  { %8932 = shalt.err (!%p8929_p2)
}
   0xb   :  { %s8933_s26 = scalar_lea.vmem %s32_s16, 512  ;;  %p8938_p4 = scmp.lt.s32.totalorder %s32_s16, %s32_s16 }
   0xc   :  { %p8934_p3 = scmp.ne.s32.totalorder %s32_s16, %s8933_s26  ;;  %p8939_p5 = scmp.lt.s32.totalorder %s8933_s26, %s8933_s26 }
   0xe   :  { %p8940_p6 = por %p8939_p5, %p8938_p4 }
  0x10   :  { %p8941_p7 = pnand %p8940_p6, %p8934_p3 }
  0x12   :  { %8944 = shalt.err (!%p8941_p7)
}
  0x13   :  { %s9043_s27 = smov 64   ;;  %s9044_s28 = smov 4  }
  0x14   :  { %37 = dma.hbm_to_vmem [thread:$0]  %s11288_s1, 512, %s32_s16, [#allocation7], %s9043_s27, %s9043_s27, %s9044_s28  }
  0x15   :  { %s8945_s7 = scalar_lea.hbm %s11287_s0, 2304 }
  0x16   :  { %p8946_p8 = scmp.ne.s32.totalorder %s11287_s0, %s8945_s7  ;;  %p8949_p9 = scmp.lt.u32.totalorder %s8945_s7, %s11287_s0 }
  0x18   :  { %p8951_p10 = pnand %p8949_p9, %p8946_p8 }
  0x1a   :  { %8954 = shalt.err (!%p8951_p10)
}
  0x1b   :  { %s8955_s12 = scalar_lea.vmem %s9074_s18, 2304  ;;  %p8960_p12 = scmp.lt.s32.totalorder %s9074_s18, %s9074_s18 }
  0x1c   :  { %p8956_p11 = scmp.ne.s32.totalorder %s9074_s18, %s8955_s12  ;;  %p8961_p13 = scmp.lt.s32.totalorder %s8955_s12, %s8955_s12 }
  0x1e   :  { %p8962_p0 = por %p8961_p13, %p8960_p12 }
  0x20   :  { %p8963_p1 = pnand %p8962_p0, %p8956_p11 }
  0x22   :  { %8966 = shalt.err (!%p8963_p1)
}
  0x23   :  { %25 = dma.hbm_to_vmem [thread:$0]  %s11287_s0, 2304, %s9074_s18, [#allocation4], %s9043_s27, %s9043_s27, %s9044_s28  }
  0x24   :  { %s9045_s14 = smov [#allocation8]   ;;  %s8967_s19 = scalar_lea.hbm %s11289_s2, 1024 }
  0x25   :  { %s43_s15 = sshll.u32 %s9045_s14, 4  ;;  %p8968_p2 = scmp.ne.s32.totalorder %s11289_s2, %s8967_s19  ;;  %s44_s15 = int_to_ptr.vmem [resolvable:$true] %s43_s15 }
  0x26   :  { %p8971_p3 = scmp.lt.u32.totalorder %s8967_s19, %s11289_s2 }
  0x28   :  { %p8973_p4 = pnand %p8971_p3, %p8968_p2 }
  0x2a   :  { %8976 = shalt.err (!%p8973_p4)
}
  0x2b   :  { %s8977_s24 = scalar_lea.vmem %s44_s15, 1024  ;;  %p8982_p6 = scmp.lt.s32.totalorder %s44_s15, %s44_s15 }
  0x2c   :  { %p8978_p5 = scmp.ne.s32.totalorder %s44_s15, %s8977_s24  ;;  %p8983_p7 = scmp.lt.s32.totalorder %s8977_s24, %s8977_s24 }
  0x2e   :  { %p8984_p8 = por %p8983_p7, %p8982_p6 }
  0x30   :  { %p8985_p9 = pnand %p8984_p8, %p8978_p5 }
  0x32   :  { %8988 = shalt.err (!%p8985_p9)
}
  0x33   :  { %49 = dma.hbm_to_vmem [thread:$0]  %s11289_s2, 1024, %s44_s15, [#allocation7], %s9043_s27, %s9043_s27, %s9044_s28  }
  0x34   :  { %9033 = dma.done.wait [#allocation4], 2304  }
  0x35   :  { %9034 = vsyncadd [#allocation4], 4294964992 }
  0x36   :  { %9035 = dma.done.wait [#allocation7], 1536  }
  0x37   :  { %9036 = vsyncadd [#allocation7], 4294965760  ;;  %v8884_v0 = vld [vmem:[#allocation6 + $0x10] sm:$0xff]   ;;  %v64_v2 = vld [vmem:[#allocation3 + $0x10] ss:$8 sps:$4 sm:$0xff]   ;;  %vm600_vm4 = vcmask 130048  }
  0x38   :  { %v60_v1 = vld [vmem:[#allocation3] ss:$8 sps:$4 sm:$0xff]   ;;  %8296 = vmatprep.subr.bf16.mxu0 %v8884_v0  ;;  %v100_v6 = vunpack.c.l.bf16 %v64_v2  ;;  %v102_v7 = vunpack.c.h.bf16 %v64_v2  ;;  %v8885_v8 = vld [vmem:[#allocation6 + $0x8] sm:$0xff]   ;;  %v9130_v20 = vld [vmem:[#allocation6] sm:$0xff]   ;;  %vm340_vm10 = vsmask.f32 3328 }
  0x39   :  { %v68_v3 = vld [vmem:[#allocation3 + $0x20] ss:$8 sps:$4 sm:$0xff]   ;;  %v96_v4 = vunpack.c.l.bf16 %v60_v1  ;;  %v98_v5 = vunpack.c.h.bf16 %v60_v1  ;;  %8297 = vmatpush3.bf16.msra.mxu0 %v8884_v0  ;;  %v72_v10 = vld [vmem:[#allocation3 + $0x30] ss:$8 sps:$4 sm:$0xff]   ;;  %8260 = vmatprep.subr.bf16.mxu1 %v8885_v8  ;;  %v61_v50 = vld [vmem:[#allocation3 + $0x4] sm:$0x1] }
  0x3a   :  { %v104_v9 = vunpack.c.l.bf16 %v68_v3  ;;  %vm136_vm2 = vcmp.ge.f32.partialorder %v100_v6, 0.0  ;;  %vm138_vm3 = vcmp.ge.f32.partialorder %v102_v7, 0.0  ;;  %v172_v13 = vmul.f32 0.2, %v100_v6  ;;  %8261 = vmatpush3.bf16.msra.mxu1 %v8885_v8  ;;  %v8887_v29 = vld [vmem:[#allocation6 + $0x18] sm:$0xff]   ;;  %s9047_s2 = smov [#allocation10]  }
  0x3b   :  { %vm132_vm0 = vcmp.ge.f32.partialorder %v96_v4, 0.0  ;;  %vm134_vm1 = vcmp.ge.f32.partialorder %v98_v5, 0.0  ;;  %v168_v11 = vmul.f32 0.2, %v96_v4  ;;  %v170_v12 = vmul.f32 0.2, %v98_v5  ;;  %8278 = vmatprep.subr.bf16.mxu1 %v9130_v20  ;;  %8314 = vmatprep.subr.bf16.mxu0 %v8887_v29 }
  0x3c   :  { %v174_v14 = vmul.f32 0.2, %v102_v7  ;;  %v106_v15 = vunpack.c.h.bf16 %v68_v3  ;;  %v108_v16 = vunpack.c.l.bf16 %v72_v10  ;;  %v9128_v18 = vsel %vm136_vm2, %v100_v6, %v172_v13  ;;  %v9155_v35 = vld [vmem:[#allocation3 + $0x40] ss:$16 sps:$4 sm:$0xff]   ;;  %v63_v54 = vld [vmem:[#allocation3 + $0xc] sm:$0x1] }
  0x3d   :  { %v9126_v17 = vsel %vm134_vm1, %v98_v5, %v170_v12  ;;  %vm140_vm5 = vcmp.ge.f32.partialorder %v104_v9, 0.0  ;;  %v176_v19 = vmul.f32 0.2, %v104_v9  ;;  %v9133_v21 = vsel %vm132_vm0, %v96_v4, %v168_v11  ;;  %v65_v58 = vld [vmem:[#allocation3 + $0x14] sm:$0x1]  ;;  %s7494_s25 = sshll.u32 %s9047_s2, 4  ;;  %s7495_s25 = int_to_ptr.vmem [resolvable:$true] %s7494_s25 }
  0x3e   :  { %v9136_v22 = vsel %vm138_vm3, %v102_v7, %v174_v14  ;;  %v7982_v23 = vpack.c.bf16 %v9126_v17, %v9126_v17  ;;  %v7984_v24 = vpack.c.bf16 %v9128_v18, %v9128_v18  ;;  %v8020_v28 = vpack.c.bf16 %v9128_v18, %v9126_v17  ;;  %v67_v63 = vld [vmem:[#allocation3 + $0x1c] sm:$0x1]  ;;  %v69_v4 = vld [vmem:[#allocation3 + $0x24] sm:$0x1]  ;;  %s8989_s26 = scalar_lea.vmem %s7495_s25, 32  ;;  %p8994_p11 = scmp.lt.s32.totalorder %s7495_s25, %s7495_s25 }
  0x3f   :  { %v7986_v25 = vpack.c.bf16 %v9136_v22, %v9136_v22  ;;  %vm142_vm6 = vcmp.ge.f32.partialorder %v106_v15, 0.0  ;;  %v9153_v33 = vsel %vm140_vm5, %v104_v9, %v176_v19  ;;  %v178_v34 = vmul.f32 0.2, %v106_v15  ;;  %p8990_p10 = scmp.ne.s32.totalorder %s7495_s25, %s8989_s26  ;;  %p8995_p12 = scmp.lt.s32.totalorder %s8989_s26, %s8989_s26 }
  0x40   :  { %v358_v30 = vshrl.u32 %v7982_v23, 16  ;;  %v361_v31 = vshll.u32 %v7982_v23, 16  ;;  %v372_v32 = vshrl.u32 %v7984_v24, 16  ;;  %8298 = vmatprep.mubr.msk.bf16.mxu0 %vm600_vm4, %v8020_v28  ;;  %v9159_v36 = vpack.c.bf16 %v9133_v21, %v9133_v21 }
  0x41   :  { %v375_v37 = vshll.u32 %v7984_v24, 16  ;;  %vm144_vm7 = vcmp.ge.f32.partialorder %v108_v16, 0.0  ;;  %v386_v38 = vshrl.u32 %v7986_v25, 16  ;;  %v389_v39 = vshll.u32 %v7986_v25, 16  ;;  %p8996_p13 = por %p8995_p12, %p8994_p11 }
  0x42   :  { %v7988_v40 = vpack.c.bf16 %v9153_v33, %v9153_v33  ;;  %v8021_v41 = vpack.c.bf16 %v9153_v33, %v9136_v22  ;;  %v180_v42 = vmul.f32 0.2, %v108_v16  ;;  %v9166_v43 = vsel %vm142_vm6, %v106_v15, %v178_v34 }
  0x43   :  { %v110_v44 = vunpack.c.h.bf16 %v72_v10  ;;  %v112_v45 = vunpack.c.l.bf16 %v9155_v35  ;;  %v9169_v46 = vrot.slane %v358_v30, 4  ;;  %v9171_v47 = vrot.slane %v361_v31, 5  ;;  %p8997_p0 = pnand %p8996_p13, %p8990_p10 }
  0x44   :  { %v9173_v48 = vrot.slane %v372_v32, 4  ;;  %8299 = vmatmul.mubr.msk.bf16.vlgmr.msra.gmra.mrb[0].mxu0 %vm600_vm4, %v8021_v41  ;;  %v7990_v49 = vpack.c.bf16 %v9166_v43, %v9166_v43  ;;  %v9178_v51 = vrot.slane %v375_v37, 5  ;;  %v9181_v52 = vsel %vm144_vm7, %v108_v16, %v180_v42 }
  0x45   :  { %vm146_vm8 = vcmp.ge.f32.partialorder %v110_v44, 0.0  ;;  %v182_v53 = vmul.f32 0.2, %v110_v44  ;;  %8315 = vmatpush3.bf16.msra.mxu0 %v8887_v29  ;;  %v400_v55 = vshrl.u32 %v7988_v40, 16  ;;  %v403_v56 = vshll.u32 %v7988_v40, 16 }
  0x46   :  { %v7992_v57 = vpack.c.bf16 %v9181_v52, %v9181_v52  ;;  %vm148_vm9 = vcmp.ge.f32.partialorder %v112_v45, 0.0  ;;  %v414_v59 = vshrl.u32 %v7990_v49, 16  ;;  %v8022_v60 = vpack.c.bf16 %v9181_v52, %v9166_v43 }
  0x47   :  { %v184_v61 = vmul.f32 0.2, %v112_v45  ;;  %v9187_v62 = vsel %vm146_vm8, %v110_v44, %v182_v53  ;;  %v417_v0 = vshll.u32 %v7990_v49, 16  ;;  %v97_v6 = vunpack.c.l.bf16 %v61_v50 }
  0x48   :  { %v428_v1 = vshrl.u32 %v7992_v57, 16  ;;  %v431_v2 = vshll.u32 %v7992_v57, 16  ;;  %v9191_v3 = vpack.c.bf16 %v9187_v62, %v9187_v62  ;;  %8302 = vmatprep.mubr.msk.bf16.mxu0 %vm600_vm4, %v8022_v60  ;;  %v99_v7 = vunpack.c.l.bf16 %v63_v54 }
  0x49   :  { %v220_v5 = vsel %vm148_vm9, %v112_v45, %v184_v61  ;;  %v101_v8 = vunpack.c.l.bf16 %v65_v58  ;;  %vm341_vm11 = vsmask.f32 7440  ;;  %v388_v9 = vrot.slane %v386_v38, 4 }
  0x4a   :  { %v391_v10 = vrot.slane %v389_v39, 5  ;;  %v9194_v11 = vrot.slane %v400_v55, 4  ;;  %v9196_v12 = vrot.slane %v403_v56, 5  ;;  %v9198_v13 = vrot.slane %v414_v59, 4  ;;  %vm9218_vm1 = vmor %vm340_vm10, %vm341_vm11 }
  0x4b   :  { %v8023_v14 = vpack.c.bf16 %v220_v5, %v9187_v62  ;;  %v103_v15 = vunpack.c.l.bf16 %v67_v63  ;;  %v105_v16 = vunpack.c.l.bf16 %v69_v4  ;;  %v9201_v19 = vrot.slane %v417_v0, 5 }
  0x4c   :  { %v9203_v23 = vrot.slane %v428_v1, 4  ;;  %v9205_v24 = vrot.slane %v431_v2, 5  ;;  %v442_v25 = vshrl.u32 %v9191_v3, 16  ;;  %v445_v28 = vshll.u32 %v9191_v3, 16 }
  0x4d   :  { %8303 = vmatmul.mubr.msk.bf16.gmra.mrb[4].mxu0 %vm600_vm4, %v8023_v14  ;;  %vm133_vm12 = vcmp.ge.f32.partialorder %v97_v6, 0.0  ;;  %vm135_vm13 = vcmp.ge.f32.partialorder %v99_v7, 0.0  ;;  %vm137_vm14 = vcmp.ge.f32.partialorder %v101_v8, 0.0  ;;  %vm139_vm15 = vcmp.ge.f32.partialorder %v103_v15, 0.0 }
  0x4e   :  { %v169_v29 = vmul.f32 0.2, %v97_v6  ;;  %v171_v30 = vmul.f32 0.2, %v99_v7  ;;  %v344_v31 = vshrl.u32 %v9159_v36, 16  ;;  %v9211_v32 = vpack.c.bf16 %v220_v5, %v220_v5 }
  0x4f   :  { %vm141_vm0 = vcmp.ge.f32.partialorder %v105_v16, 0.0  ;;  %v173_v34 = vmul.f32 0.2, %v101_v8  ;;  %v175_v37 = vmul.f32 0.2, %v103_v15  ;;  %v347_v55 = vshll.u32 %v9159_v36, 16 }
  0x50   :  { %v177_v38 = vmul.f32 0.2, %v105_v16  ;;  %v205_v39 = vsel %vm133_vm12, %v97_v6, %v169_v29  ;;  %v207_v40 = vsel %vm135_vm13, %v99_v7, %v171_v30  ;;  %v346_v41 = vrot.slane %v344_v31, 4  ;;  %v82_v6 = vld [vmem:[#allocation3 + $0x58] ss:$8 sps:$4 sm:$0xff]  }
  0x51   :  { %v209_v42 = vsel %vm137_vm14, %v101_v8, %v173_v34  ;;  %v211_v44 = vsel %vm139_vm15, %v103_v15, %v175_v37  ;;  %v7981_v45 = vpack.c.bf16 %v205_v39, %v205_v39  ;;  %v7983_v49 = vpack.c.bf16 %v207_v40, %v207_v40  ;;  %v9235_v30 = vld [vmem:[#allocation3 + $0x68] ss:$8 sps:$4 sm:$0xff]  }
  0x52   :  { %v213_v50 = vsel %vm141_vm0, %v105_v16, %v177_v38  ;;  %v7985_v53 = vpack.c.bf16 %v209_v42, %v209_v42  ;;  %v7987_v54 = vpack.c.bf16 %v211_v44, %v211_v44  ;;  %v364_v58 = vor.u32 %v9171_v47, %v9169_v46 }
  0x53   :  { %v7989_v56 = vpack.c.bf16 %v213_v50, %v213_v50  ;;  %v353_v57 = vshll.u32 %v7981_v45, 16  ;;  %v367_v59 = vshll.u32 %v7983_v49, 16  ;;  %v349_v61 = vrot.slane %v347_v55, 5 }
  0x54   :  { %v378_v63 = vor.u32 %v9178_v51, %v9173_v48  ;;  %v381_v0 = vshll.u32 %v7985_v53, 16  ;;  %v392_v1 = vor.u32 %v391_v10, %v388_v9  ;;  %v365_v36 = vrot.slane %v364_v58, 4 }
  0x55   :  { %v355_v2 = vrot.slane %v353_v57, 5  ;;  %v369_v4 = vrot.slane %v367_v59, 5  ;;  %v395_v5 = vshll.u32 %v7987_v54, 16  ;;  %v350_v7 = vor.u32 %v349_v61, %v346_v41 }
  0x56   :  { %v379_v46 = vrot.slane %v378_v63, 4  ;;  %v383_v47 = vrot.slane %v381_v0, 5  ;;  %v393_v8 = vrot.slane %v392_v1, 4  ;;  %v406_v16 = vor.u32 %v9196_v12, %v9194_v11  ;;  %v71_v12 = vld [vmem:[#allocation3 + $0x2c] sm:$0x1] }
  0x57   :  { %v9226_v14 = vsel %vm9218_vm1, %v365_v36, %v369_v4  ;;  %v397_v15 = vrot.slane %v395_v5, 5  ;;  %v409_v48 = vshll.u32 %v7989_v56, 16  ;;  %v351_v51 = vrot.slane %v350_v7, 4  ;;  %v73_v56 = vld [vmem:[#allocation3 + $0x34] sm:$0x1] }
  0x58   :  { %v9232_v9 = vsel %vm9218_vm1, %v379_v46, %v383_v47  ;;  %v116_v10 = vunpack.c.h.bf16 %v9155_v35  ;;  %v118_v29 = vunpack.c.l.bf16 %v82_v6  ;;  %v9237_v31 = vrot.slane %v442_v25, 4  ;;  %v75_v5 = vld [vmem:[#allocation3 + $0x3c] sm:$0x1] }
  0x59   :  { %v1022_v34 = vshrl.u32 %v9211_v32, 16  ;;  %v9242_v37 = vsel %vm9218_vm1, %v393_v8, %v397_v15  ;;  %v407_v11 = vrot.slane %v406_v16, 4  ;;  %v356_v38 = vsel %vm9218_vm1, %v351_v51, %v355_v2 }
  0x5a   :  { %v7541_v39 = vcombine.low %v9232_v9, %v9242_v37  ;;  %vm152_vm2 = vcmp.ge.f32.partialorder %v116_v10, 0.0  ;;  %vm154_vm3 = vcmp.ge.f32.partialorder %v118_v29, 0.0  ;;  %v411_v35 = vrot.slane %v409_v48, 5 }
  0x5b   :  { %v7540_v25 = vcombine.low %v356_v38, %v9226_v14  ;;  %v188_v40 = vmul.f32 0.2, %v116_v10  ;;  %v190_v41 = vmul.f32 0.2, %v118_v29  ;;  %v9251_v42 = vrot.slane %v445_v28, 5 }
  0x5c   :  { %v120_v44 = vunpack.c.h.bf16 %v82_v6  ;;  %v122_v45 = vunpack.c.l.bf16 %v9235_v30  ;;  %v107_v49 = vunpack.c.l.bf16 %v71_v12  ;;  %v9254_v50 = vrot.slane %v1022_v34, 4 }
  0x5d   :  { %v1025_v53 = vshll.u32 %v9211_v32, 16  ;;  %8262 = vmatprep.mubr.msk.bf16.mxu1 %vm600_vm4, %v7540_v25  ;;  %v9258_v54 = vsel %vm152_vm2, %v116_v10, %v188_v40  ;;  %v9260_v55 = vsel %vm154_vm3, %v118_v29, %v190_v41  ;;  %v9273_v32 = vsel %vm9218_vm1, %v407_v11, %v411_v35 }
  0x5e   :  { %8263 = vmatmul.mubr.msk.bf16.vlgmr.msra.gmra.mrb[0].mxu1 %vm600_vm4, %v7541_v39  ;;  %v7998_v3 = vpack.c.bf16 %v9258_v54, %v9258_v54  ;;  %v9267_v28 = vpack.c.bf16 %v9260_v55, %v9260_v55  ;;  %v8024_v57 = vpack.c.bf16 %v9260_v55, %v9258_v54  ;;  %vm156_vm5 = vcmp.ge.f32.partialorder %v120_v44, 0.0  ;;  %v90_v39 = vld [vmem:[#allocation3 + $0x78] ss:$8 sps:$4 sm:$0xff]  }
  0x5f   :  { %8279 = vmatpush3.bf16.msra.mxu1 %v9130_v20  ;;  %vm158_vm6 = vcmp.ge.f32.partialorder %v122_v45, 0.0  ;;  %v192_v58 = vmul.f32 0.2, %v120_v44  ;;  %v194_v59 = vmul.f32 0.2, %v122_v45  ;;  %vm143_vm7 = vcmp.ge.f32.partialorder %v107_v49, 0.0 }
  0x60   :  { %v470_v61 = vshrl.u32 %v7998_v3, 16  ;;  %8306 = vmatprep.mubr.msk.bf16.mxu0 %vm600_vm4, %v8024_v57  ;;  %v420_v63 = vor.u32 %v9201_v19, %v9198_v13  ;;  %v109_v0 = vunpack.c.l.bf16 %v73_v56  ;;  %v473_v1 = vshll.u32 %v7998_v3, 16 }
  0x61   :  { %v9279_v2 = vsel %vm156_vm5, %v120_v44, %v192_v58  ;;  %v9281_v36 = vsel %vm158_vm6, %v122_v45, %v194_v59  ;;  %v179_v4 = vmul.f32 0.2, %v107_v49  ;;  %v9283_v6 = vrot.slane %v1025_v53, 5 }
  0x62   :  { %v7595_v20 = vcombine.low %v9226_v14, %v9232_v9  ;;  %v7596_v7 = vcombine.low %v9242_v37, %v9273_v32  ;;  %v484_v46 = vshrl.u32 %v9267_v28, 16  ;;  %v9292_v13 = vpack.c.bf16 %v9279_v2, %v9279_v2  ;;  %v91_v37 = vld [vmem:[#allocation3 + $0x7c] sm:$0x1] }
  0x63   :  { %v9296_v19 = vpack.c.bf16 %v9281_v36, %v9281_v36  ;;  %v8025_v47 = vpack.c.bf16 %v9281_v36, %v9279_v2  ;;  %v215_v8 = vsel %vm143_vm7, %v107_v49, %v179_v4  ;;  %v111_v16 = vunpack.c.l.bf16 %v75_v5 }
  0x64   :  { %v7991_v15 = vpack.c.bf16 %v215_v8, %v215_v8  ;;  %vm145_vm8 = vcmp.ge.f32.partialorder %v109_v0, 0.0  ;;  %v181_v48 = vmul.f32 0.2, %v109_v0  ;;  %v9300_v51 = vrot.slane %v470_v61, 4 }
  0x65   :  { %v9302_v10 = vrot.slane %v473_v1, 5  ;;  %v487_v29 = vshll.u32 %v9267_v28, 16  ;;  %8307 = vmatmul.mubr.msk.bf16.gmra.mrb[8].mxu0 %vm600_vm4, %v8025_v47  ;;  %v421_v34 = vrot.slane %v420_v63, 4  ;;  %vm147_vm9 = vcmp.ge.f32.partialorder %v111_v16, 0.0 }
  0x66   :  { %v423_v11 = vshll.u32 %v7991_v15, 16  ;;  %v183_v12 = vmul.f32 0.2, %v111_v16  ;;  %v217_v38 = vsel %vm145_vm8, %v109_v0, %v181_v48  ;;  %v498_v35 = vshrl.u32 %v9292_v13, 16  ;;  %v94_v0 = vld [vmem:[#allocation3 + $0x88] sm:$0xf] }
  0x67   :  { %v501_v25 = vshll.u32 %v9292_v13, 16  ;;  %v512_v40 = vshrl.u32 %v9296_v19, 16  ;;  %v515_v41 = vshll.u32 %v9296_v19, 16  ;;  %v7993_v49 = vpack.c.bf16 %v217_v38, %v217_v38 }
  0x68   :  { %v425_v44 = vrot.slane %v423_v11, 5  ;;  %v219_v45 = vsel %vm147_vm9, %v111_v16, %v183_v12  ;;  %v434_v53 = vor.u32 %v9205_v24, %v9203_v23  ;;  %v448_v3 = vor.u32 %v9251_v42, %v9237_v31  ;;  %v78_v24 = vld [vmem:[#allocation3 + $0x48] sm:$0xf] }
  0x69   :  { %v7995_v56 = vpack.c.bf16 %v219_v45, %v219_v45  ;;  %v124_v57 = vunpack.c.h.bf16 %v9235_v30  ;;  %v126_v58 = vunpack.c.l.bf16 %v90_v39  ;;  %v437_v63 = vshll.u32 %v7993_v49, 16 }
  0x6a   :  { %v9317_v59 = vsel %vm9218_vm1, %v421_v34, %v425_v44  ;;  %v435_v61 = vrot.slane %v434_v53, 4  ;;  %v128_v1 = vunpack.c.h.bf16 %v90_v39  ;;  %v449_v5 = vrot.slane %v448_v3, 4  ;;  %v79_v39 = vld [vmem:[#allocation3 + $0x4c] sm:$0x1]  ;;  %v81_v44 = vld [vmem:[#allocation3 + $0x54] sm:$0x1] }
  0x6b   :  { %v7542_v4 = vcombine.low %v9273_v32, %v9317_v59  ;;  %v451_v23 = vshll.u32 %v7995_v56, 16  ;;  %vm160_vm10 = vcmp.ge.f32.partialorder %v124_v57, 0.0  ;;  %v439_v13 = vrot.slane %v437_v63, 5 }
  0x6c   :  { %vm162_vm11 = vcmp.ge.f32.partialorder %v126_v58, 0.0  ;;  %v196_v31 = vmul.f32 0.2, %v124_v57  ;;  %v198_v30 = vmul.f32 0.2, %v126_v58  ;;  %v130_v19 = vunpack.c.l.bf16 %v94_v0 }
  0x6d   :  { %8266 = vmatprep.mubr.msk.bf16.mxu1 %vm600_vm4, %v7542_v4  ;;  %v453_v42 = vrot.slane %v451_v23, 5  ;;  %vm164_vm12 = vcmp.ge.f32.partialorder %v128_v1, 0.0  ;;  %v200_v47 = vmul.f32 0.2, %v128_v1  ;;  %v9324_v8 = vsel %vm9218_vm1, %v435_v61, %v439_v13 }
  0x6e   :  { %v9326_v15 = vsel %vm160_vm10, %v124_v57, %v196_v31  ;;  %v9328_v16 = vsel %vm162_vm11, %v126_v58, %v198_v30  ;;  %v114_v48 = vunpack.c.l.bf16 %v78_v24  ;;  %vm166_vm13 = vcmp.ge.f32.partialorder %v130_v19, 0.0 }
  0x6f   :  { %v9332_v34 = vsel %vm9218_vm1, %v449_v5, %v453_v42  ;;  %v8006_v11 = vpack.c.bf16 %v9326_v15, %v9326_v15  ;;  %v8008_v12 = vpack.c.bf16 %v9328_v16, %v9328_v16  ;;  %v8026_v38 = vpack.c.bf16 %v9328_v16, %v9326_v15 }
  0x70   :  { %v7543_v45 = vcombine.low %v9324_v8, %v9332_v34  ;;  %v202_v49 = vmul.f32 0.2, %v130_v19  ;;  %v9342_v53 = vsel %vm164_vm12, %v128_v1, %v200_v47  ;;  %v115_v0 = vunpack.c.l.bf16 %v79_v39 }
  0x71   :  { %v526_v56 = vshrl.u32 %v8006_v11, 16  ;;  %v529_v3 = vshll.u32 %v8006_v11, 16  ;;  %v540_v57 = vshrl.u32 %v8008_v12, 16  ;;  %v543_v58 = vshll.u32 %v8008_v12, 16  ;;  %8310 = vmatprep.mubr.msk.bf16.mxu0 %vm600_vm4, %v8026_v38 }
  0x72   :  { %8267 = vmatmul.mubr.msk.bf16.gmra.mrb[4].mxu1 %vm600_vm4, %v7543_v45  ;;  %v9346_v61 = vsel %vm166_vm13, %v130_v19, %v202_v49  ;;  %v9350_v63 = vpack.c.bf16 %v9342_v53, %v9342_v53  ;;  %v117_v4 = vunpack.c.l.bf16 %v81_v44  ;;  %v486_v1 = vrot.slane %v484_v46, 4  ;;  %v83_v19 = vld [vmem:[#allocation3 + $0x5c] sm:$0x1] }
  0x73   :  { %v489_v5 = vrot.slane %v487_v29, 5  ;;  %v500_v23 = vrot.slane %v498_v35, 4  ;;  %v503_v24 = vrot.slane %v501_v25, 5  ;;  %v9356_v13 = vrot.slane %v512_v40, 4  ;;  %v85_v35 = vld [vmem:[#allocation3 + $0x64] sm:$0x1] }
  0x74   :  { %v9358_v31 = vrot.slane %v515_v41, 5  ;;  %v554_v30 = vshrl.u32 %v9350_v63, 16  ;;  %v8027_v42 = vpack.c.bf16 %v9346_v61, %v9342_v53  ;;  %v9363_v47 = vrot.slane %v526_v56, 4 }
  0x75   :  { %v9365_v11 = vrot.slane %v529_v3, 5  ;;  %vm150_vm14 = vcmp.ge.f32.partialorder %v114_v48, 0.0  ;;  %v186_v46 = vmul.f32 0.2, %v114_v48  ;;  %v9367_v28 = vrot.slane %v540_v57, 4 }
  0x76   :  { %v9369_v29 = vrot.slane %v543_v58, 5  ;;  %8311 = vmatmul.mubr.msk.bf16.gmra.mrb[12].mxu0 %vm600_vm4, %v8027_v42  ;;  %vm151_vm15 = vcmp.ge.f32.partialorder %v115_v0, 0.0  ;;  %vm153_vm0 = vcmp.ge.f32.partialorder %v117_v4, 0.0  ;;  %v187_v25 = vmul.f32 0.2, %v115_v0 }
  0x77   :  { %v189_v40 = vmul.f32 0.2, %v117_v4  ;;  %v9372_v41 = vsel %vm150_vm14, %v114_v48, %v186_v46  ;;  %v476_v12 = vor.u32 %v9302_v10, %v9300_v51  ;;  %8316 = vmatprep.mubr.msk.bf16.mxu0 %vm600_vm4, %v7595_v20  ;;  %v9380_v38 = vrot.slane %v554_v30, 4  ;;  %v87_v46 = vld [vmem:[#allocation3 + $0x6c] sm:$0x1] }
  0x78   :  { %v557_v39 = vshll.u32 %v9350_v63, 16  ;;  %v7996_v44 = vpack.c.bf16 %v9372_v41, %v9372_v41  ;;  %v119_v45 = vunpack.c.l.bf16 %v83_v19  ;;  %v223_v49 = vsel %vm151_vm15, %v115_v0, %v187_v25 }
  0x79   :  { %v225_v56 = vsel %vm153_vm0, %v117_v4, %v189_v40  ;;  %v477_v48 = vrot.slane %v476_v12, 4  ;;  %v121_v3 = vunpack.c.l.bf16 %v85_v35  ;;  %v7997_v57 = vpack.c.bf16 %v223_v49, %v223_v49  ;;  %v89_v4 = vld [vmem:[#allocation3 + $0x74] sm:$0x1] }
  0x7a   :  { %v7999_v58 = vpack.c.bf16 %v225_v56, %v225_v56  ;;  %v456_v51 = vshrl.u32 %v7996_v44, 16  ;;  %v459_v10 = vshll.u32 %v7996_v44, 16  ;;  %vm155_vm2 = vcmp.ge.f32.partialorder %v119_v45, 0.0 }
  0x7b   :  { %vm157_vm3 = vcmp.ge.f32.partialorder %v121_v3, 0.0  ;;  %v191_v14 = vmul.f32 0.2, %v119_v45  ;;  %v193_v9 = vmul.f32 0.2, %v121_v3  ;;  %v465_v42 = vshll.u32 %v7997_v57, 16 }
  0x7c   :  { %v458_v20 = vrot.slane %v456_v51, 4  ;;  %v461_v30 = vrot.slane %v459_v10, 5  ;;  %v479_v63 = vshll.u32 %v7999_v58, 16  ;;  %v490_v19 = vor.u32 %v489_v5, %v486_v1 }
  0x7d   :  { %v227_v27 = vsel %vm155_vm2, %v119_v45, %v191_v14  ;;  %v229_v26 = vsel %vm157_vm3, %v121_v3, %v193_v9  ;;  %v504_v0 = vor.u32 %v503_v24, %v500_v23  ;;  %v467_v35 = vrot.slane %v465_v42, 5  ;;  %v93_v3 = vld [vmem:[#allocation3 + $0x84] sm:$0x1] }
  0x7e   :  { %v462_v25 = vor.u32 %v461_v30, %v458_v20  ;;  %v481_v40 = vrot.slane %v479_v63, 5  ;;  %v8001_v12 = vpack.c.bf16 %v227_v27, %v227_v27  ;;  %8317 = vmatmul.mubr.msk.bf16.vlgmr.msra.gmra.mrb[0].mxu0 %vm600_vm4, %v7596_v7  ;;  %v8003_v44 = vpack.c.bf16 %v229_v26, %v229_v26 }
  0x7f   :  { %v491_v49 = vrot.slane %v490_v19, 4  ;;  %v505_v56 = vrot.slane %v504_v0, 4  ;;  %v123_v57 = vunpack.c.l.bf16 %v87_v46  ;;  %v125_v5 = vunpack.c.l.bf16 %v89_v4 }
  0x80   :  { %v463_v58 = vrot.slane %v462_v25, 4  ;;  %v9391_v45 = vsel %vm9218_vm1, %v477_v48, %v481_v40  ;;  %v493_v1 = vshll.u32 %v8001_v12, 16  ;;  %v507_v23 = vshll.u32 %v8003_v44, 16  ;;  %v77_v25 = vld [vmem:[#allocation3 + $0x44] sm:$0x1] }
  0x81   :  { %vm159_vm5 = vcmp.ge.f32.partialorder %v123_v57, 0.0  ;;  %v195_v24 = vmul.f32 0.2, %v123_v57  ;;  %v518_v27 = vor.u32 %v9358_v31, %v9356_v13  ;;  %vm161_vm6 = vcmp.ge.f32.partialorder %v125_v5, 0.0 }
  0x82   :  { %v468_v26 = vsel %vm9218_vm1, %v463_v58, %v467_v35  ;;  %v495_v32 = vrot.slane %v493_v1, 5  ;;  %v197_v7 = vmul.f32 0.2, %v125_v5  ;;  %v559_v51 = vrot.slane %v557_v39, 5 }
  0x83   :  { %v7544_v48 = vcombine.low %v468_v26, %v9391_v45  ;;  %v509_v10 = vrot.slane %v507_v23, 5  ;;  %v231_v14 = vsel %vm159_vm5, %v123_v57, %v195_v24  ;;  %v532_v13 = vor.u32 %v9365_v11, %v9363_v47 }
  0x84   :  { %v9400_v9 = vsel %vm9218_vm1, %v491_v49, %v495_v32  ;;  %v233_v20 = vsel %vm161_vm6, %v125_v5, %v197_v7  ;;  %v8005_v30 = vpack.c.bf16 %v231_v14, %v231_v14  ;;  %v127_v42 = vunpack.c.l.bf16 %v91_v37 }
  0x85   :  { %8270 = vmatprep.mubr.msk.bf16.mxu1 %vm600_vm4, %v7544_v48  ;;  %v9407_v31 = vsel %vm9218_vm1, %v505_v56, %v509_v10  ;;  %v8007_v39 = vpack.c.bf16 %v233_v20, %v233_v20  ;;  %v129_v63 = vunpack.c.l.bf16 %v93_v3  ;;  %v519_v19 = vrot.slane %v518_v27, 4 }
  0x86   :  { %v7545_v46 = vcombine.low %v9400_v9, %v9407_v31  ;;  %v521_v0 = vshll.u32 %v8005_v30, 16  ;;  %v533_v4 = vrot.slane %v532_v13, 4  ;;  %vm163_vm7 = vcmp.ge.f32.partialorder %v127_v42, 0.0 }
  0x87   :  { %v535_v35 = vshll.u32 %v8007_v39, 16  ;;  %vm165_vm8 = vcmp.ge.f32.partialorder %v129_v63, 0.0  ;;  %v199_v47 = vmul.f32 0.2, %v127_v42  ;;  %v201_v40 = vmul.f32 0.2, %v129_v63 }
  0x88   :  { %8271 = vmatmul.mubr.msk.bf16.gmra.mrb[8].mxu1 %vm600_vm4, %v7545_v46  ;;  %v523_v11 = vrot.slane %v521_v0, 5  ;;  %v546_v12 = vor.u32 %v9369_v29, %v9367_v28  ;;  %v560_v44 = vor.u32 %v559_v51, %v9380_v38  ;;  %v7597_v57 = vcombine.low %v9317_v59, %v9324_v8 }
  0x89   :  { %v537_v49 = vrot.slane %v535_v35, 5  ;;  %v235_v56 = vsel %vm163_vm7, %v127_v42, %v199_v47  ;;  %v113_v58 = vunpack.c.l.bf16 %v77_v25  ;;  %v8030_v1 = vpack.c.bf16 %v9346_v61, %v9346_v61  ;;  %v95_v61 = vld [vmem:[#allocation3 + $0x8c] sm:$0x1] }
  0x8a   :  { %v524_v5 = vsel %vm9218_vm1, %v519_v19, %v523_v11  ;;  %v237_v23 = vsel %vm165_vm8, %v129_v63, %v201_v40  ;;  %v8009_v24 = vpack.c.bf16 %v235_v56, %v235_v56  ;;  %8320 = vmatprep.mubr.msk.bf16.mxu0 %vm600_vm4, %v7597_v57  ;;  %v547_v37 = vrot.slane %v546_v12, 4 }
  0x8b   :  { %v538_v27 = vsel %vm9218_vm1, %v533_v4, %v537_v49  ;;  %v8011_v28 = vpack.c.bf16 %v237_v23, %v237_v23  ;;  %vm149_vm9 = vcmp.ge.f32.partialorder %v113_v58, 0.0  ;;  %v185_v29 = vmul.f32 0.2, %v113_v58  ;;  %v1286_v49 = vld [vmem:[#allocation2 + $0xc] sm:$0x1] }
  0x8c   :  { %v7546_v38 = vcombine.low %v524_v5, %v538_v27  ;;  %v549_v59 = vshll.u32 %v8009_v24, 16  ;;  %v1028_v8 = vor.u32 %v9283_v6, %v9254_v50  ;;  %v561_v26 = vrot.slane %v560_v44, 4  ;;  %v1295_v23 = vld [vmem:[#allocation2 + $0x24] sm:$0x1]  ;;  %v1239_v24 = vld [vmem:[#allocation2 + $0x10] sm:$0x1] }
  0x8d   :  { %v563_v32 = vshll.u32 %v8011_v28, 16  ;;  %v221_v7 = vsel %vm149_vm9, %v113_v58, %v185_v29  ;;  %v1036_v48 = vshrl.u32 %v8030_v1, 16  ;;  %v1039_v10 = vshll.u32 %v8030_v1, 16  ;;  %v1245_v1 = vld [vmem:[#allocation2 + $0x20] sm:$0x1] }
  0x8e   :  { %8274 = vmatprep.mubr.msk.bf16.mxu1 %vm600_vm4, %v7546_v38  ;;  %v551_v3 = vrot.slane %v549_v59, 5  ;;  %v8029_v51 = vpack.c.bf16 %v221_v7, %v221_v7  ;;  %v131_v20 = vunpack.c.l.bf16 %v95_v61  ;;  %v1029_v13 = vrot.slane %v1028_v8, 4  ;;  %v1289_v29 = vld [vmem:[#allocation2 + $0x14] sm:$0x1]  ;;  %v1254_v59 = vld [vmem:[#allocation2 + $0x38] sm:$0x1] }
  0x8f   :  { %v565_v14 = vrot.slane %v563_v32, 5  ;;  %v8017_v50 = vpack.c.bf16 %v9279_v2, %v9260_v55  ;;  %v1038_v19 = vrot.slane %v1036_v48, 4  ;;  %v1041_v4 = vrot.slane %v1039_v10, 5  ;;  %v1304_v8 = vld [vmem:[#allocation2 + $0x3c] sm:$0x1] }
  0x90   :  { %v552_v30 = vsel %vm9218_vm1, %v547_v37, %v551_v3  ;;  %v1031_v39 = vshll.u32 %v8029_v51, 16  ;;  %vm167_vm10 = vcmp.ge.f32.partialorder %v131_v20, 0.0  ;;  %v203_v42 = vmul.f32 0.2, %v131_v20  ;;  %v1248_v32 = vld [vmem:[#allocation2 + $0x28] sm:$0x1] }
  0x91   :  { %v566_v6 = vsel %vm9218_vm1, %v561_v26, %v565_v14  ;;  %v7599_v35 = vcombine.low %v9391_v45, %v9400_v9  ;;  %v11294_v2 = vpack.c.bf16 %v9126_v17, %v9133_v21  ;;  %v1042_v11 = vor.u32 %v1041_v4, %v1038_v19  ;;  %v1298_v7 = vld [vmem:[#allocation2 + $0x2c] sm:$0x1]  ;;  %v1257_v48 = vld [vmem:[#allocation2 + $0x40] sm:$0x1]  ;;  %v1307_v10 = vld [vmem:[#allocation2 + $0x44] sm:$0x1] }
  0x92   :  { %v7547_v63 = vcombine.low %v552_v30, %v566_v6  ;;  %v1033_v46 = vrot.slane %v1031_v39, 5  ;;  %v239_v0 = vsel %vm167_vm10, %v131_v20, %v203_v42  ;;  %v8014_v12 = vpack.c.bf16 %v9166_v43, %v9153_v33  ;;  %v1266_v42 = vld [vmem:[#allocation2 + $0x68] sm:$0x1]  ;;  %v1310_v4 = vld [vmem:[#allocation2 + $0x5c] sm:$0x1] }
  0x93   :  { %v8031_v47 = vpack.c.bf16 %v239_v0, %v239_v0  ;;  %v7600_v44 = vcombine.low %v9407_v31, %v524_v5  ;;  %v11295_v45 = vpack.c.bf16 %v9136_v22, %v9128_v18  ;;  %v1043_v17 = vrot.slane %v1042_v11, 4  ;;  %v1236_v31 = vld [vmem:[#allocation2 + $0x8] sm:$0x1]  ;;  %v1260_v0 = vld [vmem:[#allocation2 + $0x58] sm:$0x1] }
  0x94   :  { %8275 = vmatmul.mubr.msk.bf16.gmra.mrb[12].mxu1 %vm600_vm4, %v7547_v63  ;;  %v1034_v25 = vsel %vm9218_vm1, %v1029_v13, %v1033_v46  ;;  %v8015_v9 = vpack.c.bf16 %v9187_v62, %v9181_v52  ;;  %v8016_v18 = vpack.c.bf16 %v9258_v54, %v9372_v41  ;;  %v8018_v43 = vpack.c.bf16 %v9326_v15, %v9281_v36  ;;  %v3349_v62 = vld [vmem:[#allocation8 + $0x14] sm:$0xf]  ;;  %v1242_v15 = vld [vmem:[#allocation2 + $0x18] sm:$0x1]  ;;  %v1292_v41 = vld [vmem:[#allocation2 + $0x1c] sm:$0x1] }
  0x95   :  { %v7598_v55 = vcombine.low %v9332_v34, %v1034_v25  ;;  %8280 = vmatprep.mubr.msk.bf16.mxu1 %vm600_vm4, %v11294_v2  ;;  %v1045_v40 = vshll.u32 %v8031_v47, 16  ;;  %v7601_v34 = vcombine.low %v538_v27, %v552_v30  ;;  %v8019_v52 = vpack.c.bf16 %v9342_v53, %v9328_v16  ;;  %v1251_v30 = vld [vmem:[#allocation2 + $0x30] sm:$0x1]  ;;  %v1301_v13 = vld [vmem:[#allocation2 + $0x34] sm:$0x1] }
  0x96   :  { %vm1964_vm11 = vcmask 1043456   ;;  %vm1223_vm12 = vcmask 57344   ;;  %vm1234_vm13 = vsmask.f32 256  ;;  %vm1284_vm14 = vsmask.f32 7938 }
  0x97   :  { %8321 = vmatmul.mubr.msk.bf16.gmra.mrb[4].mxu0 %vm600_vm4, %v7598_v55  ;;  %v1047_v21 = vrot.slane %v1045_v40, 5  ;;  %8864 = vmatprep.subr.msk.bf16.mxu0 %vm1964_vm11, %v3349_v62  ;;  %v3399_v54 = vsel %vm1964_vm11, %v3349_v62, 0  ;;  %vm9474_vm15 = vmand %vm1223_vm12, %vm1234_vm13  ;;  %vm1221_vm0 = vcmask 60416   ;;  %v1316_v63 = vld [vmem:[#allocation2 + $0x6c] sm:$0x1]  ;;  %vm3281_vm3 = vcmask 1042432  }
  0x98   :  { %8324 = vmatprep.mubr.msk.bf16.mxu0 %vm600_vm4, %v7599_v35  ;;  %8405 = vmatpush3.bf16.msra.mxu0 %v3399_v54  ;;  %v1243_v16 = vsel %vm9474_vm15, 0, %v1242_v15  ;;  %v1237_v57 = vsel %vm9474_vm15, 0, %v1236_v31  ;;  %v1246_v5 = vsel %vm9474_vm15, 0, %v1245_v1  ;;  %v1240_v28 = vsel %vm9474_vm15, 0, %v1239_v24  ;;  %vm9502_vm2 = vmand %vm1221_vm0, %vm1284_vm14  ;;  %v1269_v47 = vld [vmem:[#allocation2 + $0x70] sm:$0x1] }
  0x99   :  { %v1048_v33 = vsel %vm9218_vm1, %v1043_v17, %v1047_v21  ;;  %1244 = vst [vmem:[#allocation2 + $0x18] sm:$0x1] %v1243_v16  ;;  %1238 = vst [vmem:[#allocation2 + $0x8] sm:$0x1] %v1237_v57  ;;  %v1255_v61 = vsel %vm9474_vm15, 0, %v1254_v59  ;;  %v1249_v3 = vsel %vm9474_vm15, 0, %v1248_v32 }
  0x9a   :  { %v7602_v22 = vcombine.low %v566_v6, %v1048_v33  ;;  %1247 = vst [vmem:[#allocation2 + $0x20] sm:$0x1] %v1246_v5  ;;  %1241 = vst [vmem:[#allocation2 + $0x10] sm:$0x1] %v1240_v28  ;;  %v1258_v14 = vsel %vm9474_vm15, 0, %v1257_v48  ;;  %v1252_v39 = vsel %vm9474_vm15, 0, %v1251_v30 }
  0x9b   :  { %1256 = vst [vmem:[#allocation2 + $0x38] sm:$0x1] %v1255_v61  ;;  %1250 = vst [vmem:[#allocation2 + $0x28] sm:$0x1] %v1249_v3  ;;  %v9046_v6 = vmov 0   ;;  %v1267_v46 = vsel %vm9474_vm15, 0, %v1266_v42 }
  0x9c   :  { %8281 = vmatmul.mubr.msk.bf16.vlgmr.msra.gmra.mrb[0].mxu1 %vm600_vm4, %v11295_v45  ;;  %1259 = vst [vmem:[#allocation2 + $0x40] sm:$0x1] %v1258_v14  ;;  %1253 = vst [vmem:[#allocation2 + $0x30] sm:$0x1] %v1252_v39  ;;  %v1261_v25 = vsel %vm9474_vm15, 0, %v1260_v0  ;;  %v1270_v2 = vsel %vm9474_vm15, 0, %v1269_v47 }
  0x9d   :  { %8284 = vmatprep.mubr.msk.bf16.mxu1 %vm600_vm4, %v8014_v12  ;;  %1222 = vst.msk [vmem:[#allocation2] sm:$0xf] %vm1221_vm0, %v9046_v6  ;;  %1225 = vst.msk [vmem:[#allocation2 + $0x50] sm:$0xf] %vm1221_vm0, %v9046_v6  ;;  %v1319_v55 = vld [vmem:[#allocation2 + $0x74] sm:$0x1] }
  0x9e   :  { %1224 = vst.msk [vmem:[#allocation2 + $0x4] sm:$0x1] %vm1223_vm12, %v9046_v6  ;;  %1226 = vst.msk [vmem:[#allocation2 + $0x54] sm:$0x1] %vm1223_vm12, %v9046_v6  ;;  %v1263_v40 = vld [vmem:[#allocation2 + $0x60] sm:$0x1] }
  0x9f   :  { %8325 = vmatmul.mubr.msk.bf16.gmra.mrb[8].mxu0 %vm600_vm4, %v7600_v44  ;;  %1228 = vst.msk [vmem:[#allocation2 + $0x48] sm:$0xf] %vm1221_vm0, %v9046_v6  ;;  %1230 = vst.msk [vmem:[#allocation2 + $0x98] sm:$0xf] %vm1221_vm0, %v9046_v6  ;;  %v1313_v12 = vld [vmem:[#allocation2 + $0x64] sm:$0x1] }
  0xa0   :  { %8328 = vmatprep.mubr.msk.bf16.mxu0 %vm600_vm4, %v7601_v34  ;;  %1229 = vst.msk [vmem:[#allocation2 + $0x4c] sm:$0x1] %vm1223_vm12, %v9046_v6  ;;  %1231 = vst.msk [vmem:[#allocation2 + $0x9c] sm:$0x1] %vm1223_vm12, %v9046_v6  ;;  %v1264_v44 = vsel %vm9474_vm15, 0, %v1263_v40  ;;  %vm3282_vm5 = vcmask 1046532  }
  0xa1   :  { %1268 = vst [vmem:[#allocation2 + $0x68] sm:$0x1] %v1267_v46  ;;  %1262 = vst [vmem:[#allocation2 + $0x58] sm:$0x1] %v1261_v25  ;;  %v1278_v34 = vld [vmem:[#allocation2 + $0x88] sm:$0x1] }
  0xa2   :  { %1271 = vst [vmem:[#allocation2 + $0x70] sm:$0x1] %v1270_v2  ;;  %1265 = vst [vmem:[#allocation2 + $0x60] sm:$0x1] %v1264_v44  ;;  %v1328_v17 = vld [vmem:[#allocation2 + $0x8c] sm:$0x1] }
  0xa3   :  { %v1279_v21 = vsel %vm9474_vm15, 0, %v1278_v34  ;;  %v1272_v33 = vld [vmem:[#allocation2 + $0x78] sm:$0x1]  ;;  %v1331_v62 = vld [vmem:[#allocation2 + $0x94] sm:$0x1]  ;;  %vm9585_vm6 = vmor %vm3281_vm3, %vm3282_vm5  ;;  %vm1939_vm7 = vcmask 64512  }
  0xa4   :  { %8285 = vmatmul.mubr.msk.bf16.gmra.mrb[4].mxu1 %vm600_vm4, %v8015_v9  ;;  %1280 = vst [vmem:[#allocation2 + $0x88] sm:$0x1] %v1279_v21  ;;  %v1325_v16 = vld [vmem:[#allocation2 + $0x84] sm:$0x1]  ;;  %v1914_v57 = vld [vmem:[#allocation8 + $0x4] sm:$0xf] }
  0xa5   :  { %8288 = vmatprep.mubr.msk.bf16.mxu1 %vm600_vm4, %v8016_v18  ;;  %v1273_v18 = vsel %vm9474_vm15, 0, %v1272_v33  ;;  %8860 = vmatprep.subr.msk.bf16.mxu1 %vm1964_vm11, %v1914_v57  ;;  %v9572_v53 = vld [vmem:[#allocation8] sm:$0xf]  ;;  %v2975_v28 = vld [vmem:[#allocation2] sm:$0xf]  ;;  %vm2882_vm8 = vcmask 31744  }
  0xa6   :  { %1274 = vst [vmem:[#allocation2 + $0x78] sm:$0x1] %v1273_v18  ;;  %v3011_v61 = vshll.u32 %v2975_v28, 16  ;;  %v1673_v30 = vld [vmem:[#allocation2 + $0x4] sm:$0x1]  ;;  %vm4458_vm9 = vcmask 60448  }
  0xa7   :  { %8329 = vmatmul.mubr.msk.bf16.gmra.mrb[12].mxu0 %vm600_vm4, %v7602_v22  ;;  %v1322_v22 = vld [vmem:[#allocation2 + $0x7c] sm:$0x1]  ;;  %v3233_v39 = vld [vmem:[#allocation2] sm:$0xe]  ;;  %v1699_v25 = vshll.u32 %v1673_v30, 16  ;;  %vm7473_vm10 = vcmask 24576  }
  0xa8   :  { %v3241_v44 = vld [vmem:[#allocation2 + $0x50] sm:$0xe] }
  0xac   :  { %8289 = vmatmul.mubr.msk.bf16.gmra.mrb[8].mxu1 %vm600_vm4, %v8017_v50 }
  0xad   :  { %8292 = vmatprep.mubr.msk.bf16.mxu1 %vm600_vm4, %v8018_v43 }
  0xb4   :  { %8293 = vmatmul.mubr.msk.bf16.gmra.mrb[12].mxu1 %vm600_vm4, %v8019_v52  ;;  %vm9482_vm4 = vmand %vm1223_vm12, %vm1284_vm14  ;;  %v1281_v52 = vld [vmem:[#allocation2 + $0x90] sm:$0x1] }
  0xb5   :  { %v1293_v56 = vsel %vm9482_vm4, 0, %v1292_v41  ;;  %v1287_v58 = vsel %vm9482_vm4, 0, %v1286_v49  ;;  %v1296_v27 = vsel %vm9482_vm4, 0, %v1295_v23  ;;  %v1290_v38 = vsel %vm9482_vm4, 0, %v1289_v29  ;;  %v1275_v41 = vld [vmem:[#allocation2 + $0x80] sm:$0x1] }
  0xb6   :  { %1294 = vst [vmem:[#allocation2 + $0x1c] sm:$0x1] %v1293_v56  ;;  %1288 = vst [vmem:[#allocation2 + $0xc] sm:$0x1] %v1287_v58  ;;  %v1305_v26 = vsel %vm9482_vm4, 0, %v1304_v8  ;;  %v1299_v51 = vsel %vm9482_vm4, 0, %v1298_v7 }
  0xb7   :  { %1297 = vst [vmem:[#allocation2 + $0x24] sm:$0x1] %v1296_v27  ;;  %1291 = vst [vmem:[#allocation2 + $0x14] sm:$0x1] %v1290_v38  ;;  %v1308_v20 = vsel %vm9482_vm4, 0, %v1307_v10  ;;  %v1302_v50 = vsel %vm9482_vm4, 0, %v1301_v13 }
  0xb8   :  { %1306 = vst [vmem:[#allocation2 + $0x3c] sm:$0x1] %v1305_v26  ;;  %1300 = vst [vmem:[#allocation2 + $0x2c] sm:$0x1] %v1299_v51  ;;  %v1317_v19 = vsel %vm9482_vm4, 0, %v1316_v63  ;;  %v1311_v35 = vsel %vm9482_vm4, 0, %v1310_v4 }
  0xb9   :  { %1309 = vst [vmem:[#allocation2 + $0x44] sm:$0x1] %v1308_v20  ;;  %1303 = vst [vmem:[#allocation2 + $0x34] sm:$0x1] %v1302_v50  ;;  %v1320_v11 = vsel %vm9482_vm4, 0, %v1319_v55  ;;  %v1314_v45 = vsel %vm9482_vm4, 0, %v1313_v12 }
  0xba   :  { %1318 = vst [vmem:[#allocation2 + $0x6c] sm:$0x1] %v1317_v19  ;;  %1312 = vst [vmem:[#allocation2 + $0x5c] sm:$0x1] %v1311_v35  ;;  %v1329_v9 = vsel %vm9482_vm4, 0, %v1328_v17  ;;  %v1323_v43 = vsel %vm9482_vm4, 0, %v1322_v22 }
  0xbb   :  { %1321 = vst [vmem:[#allocation2 + $0x74] sm:$0x1] %v1320_v11  ;;  %1315 = vst [vmem:[#allocation2 + $0x64] sm:$0x1] %v1314_v45  ;;  %v1282_v54 = vsel %vm9474_vm15, 0, %v1281_v52  ;;  %v1332_v15 = vsel %vm9482_vm4, 0, %v1331_v62 }
  0xbc   :  { %1330 = vst [vmem:[#allocation2 + $0x8c] sm:$0x1] %v1329_v9  ;;  %1324 = vst [vmem:[#allocation2 + $0x7c] sm:$0x1] %v1323_v43  ;;  %v1276_v31 = vsel %vm9474_vm15, 0, %v1275_v41  ;;  %v1326_v49 = vsel %vm9482_vm4, 0, %v1325_v16 }
  0xbd   :  { %1283 = vst [vmem:[#allocation2 + $0x90] sm:$0x1] %v1282_v54  ;;  %1333 = vst [vmem:[#allocation2 + $0x94] sm:$0x1] %v1332_v15  ;;  %v9562_v56 = vld [vmem:[#allocation8 + $0x10] sm:$0xf] }
  0xbe   :  { %1277 = vst [vmem:[#allocation2 + $0x80] sm:$0x1] %v1276_v31  ;;  %1327 = vst [vmem:[#allocation2 + $0x84] sm:$0x1] %v1326_v49  ;;  %8865 = vmatprep.subr.msk.bf16.mxu0 %vm1964_vm11, %v9562_v56  ;;  %v1966_v58 = vsel %vm1964_vm11, %v1914_v57, 0  ;;  %v3008_v8 = vshrl.u32 %v2975_v28, 16 }
  0xbf   :  { %8333 = vmatpush3.bf16.msra.mxu1 %v1966_v58  ;;  %v1656_v27 = vld [vmem:[#allocation2] sm:$0xf]  ;;  %v1664_v29 = vld [vmem:[#allocation2 + $0x50] sm:$0xf]  ;;  %v3013_v20 = vrot.slane %v3011_v61, 5  ;;  %v7692_v55 = vrot.slane %v3233_v39, 9 }
  0xc0   :  { %8861 = vmatprep.subr.msk.bf16.mxu1 %vm1964_vm11, %v9572_v53  ;;  %v1690_v38 = vshrl.u32 %v1656_v27, 16  ;;  %v1693_v59 = vshll.u32 %v1656_v27, 16  ;;  %v2991_v26 = vld [vmem:[#allocation2 + $0x50] sm:$0xf]  ;;  %v1802_v32 = vshrl.u32 %v1664_v29, 16  ;;  %v1805_v7 = vshll.u32 %v1664_v29, 16 }
  0xc1   :  { %v3120_v3 = vshrl.u32 %v2991_v26, 16  ;;  %v3123_v51 = vshll.u32 %v2991_v26, 16  ;;  %v3010_v14 = vrot.slane %v3008_v8, 4  ;;  %v2976_v13 = vld [vmem:[#allocation2 + $0x4] sm:$0x1]  ;;  %v9591_v22 = vrot.slane %v1699_v25, 5 }
  0xc2   :  { %v1692_v48 = vrot.slane %v1690_v38, 4  ;;  %v1695_v10 = vrot.slane %v1693_v59, 5  ;;  %v1804_v50 = vrot.slane %v1802_v32, 4  ;;  %v1807_v6 = vrot.slane %v1805_v7, 5  ;;  %v1681_v63 = vld [vmem:[#allocation2 + $0x54] sm:$0x1] }
  0xc3   :  { %v3122_v46 = vrot.slane %v3120_v3, 4  ;;  %v3125_v19 = vrot.slane %v3123_v51, 5  ;;  %v3014_v35 = vor.u32 %v3013_v20, %v3010_v14  ;;  %v3286_v2 = vrot.slane %v2976_v13, 5  ;;  %v2992_v12 = vld [vmem:[#allocation2 + $0x54] sm:$0x1] }
  0xc4   :  { %v1696_v4 = vor.u32 %v1695_v10, %v1692_v48  ;;  %v3017_v11 = vshll.u32 %v2976_v13, 16  ;;  %v1808_v45 = vor.u32 %v1807_v6, %v1804_v50  ;;  %v1811_v34 = vshll.u32 %v1681_v63, 16  ;;  %v9605_v27 = vld [vmem:[#allocation8 + $0x18] sm:$0xf] }
  0xc5   :  { %v3126_v21 = vor.u32 %v3125_v19, %v3122_v46  ;;  %v3129_v9 = vshll.u32 %v2992_v12, 16  ;;  %v9593_v43 = vrot.slane %v3014_v35, 4  ;;  %v7700_v54 = vrot.slane %v3241_v44, 9  ;;  %v1572_v46 = vld [vmem:[#allocation2 + $0x18] sm:$0xf] }
  0xc6   :  { %v9589_v18 = vrot.slane %v1696_v4, 4  ;;  %v3318_v15 = vrot.slane %v2992_v12, 5  ;;  %v9595_v41 = vrot.slane %v3017_v11, 5  ;;  %v9599_v49 = vsel %vm9585_vm6, %v7692_v55, %v3286_v2  ;;  %v1575_v19 = vld [vmem:[#allocation2 + $0x1c] sm:$0x1] }
  0xc7   :  { %v9601_v57 = vrot.slane %v1808_v45, 4  ;;  %v9603_v58 = vrot.slane %v1811_v34, 5  ;;  %v9610_v59 = vrot.slane %v3126_v21, 4  ;;  %v9619_v32 = vsel %vm1964_vm11, %v9562_v56, 0  ;;  %v1560_v11 = vld [vmem:[#allocation2 + $0x8] sm:$0xf] }
  0xc8   :  { %v9629_v48 = vsel %vm9585_vm6, %v7700_v54, %v3318_v15  ;;  %v9643_v30 = vsel %vm1964_vm11, %v9605_v27, 0  ;;  %v9647_v50 = vsel %vm1964_vm11, %v9572_v53, 0  ;;  %v1563_v12 = vld [vmem:[#allocation2 + $0xc] sm:$0x1] }
  0xc9   :  { %v1814_v20 = vsel %vm9218_vm1, %v9601_v57, %v9603_v58 }
 0x151   :  { %v8318_v1 = vpop.f32.mrb[0].mxu0 }
 0x152   :  { %v1126_v5 = vpop.f32.mrb[1].mxu0 }
 0x153   :  { %v9568_v23 = vpop.f32.mrb[2].mxu0 }
 0x154   :  { %v9570_v24 = vpop.f32.mrb[3].mxu0 }
 0x16a   :  { %v9576_v42 = vpop.f32.mrb[4].mxu0 }
 0x16b   :  { %v9578_v0 = vpop.f32.mrb[5].mxu0 }
 0x16c   :  { %v9580_v47 = vpop.f32.mrb[6].mxu0 }
 0x16d   :  { %v9582_v40 = vpop.f32.mrb[7].mxu0 }
 0x16f   :  { %v8282_v33 = vpop.f32.mrb[0].mxu1 }
 0x170   :  { %v8620_v52 = vadd.f32 %v8318_v1, %v8282_v33  ;;  %v794_v62 = vpop.f32.mrb[1].mxu1 }
 0x171   :  { %v8621_v16 = vadd.f32 %v1126_v5, %v794_v62  ;;  %v8283_v31 = vpop.f32.mrb[2].mxu1  ;;  %v9612_v5 = vrot.slane %v3129_v9, 5  ;;  %v1578_v9 = vld [vmem:[#allocation2 + $0x20] sm:$0xf] }
 0x172   :  { %v1207_v28 = vmax.f32 %v8620_v52, 0.0  ;;  %v8622_v1 = vadd.f32 %v9568_v23, %v8283_v31  ;;  %v797_v29 = vpop.f32.mrb[3].mxu1  ;;  %v9608_v38 = vpop.f32.mrb[8].mxu0  ;;  %v1702_v23 = vsel %vm9218_vm1, %v9589_v18, %v9591_v22 }
 0x173   :  { %v1205_v8 = vmax.f32 %v8621_v16, 0.0  ;;  %v8623_v61 = vadd.f32 %v9570_v24, %v797_v29  ;;  %v9615_v26 = vpop.f32.mrb[9].mxu0  ;;  %v3020_v24 = vsel %vm9218_vm1, %v9593_v43, %v9595_v41 }
 0x174   :  { %v8034_v7 = vpack.c.bf16 %v1207_v28, %v1207_v28  ;;  %v1208_v3 = vmax.f32 %v8622_v1, 0.0  ;;  %v9625_v51 = vpop.f32.mrb[10].mxu0 }
 0x175   :  { %v8032_v56 = vpack.c.bf16 %v1205_v8, %v1205_v8  ;;  %v1206_v10 = vmax.f32 %v8623_v61, 0.0  ;;  %v9635_v14 = vpop.f32.mrb[11].mxu0 }
 0x176   :  { %v1415_v13 = vshrl.u32 %v8034_v7, 16  ;;  %v8035_v39 = vpack.c.bf16 %v1208_v3, %v1208_v3  ;;  %v1418_v63 = vshll.u32 %v8034_v7, 16  ;;  %v1581_v7 = vld [vmem:[#allocation2 + $0x24] sm:$0x1] }
 0x177   :  { %v1399_v4 = vshrl.u32 %v8032_v56, 16  ;;  %v1402_v25 = vshll.u32 %v8032_v56, 16  ;;  %v8033_v35 = vpack.c.bf16 %v1206_v10, %v1206_v10  ;;  %v8286_v55 = vpop.f32.mrb[4].mxu1 }
 0x178   :  { %v1417_v2 = vrot.slane %v1415_v13, 7  ;;  %v1423_v44 = vshrl.u32 %v8035_v39, 16  ;;  %v1426_v45 = vshll.u32 %v8035_v39, 16  ;;  %v8624_v53 = vadd.f32 %v9576_v42, %v8286_v55  ;;  %v810_v34 = vpop.f32.mrb[5].mxu1 }
 0x179   :  { %v1401_v21 = vrot.slane %v1399_v4, 7  ;;  %v1407_v33 = vshrl.u32 %v8033_v35, 16  ;;  %v1410_v52 = vshll.u32 %v8033_v35, 16  ;;  %v8625_v62 = vadd.f32 %v9578_v0, %v810_v34  ;;  %v8287_v54 = vpop.f32.mrb[6].mxu1  ;;  %v1569_v4 = vld [vmem:[#allocation2 + $0x14] sm:$0x1] }
 0x17a   :  { %v1420_v15 = vor.u32 %v1418_v63, %v1417_v2  ;;  %v1421_v16 = vrot.slane %v1417_v2, 4  ;;  %v1425_v31 = vrot.slane %v1423_v44, 7  ;;  %v1211_v28 = vmax.f32 %v8624_v53, 0.0  ;;  %v813_v1 = vpop.f32.mrb[7].mxu1  ;;  %v9655_v29 = vpop.f32.mrb[12].mxu0 }
 0x17b   :  { %v1404_v8 = vor.u32 %v1402_v25, %v1401_v21  ;;  %v1405_v61 = vrot.slane %v1401_v21, 4  ;;  %v1409_v3 = vrot.slane %v1407_v33, 7  ;;  %v1209_v42 = vmax.f32 %v8625_v62, 0.0  ;;  %v9657_v56 = vpop.f32.mrb[13].mxu0  ;;  %v1566_v63 = vld [vmem:[#allocation2 + $0x10] sm:$0xf] }
 0x17c   :  { %v1573_v10 = vsel %vm9502_vm2, %v1420_v15, %v1572_v46  ;;  %v1576_v0 = vsel %vm9474_vm15, %v1421_v16, %v1575_v19  ;;  %v1428_v13 = vor.u32 %v1426_v45, %v1425_v31  ;;  %v1429_v39 = vrot.slane %v1425_v31, 4  ;;  %v9663_v35 = vpop.f32.mrb[14].mxu0  ;;  %v4181_v62 = vld [vmem:[#allocation8 + $0x1c] sm:$0xf] }
 0x17d   :  { %1574 = vst [vmem:[#allocation2 + $0x18] sm:$0xf] %v1573_v10  ;;  %1577 = vst [vmem:[#allocation2 + $0x1c] sm:$0x1] %v1576_v0  ;;  %v1561_v25 = vsel %vm9502_vm2, %v1404_v8, %v1560_v11  ;;  %v1564_v55 = vsel %vm9474_vm15, %v1405_v61, %v1563_v12  ;;  %v1412_v2 = vor.u32 %v1410_v52, %v1409_v3  ;;  %v1413_v44 = vrot.slane %v1409_v3, 4  ;;  %v9669_v46 = vpop.f32.mrb[15].mxu0 }
 0x17e   :  { %1562 = vst [vmem:[#allocation2 + $0x8] sm:$0xf] %v1561_v25  ;;  %1565 = vst [vmem:[#allocation2 + $0xc] sm:$0x1] %v1564_v55  ;;  %v1579_v19 = vsel %vm9502_vm2, %v1428_v13, %v1578_v9  ;;  %v1582_v45 = vsel %vm9474_vm15, %v1429_v39, %v1581_v7  ;;  %v8038_v53 = vpack.c.bf16 %v1211_v28, %v1211_v28  ;;  %v1596_v8 = vld [vmem:[#allocation2 + $0x38] sm:$0xf] }
 0x17f   :  { %v8036_v34 = vpack.c.bf16 %v1209_v42, %v1209_v42  ;;  %1580 = vst [vmem:[#allocation2 + $0x20] sm:$0xf] %v1579_v19  ;;  %1583 = vst [vmem:[#allocation2 + $0x24] sm:$0x1] %v1582_v45  ;;  %v1567_v11 = vsel %vm9502_vm2, %v1412_v2, %v1566_v63  ;;  %v1570_v12 = vsel %vm9474_vm15, %v1413_v44, %v1569_v4  ;;  %v8290_v52 = vpop.f32.mrb[8].mxu1  ;;  %v9687_v13 = vsel %vm1964_vm11, %v4181_v62, 0 }
 0x180   :  { %v8626_v21 = vadd.f32 %v9580_v47, %v8287_v54  ;;  %v8627_v33 = vadd.f32 %v9582_v40, %v813_v1  ;;  %1568 = vst [vmem:[#allocation2 + $0x10] sm:$0xf] %v1567_v11  ;;  %1571 = vst [vmem:[#allocation2 + $0x14] sm:$0x1] %v1570_v12  ;;  %v1447_v9 = vshrl.u32 %v8038_v53, 16  ;;  %v1450_v15 = vshll.u32 %v8038_v53, 16 }
 0x181   :  { %v1431_v16 = vshrl.u32 %v8036_v34, 16  ;;  %v1434_v31 = vshll.u32 %v8036_v34, 16  ;;  %v826_v28 = vpop.f32.mrb[9].mxu1  ;;  %v8628_v3 = vadd.f32 %v9608_v38, %v8290_v52  ;;  %v1599_v54 = vld [vmem:[#allocation2 + $0x3c] sm:$0x1] }
 0x182   :  { %v1212_v61 = vmax.f32 %v8626_v21, 0.0  ;;  %v1210_v7 = vmax.f32 %v8627_v33, 0.0  ;;  %v8629_v42 = vadd.f32 %v9615_v26, %v826_v28  ;;  %v8291_v10 = vpop.f32.mrb[10].mxu1  ;;  %v1449_v47 = vrot.slane %v1447_v9, 7  ;;  %v1584_v39 = vld [vmem:[#allocation2 + $0x28] sm:$0xf] }
 0x183   :  { %v1433_v40 = vrot.slane %v1431_v16, 7  ;;  %v9684_v1 = vadd.f32 %v9625_v51, %v8291_v10  ;;  %v829_v0 = vpop.f32.mrb[11].mxu1  ;;  %v1587_v63 = vld [vmem:[#allocation2 + $0x2c] sm:$0x1]  ;;  %v1215_v55 = vmax.f32 %v8628_v3, 0.0 }
 0x184   :  { %v8039_v4 = vpack.c.bf16 %v1212_v61, %v1212_v61  ;;  %v8037_v25 = vpack.c.bf16 %v1210_v7, %v1210_v7  ;;  %v1213_v2 = vmax.f32 %v8629_v42, 0.0  ;;  %v1452_v38 = vor.u32 %v1450_v15, %v1449_v47  ;;  %v1602_v52 = vld [vmem:[#allocation2 + $0x40] sm:$0xf]  ;;  %v1605_v62 = vld [vmem:[#allocation2 + $0x44] sm:$0x1] }
 0x185   :  { %v1453_v44 = vrot.slane %v1449_v47, 4  ;;  %v1436_v26 = vor.u32 %v1434_v31, %v1433_v40  ;;  %v1437_v19 = vrot.slane %v1433_v40, 4  ;;  %v9697_v9 = vld [vmem:[#allocation2 + $0x8] sm:$0xe]  ;;  %v1590_v31 = vld [vmem:[#allocation2 + $0x30] sm:$0xf]  ;;  %v8042_v28 = vpack.c.bf16 %v1215_v55, %v1215_v55 }
 0x186   :  { %v1455_v45 = vshrl.u32 %v8039_v4, 16  ;;  %v1458_v53 = vshll.u32 %v8039_v4, 16  ;;  %v1439_v34 = vshrl.u32 %v8037_v25, 16  ;;  %v1442_v11 = vshll.u32 %v8037_v25, 16  ;;  %v1593_v7 = vld [vmem:[#allocation2 + $0x34] sm:$0x1] }
 0x187   :  { %v1597_v51 = vsel %vm9502_vm2, %v1452_v38, %v1596_v8  ;;  %v1600_v12 = vsel %vm9474_vm15, %v1453_v44, %v1599_v54  ;;  %v1585_v21 = vsel %vm9502_vm2, %v1436_v26, %v1584_v39  ;;  %v1588_v33 = vsel %vm9474_vm15, %v1437_v19, %v1587_v63  ;;  %v8294_v61 = vpop.f32.mrb[12].mxu1  ;;  %v1620_v19 = vld [vmem:[#allocation2 + $0x68] sm:$0xf] }
 0x188   :  { %1598 = vst [vmem:[#allocation2 + $0x38] sm:$0xf] %v1597_v51  ;;  %1601 = vst [vmem:[#allocation2 + $0x3c] sm:$0x1] %v1600_v12  ;;  %v1457_v15 = vrot.slane %v1455_v45, 7  ;;  %v1441_v16 = vrot.slane %v1439_v34, 7  ;;  %v8040_v8 = vpack.c.bf16 %v1213_v2, %v1213_v2  ;;  %v8631_v42 = vadd.f32 %v9635_v14, %v829_v0 }
 0x189   :  { %1586 = vst [vmem:[#allocation2 + $0x28] sm:$0xf] %v1585_v21  ;;  %1589 = vst [vmem:[#allocation2 + $0x2c] sm:$0x1] %v1588_v33  ;;  %v1216_v3 = vmax.f32 %v9684_v1, 0.0  ;;  %v8632_v10 = vadd.f32 %v9655_v29, %v8294_v61  ;;  %v842_v47 = vpop.f32.mrb[13].mxu1 }
 0x18a   :  { %v7693_v54 = vrot.slane %v9697_v9, 9  ;;  %v1460_v40 = vor.u32 %v1458_v53, %v1457_v15  ;;  %v1461_v39 = vrot.slane %v1457_v15, 4  ;;  %v1444_v63 = vor.u32 %v1442_v11, %v1441_v16  ;;  %v8295_v25 = vpop.f32.mrb[14].mxu1  ;;  %v1623_v53 = vld [vmem:[#allocation2 + $0x6c] sm:$0x1] }
 0x18b   :  { %v1445_v4 = vrot.slane %v1441_v16, 4  ;;  %v1479_v38 = vshrl.u32 %v8042_v28, 16  ;;  %v1482_v44 = vshll.u32 %v8042_v28, 16  ;;  %v1463_v55 = vshrl.u32 %v8040_v8, 16  ;;  %v845_v26 = vpop.f32.mrb[15].mxu1 }
 0x18c   :  { %v1466_v2 = vshll.u32 %v8040_v8, 16  ;;  %v1603_v1 = vsel %vm9502_vm2, %v1460_v40, %v1602_v52  ;;  %v1606_v14 = vsel %vm9474_vm15, %v1461_v39, %v1605_v62  ;;  %v1591_v29 = vsel %vm9502_vm2, %v1444_v63, %v1590_v31  ;;  %v1608_v12 = vld [vmem:[#allocation2 + $0x58] sm:$0xf]  ;;  %v1611_v21 = vld [vmem:[#allocation2 + $0x5c] sm:$0x1] }
 0x18d   :  { %v1594_v0 = vsel %vm9474_vm15, %v1445_v4, %v1593_v7  ;;  %1604 = vst [vmem:[#allocation2 + $0x40] sm:$0xf] %v1603_v1  ;;  %1607 = vst [vmem:[#allocation2 + $0x44] sm:$0x1] %v1606_v14  ;;  %v1481_v45 = vrot.slane %v1479_v38, 7  ;;  %v1465_v34 = vrot.slane %v1463_v55, 7  ;;  %v8043_v11 = vpack.c.bf16 %v1216_v3, %v1216_v3 }
 0x18e   :  { %1592 = vst [vmem:[#allocation2 + $0x30] sm:$0xf] %v1591_v29  ;;  %1595 = vst [vmem:[#allocation2 + $0x34] sm:$0x1] %v1594_v0  ;;  %v1214_v51 = vmax.f32 %v8631_v42, 0.0  ;;  %v1219_v33 = vmax.f32 %v8632_v10, 0.0  ;;  %v8633_v52 = vadd.f32 %v9657_v56, %v842_v47  ;;  %v8634_v62 = vadd.f32 %v9663_v35, %v8295_v25 }
 0x18f   :  { %v8635_v15 = vadd.f32 %v9669_v46, %v845_v26  ;;  %v1484_v16 = vor.u32 %v1482_v44, %v1481_v45  ;;  %v1485_v31 = vrot.slane %v1481_v45, 4  ;;  %v1468_v28 = vor.u32 %v1466_v2, %v1465_v34  ;;  %v1626_v46 = vld [vmem:[#allocation2 + $0x70] sm:$0xf]  ;;  %v9722_v25 = vld [vmem:[#allocation2 + $0xc] sm:$0x1] }
 0x190   :  { %v1469_v8 = vrot.slane %v1465_v34, 4  ;;  %v1487_v61 = vshrl.u32 %v8043_v11, 16  ;;  %v1490_v7 = vshll.u32 %v8043_v11, 16  ;;  %v8041_v40 = vpack.c.bf16 %v1214_v51, %v1214_v51  ;;  %v1629_v38 = vld [vmem:[#allocation2 + $0x74] sm:$0x1] }
 0x191   :  { %v8046_v39 = vpack.c.bf16 %v1219_v33, %v1219_v33  ;;  %v1621_v3 = vsel %vm9502_vm2, %v1484_v16, %v1620_v19  ;;  %v1624_v42 = vsel %vm9474_vm15, %v1485_v31, %v1623_v53  ;;  %v1609_v56 = vsel %vm9502_vm2, %v1468_v28, %v1608_v12  ;;  %v1614_v19 = vld [vmem:[#allocation2 + $0x60] sm:$0xf]  ;;  %v1617_v45 = vld [vmem:[#allocation2 + $0x64] sm:$0x1] }
 0x192   :  { %v1612_v35 = vsel %vm9474_vm15, %v1469_v8, %v1611_v21  ;;  %1622 = vst [vmem:[#allocation2 + $0x68] sm:$0xf] %v1621_v3  ;;  %1625 = vst [vmem:[#allocation2 + $0x6c] sm:$0x1] %v1624_v42  ;;  %v1489_v10 = vrot.slane %v1487_v61, 7  ;;  %v1471_v47 = vshrl.u32 %v8041_v40, 16 }
 0x193   :  { %1610 = vst [vmem:[#allocation2 + $0x58] sm:$0xf] %v1609_v56  ;;  %1613 = vst [vmem:[#allocation2 + $0x5c] sm:$0x1] %v1612_v35  ;;  %v1474_v63 = vshll.u32 %v8041_v40, 16  ;;  %v1511_v4 = vshrl.u32 %v8046_v39, 16 }
 0x194   :  { %v1514_v44 = vshll.u32 %v8046_v39, 16  ;;  %v1217_v55 = vmax.f32 %v8633_v52, 0.0  ;;  %v1220_v2 = vmax.f32 %v8634_v62, 0.0  ;;  %v1218_v26 = vmax.f32 %v8635_v15, 0.0  ;;  %v1644_v62 = vld [vmem:[#allocation2 + $0x88] sm:$0xf] }
 0x195   :  { %v1492_v1 = vor.u32 %v1490_v7, %v1489_v10  ;;  %v1493_v14 = vrot.slane %v1489_v10, 4  ;;  %v1473_v29 = vrot.slane %v1471_v47, 7  ;;  %v1513_v0 = vrot.slane %v1511_v4, 7  ;;  %v1647_v15 = vld [vmem:[#allocation2 + $0x8c] sm:$0x1] }
 0x196   :  { %v8044_v53 = vpack.c.bf16 %v1217_v55, %v1217_v55  ;;  %v8047_v34 = vpack.c.bf16 %v1220_v2, %v1220_v2  ;;  %v8045_v11 = vpack.c.bf16 %v1218_v26, %v1218_v26  ;;  %v3290_v51 = vrot.slane %v9722_v25, 5  ;;  %v3235_v61 = vld [vmem:[#allocation2 + $0x10] sm:$0xe]  ;;  %v1632_v39 = vld [vmem:[#allocation2 + $0x78] sm:$0xf] }
 0x197   :  { %v1627_v12 = vsel %vm9502_vm2, %v1492_v1, %v1626_v46  ;;  %v1630_v21 = vsel %vm9474_vm15, %v1493_v14, %v1629_v38  ;;  %v1476_v33 = vor.u32 %v1474_v63, %v1473_v29  ;;  %v1477_v52 = vrot.slane %v1473_v29, 4  ;;  %v1635_v3 = vld [vmem:[#allocation2 + $0x7c] sm:$0x1]  ;;  %v1650_v47 = vld [vmem:[#allocation2 + $0x90] sm:$0xf] }
 0x198   :  { %1628 = vst [vmem:[#allocation2 + $0x70] sm:$0xf] %v1627_v12  ;;  %1631 = vst [vmem:[#allocation2 + $0x74] sm:$0x1] %v1630_v21  ;;  %v1516_v16 = vor.u32 %v1514_v44, %v1513_v0  ;;  %v1517_v31 = vrot.slane %v1513_v0, 4  ;;  %v1495_v28 = vshrl.u32 %v8044_v53, 16  ;;  %v3291_v1 = vsel %vm9585_vm6, %v7693_v54, %v3290_v51 }
 0x199   :  { %v1498_v8 = vshll.u32 %v8044_v53, 16  ;;  %v1615_v7 = vsel %vm9502_vm2, %v1476_v33, %v1614_v19  ;;  %v1618_v40 = vsel %vm9474_vm15, %v1477_v52, %v1617_v45  ;;  %v1519_v42 = vshrl.u32 %v8047_v34, 16  ;;  %v1653_v63 = vld [vmem:[#allocation2 + $0x94] sm:$0x1]  ;;  %v3236_v44 = vld [vmem:[#allocation2 + $0x18] sm:$0xe] }
 0x19a   :  { %v1522_v56 = vshll.u32 %v8047_v34, 16  ;;  %1616 = vst [vmem:[#allocation2 + $0x60] sm:$0xf] %v1615_v7  ;;  %1619 = vst [vmem:[#allocation2 + $0x64] sm:$0x1] %v1618_v40  ;;  %v1645_v35 = vsel %vm9502_vm2, %v1516_v16, %v1644_v62  ;;  %v1648_v46 = vsel %vm9474_vm15, %v1517_v31, %v1647_v15  ;;  %v1497_v10 = vrot.slane %v1495_v28, 7 }
 0x19b   :  { %v1503_v4 = vshrl.u32 %v8045_v11, 16  ;;  %v9737_v38 = vld [vmem:[#allocation2 + $0x14] sm:$0x1]  ;;  %1646 = vst [vmem:[#allocation2 + $0x88] sm:$0xf] %v1645_v35  ;;  %v1521_v55 = vrot.slane %v1519_v42, 7  ;;  %v7708_v53 = vcombine.low %v9599_v49, %v3291_v1 }
 0x19c   :  { %1649 = vst [vmem:[#allocation2 + $0x8c] sm:$0x1] %v1648_v46  ;;  %v1506_v2 = vshll.u32 %v8045_v11, 16  ;;  %v1638_v26 = vld [vmem:[#allocation2 + $0x80] sm:$0xf]  ;;  %v7694_v14 = vrot.slane %v3235_v61, 9  ;;  %v1500_v29 = vor.u32 %v1498_v8, %v1497_v10 }
 0x19d   :  { %v1501_v0 = vrot.slane %v1497_v10, 4  ;;  %v1505_v19 = vrot.slane %v1503_v4, 7  ;;  %v1641_v45 = vld [vmem:[#allocation2 + $0x84] sm:$0x1]  ;;  %v9744_v34 = vld [vmem:[#allocation2 + $0x1c] sm:$0x1]  ;;  %v1524_v12 = vor.u32 %v1522_v56, %v1521_v55  ;;  %8406 = vmatprep.mubr.msk.bf16.mxu0 %vm1939_vm7, %v7708_v53 }
 0x19e   :  { %v1525_v21 = vrot.slane %v1521_v55, 4  ;;  %v3294_v33 = vrot.slane %v9737_v38, 5  ;;  %v7695_v11 = vrot.slane %v3236_v44, 9  ;;  %v9747_v52 = vld [vmem:[#allocation2 + $0x8] sm:$0xf]  ;;  %v1633_v9 = vsel %vm9502_vm2, %v1500_v29, %v1632_v39 }
 0x19f   :  { %v1636_v54 = vsel %vm9474_vm15, %v1501_v0, %v1635_v3  ;;  %v1508_v51 = vor.u32 %v1506_v2, %v1505_v19  ;;  %v1509_v62 = vrot.slane %v1505_v19, 4  ;;  %v1674_v49 = vld [vmem:[#allocation2 + $0xc] sm:$0x1]  ;;  %v9754_v15 = vld [vmem:[#allocation2 + $0x10] sm:$0xf]  ;;  %v1651_v16 = vsel %vm9502_vm2, %v1524_v12, %v1650_v47 }
 0x1a0   :  { %1634 = vst [vmem:[#allocation2 + $0x78] sm:$0xf] %v1633_v9  ;;  %1637 = vst [vmem:[#allocation2 + $0x7c] sm:$0x1] %v1636_v54  ;;  %v1654_v31 = vsel %vm9474_vm15, %v1525_v21, %v1653_v63  ;;  %v3295_v28 = vsel %vm9585_vm6, %v7694_v14, %v3294_v33  ;;  %v3298_v8 = vrot.slane %v9744_v34, 5  ;;  %v1704_v3 = vshrl.u32 %v9747_v52, 16 }
 0x1a1   :  { %v9763_v61 = vld [vmem:[#allocation2 + $0x18] sm:$0xf]  ;;  %v1675_v7 = vld [vmem:[#allocation2 + $0x14] sm:$0x1]  ;;  %1652 = vst [vmem:[#allocation2 + $0x90] sm:$0xf] %v1651_v16  ;;  %v1639_v40 = vsel %vm9502_vm2, %v1508_v51, %v1638_v26  ;;  %v1642_v39 = vsel %vm9474_vm15, %v1509_v62, %v1641_v45 }
 0x1a2   :  { %1655 = vst [vmem:[#allocation2 + $0x94] sm:$0x1] %v1654_v31  ;;  %v1707_v42 = vshll.u32 %v9747_v52, 16  ;;  %v1676_v56 = vld [vmem:[#allocation2 + $0x1c] sm:$0x1]  ;;  %v3299_v46 = vsel %vm9585_vm6, %v7695_v11, %v3298_v8  ;;  %v1713_v10 = vshll.u32 %v1674_v49, 16 }
 0x1a3   :  { %v9771_v35 = vld [vmem:[#allocation2 + $0x24] sm:$0x1]  ;;  %1640 = vst [vmem:[#allocation2 + $0x80] sm:$0xf] %v1639_v40  ;;  %1643 = vst [vmem:[#allocation2 + $0x84] sm:$0x1] %v1642_v39  ;;  %v7709_v36 = vcombine.low %v3295_v28, %v3299_v46 }
 0x1a4   :  { %v1718_v47 = vshrl.u32 %v9754_v15, 16  ;;  %v1721_v37 = vshll.u32 %v9754_v15, 16  ;;  %v3237_v63 = vld [vmem:[#allocation2 + $0x20] sm:$0xe]  ;;  %v1706_v4 = vrot.slane %v1704_v3, 4  ;;  %v1709_v44 = vrot.slane %v1707_v42, 5 }
 0x1a5   :  { %v1727_v55 = vshll.u32 %v1675_v7, 16  ;;  %v9777_v2 = vld [vmem:[#allocation2 + $0x2c] sm:$0x1]  ;;  %v3238_v26 = vld [vmem:[#allocation2 + $0x28] sm:$0xe]  ;;  %v1715_v1 = vrot.slane %v1713_v10, 5  ;;  %8407 = vmatmul.mubr.msk.bf16.vlgmr.msra.gmra.mrb[16].mxu0 %vm1939_vm7, %v7709_v36 }
 0x1a6   :  { %v1720_v14 = vrot.slane %v1718_v47, 4  ;;  %v1723_v29 = vrot.slane %v1721_v37, 5  ;;  %v1732_v0 = vshrl.u32 %v9763_v61, 16  ;;  %v3240_v19 = vld [vmem:[#allocation2 + $0x38] sm:$0xe]  ;;  %v1710_v45 = vor.u32 %v1709_v44, %v1706_v4  ;;  %8423 = vmatpush3.bf16.msra.mxu0 %v9619_v32 }
 0x1a7   :  { %v1729_v53 = vrot.slane %v1727_v55, 5  ;;  %v1735_v12 = vshll.u32 %v9763_v61, 16  ;;  %v1741_v21 = vshll.u32 %v1676_v56, 16  ;;  %v3239_v33 = vld [vmem:[#allocation2 + $0x30] sm:$0xe]  ;;  %v7696_v54 = vrot.slane %v3237_v63, 9  ;;  %8866 = vmatprep.subr.msk.bf16.mxu0 %vm1964_vm11, %v9605_v27 }
 0x1a8   :  { %v1724_v11 = vor.u32 %v1723_v29, %v1720_v14  ;;  %v1734_v9 = vrot.slane %v1732_v0, 4  ;;  %v3302_v51 = vrot.slane %v9771_v35, 5  ;;  %v9784_v62 = vld [vmem:[#allocation2 + $0x34] sm:$0x1]  ;;  %v1711_v49 = vrot.slane %v1710_v45, 4 }
 0x1a9   :  { %v1737_v16 = vrot.slane %v1735_v12, 5  ;;  %v1743_v31 = vrot.slane %v1741_v21, 5  ;;  %v7697_v28 = vrot.slane %v3238_v26, 9  ;;  %v9786_v8 = vld [vmem:[#allocation2 + $0x3c] sm:$0x1]  ;;  %v3306_v40 = vrot.slane %v9777_v2, 5 }
 0x1aa   :  { %v1725_v7 = vrot.slane %v1724_v11, 4  ;;  %v3303_v32 = vsel %vm9585_vm6, %v7696_v54, %v3302_v51  ;;  %v7698_v39 = vrot.slane %v3239_v33, 9  ;;  %v9793_v3 = vld [vmem:[#allocation2 + $0x20] sm:$0xf]  ;;  %v1716_v42 = vsel %vm9218_vm1, %v1711_v49, %v1715_v1  ;;  %v9798_v47 = vld [vmem:[#allocation2 + $0x28] sm:$0xf] }
 0x1ab   :  { %v1738_v56 = vor.u32 %v1737_v16, %v1734_v9  ;;  %v3310_v46 = vrot.slane %v9784_v62, 5  ;;  %v7699_v10 = vrot.slane %v3240_v19, 9  ;;  %v1677_v37 = vld [vmem:[#allocation2 + $0x24] sm:$0x1]  ;;  %v7628_v27 = vcombine.low %v1702_v23, %v1716_v42  ;;  %v1678_v1 = vld [vmem:[#allocation2 + $0x2c] sm:$0x1] }
 0x1ac   :  { %v1730_v63 = vsel %vm9218_vm1, %v1725_v7, %v1729_v53  ;;  %v3307_v36 = vsel %vm9585_vm6, %v7697_v28, %v3306_v40  ;;  %v3314_v4 = vrot.slane %v9786_v8, 5  ;;  %v1746_v14 = vshrl.u32 %v9793_v3, 16  ;;  %v9818_v0 = vld [vmem:[#allocation2 + $0x30] sm:$0xf]  ;;  %v9824_v21 = vld [vmem:[#allocation2 + $0x38] sm:$0xf] }
 0x1ad   :  { %v1739_v44 = vrot.slane %v1738_v56, 4  ;;  %v7710_v55 = vcombine.low %v3303_v32, %v3307_v36  ;;  %v3311_v26 = vsel %vm9585_vm6, %v7698_v39, %v3310_v46  ;;  %8334 = vmatprep.mubr.msk.bf16.mxu1 %vm1939_vm7, %v7628_v27  ;;  %v1749_v22 = vshll.u32 %v9793_v3, 16  ;;  %v1679_v33 = vld [vmem:[#allocation2 + $0x34] sm:$0x1]  ;;  %v9826_v11 = vld [vmem:[#allocation8 + $0x8] sm:$0xf] }
 0x1ae   :  { %v3315_v18 = vsel %vm9585_vm6, %v7699_v10, %v3314_v4  ;;  %v1755_v23 = vshll.u32 %v1677_v37, 16  ;;  %v1760_v29 = vshrl.u32 %v9798_v47, 16  ;;  %v1748_v53 = vrot.slane %v1746_v14, 4  ;;  %v1680_v16 = vld [vmem:[#allocation2 + $0x3c] sm:$0x1] }
 0x1af   :  { %v1744_v19 = vsel %vm9218_vm1, %v1739_v44, %v1743_v31  ;;  %8410 = vmatprep.mubr.msk.bf16.mxu0 %vm1939_vm7, %v7710_v55  ;;  %v7711_v45 = vcombine.low %v3311_v26, %v3315_v18  ;;  %v1763_v12 = vshll.u32 %v9798_v47, 16  ;;  %v1751_v54 = vrot.slane %v1749_v22, 5  ;;  %v9831_v40 = vld [vmem:[#allocation2 + $0x5c] sm:$0x1]  ;;  %v3242_v10 = vld [vmem:[#allocation2 + $0x58] sm:$0xe] }
 0x1b0   :  { %v7629_v9 = vcombine.low %v1730_v63, %v1744_v19  ;;  %v1757_v51 = vrot.slane %v1755_v23, 5  ;;  %v1762_v49 = vrot.slane %v1760_v29, 4  ;;  %v1769_v31 = vshll.u32 %v1678_v1, 16  ;;  %v3243_v4 = vld [vmem:[#allocation2 + $0x60] sm:$0xe] }
 0x1b1   :  { %8411 = vmatmul.mubr.msk.bf16.gmra.mrb[20].mxu0 %vm1939_vm7, %v7711_v45  ;;  %v1765_v28 = vrot.slane %v1763_v12, 5  ;;  %v1774_v7 = vshrl.u32 %v9818_v0, 16  ;;  %v1777_v32 = vshll.u32 %v9818_v0, 16  ;;  %v1752_v39 = vor.u32 %v1751_v54, %v1748_v53  ;;  %v9837_v14 = vld [vmem:[#allocation2 + $0x64] sm:$0x1] }
 0x1b2   :  { %8335 = vmatmul.mubr.msk.bf16.vlgmr.msra.gmra.mrb[16].mxu1 %vm1939_vm7, %v7629_v9  ;;  %v1783_v42 = vshll.u32 %v1679_v33, 16  ;;  %v1788_v56 = vshrl.u32 %v9824_v21, 16  ;;  %v1791_v46 = vshll.u32 %v9824_v21, 16  ;;  %v1771_v27 = vrot.slane %v1769_v31, 5  ;;  %v3244_v19 = vld [vmem:[#allocation2 + $0x68] sm:$0xe] }
 0x1b3   :  { %v1766_v37 = vor.u32 %v1765_v28, %v1762_v49  ;;  %v1776_v63 = vrot.slane %v1774_v7, 4  ;;  %v1779_v36 = vrot.slane %v1777_v32, 5  ;;  %8351 = vmatpush3.bf16.msra.mxu1 %v9647_v50  ;;  %v1753_v44 = vrot.slane %v1752_v39, 4  ;;  %v9844_v12 = vld [vmem:[#allocation2 + $0x6c] sm:$0x1] }
 0x1b4   :  { %v1785_v55 = vrot.slane %v1783_v42, 5  ;;  %v1790_v26 = vrot.slane %v1788_v56, 4  ;;  %v1793_v1 = vrot.slane %v1791_v46, 5  ;;  %8862 = vmatprep.subr.msk.bf16.mxu1 %vm1964_vm11, %v9826_v11  ;;  %v1797_v23 = vshll.u32 %v1680_v16, 16  ;;  %v9846_v9 = vld [vmem:[#allocation2 + $0x58] sm:$0xf] }
 0x1b5   :  { %v1767_v18 = vrot.slane %v1766_v37, 4  ;;  %v1780_v22 = vor.u32 %v1779_v36, %v1776_v63  ;;  %v7701_v29 = vrot.slane %v3242_v10, 9  ;;  %v1758_v45 = vsel %vm9218_vm1, %v1753_v44, %v1757_v51  ;;  %v1682_v31 = vld [vmem:[#allocation2 + $0x5c] sm:$0x1]  ;;  %v9853_v42 = vld [vmem:[#allocation2 + $0x60] sm:$0xf] }
 0x1b6   :  { %v1794_v53 = vor.u32 %v1793_v1, %v1790_v26  ;;  %v3322_v50 = vrot.slane %v9831_v40, 5  ;;  %v7702_v33 = vrot.slane %v3243_v4, 9  ;;  %v1799_v28 = vrot.slane %v1797_v23, 5  ;;  %v9855_v56 = vld [vmem:[#allocation2 + $0x68] sm:$0xf] }
 0x1b7   :  { %v1772_v54 = vsel %vm9218_vm1, %v1767_v18, %v1771_v27  ;;  %v1781_v49 = vrot.slane %v1780_v22, 4  ;;  %v3326_v16 = vrot.slane %v9837_v14, 5  ;;  %v7703_v39 = vrot.slane %v3244_v19, 9  ;;  %v1684_v63 = vld [vmem:[#allocation2 + $0x6c] sm:$0x1] }
 0x1b8   :  { %v7630_v7 = vcombine.low %v1758_v45, %v1772_v54  ;;  %v1795_v32 = vrot.slane %v1794_v53, 4  ;;  %v3323_v51 = vsel %vm9585_vm6, %v7701_v29, %v3322_v50  ;;  %v3330_v27 = vrot.slane %v9844_v12, 5  ;;  %v3245_v36 = vld [vmem:[#allocation2 + $0x70] sm:$0xe]  ;;  %v9868_v18 = vld [vmem:[#allocation2 + $0x74] sm:$0x1] }
 0x1b9   :  { %v1786_v46 = vsel %vm9218_vm1, %v1781_v49, %v1785_v55  ;;  %v7712_v10 = vcombine.low %v9629_v48, %v3323_v51  ;;  %v3327_v37 = vsel %vm9585_vm6, %v7702_v33, %v3326_v16  ;;  %v1816_v44 = vshrl.u32 %v9846_v9, 16  ;;  %v1683_v55 = vld [vmem:[#allocation2 + $0x64] sm:$0x1]  ;;  %v9875_v33 = vld [vmem:[#allocation2 + $0x7c] sm:$0x1] }
 0x1ba   :  { %8338 = vmatprep.mubr.msk.bf16.mxu1 %vm1939_vm7, %v7630_v7  ;;  %v1800_v4 = vsel %vm9218_vm1, %v1795_v32, %v1799_v28  ;;  %v1819_v26 = vshll.u32 %v9846_v9, 16  ;;  %v1825_v1 = vshll.u32 %v1682_v31, 16  ;;  %v3331_v22 = vsel %vm9585_vm6, %v7703_v39, %v3330_v27  ;;  %v3246_v54 = vld [vmem:[#allocation2 + $0x78] sm:$0xe]  ;;  %v9879_v7 = vld [vmem:[#allocation2 + $0x84] sm:$0x1] }
 0x1bb   :  { %v7631_v48 = vcombine.low %v1786_v46, %v1800_v4  ;;  %8414 = vmatprep.mubr.msk.bf16.mxu0 %vm1939_vm7, %v7712_v10  ;;  %v1830_v23 = vshrl.u32 %v9853_v42, 16  ;;  %v1833_v29 = vshll.u32 %v9853_v42, 16  ;;  %v7713_v19 = vcombine.low %v3327_v37, %v3331_v22  ;;  %v3247_v10 = vld [vmem:[#allocation2 + $0x80] sm:$0xe] }
 0x1bc   :  { %v1818_v45 = vrot.slane %v1816_v44, 4  ;;  %v1821_v53 = vrot.slane %v1819_v26, 5  ;;  %v1827_v50 = vrot.slane %v1825_v1, 5  ;;  %v1839_v16 = vshll.u32 %v1683_v55, 16  ;;  %v3248_v26 = vld [vmem:[#allocation2 + $0x88] sm:$0xe] }
 0x1bd   :  { %8339 = vmatmul.mubr.msk.bf16.gmra.mrb[20].mxu1 %vm1939_vm7, %v7631_v48  ;;  %v1832_v49 = vrot.slane %v1830_v23, 4  ;;  %v1835_v28 = vrot.slane %v1833_v29, 5  ;;  %v1844_v31 = vshrl.u32 %v9855_v56, 16  ;;  %8415 = vmatmul.mubr.msk.bf16.gmra.mrb[24].mxu0 %vm1939_vm7, %v7713_v19  ;;  %v1847_v51 = vshll.u32 %v9855_v56, 16  ;;  %v9884_v23 = vld [vmem:[#allocation2 + $0x8c] sm:$0x1] }
 0x1be   :  { %v1822_v32 = vor.u32 %v1821_v53, %v1818_v45  ;;  %v1853_v39 = vshll.u32 %v1684_v63, 16  ;;  %v7704_v46 = vrot.slane %v3245_v36, 9  ;;  %v1841_v27 = vrot.slane %v1839_v16, 5  ;;  %v2977_v45 = vld [vmem:[#allocation2 + $0x8] sm:$0xf] }
 0x1bf   :  { %v1836_v37 = vor.u32 %v1835_v28, %v1832_v49  ;;  %v1846_v4 = vrot.slane %v1844_v31, 4  ;;  %v3334_v44 = vrot.slane %v9868_v18, 5  ;;  %v1849_v55 = vrot.slane %v1847_v51, 5  ;;  %v9892_v31 = vld [vmem:[#allocation2 + $0x70] sm:$0xf] }
 0x1c0   :  { %v1823_v1 = vrot.slane %v1822_v32, 4  ;;  %v1855_v48 = vrot.slane %v1853_v39, 5  ;;  %v7705_v22 = vrot.slane %v3246_v54, 9  ;;  %v3338_v63 = vrot.slane %v9875_v33, 5  ;;  %v9904_v39 = vld [vmem:[#allocation2 + $0x78] sm:$0xf] }
 0x1c1   :  { %v1837_v29 = vrot.slane %v1836_v37, 4  ;;  %v3335_v19 = vsel %vm9585_vm6, %v7704_v46, %v3334_v44  ;;  %v7706_v36 = vrot.slane %v3247_v10, 9  ;;  %v1850_v49 = vor.u32 %v1849_v55, %v1846_v4  ;;  %v1685_v46 = vld [vmem:[#allocation2 + $0x74] sm:$0x1] }
 0x1c2   :  { %v1828_v53 = vsel %vm9218_vm1, %v1823_v1, %v1827_v50  ;;  %v3342_v28 = vrot.slane %v9879_v7, 5  ;;  %v7707_v16 = vrot.slane %v3248_v26, 9  ;;  %v3339_v51 = vsel %vm9585_vm6, %v7705_v22, %v3338_v63  ;;  %v1686_v26 = vld [vmem:[#allocation2 + $0x7c] sm:$0x1] }
 0x1c3   :  { %v7632_v54 = vcombine.low %v1814_v20, %v1828_v53  ;;  %v1842_v32 = vsel %vm9218_vm1, %v1837_v29, %v1841_v27  ;;  %v3346_v50 = vrot.slane %v9884_v23, 5  ;;  %v1851_v10 = vrot.slane %v1850_v49, 4 }
 0x1c4   :  { %v7714_v37 = vcombine.low %v3335_v19, %v3339_v51  ;;  %v3343_v4 = vsel %vm9585_vm6, %v7706_v36, %v3342_v28  ;;  %v3022_v44 = vshrl.u32 %v2977_v45, 16  ;;  %v3025_v58 = vshll.u32 %v2977_v45, 16  ;;  %v9917_v19 = vld [vmem:[#allocation2 + $0x80] sm:$0xf] }
 0x1c5   :  { %8342 = vmatprep.mubr.msk.bf16.mxu1 %vm1939_vm7, %v7632_v54  ;;  %v3347_v57 = vsel %vm9585_vm6, %v7707_v16, %v3346_v50  ;;  %v3031_v20 = vshll.u32 %v9722_v25, 16  ;;  %v1858_v27 = vshrl.u32 %v9892_v31, 16  ;;  %v1856_v1 = vsel %vm9218_vm1, %v1851_v10, %v1855_v48  ;;  %v9922_v16 = vld [vmem:[#allocation2 + $0x88] sm:$0xf]  ;;  %v1687_v50 = vld [vmem:[#allocation2 + $0x84] sm:$0x1] }
 0x1c6   :  { %8418 = vmatprep.mubr.msk.bf16.mxu0 %vm1939_vm7, %v7714_v37  ;;  %v7715_v55 = vcombine.low %v3343_v4, %v3347_v57  ;;  %v3024_v22 = vrot.slane %v3022_v44, 4  ;;  %v1861_v29 = vshll.u32 %v9892_v31, 16  ;;  %v7633_v63 = vcombine.low %v1842_v32, %v1856_v1 }
 0x1c7   :  { %v3027_v36 = vrot.slane %v3025_v58, 5  ;;  %v3033_v53 = vrot.slane %v3031_v20, 5  ;;  %v1860_v49 = vrot.slane %v1858_v27, 4  ;;  %v1867_v45 = vshll.u32 %v1685_v46, 16  ;;  %v1688_v46 = vld [vmem:[#allocation2 + $0x8c] sm:$0x1] }
 0x1c8   :  { %8419 = vmatmul.mubr.msk.bf16.gmra.mrb[28].mxu0 %vm1939_vm7, %v7715_v55  ;;  %v1863_v25 = vrot.slane %v1861_v29, 5  ;;  %v1872_v28 = vshrl.u32 %v9904_v39, 16  ;;  %v1875_v48 = vshll.u32 %v9904_v39, 16  ;;  %8343 = vmatmul.mubr.msk.bf16.gmra.mrb[24].mxu1 %vm1939_vm7, %v7633_v63  ;;  %v1881_v51 = vshll.u32 %v1686_v26, 16 }
 0x1c9   :  { %v3028_v54 = vor.u32 %v3027_v36, %v3024_v22  ;;  %v1886_v32 = vshrl.u32 %v9917_v19, 16  ;;  %v1889_v10 = vshll.u32 %v9917_v19, 16  ;;  %v1869_v4 = vrot.slane %v1867_v45, 5  ;;  %v2981_v45 = vld [vmem:[#allocation2 + $0x18] sm:$0xf] }
 0x1ca   :  { %v1864_v37 = vor.u32 %v1863_v25, %v1860_v49  ;;  %v1874_v44 = vrot.slane %v1872_v28, 4  ;;  %v1877_v57 = vrot.slane %v1875_v48, 5  ;;  %v1883_v20 = vrot.slane %v1881_v51, 5  ;;  %v2979_v25 = vld [vmem:[#allocation2 + $0x10] sm:$0xf] }
 0x1cb   :  { %v3029_v58 = vrot.slane %v3028_v54, 4  ;;  %v1888_v27 = vrot.slane %v1886_v32, 4  ;;  %v1891_v1 = vrot.slane %v1889_v10, 5  ;;  %v1895_v6 = vshll.u32 %v1687_v50, 16 }
 0x1cc   :  { %v1865_v55 = vrot.slane %v1864_v37, 4  ;;  %v1878_v29 = vor.u32 %v1877_v57, %v1874_v44  ;;  %v1900_v22 = vshrl.u32 %v9922_v16, 16  ;;  %v1903_v36 = vshll.u32 %v9922_v16, 16  ;;  %v2983_v37 = vld [vmem:[#allocation2 + $0x20] sm:$0xf] }
 0x1cd   :  { %v3034_v26 = vsel %vm9218_vm1, %v3029_v58, %v3033_v53  ;;  %v1892_v63 = vor.u32 %v1891_v1, %v1888_v27  ;;  %v1909_v49 = vshll.u32 %v1688_v46, 16  ;;  %v1897_v51 = vrot.slane %v1895_v6, 5  ;;  %v8920_v57 = vld [vmem:[#allocation2] sm:$0xf] }
 0x1ce   :  { %v7724_v28 = vcombine.low %v3020_v24, %v3034_v26  ;;  %v1870_v48 = vsel %vm9218_vm1, %v1865_v55, %v1869_v4  ;;  %v1879_v54 = vrot.slane %v1878_v29, 4  ;;  %v1902_v32 = vrot.slane %v1900_v22, 4 }
 0x1cf   :  { %v1893_v50 = vrot.slane %v1892_v63, 4  ;;  %v1905_v53 = vrot.slane %v1903_v36, 5  ;;  %v1911_v10 = vrot.slane %v1909_v49, 5  ;;  %v7644_v46 = vcombine.low %v8920_v57, %v9747_v52 }
 0x1d0   :  { %8424 = vmatprep.mubr.msk.bf16.mxu0 %vm1939_vm7, %v7724_v28  ;;  %v1884_v44 = vsel %vm9218_vm1, %v1879_v54, %v1883_v20  ;;  %v3036_v43 = vshrl.u32 %v2979_v25, 16  ;;  %v3039_v41 = vshll.u32 %v2979_v25, 16  ;;  %v3045_v58 = vshll.u32 %v9737_v38, 16  ;;  %v2985_v25 = vld [vmem:[#allocation2 + $0x28] sm:$0xf] }
 0x1d1   :  { %v7634_v24 = vcombine.low %v1870_v48, %v1884_v44  ;;  %v1898_v4 = vsel %vm9218_vm1, %v1893_v50, %v1897_v51  ;;  %v1906_v6 = vor.u32 %v1905_v53, %v1902_v32  ;;  %v3050_v55 = vshrl.u32 %v2981_v45, 16  ;;  %v2987_v44 = vld [vmem:[#allocation2 + $0x30] sm:$0xf] }
 0x1d2   :  { %v3038_v27 = vrot.slane %v3036_v43, 4  ;;  %v3041_v1 = vrot.slane %v3039_v41, 5  ;;  %v3053_v29 = vshll.u32 %v2981_v45, 16  ;;  %v3047_v20 = vrot.slane %v3045_v58, 5 }
 0x1d3   :  { %8346 = vmatprep.mubr.msk.bf16.mxu1 %vm1939_vm7, %v7634_v24  ;;  %v1907_v22 = vrot.slane %v1906_v6, 4  ;;  %v3059_v26 = vshll.u32 %v9744_v34, 16  ;;  %v3064_v52 = vshrl.u32 %v2983_v37, 16  ;;  %v3052_v36 = vrot.slane %v3050_v55, 4  ;;  %v2989_v24 = vld [vmem:[#allocation2 + $0x38] sm:$0xf] }
 0x1d4   :  { %v3042_v63 = vor.u32 %v3041_v1, %v3038_v27  ;;  %v3055_v49 = vrot.slane %v3053_v29, 5  ;;  %v3067_v28 = vshll.u32 %v2983_v37, 16  ;;  %v3073_v51 = vshll.u32 %v9771_v35, 16 }
 0x1d5   :  { %v1912_v48 = vsel %vm9218_vm1, %v1907_v22, %v1911_v10  ;;  %v3061_v38 = vrot.slane %v3059_v26, 5  ;;  %v3066_v54 = vrot.slane %v3064_v52, 4  ;;  %v3078_v34 = vshrl.u32 %v2985_v25, 16 }
 0x1d6   :  { %v7635_v45 = vcombine.low %v1898_v4, %v1912_v48  ;;  %v3043_v50 = vrot.slane %v3042_v63, 4  ;;  %v3056_v32 = vor.u32 %v3055_v49, %v3052_v36  ;;  %v3069_v53 = vrot.slane %v3067_v28, 5 }
 0x1d7   :  { %v3075_v57 = vrot.slane %v3073_v51, 5  ;;  %v3081_v43 = vshll.u32 %v2985_v25, 16  ;;  %v3087_v41 = vshll.u32 %v9777_v2, 16  ;;  %v7645_v35 = vcombine.low %v9754_v15, %v9763_v61  ;;  %v2993_v15 = vld [vmem:[#allocation2 + $0x58] sm:$0xf] }
 0x1d8   :  { %8347 = vmatmul.mubr.msk.bf16.gmra.mrb[28].mxu1 %vm1939_vm7, %v7635_v45  ;;  %v3048_v10 = vsel %vm9218_vm1, %v3043_v50, %v3047_v20  ;;  %v3057_v37 = vrot.slane %v3056_v32, 4  ;;  %v3070_v6 = vor.u32 %v3069_v53, %v3066_v54  ;;  %v3080_v4 = vrot.slane %v3078_v34, 4  ;;  %v2995_v51 = vld [vmem:[#allocation2 + $0x60] sm:$0xf] }
 0x1d9   :  { %8352 = vmatprep.mubr.msk.bf16.mxu1 %vm1939_vm7, %v7644_v46  ;;  %v3083_v58 = vrot.slane %v3081_v43, 5  ;;  %v3089_v27 = vrot.slane %v3087_v41, 5  ;;  %v7646_v1 = vcombine.low %v9793_v3, %v9798_v47  ;;  %v3092_v29 = vshrl.u32 %v2987_v44, 16  ;;  %v2997_v43 = vld [vmem:[#allocation2 + $0x68] sm:$0xf] }
 0x1da   :  { %v3062_v2 = vsel %vm9218_vm1, %v3057_v37, %v3061_v38  ;;  %v3071_v55 = vrot.slane %v3070_v6, 4  ;;  %v3095_v22 = vshll.u32 %v2987_v44, 16  ;;  %v3101_v52 = vshll.u32 %v9784_v62, 16  ;;  %v8921_v44 = vld [vmem:[#allocation8 + $0x1c] sm:$0xf] }
 0x1db   :  { %v7725_v20 = vcombine.low %v3048_v10, %v3062_v2  ;;  %v3084_v26 = vor.u32 %v3083_v58, %v3080_v4  ;;  %v3106_v63 = vshrl.u32 %v2989_v24, 16  ;;  %v3094_v46 = vrot.slane %v3092_v29, 4  ;;  %v8922_v10 = vld [vmem:[#allocation2 + $0x50] sm:$0xf] }
 0x1dc   :  { %v3076_v61 = vsel %vm9218_vm1, %v3071_v55, %v3075_v57  ;;  %v3097_v36 = vrot.slane %v3095_v22, 5  ;;  %v3109_v49 = vshll.u32 %v2989_v24, 16  ;;  %v3103_v47 = vrot.slane %v3101_v52, 5 }
 0x1dd   :  { %8425 = vmatmul.mubr.msk.bf16.vlgmr.msra.gmra.mrb[16].mxu0 %vm1939_vm7, %v7725_v20  ;;  %v3085_v3 = vrot.slane %v3084_v26, 4  ;;  %v3108_v25 = vrot.slane %v3106_v63, 4  ;;  %v3115_v28 = vshll.u32 %v9786_v8, 16  ;;  %v3134_v62 = vshrl.u32 %v2993_v15, 16  ;;  %v3001_v20 = vld [vmem:[#allocation2 + $0x78] sm:$0xf] }
 0x1de   :  { %8441 = vmatpush3.bf16.msra.mxu0 %v9643_v30  ;;  %v3098_v48 = vor.u32 %v3097_v36, %v3094_v46  ;;  %v3111_v38 = vrot.slane %v3109_v49, 5  ;;  %v3137_v54 = vshll.u32 %v2993_v15, 16  ;;  %v3143_v32 = vshll.u32 %v9831_v40, 16 }
 0x1df   :  { %v3090_v45 = vsel %vm9218_vm1, %v3085_v3, %v3089_v27  ;;  %v3117_v50 = vrot.slane %v3115_v28, 5  ;;  %v7647_v53 = vcombine.low %v9818_v0, %v9824_v21  ;;  %8867 = vmatprep.subr.msk.bf16.mxu0 %vm1964_vm11, %v8921_v44  ;;  %v3136_v34 = vrot.slane %v3134_v62, 4 }
 0x1e0   :  { %v7726_v8 = vcombine.low %v3076_v61, %v3090_v45  ;;  %8353 = vmatmul.mubr.msk.bf16.vlgmr.msra.gmra.mrb[16].mxu1 %vm1939_vm7, %v7645_v35  ;;  %v3099_v30 = vrot.slane %v3098_v48, 4  ;;  %v3112_v57 = vor.u32 %v3111_v38, %v3108_v25  ;;  %v3139_v41 = vrot.slane %v3137_v54, 5  ;;  %v3003_v54 = vld [vmem:[#allocation2 + $0x80] sm:$0xf] }
 0x1e1   :  { %8356 = vmatprep.mubr.msk.bf16.mxu1 %vm1939_vm7, %v7646_v1  ;;  %v3145_v24 = vrot.slane %v3143_v32, 5  ;;  %v7648_v40 = vcombine.low %v8922_v10, %v9846_v9  ;;  %v3148_v37 = vshrl.u32 %v2995_v51, 16  ;;  %v3151_v6 = vshll.u32 %v2995_v51, 16  ;;  %v2999_v1 = vld [vmem:[#allocation2 + $0x70] sm:$0xf] }
 0x1e2   :  { %8428 = vmatprep.mubr.msk.bf16.mxu0 %vm1939_vm7, %v7726_v8  ;;  %v3104_v0 = vsel %vm9218_vm1, %v3099_v30, %v3103_v47  ;;  %v3113_v21 = vrot.slane %v3112_v57, 4  ;;  %v3157_v35 = vshll.u32 %v9837_v14, 16  ;;  %v3140_v4 = vor.u32 %v3139_v41, %v3136_v34 }
 0x1e3   :  { %v3150_v58 = vrot.slane %v3148_v37, 4  ;;  %v3162_v27 = vshrl.u32 %v2997_v43, 16  ;;  %v3165_v2 = vshll.u32 %v2997_v43, 16  ;;  %v3153_v29 = vrot.slane %v3151_v6, 5 }
 0x1e4   :  { %v3118_v55 = vsel %vm9218_vm1, %v3113_v21, %v3117_v50  ;;  %v3159_v9 = vrot.slane %v3157_v35, 5  ;;  %v3171_v22 = vshll.u32 %v9844_v12, 16  ;;  %v3141_v52 = vrot.slane %v3140_v4, 4 }
 0x1e5   :  { %v7727_v26 = vcombine.low %v3104_v0, %v3118_v55  ;;  %v3164_v63 = vrot.slane %v3162_v27, 4  ;;  %v3167_v15 = vrot.slane %v3165_v2, 5  ;;  %v3154_v61 = vor.u32 %v3153_v29, %v3150_v58  ;;  %v10012_v29 = vld [vmem:[#allocation2 + $0x14] sm:$0x1] }
 0x1e6   :  { %v3173_v46 = vrot.slane %v3171_v22, 5  ;;  %v3176_v14 = vshrl.u32 %v2999_v1, 16  ;;  %v3179_v36 = vshll.u32 %v2999_v1, 16  ;;  %v3146_v49 = vsel %vm9218_vm1, %v3141_v52, %v3145_v24 }
 0x1e7   :  { %8429 = vmatmul.mubr.msk.bf16.gmra.mrb[20].mxu0 %vm1939_vm7, %v7727_v26  ;;  %v3168_v3 = vor.u32 %v3167_v15, %v3164_v63  ;;  %v3185_v47 = vshll.u32 %v9868_v18, 16  ;;  %v3190_v25 = vshrl.u32 %v3001_v20, 16  ;;  %v11304_v12 = vsel %vm9218_vm1, %v9610_v59, %v9612_v5 }
 0x1e8   :  { %v7728_v28 = vcombine.low %v11304_v12, %v3146_v49  ;;  %8357 = vmatmul.mubr.msk.bf16.gmra.mrb[20].mxu1 %vm1939_vm7, %v7647_v53  ;;  %v3155_v48 = vrot.slane %v3154_v61, 4  ;;  %v3178_v38 = vrot.slane %v3176_v14, 4  ;;  %v3181_v62 = vrot.slane %v3179_v36, 5  ;;  %v3005_v53 = vld [vmem:[#allocation2 + $0x88] sm:$0xf] }
 0x1e9   :  { %8360 = vmatprep.mubr.msk.bf16.mxu1 %vm1939_vm7, %v7648_v40  ;;  %v3169_v51 = vrot.slane %v3168_v3, 4  ;;  %v3187_v45 = vrot.slane %v3185_v47, 5  ;;  %v3192_v50 = vrot.slane %v3190_v25, 4  ;;  %v3193_v32 = vshll.u32 %v3001_v20, 16  ;;  %v3646_v40 = vld [vmem:[#allocation2 + $0x8] sm:$0xf] }
 0x1ea   :  { %8432 = vmatprep.mubr.msk.bf16.mxu0 %vm1939_vm7, %v7728_v28  ;;  %v3160_v18 = vsel %vm9218_vm1, %v3155_v48, %v3159_v9  ;;  %v3182_v44 = vor.u32 %v3181_v62, %v3178_v38  ;;  %v3199_v59 = vshll.u32 %v9875_v33, 16  ;;  %v7649_v5 = vcombine.low %v9853_v42, %v9855_v56  ;;  %v10005_v42 = vld [vmem:[#allocation2 + $0xc] sm:$0x1]  ;;  %v10018_v14 = vld [vmem:[#allocation2 + $0x1c] sm:$0x1] }
 0x1eb   :  { %v3174_v8 = vsel %vm9218_vm1, %v3169_v51, %v3173_v46  ;;  %v3195_v30 = vrot.slane %v3193_v32, 5  ;;  %v7650_v57 = vcombine.low %v9892_v31, %v9904_v39  ;;  %v3204_v34 = vshrl.u32 %v3003_v54, 16  ;;  %v3648_v39 = vld [vmem:[#allocation2 + $0x10] sm:$0xf]  ;;  %v3650_v46 = vld [vmem:[#allocation2 + $0x18] sm:$0xf] }
 0x1ec   :  { %v7729_v43 = vcombine.low %v3160_v18, %v3174_v8  ;;  %v3183_v41 = vrot.slane %v3182_v44, 4  ;;  %v3201_v24 = vrot.slane %v3199_v59, 5  ;;  %v3207_v10 = vshll.u32 %v3003_v54, 16  ;;  %v3652_v25 = vld [vmem:[#allocation2 + $0x20] sm:$0xf] }
 0x1ed   :  { %v3196_v37 = vor.u32 %v3195_v30, %v3192_v50  ;;  %v3206_v0 = vrot.slane %v3204_v34, 4  ;;  %v3213_v33 = vshll.u32 %v9879_v7, 16  ;;  %v3218_v21 = vshrl.u32 %v3005_v53, 16  ;;  %v8896_v51 = vld [vmem:[#allocation2 + $0x8] ss:$8 sps:$4 sm:$0xff]  }
 0x1ee   :  { %v3188_v56 = vsel %vm9218_vm1, %v3183_v41, %v3187_v45  ;;  %v3209_v6 = vrot.slane %v3207_v10, 5  ;;  %v3221_v35 = vshll.u32 %v3005_v53, 16  ;;  %v3227_v31 = vshll.u32 %v9884_v23, 16  ;;  %v10026_v45 = vld [vmem:[#allocation2 + $0x24] sm:$0x1] }
 0x1ef   :  { %8433 = vmatmul.mubr.msk.bf16.gmra.mrb[24].mxu0 %vm1939_vm7, %v7729_v43  ;;  %v3197_v4 = vrot.slane %v3196_v37, 4  ;;  %v3215_v58 = vrot.slane %v3213_v33, 5  ;;  %v3220_v27 = vrot.slane %v3218_v21, 4  ;;  %v3679_v2 = vshrl.u32 %v3646_v40, 16  ;;  %v3654_v53 = vld [vmem:[#allocation2 + $0x28] sm:$0xf] }
 0x1f0   :  { %8361 = vmatmul.mubr.msk.bf16.gmra.mrb[24].mxu1 %vm1939_vm7, %v7649_v5  ;;  %v3210_v7 = vor.u32 %v3209_v6, %v3206_v0  ;;  %v3223_v1 = vrot.slane %v3221_v35, 5  ;;  %v3229_v55 = vrot.slane %v3227_v31, 5  ;;  %v3682_v9 = vshll.u32 %v3646_v40, 16 }
 0x1f1   :  { %v3202_v22 = vsel %vm9218_vm1, %v3197_v4, %v3201_v24  ;;  %8364 = vmatprep.mubr.msk.bf16.mxu1 %vm1939_vm7, %v7650_v57  ;;  %v3681_v23 = vrot.slane %v3679_v2, 4  ;;  %v3688_v20 = vshll.u32 %v10005_v42, 16  ;;  %v3693_v26 = vshrl.u32 %v3648_v39, 16  ;;  %v3658_v2 = vld [vmem:[#allocation2 + $0x38] sm:$0xf] }
 0x1f2   :  { %v7730_v52 = vcombine.low %v3188_v56, %v3202_v22  ;;  %v3211_v63 = vrot.slane %v3210_v7, 4  ;;  %v3224_v15 = vor.u32 %v3223_v1, %v3220_v27  ;;  %v3684_v61 = vrot.slane %v3682_v9, 5  ;;  %v10039_v56 = vld [vmem:[#allocation2 + $0x34] sm:$0x1]  ;;  %v10044_v22 = vld [vmem:[#allocation2 + $0x3c] sm:$0x1] }
 0x1f3   :  { %v3690_v36 = vrot.slane %v3688_v20, 5  ;;  %v3695_v49 = vrot.slane %v3693_v26, 4  ;;  %v3696_v3 = vshll.u32 %v3648_v39, 16  ;;  %v3702_v47 = vshll.u32 %v10012_v29, 16 }
 0x1f4   :  { %8436 = vmatprep.mubr.msk.bf16.mxu0 %vm1939_vm7, %v7730_v52  ;;  %v3216_v12 = vsel %vm9218_vm1, %v3211_v63, %v3215_v58  ;;  %v3225_v28 = vrot.slane %v3224_v15, 4  ;;  %v3685_v48 = vor.u32 %v3684_v61, %v3681_v23  ;;  %v7651_v38 = vcombine.low %v9917_v19, %v9922_v16  ;;  %v10031_v19 = vld [vmem:[#allocation2 + $0x2c] sm:$0x1]  ;;  %v3656_v16 = vld [vmem:[#allocation2 + $0x30] sm:$0xf] }
 0x1f5   :  { %v3698_v62 = vrot.slane %v3696_v3, 5  ;;  %v3704_v54 = vrot.slane %v3702_v47, 5  ;;  %v3707_v50 = vshrl.u32 %v3650_v46, 16  ;;  %v3710_v32 = vshll.u32 %v3650_v46, 16  ;;  %v3660_v23 = vld [vmem:[#allocation2 + $0x40] sm:$0xf] }
 0x1f6   :  { %v3230_v18 = vsel %vm9218_vm1, %v3225_v28, %v3229_v55  ;;  %v3686_v44 = vrot.slane %v3685_v48, 4  ;;  %v3716_v59 = vshll.u32 %v10018_v14, 16  ;;  %v3721_v5 = vshrl.u32 %v3652_v25, 16  ;;  %v10049_v15 = vld [vmem:[#allocation8 + $0xc] sm:$0xf] }
 0x1f7   :  { %v7731_v8 = vcombine.low %v3216_v12, %v3230_v18  ;;  %v3699_v30 = vor.u32 %v3698_v62, %v3695_v49  ;;  %v3709_v57 = vrot.slane %v3707_v50, 4  ;;  %v3712_v34 = vrot.slane %v3710_v32, 5  ;;  %v8897_v49 = vld [vmem:[#allocation2 + $0x18] ss:$8 sps:$4 sm:$0xff]   ;;  %v8898_v12 = vld [vmem:[#allocation2 + $0x28] ss:$8 sps:$4 sm:$0xff]  }
 0x1f8   :  { %v3691_v43 = vsel %vm9218_vm1, %v3686_v44, %v3690_v36  ;;  %8365 = vmatmul.mubr.msk.bf16.gmra.mrb[28].mxu1 %vm1939_vm7, %v7651_v38  ;;  %v3718_v41 = vrot.slane %v3716_v59, 5  ;;  %v3723_v24 = vrot.slane %v3721_v5, 4  ;;  %v3724_v10 = vshll.u32 %v3652_v25, 16  ;;  %v10054_v28 = vld [vmem:[#allocation2 + $0x44] sm:$0x1] }
 0x1f9   :  { %8437 = vmatmul.mubr.msk.bf16.gmra.mrb[28].mxu0 %vm1939_vm7, %v7731_v8  ;;  %v3700_v40 = vrot.slane %v3699_v30, 4  ;;  %8370 = vmatprep.mubr.msk.bf16.mxu1 %vm1939_vm7, %v8896_v51  ;;  %v3713_v37 = vor.u32 %v3712_v34, %v3709_v57  ;;  %v3730_v0 = vshll.u32 %v10026_v45, 16  ;;  %v3735_v33 = vshrl.u32 %v3654_v53, 16  ;;  %v3662_v32 = vld [vmem:[#allocation2 + $0x58] sm:$0xf] }
 0x1fa   :  { %v3726_v21 = vrot.slane %v3724_v10, 5  ;;  %v3738_v6 = vshll.u32 %v3654_v53, 16  ;;  %v3744_v35 = vshll.u32 %v10031_v19, 16  ;;  %v3749_v31 = vshrl.u32 %v3656_v16, 16  ;;  %v10061_v5 = vld [vmem:[#allocation2 + $0x5c] sm:$0x1] }
 0x1fb   :  { %v3705_v39 = vsel %vm9218_vm1, %v3700_v40, %v3704_v54  ;;  %v3714_v4 = vrot.slane %v3713_v37, 4  ;;  %v3732_v58 = vrot.slane %v3730_v0, 5  ;;  %v3737_v27 = vrot.slane %v3735_v33, 4  ;;  %v3664_v53 = vld [vmem:[#allocation2 + $0x60] sm:$0xf] }
 0x1fc   :  { %v7740_v7 = vcombine.low %v3691_v43, %v3705_v39  ;;  %v3727_v1 = vor.u32 %v3726_v21, %v3723_v24  ;;  %v3740_v55 = vrot.slane %v3738_v6, 5  ;;  %v3746_v9 = vrot.slane %v3744_v35, 5  ;;  %v10071_v24 = vld [vmem:[#allocation2 + $0x64] sm:$0x1]  ;;  %v3666_v6 = vld [vmem:[#allocation2 + $0x68] sm:$0xf] }
 0x1fd   :  { %v3719_v20 = vsel %vm9218_vm1, %v3714_v4, %v3718_v41  ;;  %v3751_v26 = vrot.slane %v3749_v31, 4  ;;  %v3752_v52 = vshll.u32 %v3656_v16, 16  ;;  %v3758_v63 = vshll.u32 %v10039_v56, 16  ;;  %v10067_v16 = vld [vmem:[#allocation8 + $0x34] sm:$0xf] }
 0x1fe   :  { %8442 = vmatprep.mubr.msk.bf16.mxu0 %vm1939_vm7, %v7740_v7  ;;  %v3728_v61 = vrot.slane %v3727_v1, 4  ;;  %v3741_v46 = vor.u32 %v3740_v55, %v3737_v27  ;;  %v2312_v36 = vsel %vm1964_vm11, %v9826_v11, 0  ;;  %v3763_v3 = vshrl.u32 %v3658_v2, 16  ;;  %v8899_v1 = vld [vmem:[#allocation2 + $0x38] ss:$8 sps:$4 sm:$0xff]  }
 0x1ff   :  { %v3754_v47 = vrot.slane %v3752_v52, 5  ;;  %v3760_v25 = vrot.slane %v3758_v63, 5  ;;  %8369 = vmatpush3.bf16.msra.mxu1 %v2312_v36  ;;  %v3766_v48 = vshll.u32 %v3658_v2, 16  ;;  %v3772_v38 = vshll.u32 %v10044_v22, 16  ;;  %v3668_v55 = vld [vmem:[#allocation2 + $0x70] sm:$0xf] }
 0x200   :  { %v3733_v62 = vsel %vm9218_vm1, %v3728_v61, %v3732_v58  ;;  %v3742_v54 = vrot.slane %v3741_v46, 4  ;;  %v3765_v51 = vrot.slane %v3763_v3, 4  ;;  %v3777_v50 = vshrl.u32 %v3660_v23, 16  ;;  %8863 = vmatprep.subr.msk.bf16.mxu1 %vm1964_vm11, %v10049_v15  ;;  %v10077_v58 = vld [vmem:[#allocation2 + $0x6c] sm:$0x1] }
 0x201   :  { %v7741_v11 = vcombine.low %v3719_v20, %v3733_v62  ;;  %v3755_v18 = vor.u32 %v3754_v47, %v3751_v26  ;;  %v3768_v44 = vrot.slane %v3766_v48, 5  ;;  %v3774_v59 = vrot.slane %v3772_v38, 5  ;;  %v8900_v52 = vld [vmem:[#allocation2 + $0x58] ss:$8 sps:$4 sm:$0xff]   ;;  %v10084_v63 = vld [vmem:[#allocation2 + $0x74] sm:$0x1] }
 0x202   :  { %v3747_v8 = vsel %vm9218_vm1, %v3742_v54, %v3746_v9  ;;  %8371 = vmatmul.mubr.msk.bf16.vlgmr.msra.gmra.mrb[16].mxu1 %vm1939_vm7, %v8897_v49  ;;  %v3779_v30 = vrot.slane %v3777_v50, 4  ;;  %v3780_v57 = vshll.u32 %v3660_v23, 16  ;;  %v3786_v34 = vshll.u32 %v10054_v28, 16  ;;  %v3670_v3 = vld [vmem:[#allocation2 + $0x78] sm:$0xf] }
 0x203   :  { %8443 = vmatmul.mubr.msk.bf16.vlgmr.msra.gmra.mrb[16].mxu0 %vm1939_vm7, %v7741_v11  ;;  %v3756_v43 = vrot.slane %v3755_v18, 4  ;;  %8374 = vmatprep.mubr.msk.bf16.mxu1 %vm1939_vm7, %v8898_v12  ;;  %v3769_v41 = vor.u32 %v3768_v44, %v3765_v51  ;;  %v3791_v10 = vshrl.u32 %v3662_v32, 16  ;;  %v3794_v40 = vshll.u32 %v3662_v32, 16  ;;  %v10088_v38 = vld [vmem:[#allocation2 + $0x7c] sm:$0x1] }
 0x204   :  { %8459 = vmatpush3.bf16.msra.mxu0 %v9687_v13  ;;  %v3782_v37 = vrot.slane %v3780_v57, 5  ;;  %v3788_v0 = vrot.slane %v3786_v34, 5  ;;  %v3800_v33 = vshll.u32 %v10061_v5, 16  ;;  %v3805_v21 = vshrl.u32 %v3664_v53, 16  ;;  %v3672_v32 = vld [vmem:[#allocation2 + $0x80] sm:$0xf] }
 0x205   :  { %v3761_v35 = vsel %vm9218_vm1, %v3756_v43, %v3760_v25  ;;  %v3770_v31 = vrot.slane %v3769_v41, 4  ;;  %v3793_v39 = vrot.slane %v3791_v10, 4  ;;  %v3796_v4 = vrot.slane %v3794_v40, 5  ;;  %8872 = vmatprep.subr.msk.bf16.mxu0 %vm1964_vm11, %v10067_v16  ;;  %v10097_v57 = vld [vmem:[#allocation2 + $0x84] sm:$0x1] }
 0x206   :  { %v7742_v27 = vcombine.low %v3747_v8, %v3761_v35  ;;  %v3783_v2 = vor.u32 %v3782_v37, %v3779_v30  ;;  %v3802_v13 = vrot.slane %v3800_v33, 5  ;;  %v3807_v7 = vrot.slane %v3805_v21, 4  ;;  %v3674_v37 = vld [vmem:[#allocation2 + $0x88] sm:$0xf]  ;;  %v10101_v35 = vld [vmem:[#allocation2 + $0x8c] sm:$0x1] }
 0x207   :  { %v3775_v9 = vsel %vm9218_vm1, %v3770_v31, %v3774_v59  ;;  %v3797_v23 = vor.u32 %v3796_v4, %v3793_v39  ;;  %v3808_v20 = vshll.u32 %v3664_v53, 16  ;;  %v3814_v26 = vshll.u32 %v10071_v24, 16 }
 0x208   :  { %8446 = vmatprep.mubr.msk.bf16.mxu0 %vm1939_vm7, %v7742_v27  ;;  %v3784_v61 = vrot.slane %v3783_v2, 4  ;;  %v3819_v46 = vshrl.u32 %v3666_v6, 16  ;;  %v3822_v36 = vshll.u32 %v3666_v6, 16  ;;  %v3828_v49 = vshll.u32 %v10077_v58, 16  ;;  %v3676_v2 = vld [vmem:[#allocation2 + $0x90] sm:$0xf] }
 0x209   :  { %v3798_v47 = vrot.slane %v3797_v23, 4  ;;  %v3810_v25 = vrot.slane %v3808_v20, 5  ;;  %v3816_v12 = vrot.slane %v3814_v26, 5  ;;  %v3833_v48 = vshrl.u32 %v3668_v55, 16  ;;  %v8902_v26 = vld [vmem:[#allocation2 + $0x78] ss:$8 sps:$4 sm:$0xff]  }
 0x20a   :  { %v3789_v62 = vsel %vm9218_vm1, %v3784_v61, %v3788_v0  ;;  %8375 = vmatmul.mubr.msk.bf16.gmra.mrb[20].mxu1 %vm1939_vm7, %v8899_v1  ;;  %v3821_v54 = vrot.slane %v3819_v46, 4  ;;  %v3824_v51 = vrot.slane %v3822_v36, 5  ;;  %v3830_v50 = vrot.slane %v3828_v49, 5  ;;  %v10110_v49 = vld [vmem:[#allocation2 + $0x94] sm:$0x1] }
 0x20b   :  { %v7743_v11 = vcombine.low %v3775_v9, %v3789_v62  ;;  %v3803_v18 = vsel %vm9218_vm1, %v3798_v47, %v3802_v13  ;;  %v3811_v44 = vor.u32 %v3810_v25, %v3807_v7  ;;  %8378 = vmatprep.mubr.msk.bf16.mxu1 %vm1939_vm7, %v8900_v52  ;;  %v3835_v59 = vrot.slane %v3833_v48, 4  ;;  %v8901_v9 = vld [vmem:[#allocation2 + $0x68] ss:$8 sps:$4 sm:$0xff]  }
 0x20c   :  { %v3825_v53 = vor.u32 %v3824_v51, %v3821_v54  ;;  %v3836_v8 = vshll.u32 %v3668_v55, 16  ;;  %v3842_v30 = vshll.u32 %v10084_v63, 16  ;;  %v3847_v34 = vshrl.u32 %v3670_v3, 16  ;;  %v4068_v54 = vld [vmem:[#allocation2 + $0x8] sm:$0xe] }
 0x20d   :  { %8447 = vmatmul.mubr.msk.bf16.gmra.mrb[20].mxu0 %vm1939_vm7, %v7743_v11  ;;  %v3812_v43 = vrot.slane %v3811_v44, 4  ;;  %v3850_v41 = vshll.u32 %v3670_v3, 16  ;;  %v3856_v10 = vshll.u32 %v10088_v38, 16  ;;  %v3861_v40 = vshrl.u32 %v3672_v32, 16 }
 0x20e   :  { %v3826_v0 = vrot.slane %v3825_v53, 4  ;;  %v3838_v33 = vrot.slane %v3836_v8, 5  ;;  %v3844_v21 = vrot.slane %v3842_v30, 5  ;;  %v3849_v6 = vrot.slane %v3847_v34, 4  ;;  %v2427_v30 = vld [vmem:[#allocation2 + $0x8] sm:$0xf] }
 0x20f   :  { %v3817_v31 = vsel %vm9218_vm1, %v3812_v43, %v3816_v12  ;;  %v3852_v39 = vrot.slane %v3850_v41, 5  ;;  %v3858_v4 = vrot.slane %v3856_v10, 5  ;;  %v3863_v27 = vrot.slane %v3861_v40, 4  ;;  %v8903_v40 = vld [vmem:[#allocation2 + $0x88] ss:$8 sps:$4 sm:$0xff]  }
 0x210   :  { %v7744_v13 = vcombine.low %v3803_v18, %v3817_v31  ;;  %v3831_v7 = vsel %vm9218_vm1, %v3826_v0, %v3830_v50  ;;  %v3839_v1 = vor.u32 %v3838_v33, %v3835_v59  ;;  %v3864_v55 = vshll.u32 %v3672_v32, 16  ;;  %v4069_v18 = vld [vmem:[#allocation2 + $0x10] sm:$0xe] }
 0x211   :  { %v3853_v23 = vor.u32 %v3852_v39, %v3849_v6  ;;  %v3870_v20 = vshll.u32 %v10097_v57, 16  ;;  %v3875_v52 = vshrl.u32 %v3674_v37, 16  ;;  %v3878_v61 = vshll.u32 %v3674_v37, 16  ;;  %v2428_v6 = vld [vmem:[#allocation2 + $0xc] sm:$0x1] }
 0x212   :  { %8450 = vmatprep.mubr.msk.bf16.mxu0 %vm1939_vm7, %v7744_v13  ;;  %v3840_v46 = vrot.slane %v3839_v1, 4  ;;  %v3866_v36 = vrot.slane %v3864_v55, 5  ;;  %8379 = vmatmul.mubr.msk.bf16.gmra.mrb[24].mxu1 %vm1939_vm7, %v8901_v9  ;;  %v3884_v3 = vshll.u32 %v10101_v35, 16  ;;  %v3889_v47 = vshrl.u32 %v3676_v2, 16 }
 0x213   :  { %v3854_v25 = vrot.slane %v3853_v23, 4  ;;  %v3872_v12 = vrot.slane %v3870_v20, 5  ;;  %8382 = vmatprep.mubr.msk.bf16.mxu1 %vm1939_vm7, %v8902_v26  ;;  %v3877_v48 = vrot.slane %v3875_v52, 4  ;;  %v3880_v62 = vrot.slane %v3878_v61, 5 }
 0x214   :  { %v3845_v51 = vsel %vm9218_vm1, %v3840_v46, %v3844_v21  ;;  %v3867_v50 = vor.u32 %v3866_v36, %v3863_v27  ;;  %v3886_v32 = vrot.slane %v3884_v3, 5  ;;  %v3891_v11 = vrot.slane %v3889_v47, 4  ;;  %v2429_v27 = vld [vmem:[#allocation2 + $0x10] sm:$0xf]  ;;  %v4071_v3 = vld [vmem:[#allocation2 + $0x20] sm:$0xe] }
 0x215   :  { %v7745_v44 = vcombine.low %v3831_v7, %v3845_v51  ;;  %v3859_v59 = vsel %vm9218_vm1, %v3854_v25, %v3858_v4  ;;  %v3881_v53 = vor.u32 %v3880_v62, %v3877_v48  ;;  %v3892_v8 = vshll.u32 %v3676_v2, 16  ;;  %v2430_v2 = vld [vmem:[#allocation2 + $0x14] sm:$0x1]  ;;  %v4072_v62 = vld [vmem:[#allocation2 + $0x28] sm:$0xe] }
 0x216   :  { %v3868_v34 = vrot.slane %v3867_v50, 4  ;;  %v3898_v43 = vshll.u32 %v10110_v49, 16  ;;  %v7756_v41 = vrot.slane %v4068_v54, 9  ;;  %v4118_v10 = vrot.slane %v10005_v42, 5 }
 0x217   :  { %8451 = vmatmul.mubr.msk.bf16.gmra.mrb[24].mxu0 %vm1939_vm7, %v7745_v44  ;;  %v3882_v37 = vrot.slane %v3881_v53, 4  ;;  %v3894_v0 = vrot.slane %v3892_v8, 5  ;;  %v7757_v33 = vrot.slane %v4069_v18, 9  ;;  %v4122_v21 = vrot.slane %v10012_v29, 5  ;;  %v4070_v29 = vld [vmem:[#allocation2 + $0x18] sm:$0xe] }
 0x218   :  { %v3873_v31 = vsel %vm9218_vm1, %v3868_v34, %v3872_v12  ;;  %v3900_v39 = vrot.slane %v3898_v43, 5  ;;  %v4119_v4 = vsel %vm9585_vm6, %v7756_v41, %v4118_v10  ;;  %v2460_v13 = vshrl.u32 %v2427_v30, 16  ;;  %v2431_v8 = vld [vmem:[#allocation2 + $0x18] sm:$0xf]  ;;  %v2432_v41 = vld [vmem:[#allocation2 + $0x1c] sm:$0x1] }
 0x219   :  { %v7746_v42 = vcombine.low %v3859_v59, %v3873_v31  ;;  %v3887_v7 = vsel %vm9218_vm1, %v3882_v37, %v3886_v32  ;;  %v3895_v1 = vor.u32 %v3894_v0, %v3891_v11  ;;  %v4123_v55 = vsel %vm9585_vm6, %v7757_v33, %v4122_v21  ;;  %v4073_v11 = vld [vmem:[#allocation2 + $0x30] sm:$0xe]  ;;  %v10143_v33 = vld [vmem:[#allocation8 + $0x24] sm:$0xf] }
 0x21a   :  { %v7772_v9 = vcombine.low %v4119_v4, %v4123_v55  ;;  %8383 = vmatmul.mubr.msk.bf16.gmra.mrb[28].mxu1 %vm1939_vm7, %v8903_v40  ;;  %v2462_v23 = vrot.slane %v2460_v13, 4  ;;  %v2463_v20 = vshll.u32 %v2427_v30, 16  ;;  %v2469_v26 = vshll.u32 %v2428_v6, 16  ;;  %v2433_v6 = vld [vmem:[#allocation2 + $0x20] sm:$0xf] }
 0x21b   :  { %8454 = vmatprep.mubr.msk.bf16.mxu0 %vm1939_vm7, %v7746_v42  ;;  %v3896_v52 = vrot.slane %v3895_v1, 4  ;;  %v2474_v61 = vshrl.u32 %v2429_v27, 16  ;;  %v2477_v46 = vshll.u32 %v2429_v27, 16  ;;  %v2483_v36 = vshll.u32 %v2430_v2, 16  ;;  %v2434_v27 = vld [vmem:[#allocation2 + $0x24] sm:$0x1] }
 0x21c   :  { %v2465_v47 = vrot.slane %v2463_v20, 5  ;;  %v2471_v25 = vrot.slane %v2469_v26, 5  ;;  %v7758_v12 = vrot.slane %v4070_v29, 9  ;;  %v4126_v48 = vrot.slane %v10018_v14, 5  ;;  %v2435_v2 = vld [vmem:[#allocation2 + $0x28] sm:$0xf] }
 0x21d   :  { %v3901_v54 = vsel %vm9218_vm1, %v3896_v52, %v3900_v39  ;;  %v2476_v51 = vrot.slane %v2474_v61, 4  ;;  %v2479_v50 = vrot.slane %v2477_v46, 5  ;;  %v2485_v32 = vrot.slane %v2483_v36, 5  ;;  %v2436_v1 = vld [vmem:[#allocation2 + $0x2c] sm:$0x1] }
 0x21e   :  { %v7747_v18 = vcombine.low %v3887_v7, %v3901_v54  ;;  %v2466_v44 = vor.u32 %v2465_v47, %v2462_v23  ;;  %v4127_v59 = vsel %vm9585_vm6, %v7758_v12, %v4126_v48  ;;  %v7759_v53 = vrot.slane %v4071_v3, 9  ;;  %v2437_v20 = vld [vmem:[#allocation2 + $0x30] sm:$0xf]  ;;  %v2438_v61 = vld [vmem:[#allocation2 + $0x34] sm:$0x1] }
 0x21f   :  { %v2480_v30 = vor.u32 %v2479_v50, %v2476_v51  ;;  %v4130_v34 = vrot.slane %v10026_v45, 5  ;;  %v6306_v14 = vsel %vm1964_vm11, %v10067_v16, 0  ;;  %v7760_v43 = vrot.slane %v4072_v62, 9  ;;  %v4074_v48 = vld [vmem:[#allocation2 + $0x38] sm:$0xe] }
 0x220   :  { %8455 = vmatmul.mubr.msk.bf16.gmra.mrb[28].mxu0 %vm1939_vm7, %v7747_v18  ;;  %v2467_v10 = vrot.slane %v2466_v44, 4  ;;  %v4134_v40 = vrot.slane %v10031_v19, 5  ;;  %v7761_v37 = vrot.slane %v4073_v11, 9  ;;  %v4138_v0 = vrot.slane %v10039_v56, 5 }
 0x221   :  { %8460 = vmatprep.mubr.msk.bf16.mxu0 %vm1939_vm7, %v7772_v9  ;;  %v2481_v21 = vrot.slane %v2480_v30, 4  ;;  %v4131_v45 = vsel %vm9585_vm6, %v7759_v53, %v4130_v34  ;;  %v2734_v16 = vsel %vm1964_vm11, %v10049_v15, 0  ;;  %v2488_v31 = vshrl.u32 %v2431_v8, 16  ;;  %v4075_v53 = vld [vmem:[#allocation2 + $0x40] sm:$0xe] }
 0x222   :  { %v2472_v39 = vsel %vm9218_vm1, %v2467_v10, %v2471_v25  ;;  %v7773_v19 = vcombine.low %v4127_v59, %v4131_v45  ;;  %v4135_v56 = vsel %vm9585_vm6, %v7760_v43, %v4134_v40  ;;  %v4139_v4 = vsel %vm9585_vm6, %v7761_v37, %v4138_v0  ;;  %8387 = vmatpush3.bf16.msra.mxu1 %v2734_v16  ;;  %v4076_v0 = vld [vmem:[#allocation2 + $0x58] sm:$0xe] }
 0x223   :  { %v2486_v13 = vsel %vm9218_vm1, %v2481_v21, %v2485_v32  ;;  %v7774_v42 = vcombine.low %v4135_v56, %v4139_v4  ;;  %v2490_v15 = vrot.slane %v2488_v31, 4  ;;  %v2491_v7 = vshll.u32 %v2431_v8, 16  ;;  %8868 = vmatprep.subr.msk.bf16.mxu1 %vm1964_vm11, %v10143_v33  ;;  %v10161_v32 = vld [vmem:[#allocation8 + $0x30] sm:$0xf]  ;;  %v2439_v56 = vld [vmem:[#allocation2 + $0x38] sm:$0xf] }
 0x224   :  { %v7676_v55 = vcombine.low %v2472_v39, %v2486_v13  ;;  %v2497_v29 = vshll.u32 %v2432_v41, 16  ;;  %v2502_v9 = vshrl.u32 %v2433_v6, 16  ;;  %v2505_v23 = vshll.u32 %v2433_v6, 16  ;;  %v4077_v6 = vld [vmem:[#allocation2 + $0x60] sm:$0xe] }
 0x225   :  { %v2493_v26 = vrot.slane %v2491_v7, 5  ;;  %v2511_v52 = vshll.u32 %v2434_v27, 16  ;;  %v2516_v46 = vshrl.u32 %v2435_v2, 16  ;;  %v2519_v36 = vshll.u32 %v2435_v2, 16 }
 0x226   :  { %8388 = vmatprep.mubr.msk.bf16.mxu1 %vm1939_vm7, %v7676_v55  ;;  %v2499_v3 = vrot.slane %v2497_v29, 5  ;;  %v2504_v47 = vrot.slane %v2502_v9, 4  ;;  %v2507_v25 = vrot.slane %v2505_v23, 5  ;;  %v2525_v12 = vshll.u32 %v2436_v1, 16  ;;  %v2442_v23 = vld [vmem:[#allocation2 + $0x44] sm:$0x1] }
 0x227   :  { %v2494_v62 = vor.u32 %v2493_v26, %v2490_v15  ;;  %v2513_v54 = vrot.slane %v2511_v52, 5  ;;  %v2518_v51 = vrot.slane %v2516_v46, 4  ;;  %v2521_v50 = vrot.slane %v2519_v36, 5  ;;  %v2441_v15 = vld [vmem:[#allocation2 + $0x40] sm:$0xf] }
 0x228   :  { %8461 = vmatmul.mubr.msk.bf16.vlgmr.msra.gmra.mrb[16].mxu0 %vm1939_vm7, %v7773_v19  ;;  %v2508_v11 = vor.u32 %v2507_v25, %v2504_v47  ;;  %v2527_v18 = vrot.slane %v2525_v12, 5  ;;  %v2530_v44 = vshrl.u32 %v2437_v20, 16  ;;  %v2533_v59 = vshll.u32 %v2437_v20, 16  ;;  %v2443_v36 = vld [vmem:[#allocation2 + $0x58] sm:$0xf] }
 0x229   :  { %8549 = vmatpush3.bf16.msra.mxu0 %v6306_v14  ;;  %8464 = vmatprep.mubr.msk.bf16.mxu0 %vm1939_vm7, %v7774_v42  ;;  %v2495_v8 = vrot.slane %v2494_v62, 4  ;;  %v2522_v30 = vor.u32 %v2521_v50, %v2518_v51  ;;  %v2539_v34 = vshll.u32 %v2438_v61, 16  ;;  %v7762_v43 = vrot.slane %v4074_v48, 9  ;;  %v2440_v42 = vld [vmem:[#allocation2 + $0x3c] sm:$0x1] }
 0x22a   :  { %v2509_v41 = vrot.slane %v2508_v11, 4  ;;  %v2532_v10 = vrot.slane %v2530_v44, 4  ;;  %v2535_v40 = vrot.slane %v2533_v59, 5  ;;  %v4142_v37 = vrot.slane %v10044_v22, 5  ;;  %8873 = vmatprep.subr.msk.bf16.mxu0 %vm1964_vm11, %v10161_v32  ;;  %v2445_v48 = vld [vmem:[#allocation2 + $0x60] sm:$0xf] }
 0x22b   :  { %v2500_v21 = vsel %vm9218_vm1, %v2495_v8, %v2499_v3  ;;  %v2523_v45 = vrot.slane %v2522_v30, 4  ;;  %v2541_v14 = vrot.slane %v2539_v34, 5  ;;  %v7763_v16 = vrot.slane %v4075_v53, 9  ;;  %v2444_v3 = vld [vmem:[#allocation2 + $0x5c] sm:$0x1] }
 0x22c   :  { %v2514_v31 = vsel %vm9218_vm1, %v2509_v41, %v2513_v54  ;;  %v2536_v39 = vor.u32 %v2535_v40, %v2532_v10  ;;  %v4143_v19 = vsel %vm9585_vm6, %v7762_v43, %v4142_v37  ;;  %v4146_v22 = vrot.slane %v10054_v28, 5  ;;  %v4078_v41 = vld [vmem:[#allocation2 + $0x68] sm:$0xe] }
 0x22d   :  { %v7677_v4 = vcombine.low %v2500_v21, %v2514_v31  ;;  %v2528_v27 = vsel %vm9218_vm1, %v2523_v45, %v2527_v18  ;;  %v7764_v2 = vrot.slane %v4076_v0, 9  ;;  %v4150_v13 = vrot.slane %v10061_v5, 5  ;;  %v2446_v18 = vld [vmem:[#allocation2 + $0x64] sm:$0x1]  ;;  %v4079_v21 = vld [vmem:[#allocation2 + $0x70] sm:$0xe] }
 0x22e   :  { %v2537_v7 = vrot.slane %v2536_v39, 4  ;;  %v4147_v1 = vsel %vm9585_vm6, %v7763_v16, %v4146_v22  ;;  %v7765_v55 = vrot.slane %v4077_v6, 9  ;;  %v4154_v29 = vrot.slane %v10071_v24, 5  ;;  %v4080_v31 = vld [vmem:[#allocation2 + $0x78] sm:$0xe] }
 0x22f   :  { %8389 = vmatmul.mubr.msk.bf16.vlgmr.msra.gmra.mrb[16].mxu1 %vm1939_vm7, %v7677_v4  ;;  %v7775_v28 = vcombine.low %v4143_v19, %v4147_v1  ;;  %v4151_v9 = vsel %vm9585_vm6, %v7764_v2, %v4150_v13  ;;  %v2544_v20 = vshrl.u32 %v2439_v56, 16  ;;  %v2547_v26 = vshll.u32 %v2439_v56, 16  ;;  %v4081_v4 = vld [vmem:[#allocation2 + $0x80] sm:$0xe] }
 0x230   :  { %v2542_v5 = vsel %vm9218_vm1, %v2537_v7, %v2541_v14  ;;  %v4155_v52 = vsel %vm9585_vm6, %v7765_v55, %v4154_v29  ;;  %v2553_v61 = vshll.u32 %v2440_v42, 16  ;;  %v2558_v46 = vshrl.u32 %v2441_v15, 16  ;;  %v2447_v29 = vld [vmem:[#allocation2 + $0x68] sm:$0xf] }
 0x231   :  { %v7678_v24 = vcombine.low %v2528_v27, %v2542_v5  ;;  %8465 = vmatmul.mubr.msk.bf16.gmra.mrb[20].mxu0 %vm1939_vm7, %v7775_v28  ;;  %v7776_v47 = vcombine.low %v4151_v9, %v4155_v52  ;;  %v2546_v25 = vrot.slane %v2544_v20, 4  ;;  %v2549_v12 = vrot.slane %v2547_v26, 5  ;;  %v2448_v20 = vld [vmem:[#allocation2 + $0x6c] sm:$0x1] }
 0x232   :  { %v2555_v62 = vrot.slane %v2553_v61, 5  ;;  %v2560_v54 = vrot.slane %v2558_v46, 4  ;;  %v2561_v51 = vshll.u32 %v2441_v15, 16  ;;  %v2567_v50 = vshll.u32 %v2442_v23, 16 }
 0x233   :  { %8392 = vmatprep.mubr.msk.bf16.mxu1 %vm1939_vm7, %v7678_v24  ;;  %8468 = vmatprep.mubr.msk.bf16.mxu0 %vm1939_vm7, %v7776_v47  ;;  %v2550_v11 = vor.u32 %v2549_v12, %v2546_v25  ;;  %v2572_v44 = vshrl.u32 %v2443_v36, 16  ;;  %v2575_v59 = vshll.u32 %v2443_v36, 16  ;;  %v2581_v53 = vshll.u32 %v2444_v3, 16  ;;  %v2451_v47 = vld [vmem:[#allocation2 + $0x78] sm:$0xf] }
 0x234   :  { %v2563_v8 = vrot.slane %v2561_v51, 5  ;;  %v2569_v30 = vrot.slane %v2567_v50, 5  ;;  %v2586_v34 = vshrl.u32 %v2445_v48, 16  ;;  %v2589_v43 = vshll.u32 %v2445_v48, 16 }
 0x235   :  { %v2551_v10 = vrot.slane %v2550_v11, 4  ;;  %v2574_v40 = vrot.slane %v2572_v44, 4  ;;  %v2577_v37 = vrot.slane %v2575_v59, 5  ;;  %v2583_v0 = vrot.slane %v2581_v53, 5 }
 0x236   :  { %v2564_v45 = vor.u32 %v2563_v8, %v2560_v54  ;;  %v2588_v14 = vrot.slane %v2586_v34, 4  ;;  %v2591_v16 = vrot.slane %v2589_v43, 5  ;;  %v2595_v6 = vshll.u32 %v2446_v18, 16  ;;  %v2453_v18 = vld [vmem:[#allocation2 + $0x80] sm:$0xf] }
 0x237   :  { %v2556_v39 = vsel %vm9218_vm1, %v2551_v10, %v2555_v62  ;;  %v2578_v19 = vor.u32 %v2577_v37, %v2574_v40  ;;  %v7766_v22 = vrot.slane %v4078_v41, 9  ;;  %v4158_v56 = vrot.slane %v10077_v58, 5  ;;  %v2454_v8 = vld [vmem:[#allocation2 + $0x84] sm:$0x1]  ;;  %v4082_v40 = vld [vmem:[#allocation2 + $0x88] sm:$0xe] }
 0x238   :  { %v2565_v27 = vrot.slane %v2564_v45, 4  ;;  %v2592_v2 = vor.u32 %v2591_v16, %v2588_v14  ;;  %v2597_v13 = vrot.slane %v2595_v6, 5  ;;  %v7767_v42 = vrot.slane %v4079_v21, 9 }
 0x239   :  { %v2579_v15 = vrot.slane %v2578_v19, 4  ;;  %v4159_v7 = vsel %vm9585_vm6, %v7766_v22, %v4158_v56  ;;  %v4162_v1 = vrot.slane %v10084_v63, 5  ;;  %v7768_v55 = vrot.slane %v4080_v31, 9  ;;  %v2449_v63 = vld [vmem:[#allocation2 + $0x70] sm:$0xf] }
 0x23a   :  { %v2570_v28 = vsel %vm9218_vm1, %v2565_v27, %v2569_v30  ;;  %v2593_v9 = vrot.slane %v2592_v2, 4  ;;  %v4166_v23 = vrot.slane %v10088_v38, 5  ;;  %v7769_v58 = vrot.slane %v4081_v4, 9  ;;  %v2450_v38 = vld [vmem:[#allocation2 + $0x74] sm:$0x1] }
 0x23b   :  { %v7679_v26 = vcombine.low %v2556_v39, %v2570_v28  ;;  %v2584_v5 = vsel %vm9218_vm1, %v2579_v15, %v2583_v0  ;;  %v4163_v52 = vsel %vm9585_vm6, %v7767_v42, %v4162_v1  ;;  %v4170_v61 = vrot.slane %v10097_v57, 5  ;;  %v2452_v57 = vld [vmem:[#allocation2 + $0x7c] sm:$0x1]  ;;  %v4083_v39 = vld [vmem:[#allocation2 + $0x90] sm:$0xe] }
 0x23c   :  { %v2598_v46 = vsel %vm9218_vm1, %v2593_v9, %v2597_v13  ;;  %v7777_v36 = vcombine.low %v4159_v7, %v4163_v52  ;;  %v4167_v3 = vsel %vm9585_vm6, %v7768_v55, %v4166_v23  ;;  %v2600_v24 = vshrl.u32 %v2447_v29, 16  ;;  %v10215_v27 = vld [vmem:[#allocation2 + $0xc] sm:$0x1]  ;;  %v6143_v7 = vld [vmem:[#allocation2 + $0x8] sm:$0xe] }
 0x23d   :  { %8393 = vmatmul.mubr.msk.bf16.gmra.mrb[20].mxu1 %vm1939_vm7, %v7679_v26  ;;  %v7680_v25 = vcombine.low %v2584_v5, %v2598_v46  ;;  %v4171_v12 = vsel %vm9585_vm6, %v7769_v58, %v4170_v61  ;;  %v2603_v48 = vshll.u32 %v2447_v29, 16  ;;  %v2609_v62 = vshll.u32 %v2448_v20, 16  ;;  %v6144_v9 = vld [vmem:[#allocation2 + $0x10] sm:$0xe]  ;;  %v10225_v5 = vld [vmem:[#allocation2 + $0x14] sm:$0x1] }
 0x23e   :  { %8469 = vmatmul.mubr.msk.bf16.gmra.mrb[24].mxu0 %vm1939_vm7, %v7777_v36  ;;  %v7778_v54 = vcombine.low %v4167_v3, %v4171_v12  ;;  %v2602_v51 = vrot.slane %v2600_v24, 4  ;;  %v2614_v50 = vshrl.u32 %v2449_v63, 16  ;;  %v2617_v11 = vshll.u32 %v2449_v63, 16  ;;  %v2457_v36 = vld [vmem:[#allocation2 + $0x90] sm:$0xf] }
 0x23f   :  { %8396 = vmatprep.mubr.msk.bf16.mxu1 %vm1939_vm7, %v7680_v25  ;;  %v2605_v44 = vrot.slane %v2603_v48, 5  ;;  %v2611_v59 = vrot.slane %v2609_v62, 5  ;;  %v2623_v53 = vshll.u32 %v2450_v38, 16  ;;  %v2628_v30 = vshrl.u32 %v2451_v47, 16  ;;  %v2458_v25 = vld [vmem:[#allocation2 + $0x94] sm:$0x1] }
 0x240   :  { %8472 = vmatprep.mubr.msk.bf16.mxu0 %vm1939_vm7, %v7778_v54  ;;  %v2616_v34 = vrot.slane %v2614_v50, 4  ;;  %v2619_v43 = vrot.slane %v2617_v11, 5  ;;  %v2631_v41 = vshll.u32 %v2451_v47, 16  ;;  %v2637_v10 = vshll.u32 %v2452_v57, 16  ;;  %v10232_v12 = vld [vmem:[#allocation2 + $0x8] sm:$0xf] }
 0x241   :  { %v2606_v37 = vor.u32 %v2605_v44, %v2602_v51  ;;  %v2625_v0 = vrot.slane %v2623_v53, 5  ;;  %v2630_v21 = vrot.slane %v2628_v30, 4  ;;  %v2642_v45 = vshrl.u32 %v2453_v18, 16  ;;  %v10238_v51 = vld [vmem:[#allocation2 + $0x10] sm:$0xf] }
 0x242   :  { %v2620_v14 = vor.u32 %v2619_v43, %v2616_v34  ;;  %v2633_v16 = vrot.slane %v2631_v41, 5  ;;  %v2639_v6 = vrot.slane %v2637_v10, 5  ;;  %v2645_v31 = vshll.u32 %v2453_v18, 16  ;;  %v4585_v34 = vld [vmem:[#allocation2 + $0xc] sm:$0x1] }
 0x243   :  { %v2607_v19 = vrot.slane %v2606_v37, 4  ;;  %v2644_v22 = vrot.slane %v2642_v45, 4  ;;  %v2651_v56 = vshll.u32 %v2454_v8, 16  ;;  %v7770_v4 = vrot.slane %v4082_v40, 9  ;;  %v4586_v37 = vld [vmem:[#allocation2 + $0x14] sm:$0x1] }
 0x244   :  { %v2621_v2 = vrot.slane %v2620_v14, 4  ;;  %v2634_v13 = vor.u32 %v2633_v16, %v2630_v21  ;;  %v2647_v42 = vrot.slane %v2645_v31, 5  ;;  %v4174_v15 = vrot.slane %v10101_v35, 5  ;;  %v2455_v35 = vld [vmem:[#allocation2 + $0x88] sm:$0xf] }
 0x245   :  { %v2612_v1 = vsel %vm9218_vm1, %v2607_v19, %v2611_v59  ;;  %v2653_v55 = vrot.slane %v2651_v56, 5  ;;  %v7771_v29 = vrot.slane %v4083_v39, 9  ;;  %v4178_v28 = vrot.slane %v10110_v49, 5  ;;  %v2456_v49 = vld [vmem:[#allocation2 + $0x8c] sm:$0x1] }
 0x246   :  { %v2626_v23 = vsel %vm9218_vm1, %v2621_v2, %v2625_v0  ;;  %v2635_v58 = vrot.slane %v2634_v13, 4  ;;  %v2648_v20 = vor.u32 %v2647_v42, %v2644_v22  ;;  %v4175_v26 = vsel %vm9585_vm6, %v7770_v4, %v4174_v15  ;;  %v10248_v16 = vld [vmem:[#allocation2 + $0x1c] sm:$0x1]  ;;  %v10253_v22 = vld [vmem:[#allocation2 + $0x24] sm:$0x1] }
 0x247   :  { %v7681_v52 = vcombine.low %v2612_v1, %v2626_v23  ;;  %v4179_v61 = vsel %vm9585_vm6, %v7771_v29, %v4178_v28  ;;  %v7868_v63 = vrot.slane %v6143_v7, 9  ;;  %v6193_v46 = vrot.slane %v10215_v27, 5  ;;  %v6145_v56 = vld [vmem:[#allocation2 + $0x18] sm:$0xe]  ;;  %v6146_v15 = vld [vmem:[#allocation2 + $0x20] sm:$0xe] }
 0x248   :  { %v2640_v3 = vsel %vm9218_vm1, %v2635_v58, %v2639_v6  ;;  %v2649_v38 = vrot.slane %v2648_v20, 4  ;;  %v7779_v24 = vcombine.low %v4175_v26, %v4179_v61  ;;  %v7869_v47 = vrot.slane %v6144_v9, 9  ;;  %v10255_v28 = vld [vmem:[#allocation2 + $0x2c] sm:$0x1]  ;;  %v10259_v26 = vld [vmem:[#allocation2 + $0x34] sm:$0x1] }
 0x249   :  { %8397 = vmatmul.mubr.msk.bf16.gmra.mrb[24].mxu1 %vm1939_vm7, %v7681_v52  ;;  %v6194_v48 = vsel %vm9585_vm6, %v7868_v63, %v6193_v46  ;;  %v6197_v62 = vrot.slane %v10225_v5, 5  ;;  %v2656_v57 = vshrl.u32 %v2455_v35, 16  ;;  %v2659_v54 = vshll.u32 %v2455_v35, 16  ;;  %v6147_v35 = vld [vmem:[#allocation2 + $0x28] sm:$0xe] }
 0x24a   :  { %v2654_v50 = vsel %vm9218_vm1, %v2649_v38, %v2653_v55  ;;  %8473 = vmatmul.mubr.msk.bf16.gmra.mrb[28].mxu0 %vm1939_vm7, %v7779_v24  ;;  %v2665_v11 = vshll.u32 %v2456_v49, 16  ;;  %v2670_v18 = vshrl.u32 %v2457_v36, 16  ;;  %v2673_v44 = vshll.u32 %v2457_v36, 16  ;;  %v6148_v49 = vld [vmem:[#allocation2 + $0x30] sm:$0xe] }
 0x24b   :  { %v7682_v59 = vcombine.low %v2640_v3, %v2654_v50  ;;  %v6198_v53 = vsel %vm9585_vm6, %v7869_v47, %v6197_v62  ;;  %v2658_v8 = vrot.slane %v2656_v57, 4  ;;  %v2661_v30 = vrot.slane %v2659_v54, 5  ;;  %v10264_v36 = vld [vmem:[#allocation2 + $0x18] sm:$0xf] }
 0x24c   :  { %v7884_v43 = vcombine.low %v6194_v48, %v6198_v53  ;;  %v2667_v41 = vrot.slane %v2665_v11, 5  ;;  %v2672_v10 = vrot.slane %v2670_v18, 4  ;;  %v2675_v40 = vrot.slane %v2673_v44, 5  ;;  %v4587_v48 = vld [vmem:[#allocation2 + $0x1c] sm:$0x1] }
 0x24d   :  { %8400 = vmatprep.mubr.msk.bf16.mxu1 %vm1939_vm7, %v7682_v59  ;;  %v2662_v0 = vor.u32 %v2661_v30, %v2658_v8  ;;  %v2679_v21 = vshll.u32 %v2458_v25, 16  ;;  %v4602_v45 = vshrl.u32 %v10232_v12, 16  ;;  %v4605_v14 = vshll.u32 %v10232_v12, 16  ;;  %v10267_v25 = vld [vmem:[#allocation2 + $0x20] sm:$0xf] }
 0x24e   :  { %8550 = vmatprep.mubr.msk.bf16.mxu0 %vm1939_vm7, %v7884_v43  ;;  %v2676_v6 = vor.u32 %v2675_v40, %v2672_v10  ;;  %v4611_v31 = vshll.u32 %v4585_v34, 16  ;;  %v4616_v39 = vshrl.u32 %v10238_v51, 16  ;;  %v4619_v19 = vshll.u32 %v10238_v51, 16  ;;  %v4588_v11 = vld [vmem:[#allocation2 + $0x24] sm:$0x1] }
 0x24f   :  { %v2663_v4 = vrot.slane %v2662_v0, 4  ;;  %v2681_v2 = vrot.slane %v2679_v21, 5  ;;  %v4604_v13 = vrot.slane %v4602_v45, 4  ;;  %v4607_v42 = vrot.slane %v4605_v14, 5  ;;  %v10279_v8 = vld [vmem:[#allocation2 + $0x28] sm:$0xf] }
 0x250   :  { %v2677_v7 = vrot.slane %v2676_v6, 4  ;;  %v4613_v1 = vrot.slane %v4611_v31, 5  ;;  %v4618_v55 = vrot.slane %v4616_v39, 4  ;;  %v4621_v29 = vrot.slane %v4619_v19, 5  ;;  %v10281_v30 = vld [vmem:[#allocation8 + $0x20] sm:$0xf] }
 0x251   :  { %v2668_v9 = vsel %vm9218_vm1, %v2663_v4, %v2667_v41  ;;  %v4608_v23 = vor.u32 %v4607_v42, %v4604_v13  ;;  %v4625_v58 = vshll.u32 %v4586_v37, 16  ;;  %v7870_v20 = vrot.slane %v6145_v56, 9  ;;  %v10292_v21 = vld [vmem:[#allocation2 + $0x30] sm:$0xf]  ;;  %v10294_v45 = vld [vmem:[#allocation8 + $0x38] sm:$0xf] }
 0x252   :  { %v2682_v52 = vsel %vm9218_vm1, %v2677_v7, %v2681_v2  ;;  %v4622_v61 = vor.u32 %v4621_v29, %v4618_v55  ;;  %v6201_v63 = vrot.slane %v10248_v16, 5  ;;  %v7871_v46 = vrot.slane %v6146_v15, 9  ;;  %v4589_v39 = vld [vmem:[#allocation2 + $0x2c] sm:$0x1]  ;;  %v4590_v13 = vld [vmem:[#allocation2 + $0x34] sm:$0x1] }
 0x253   :  { %v7683_v3 = vcombine.low %v2668_v9, %v2682_v52  ;;  %v4609_v38 = vrot.slane %v4608_v23, 4  ;;  %v4627_v24 = vrot.slane %v4625_v58, 5  ;;  %v6205_v47 = vrot.slane %v10253_v22, 5  ;;  %v10305_v55 = vld [vmem:[#allocation2 + $0x3c] sm:$0x1] }
 0x254   :  { %v4623_v62 = vrot.slane %v4622_v61, 4  ;;  %v6202_v57 = vsel %vm9585_vm6, %v7870_v20, %v6201_v63  ;;  %v6454_v54 = vsel %vm1964_vm11, %v10161_v32, 0  ;;  %v7872_v50 = vrot.slane %v6147_v35, 9  ;;  %v10311_v20 = vld [vmem:[#allocation2 + $0x44] sm:$0x1] }
 0x255   :  { %8401 = vmatmul.mubr.msk.bf16.gmra.mrb[28].mxu1 %vm1939_vm7, %v7683_v3  ;;  %v4614_v18 = vsel %vm9218_vm1, %v4609_v38, %v4613_v1  ;;  %v6206_v44 = vsel %vm9585_vm6, %v7871_v46, %v6205_v47  ;;  %v6209_v59 = vrot.slane %v10255_v28, 5  ;;  %v7873_v53 = vrot.slane %v6148_v49, 9  ;;  %v6149_v35 = vld [vmem:[#allocation2 + $0x38] sm:$0xe]  ;;  %v6150_v49 = vld [vmem:[#allocation2 + $0x40] sm:$0xe] }
 0x256   :  { %v4628_v32 = vsel %vm9218_vm1, %v4623_v62, %v4627_v24  ;;  %v7885_v34 = vcombine.low %v6202_v57, %v6206_v44  ;;  %v6213_v43 = vrot.slane %v10259_v26, 5  ;;  %v4876_v41 = vsel %vm1964_vm11, %v10143_v33, 0  ;;  %v6151_v62 = vld [vmem:[#allocation2 + $0x58] sm:$0xe]  ;;  %v6152_v44 = vld [vmem:[#allocation2 + $0x60] sm:$0xe] }
 0x257   :  { %v7804_v10 = vcombine.low %v4614_v18, %v4628_v32  ;;  %v6210_v40 = vsel %vm9585_vm6, %v7872_v50, %v6209_v59  ;;  %8477 = vmatpush3.bf16.msra.mxu1 %v4876_v41  ;;  %v4630_v37 = vshrl.u32 %v10264_v36, 16  ;;  %v4633_v0 = vshll.u32 %v10264_v36, 16  ;;  %v10317_v18 = vld [vmem:[#allocation2 + $0x64] sm:$0x1] }
 0x258   :  { %8551 = vmatmul.mubr.msk.bf16.vlgmr.msra.gmra.mrb[32].mxu0 %vm1939_vm7, %v7885_v34  ;;  %v6214_v14 = vsel %vm9585_vm6, %v7873_v53, %v6213_v43  ;;  %v4639_v6 = vshll.u32 %v4587_v48, 16  ;;  %v4644_v33 = vshrl.u32 %v10267_v25, 16  ;;  %v4647_v31 = vshll.u32 %v10267_v25, 16  ;;  %8869 = vmatprep.subr.msk.bf16.mxu1 %vm1964_vm11, %v10281_v30  ;;  %v10315_v48 = vld [vmem:[#allocation2 + $0x5c] sm:$0x1] }
 0x259   :  { %8478 = vmatprep.mubr.msk.bf16.mxu1 %vm1939_vm7, %v7804_v10  ;;  %8567 = vmatpush3.bf16.msra.mxu0 %v6454_v54  ;;  %v7886_v19 = vcombine.low %v6210_v40, %v6214_v14  ;;  %v4632_v56 = vrot.slane %v4630_v37, 4  ;;  %v4635_v4 = vrot.slane %v4633_v0, 5  ;;  %v4653_v2 = vshll.u32 %v4588_v11, 16  ;;  %v10322_v43 = vld [vmem:[#allocation2 + $0x38] sm:$0xf] }
 0x25a   :  { %v4641_v42 = vrot.slane %v4639_v6, 5  ;;  %v4646_v15 = vrot.slane %v4644_v33, 4  ;;  %v4649_v7 = vrot.slane %v4647_v31, 5  ;;  %v4658_v1 = vshrl.u32 %v10279_v8, 16  ;;  %8874 = vmatprep.subr.msk.bf16.mxu0 %vm1964_vm11, %v10294_v45  ;;  %v4591_v31 = vld [vmem:[#allocation2 + $0x3c] sm:$0x1] }
 0x25b   :  { %8554 = vmatprep.mubr.msk.bf16.mxu0 %vm1939_vm7, %v7886_v19  ;;  %v4636_v29 = vor.u32 %v4635_v4, %v4632_v56  ;;  %v4655_v9 = vrot.slane %v4653_v2, 5  ;;  %v4661_v23 = vshll.u32 %v10279_v8, 16  ;;  %v4667_v58 = vshll.u32 %v4589_v39, 16  ;;  %v10332_v2 = vld [vmem:[#allocation2 + $0x40] sm:$0xf] }
 0x25c   :  { %v4650_v52 = vor.u32 %v4649_v7, %v4646_v15  ;;  %v4660_v61 = vrot.slane %v4658_v1, 4  ;;  %v4672_v63 = vshrl.u32 %v10292_v21, 16  ;;  %v4675_v46 = vshll.u32 %v10292_v21, 16 }
 0x25d   :  { %v4637_v3 = vrot.slane %v4636_v29, 4  ;;  %v4663_v38 = vrot.slane %v4661_v23, 5  ;;  %v4669_v24 = vrot.slane %v4667_v58, 5  ;;  %v4681_v47 = vshll.u32 %v4590_v13, 16 }
 0x25e   :  { %v4651_v57 = vrot.slane %v4650_v52, 4  ;;  %v4674_v54 = vrot.slane %v4672_v63, 4  ;;  %v4677_v50 = vrot.slane %v4675_v46, 5  ;;  %v7874_v11 = vrot.slane %v6149_v35, 9  ;;  %v10344_v35 = vld [vmem:[#allocation2 + $0x58] sm:$0xf] }
 0x25f   :  { %v4642_v59 = vsel %vm9218_vm1, %v4637_v3, %v4641_v42  ;;  %v4664_v53 = vor.u32 %v4663_v38, %v4660_v61  ;;  %v4683_v32 = vrot.slane %v4681_v47, 5  ;;  %v6217_v34 = vrot.slane %v10305_v55, 5  ;;  %v4593_v3 = vld [vmem:[#allocation2 + $0x5c] sm:$0x1] }
 0x260   :  { %v4656_v41 = vsel %vm9218_vm1, %v4651_v57, %v4655_v9  ;;  %v4678_v10 = vor.u32 %v4677_v50, %v4674_v54  ;;  %v7875_v40 = vrot.slane %v6150_v49, 9  ;;  %v6221_v37 = vrot.slane %v10311_v20, 5  ;;  %v4592_v9 = vld [vmem:[#allocation2 + $0x44] sm:$0x1]  ;;  %v10350_v49 = vld [vmem:[#allocation2 + $0x60] sm:$0xf] }
 0x261   :  { %v7805_v0 = vcombine.low %v4642_v59, %v4656_v41  ;;  %v4665_v14 = vrot.slane %v4664_v53, 4  ;;  %v6218_v6 = vsel %vm9585_vm6, %v7874_v11, %v6217_v34  ;;  %v7876_v33 = vrot.slane %v6151_v62, 9  ;;  %v4594_v57 = vld [vmem:[#allocation2 + $0x64] sm:$0x1]  ;;  %v6153_v54 = vld [vmem:[#allocation2 + $0x68] sm:$0xe] }
 0x262   :  { %v4679_v39 = vrot.slane %v4678_v10, 4  ;;  %v6222_v19 = vsel %vm9585_vm6, %v7875_v40, %v6221_v37  ;;  %v6225_v56 = vrot.slane %v10315_v48, 5  ;;  %v7877_v4 = vrot.slane %v6152_v44, 9  ;;  %v10356_v53 = vld [vmem:[#allocation2 + $0x6c] sm:$0x1] }
 0x263   :  { %8479 = vmatmul.mubr.msk.bf16.vlgmr.msra.gmra.mrb[32].mxu1 %vm1939_vm7, %v7805_v0  ;;  %v4670_v13 = vsel %vm9218_vm1, %v4665_v14, %v4669_v24  ;;  %v7887_v42 = vcombine.low %v6218_v6, %v6222_v19  ;;  %v6229_v15 = vrot.slane %v10317_v18, 5  ;;  %v4686_v7 = vshrl.u32 %v10322_v43, 16  ;;  %v10360_v40 = vld [vmem:[#allocation2 + $0x74] sm:$0x1]  ;;  %v6154_v37 = vld [vmem:[#allocation2 + $0x70] sm:$0xe] }
 0x264   :  { %v4684_v1 = vsel %vm9218_vm1, %v4679_v39, %v4683_v32  ;;  %v6226_v29 = vsel %vm9585_vm6, %v7876_v33, %v6225_v56  ;;  %v4689_v23 = vshll.u32 %v10322_v43, 16  ;;  %v4695_v58 = vshll.u32 %v4591_v31, 16  ;;  %v10363_v31 = vld [vmem:[#allocation2 + $0x7c] sm:$0x1] }
 0x265   :  { %v7806_v52 = vcombine.low %v4670_v13, %v4684_v1  ;;  %8555 = vmatmul.mubr.msk.bf16.gmra.mrb[36].mxu0 %vm1939_vm7, %v7887_v42  ;;  %v6230_v61 = vsel %vm9585_vm6, %v7877_v4, %v6229_v15  ;;  %v4688_v63 = vrot.slane %v4686_v7, 4  ;;  %v4700_v46 = vshrl.u32 %v10332_v2, 16  ;;  %v6155_v1 = vld [vmem:[#allocation2 + $0x78] sm:$0xe] }
 0x266   :  { %v7888_v38 = vcombine.low %v6226_v29, %v6230_v61  ;;  %v4691_v24 = vrot.slane %v4689_v23, 5  ;;  %v4697_v47 = vrot.slane %v4695_v58, 5  ;;  %v4703_v62 = vshll.u32 %v10332_v2, 16 }
 0x267   :  { %8482 = vmatprep.mubr.msk.bf16.mxu1 %vm1939_vm7, %v7806_v52  ;;  %v4702_v50 = vrot.slane %v4700_v46, 4  ;;  %v4709_v11 = vshll.u32 %v4592_v9, 16  ;;  %v4714_v44 = vshrl.u32 %v10344_v35, 16  ;;  %v4717_v59 = vshll.u32 %v10344_v35, 16  ;;  %v10368_v52 = vld [vmem:[#allocation2 + $0x84] sm:$0x1] }
 0x268   :  { %8558 = vmatprep.mubr.msk.bf16.mxu0 %vm1939_vm7, %v7888_v38  ;;  %v4692_v32 = vor.u32 %v4691_v24, %v4688_v63  ;;  %v4705_v34 = vrot.slane %v4703_v62, 5  ;;  %v4723_v41 = vshll.u32 %v4593_v3, 16  ;;  %v4728_v10 = vshrl.u32 %v10350_v49, 16  ;;  %v6156_v38 = vld [vmem:[#allocation2 + $0x80] sm:$0xe] }
 0x269   :  { %v4711_v0 = vrot.slane %v4709_v11, 5  ;;  %v4716_v14 = vrot.slane %v4714_v44, 4  ;;  %v4719_v6 = vrot.slane %v4717_v59, 5  ;;  %v4731_v33 = vshll.u32 %v10350_v49, 16 }
 0x26a   :  { %v4693_v39 = vrot.slane %v4692_v32, 4  ;;  %v4706_v19 = vor.u32 %v4705_v34, %v4702_v50  ;;  %v4725_v56 = vrot.slane %v4723_v41, 5  ;;  %v4730_v4 = vrot.slane %v4728_v10, 4  ;;  %v4595_v50 = vld [vmem:[#allocation2 + $0x6c] sm:$0x1] }
 0x26b   :  { %v4720_v13 = vor.u32 %v4719_v6, %v4716_v14  ;;  %v4733_v42 = vrot.slane %v4731_v33, 5  ;;  %v4737_v15 = vshll.u32 %v4594_v57, 16  ;;  %v7878_v7 = vrot.slane %v6153_v54, 9  ;;  %v10376_v54 = vld [vmem:[#allocation2 + $0x68] sm:$0xf] }
 0x26c   :  { %v4698_v29 = vsel %vm9218_vm1, %v4693_v39, %v4697_v47  ;;  %v4707_v9 = vrot.slane %v4706_v19, 4  ;;  %v6233_v23 = vrot.slane %v10356_v53, 5  ;;  %v7879_v58 = vrot.slane %v6154_v37, 9  ;;  %v10382_v34 = vld [vmem:[#allocation2 + $0x70] sm:$0xf] }
 0x26d   :  { %v4721_v61 = vrot.slane %v4720_v13, 4  ;;  %v4734_v63 = vor.u32 %v4733_v42, %v4730_v4  ;;  %v4739_v46 = vrot.slane %v4737_v15, 5  ;;  %v6237_v3 = vrot.slane %v10360_v40, 5  ;;  %v4596_v14 = vld [vmem:[#allocation2 + $0x74] sm:$0x1] }
 0x26e   :  { %v4712_v24 = vsel %vm9218_vm1, %v4707_v9, %v4711_v0  ;;  %v6234_v62 = vsel %vm9585_vm6, %v7878_v7, %v6233_v23  ;;  %v7880_v57 = vrot.slane %v6155_v1, 9  ;;  %v6241_v47 = vrot.slane %v10363_v31, 5  ;;  %v10399_v7 = vld [vmem:[#allocation2 + $0x80] sm:$0xf]  ;;  %v4597_v1 = vld [vmem:[#allocation2 + $0x7c] sm:$0x1] }
 0x26f   :  { %v7807_v11 = vcombine.low %v4698_v29, %v4712_v24  ;;  %v4726_v44 = vsel %vm9218_vm1, %v4721_v61, %v4725_v56  ;;  %v4735_v59 = vrot.slane %v4734_v63, 4  ;;  %v6238_v32 = vsel %vm9585_vm6, %v7879_v58, %v6237_v3  ;;  %v10392_v56 = vld [vmem:[#allocation2 + $0x78] sm:$0xf]  ;;  %v4598_v61 = vld [vmem:[#allocation2 + $0x84] sm:$0x1] }
 0x270   :  { %v7889_v41 = vcombine.low %v6234_v62, %v6238_v32  ;;  %v6242_v10 = vsel %vm9585_vm6, %v7880_v57, %v6241_v47  ;;  %v7881_v37 = vrot.slane %v6156_v38, 9  ;;  %v6245_v0 = vrot.slane %v10368_v52, 5  ;;  %v10403_v24 = vld [vmem:[#allocation2 + $0x8c] sm:$0x1] }
 0x271   :  { %8483 = vmatmul.mubr.msk.bf16.gmra.mrb[36].mxu1 %vm1939_vm7, %v7807_v11  ;;  %v4740_v6 = vsel %vm9218_vm1, %v4735_v59, %v4739_v46  ;;  %v4742_v33 = vshrl.u32 %v10376_v54, 16  ;;  %v4745_v39 = vshll.u32 %v10376_v54, 16  ;;  %v4751_v19 = vshll.u32 %v4595_v50, 16  ;;  %v6157_v11 = vld [vmem:[#allocation2 + $0x88] sm:$0xe] }
 0x272   :  { %v7808_v4 = vcombine.low %v4726_v44, %v4740_v6  ;;  %8559 = vmatmul.mubr.msk.bf16.gmra.mrb[40].mxu0 %vm1939_vm7, %v7889_v41  ;;  %v6246_v13 = vsel %vm9585_vm6, %v7881_v37, %v6245_v0  ;;  %v4756_v42 = vshrl.u32 %v10382_v34, 16  ;;  %v4759_v15 = vshll.u32 %v10382_v34, 16 }
 0x273   :  { %v7890_v29 = vcombine.low %v6242_v10, %v6246_v13  ;;  %v4744_v9 = vrot.slane %v4742_v33, 4  ;;  %v4747_v23 = vrot.slane %v4745_v39, 5  ;;  %v4753_v58 = vrot.slane %v4751_v19, 5  ;;  %v6158_v10 = vld [vmem:[#allocation2 + $0x90] sm:$0xe] }
 0x274   :  { %8486 = vmatprep.mubr.msk.bf16.mxu1 %vm1939_vm7, %v7808_v4  ;;  %v4758_v63 = vrot.slane %v4756_v42, 4  ;;  %v4761_v46 = vrot.slane %v4759_v15, 5  ;;  %v4765_v3 = vshll.u32 %v4596_v14, 16  ;;  %v4770_v38 = vshrl.u32 %v10392_v56, 16  ;;  %v10409_v33 = vld [vmem:[#allocation2 + $0x94] sm:$0x1] }
 0x275   :  { %8562 = vmatprep.mubr.msk.bf16.mxu0 %vm1939_vm7, %v7890_v29  ;;  %v4748_v62 = vor.u32 %v4747_v23, %v4744_v9  ;;  %v4773_v57 = vshll.u32 %v10392_v56, 16  ;;  %v4779_v47 = vshll.u32 %v4597_v1, 16  ;;  %v4784_v50 = vshrl.u32 %v10399_v7, 16  ;;  %v5885_v42 = vld [vmem:[#allocation2 + $0x8] sm:$0xf] }
 0x276   :  { %v4762_v44 = vor.u32 %v4761_v46, %v4758_v63  ;;  %v4767_v59 = vrot.slane %v4765_v3, 5  ;;  %v4772_v32 = vrot.slane %v4770_v38, 4  ;;  %v4787_v41 = vshll.u32 %v10399_v7, 16  ;;  %v5887_v38 = vld [vmem:[#allocation2 + $0x10] sm:$0xf] }
 0x277   :  { %v4749_v37 = vrot.slane %v4748_v62, 4  ;;  %v4775_v0 = vrot.slane %v4773_v57, 5  ;;  %v4781_v14 = vrot.slane %v4779_v47, 5  ;;  %v4786_v6 = vrot.slane %v4784_v50, 4 }
 0x278   :  { %v4763_v39 = vrot.slane %v4762_v44, 4  ;;  %v4789_v19 = vrot.slane %v4787_v41, 5  ;;  %v4793_v4 = vshll.u32 %v4598_v61, 16  ;;  %v7882_v13 = vrot.slane %v6157_v11, 9 }
 0x279   :  { %v4754_v15 = vsel %vm9218_vm1, %v4749_v37, %v4753_v58  ;;  %v4776_v1 = vor.u32 %v4775_v0, %v4772_v32  ;;  %v6249_v29 = vrot.slane %v10403_v24, 5  ;;  %v7883_v9 = vrot.slane %v6158_v10, 9  ;;  %v10422_v32 = vld [vmem:[#allocation2 + $0x88] sm:$0xf]  ;;  %v4599_v0 = vld [vmem:[#allocation2 + $0x8c] sm:$0x1] }
 0x27a   :  { %v4768_v23 = vsel %vm9218_vm1, %v4763_v39, %v4767_v59  ;;  %v4790_v63 = vor.u32 %v4789_v19, %v4786_v6  ;;  %v4795_v46 = vrot.slane %v4793_v4, 5  ;;  %v6253_v3 = vrot.slane %v10409_v33, 5 }
 0x27b   :  { %v7809_v62 = vcombine.low %v4754_v15, %v4768_v23  ;;  %v4777_v57 = vrot.slane %v4776_v1, 4  ;;  %v6250_v61 = vsel %vm9585_vm6, %v7882_v13, %v6249_v29  ;;  %v5918_v47 = vshrl.u32 %v5885_v42, 16  ;;  %v10429_v13 = vld [vmem:[#allocation2 + $0x90] sm:$0xf] }
 0x27c   :  { %v4791_v50 = vrot.slane %v4790_v63, 4  ;;  %v6254_v58 = vsel %vm9585_vm6, %v7883_v9, %v6253_v3  ;;  %v5921_v11 = vshll.u32 %v5885_v42, 16  ;;  %v5927_v44 = vshll.u32 %v10215_v27, 16  ;;  %v4600_v9 = vld [vmem:[#allocation2 + $0x94] sm:$0x1] }
 0x27d   :  { %8487 = vmatmul.mubr.msk.bf16.gmra.mrb[40].mxu1 %vm1939_vm7, %v7809_v62  ;;  %v4782_v59 = vsel %vm9218_vm1, %v4777_v57, %v4781_v14  ;;  %v7891_v41 = vcombine.low %v6250_v61, %v6254_v58  ;;  %v5920_v10 = vrot.slane %v5918_v47, 4  ;;  %v5932_v37 = vshrl.u32 %v5887_v38, 16  ;;  %v5889_v57 = vld [vmem:[#allocation2 + $0x18] sm:$0xf] }
 0x27e   :  { %v4796_v6 = vsel %vm9218_vm1, %v4791_v50, %v4795_v46  ;;  %v5923_v39 = vrot.slane %v5921_v11, 5  ;;  %v5929_v19 = vrot.slane %v5927_v44, 5  ;;  %v5935_v4 = vshll.u32 %v5887_v38, 16 }
 0x27f   :  { %v7810_v27 = vcombine.low %v4782_v59, %v4796_v6  ;;  %8563 = vmatmul.mubr.msk.bf16.gmra.mrb[44].mxu0 %vm1939_vm7, %v7891_v41  ;;  %v5934_v42 = vrot.slane %v5932_v37, 4  ;;  %v5941_v15 = vshll.u32 %v10225_v5, 16  ;;  %v4798_v14 = vshrl.u32 %v10422_v32, 16  ;;  %v5891_v41 = vld [vmem:[#allocation2 + $0x20] sm:$0xf] }
 0x280   :  { %v5924_v1 = vor.u32 %v5923_v39, %v5920_v10  ;;  %v5937_v29 = vrot.slane %v5935_v4, 5  ;;  %v4801_v23 = vshll.u32 %v10422_v32, 16  ;;  %v4807_v63 = vshll.u32 %v4599_v0, 16 }
 0x281   :  { %8490 = vmatprep.mubr.msk.bf16.mxu1 %vm1939_vm7, %v7810_v27  ;;  %v5943_v46 = vrot.slane %v5941_v15, 5  ;;  %v4800_v3 = vrot.slane %v4798_v14, 4  ;;  %v4812_v38 = vshrl.u32 %v10429_v13, 16  ;;  %v4815_v62 = vshll.u32 %v10429_v13, 16 }
 0x282   :  { %v5925_v61 = vrot.slane %v5924_v1, 4  ;;  %v5938_v47 = vor.u32 %v5937_v29, %v5934_v42  ;;  %v4803_v5 = vrot.slane %v4801_v23, 5  ;;  %v4809_v50 = vrot.slane %v4807_v63, 5 }
 0x283   :  { %v4814_v58 = vrot.slane %v4812_v38, 4  ;;  %v4817_v11 = vrot.slane %v4815_v62, 5  ;;  %v4821_v44 = vshll.u32 %v4600_v9, 16  ;;  %v7820_v59 = vcombine.low %v10232_v12, %v10238_v51  ;;  %v5893_v9 = vld [vmem:[#allocation2 + $0x28] sm:$0xf] }
 0x284   :  { %v5930_v10 = vsel %vm9218_vm1, %v5925_v61, %v5929_v19  ;;  %v5939_v37 = vrot.slane %v5938_v47, 4  ;;  %v4804_v0 = vor.u32 %v4803_v5, %v4800_v3  ;;  %v5946_v6 = vshrl.u32 %v5889_v57, 16 }
 0x285   :  { %v4818_v39 = vor.u32 %v4817_v11, %v4814_v58  ;;  %v4823_v4 = vrot.slane %v4821_v44, 5  ;;  %v5949_v27 = vshll.u32 %v5889_v57, 16  ;;  %v5955_v42 = vshll.u32 %v10248_v16, 16  ;;  %v5895_v57 = vld [vmem:[#allocation2 + $0x30] sm:$0xf] }
 0x286   :  { %v5944_v15 = vsel %vm9218_vm1, %v5939_v37, %v5943_v46  ;;  %v4805_v14 = vrot.slane %v4804_v0, 4  ;;  %v5948_v1 = vrot.slane %v5946_v6, 4  ;;  %v5960_v29 = vshrl.u32 %v5891_v41, 16  ;;  %v5897_v37 = vld [vmem:[#allocation2 + $0x38] sm:$0xf] }
 0x287   :  { %v7900_v12 = vcombine.low %v5930_v10, %v5944_v15  ;;  %v4819_v51 = vrot.slane %v4818_v39, 4  ;;  %v5951_v23 = vrot.slane %v5949_v27, 5  ;;  %v5957_v63 = vrot.slane %v5955_v42, 5  ;;  %v10456_v27 = vld [vmem:[#allocation8 + $0x28] sm:$0xf] }
 0x288   :  { %v4810_v19 = vsel %vm9218_vm1, %v4805_v14, %v4809_v50  ;;  %v5962_v3 = vrot.slane %v5960_v29, 4  ;;  %v5963_v38 = vshll.u32 %v5891_v41, 16  ;;  %v5969_v62 = vshll.u32 %v10253_v22, 16 }
 0x289   :  { %8568 = vmatprep.mubr.msk.bf16.mxu0 %vm1939_vm7, %v7900_v12  ;;  %v4824_v16 = vsel %vm9218_vm1, %v4819_v51, %v4823_v4  ;;  %v5952_v46 = vor.u32 %v5951_v23, %v5948_v1  ;;  %v6860_v61 = vsel %vm1964_vm11, %v10294_v45, 0  ;;  %v5974_v47 = vshrl.u32 %v5893_v9, 16  ;;  %v5899_v12 = vld [vmem:[#allocation2 + $0x40] sm:$0xf] }
 0x28a   :  { %v7811_v5 = vcombine.low %v4810_v19, %v4824_v16  ;;  %v5965_v58 = vrot.slane %v5963_v38, 5  ;;  %v5971_v11 = vrot.slane %v5969_v62, 5  ;;  %v5977_v44 = vshll.u32 %v5893_v9, 16  ;;  %v5901_v38 = vld [vmem:[#allocation2 + $0x58] sm:$0xf] }
 0x28b   :  { %v5953_v50 = vrot.slane %v5952_v46, 4  ;;  %v5976_v10 = vrot.slane %v5974_v47, 4  ;;  %v5983_v41 = vshll.u32 %v10255_v28, 16  ;;  %v5988_v22 = vshrl.u32 %v5895_v57, 16  ;;  %v10474_v47 = vld [vmem:[#allocation8 + $0x3c] sm:$0xf] }
 0x28c   :  { %8491 = vmatmul.mubr.msk.bf16.gmra.mrb[44].mxu1 %vm1939_vm7, %v7811_v5  ;;  %v5966_v0 = vor.u32 %v5965_v58, %v5962_v3  ;;  %v5979_v6 = vrot.slane %v5977_v44, 5  ;;  %v5991_v39 = vshll.u32 %v5895_v57, 16  ;;  %v5997_v4 = vshll.u32 %v10259_v26, 16 }
 0x28d   :  { %8496 = vmatprep.mubr.msk.bf16.mxu1 %vm1939_vm7, %v7820_v59  ;;  %v5958_v45 = vsel %vm9218_vm1, %v5953_v50, %v5957_v63  ;;  %v5985_v42 = vrot.slane %v5983_v41, 5  ;;  %v5990_v15 = vrot.slane %v5988_v22, 4  ;;  %v5040_v28 = vsel %vm1964_vm11, %v10281_v30, 0 }
 0x28e   :  { %v5967_v14 = vrot.slane %v5966_v0, 4  ;;  %v5980_v1 = vor.u32 %v5979_v6, %v5976_v10  ;;  %v5993_v29 = vrot.slane %v5991_v39, 5  ;;  %v5999_v9 = vrot.slane %v5997_v4, 5  ;;  %8495 = vmatpush3.bf16.msra.mxu1 %v5040_v28 }
 0x28f   :  { %v7821_v26 = vcombine.low %v10264_v36, %v10267_v25  ;;  %v7822_v59 = vcombine.low %v10279_v8, %v10292_v21  ;;  %v6002_v51 = vshrl.u32 %v5897_v37, 16  ;;  %v6005_v23 = vshll.u32 %v5897_v37, 16  ;;  %8870 = vmatprep.subr.msk.bf16.mxu1 %vm1964_vm11, %v10456_v27 }
 0x290   :  { %v5972_v30 = vsel %vm9218_vm1, %v5967_v14, %v5971_v11  ;;  %v5981_v63 = vrot.slane %v5980_v1, 4  ;;  %v5994_v19 = vor.u32 %v5993_v29, %v5990_v15  ;;  %v6011_v3 = vshll.u32 %v10305_v55, 16  ;;  %v5903_v55 = vld [vmem:[#allocation2 + $0x60] sm:$0xf]  ;;  %v5907_v1 = vld [vmem:[#allocation2 + $0x70] sm:$0xf] }
 0x291   :  { %v7901_v62 = vcombine.low %v5958_v45, %v5972_v30  ;;  %v6004_v57 = vrot.slane %v6002_v51, 4  ;;  %v6007_v16 = vrot.slane %v6005_v23, 5  ;;  %v6016_v36 = vshrl.u32 %v5899_v12, 16 }
 0x292   :  { %v5986_v25 = vsel %vm9218_vm1, %v5981_v63, %v5985_v42  ;;  %v5995_v8 = vrot.slane %v5994_v19, 4  ;;  %v6013_v21 = vrot.slane %v6011_v3, 5  ;;  %v6019_v46 = vshll.u32 %v5899_v12, 16  ;;  %v5905_v42 = vld [vmem:[#allocation2 + $0x68] sm:$0xf] }
 0x293   :  { %8569 = vmatmul.mubr.msk.bf16.vlgmr.msra.gmra.mrb[32].mxu0 %vm1939_vm7, %v7901_v62  ;;  %v6008_v5 = vor.u32 %v6007_v16, %v6004_v57  ;;  %v6018_v58 = vrot.slane %v6016_v36, 4  ;;  %v6025_v11 = vshll.u32 %v10311_v20, 16  ;;  %v6030_v44 = vshrl.u32 %v5901_v38, 16  ;;  %v5911_v16 = vld [vmem:[#allocation2 + $0x80] sm:$0xf] }
 0x294   :  { %8585 = vmatpush3.bf16.msra.mxu0 %v6860_v61  ;;  %v6000_v50 = vsel %vm9218_vm1, %v5995_v8, %v5999_v9  ;;  %8497 = vmatmul.mubr.msk.bf16.vlgmr.msra.gmra.mrb[32].mxu1 %vm1939_vm7, %v7821_v26  ;;  %v6021_v10 = vrot.slane %v6019_v46, 5  ;;  %v6033_v41 = vshll.u32 %v5901_v38, 16  ;;  %v6039_v22 = vshll.u32 %v10315_v48, 16  ;;  %v5909_v38 = vld [vmem:[#allocation2 + $0x78] sm:$0xf] }
 0x295   :  { %v7902_v37 = vcombine.low %v5986_v25, %v6000_v50  ;;  %8500 = vmatprep.mubr.msk.bf16.mxu1 %vm1939_vm7, %v7822_v59  ;;  %v6009_v0 = vrot.slane %v6008_v5, 4  ;;  %v6027_v6 = vrot.slane %v6025_v11, 5  ;;  %v6032_v39 = vrot.slane %v6030_v44, 4  ;;  %8875 = vmatprep.subr.msk.bf16.mxu0 %vm1964_vm11, %v10474_v47 }
 0x296   :  { %v6022_v20 = vor.u32 %v6021_v10, %v6018_v58  ;;  %v6035_v61 = vrot.slane %v6033_v41, 5  ;;  %v6041_v4 = vrot.slane %v6039_v22, 5  ;;  %v6044_v45 = vshrl.u32 %v5903_v55, 16 }
 0x297   :  { %8572 = vmatprep.mubr.msk.bf16.mxu0 %vm1939_vm7, %v7902_v37  ;;  %v6014_v15 = vsel %vm9218_vm1, %v6009_v0, %v6013_v21  ;;  %v6047_v48 = vshll.u32 %v5903_v55, 16  ;;  %v6053_v28 = vshll.u32 %v10317_v18, 16  ;;  %v7823_v14 = vcombine.low %v10322_v43, %v10332_v2 }
 0x298   :  { %v6023_v29 = vrot.slane %v6022_v20, 4  ;;  %v6036_v9 = vor.u32 %v6035_v61, %v6032_v39  ;;  %v6046_v12 = vrot.slane %v6044_v45, 4  ;;  %v7824_v26 = vcombine.low %v10344_v35, %v10350_v49  ;;  %v5913_v39 = vld [vmem:[#allocation2 + $0x88] sm:$0xf] }
 0x299   :  { %v6049_v59 = vrot.slane %v6047_v48, 5  ;;  %v6055_v51 = vrot.slane %v6053_v28, 5  ;;  %v6058_v23 = vshrl.u32 %v5905_v42, 16  ;;  %v6061_v30 = vshll.u32 %v5905_v42, 16 }
 0x29a   :  { %v6028_v63 = vsel %vm9218_vm1, %v6023_v29, %v6027_v6  ;;  %v6037_v19 = vrot.slane %v6036_v9, 4  ;;  %v6067_v18 = vshll.u32 %v10356_v53, 16  ;;  %v6072_v3 = vshrl.u32 %v5907_v1, 16 }
 0x29b   :  { %v7903_v43 = vcombine.low %v6014_v15, %v6028_v63  ;;  %v6050_v2 = vor.u32 %v6049_v59, %v6046_v12  ;;  %v6060_v62 = vrot.slane %v6058_v23, 4  ;;  %v6063_v57 = vrot.slane %v6061_v30, 5  ;;  %v6553_v59 = vld [vmem:[#allocation2 + $0x10] sm:$0xf] }
 0x29c   :  { %v6042_v35 = vsel %vm9218_vm1, %v6037_v19, %v6041_v4  ;;  %8501 = vmatmul.mubr.msk.bf16.gmra.mrb[36].mxu1 %vm1939_vm7, %v7823_v14  ;;  %v6069_v49 = vrot.slane %v6067_v18, 5  ;;  %v6074_v36 = vrot.slane %v6072_v3, 4  ;;  %v6075_v25 = vshll.u32 %v5907_v1, 16 }
 0x29d   :  { %8573 = vmatmul.mubr.msk.bf16.gmra.mrb[36].mxu0 %vm1939_vm7, %v7903_v43  ;;  %v6051_v8 = vrot.slane %v6050_v2, 4  ;;  %8504 = vmatprep.mubr.msk.bf16.mxu1 %vm1939_vm7, %v7824_v26  ;;  %v6064_v53 = vor.u32 %v6063_v57, %v6060_v62  ;;  %v6081_v21 = vshll.u32 %v10360_v40, 16  ;;  %v6086_v46 = vshrl.u32 %v5909_v38, 16  ;;  %v10524_v62 = vld [vmem:[#allocation2 + $0x1c] sm:$0x1] }
 0x29e   :  { %v6077_v5 = vrot.slane %v6075_v25, 5  ;;  %v6089_v58 = vshll.u32 %v5909_v38, 16  ;;  %v6095_v11 = vshll.u32 %v10363_v31, 16  ;;  %v6100_v55 = vshrl.u32 %v5911_v16, 16  ;;  %v5915_v31 = vld [vmem:[#allocation2 + $0x90] sm:$0xf] }
 0x29f   :  { %v6056_v44 = vsel %vm9218_vm1, %v6051_v8, %v6055_v51  ;;  %v6065_v50 = vrot.slane %v6064_v53, 4  ;;  %v6083_v10 = vrot.slane %v6081_v21, 5  ;;  %v6088_v41 = vrot.slane %v6086_v46, 4  ;;  %v6557_v53 = vld [vmem:[#allocation2 + $0x20] sm:$0xf] }
 0x2a0   :  { %v7904_v22 = vcombine.low %v6042_v35, %v6056_v44  ;;  %v6078_v37 = vor.u32 %v6077_v5, %v6074_v36  ;;  %v6091_v0 = vrot.slane %v6089_v58, 5  ;;  %v6097_v6 = vrot.slane %v6095_v11, 5 }
 0x2a1   :  { %v6070_v40 = vsel %vm9218_vm1, %v6065_v50, %v6069_v49  ;;  %v6102_v20 = vrot.slane %v6100_v55, 4  ;;  %v6103_v61 = vshll.u32 %v5911_v16, 16  ;;  %v6109_v4 = vshll.u32 %v10368_v52, 16 }
 0x2a2   :  { %8576 = vmatprep.mubr.msk.bf16.mxu0 %vm1939_vm7, %v7904_v22  ;;  %v6079_v45 = vrot.slane %v6078_v37, 4  ;;  %v6092_v42 = vor.u32 %v6091_v0, %v6088_v41  ;;  %v7825_v15 = vcombine.low %v10376_v54, %v10382_v34  ;;  %v7826_v48 = vcombine.low %v10392_v56, %v10399_v7  ;;  %v10518_v56 = vld [vmem:[#allocation2 + $0x14] sm:$0x1]  ;;  %v6555_v7 = vld [vmem:[#allocation2 + $0x18] sm:$0xf] }
 0x2a3   :  { %v6105_v28 = vrot.slane %v6103_v61, 5  ;;  %v6111_v14 = vrot.slane %v6109_v4, 5  ;;  %v6114_v1 = vshrl.u32 %v5913_v39, 16  ;;  %v6117_v29 = vshll.u32 %v5913_v39, 16  ;;  %v8912_v0 = vld [vmem:[#allocation2 + $0x10] ss:$8 sps:$4 sm:$0xff]  }
 0x2a4   :  { %v6084_v9 = vsel %vm9218_vm1, %v6079_v45, %v6083_v10  ;;  %v6093_v12 = vrot.slane %v6092_v42, 4  ;;  %8505 = vmatmul.mubr.msk.bf16.gmra.mrb[40].mxu1 %vm1939_vm7, %v7825_v15  ;;  %v6123_v52 = vshll.u32 %v10403_v24, 16  ;;  %v6128_v26 = vshrl.u32 %v5915_v31, 16  ;;  %v6559_v10 = vld [vmem:[#allocation2 + $0x28] sm:$0xf] }
 0x2a5   :  { %v7905_v51 = vcombine.low %v6070_v40, %v6084_v9  ;;  %v6106_v23 = vor.u32 %v6105_v28, %v6102_v20  ;;  %8508 = vmatprep.mubr.msk.bf16.mxu1 %vm1939_vm7, %v7826_v48  ;;  %v6116_v54 = vrot.slane %v6114_v1, 4  ;;  %v6119_v34 = vrot.slane %v6117_v29, 5  ;;  %v10537_v20 = vld [vmem:[#allocation2 + $0x2c] sm:$0x1]  ;;  %v6561_v48 = vld [vmem:[#allocation2 + $0x30] sm:$0xf] }
 0x2a6   :  { %v6098_v30 = vsel %vm9218_vm1, %v6093_v12, %v6097_v6  ;;  %v6125_v63 = vrot.slane %v6123_v52, 5  ;;  %v6130_v19 = vrot.slane %v6128_v26, 4  ;;  %v6131_v18 = vshll.u32 %v5915_v31, 16  ;;  %v10544_v1 = vld [vmem:[#allocation2 + $0x34] sm:$0x1] }
 0x2a7   :  { %8577 = vmatmul.mubr.msk.bf16.gmra.mrb[40].mxu0 %vm1939_vm7, %v7905_v51  ;;  %v6107_v24 = vrot.slane %v6106_v23, 4  ;;  %v6120_v3 = vor.u32 %v6119_v34, %v6116_v54  ;;  %v6137_v38 = vshll.u32 %v10409_v33, 16  ;;  %v6586_v43 = vshrl.u32 %v6553_v59, 16  ;;  %v10529_v33 = vld [vmem:[#allocation2 + $0x24] sm:$0x1] }
 0x2a8   :  { %v6133_v2 = vrot.slane %v6131_v18, 5  ;;  %v6589_v57 = vshll.u32 %v6553_v59, 16  ;;  %v6595_v16 = vshll.u32 %v10518_v56, 16  ;;  %v6600_v35 = vshrl.u32 %v6555_v7, 16  ;;  %v6563_v26 = vld [vmem:[#allocation2 + $0x38] sm:$0xf] }
 0x2a9   :  { %v6112_v49 = vsel %vm9218_vm1, %v6107_v24, %v6111_v14  ;;  %v6121_v36 = vrot.slane %v6120_v3, 4  ;;  %v6139_v25 = vrot.slane %v6137_v38, 5  ;;  %v6588_v8 = vrot.slane %v6586_v43, 4  ;;  %v6565_v43 = vld [vmem:[#allocation2 + $0x40] sm:$0xf] }
 0x2aa   :  { %v7906_v21 = vcombine.low %v6098_v30, %v6112_v49  ;;  %v6134_v46 = vor.u32 %v6133_v2, %v6130_v19  ;;  %v6591_v5 = vrot.slane %v6589_v57, 5  ;;  %v6597_v58 = vrot.slane %v6595_v16, 5  ;;  %v10552_v30 = vld [vmem:[#allocation2 + $0x3c] sm:$0x1]  ;;  %v6567_v49 = vld [vmem:[#allocation2 + $0x48] sm:$0xf] }
 0x2ab   :  { %v6126_v11 = vsel %vm9218_vm1, %v6121_v36, %v6125_v63  ;;  %v6602_v55 = vrot.slane %v6600_v35, 4  ;;  %v6603_v44 = vshll.u32 %v6555_v7, 16  ;;  %v6609_v50 = vshll.u32 %v10524_v62, 16 }
 0x2ac   :  { %8580 = vmatprep.mubr.msk.bf16.mxu0 %vm1939_vm7, %v7906_v21  ;;  %v6135_v41 = vrot.slane %v6134_v46, 4  ;;  %v6592_v22 = vor.u32 %v6591_v5, %v6588_v8  ;;  %v7827_v37 = vcombine.low %v10422_v32, %v10429_v13  ;;  %v6614_v6 = vshrl.u32 %v6557_v53, 16  ;;  %v10562_v21 = vld [vmem:[#allocation8 + $0x2c] sm:$0xf] }
 0x2ad   :  { %v6605_v39 = vrot.slane %v6603_v44, 5  ;;  %v6611_v40 = vrot.slane %v6609_v50, 5  ;;  %v6617_v61 = vshll.u32 %v6557_v53, 16  ;;  %v6623_v4 = vshll.u32 %v10529_v33, 16 }
 0x2ae   :  { %v6140_v31 = vsel %vm9218_vm1, %v6135_v41, %v6139_v25  ;;  %v6593_v45 = vrot.slane %v6592_v22, 4  ;;  %8509 = vmatmul.mubr.msk.bf16.gmra.mrb[44].mxu1 %vm1939_vm7, %v7827_v37  ;;  %v6616_v42 = vrot.slane %v6614_v6, 4  ;;  %v6628_v15 = vshrl.u32 %v6559_v10, 16  ;;  %v10567_v41 = vld [vmem:[#allocation2 + $0x4c] sm:$0x1] }
 0x2af   :  { %v7907_v28 = vcombine.low %v6126_v11, %v6140_v31  ;;  %v6606_v32 = vor.u32 %v6605_v39, %v6602_v55  ;;  %8514 = vmatprep.mubr.msk.bf16.mxu1 %vm1939_vm7, %v8912_v0  ;;  %v6619_v13 = vrot.slane %v6617_v61, 5  ;;  %v6625_v14 = vrot.slane %v6623_v4, 5  ;;  %v8913_v11 = vld [vmem:[#allocation2 + $0x20] ss:$8 sps:$4 sm:$0xff]  }
 0x2b0   :  { %v6598_v29 = vsel %vm9218_vm1, %v6593_v45, %v6597_v58  ;;  %v6630_v9 = vrot.slane %v6628_v15, 4  ;;  %v6631_v12 = vshll.u32 %v6559_v10, 16  ;;  %v6637_v52 = vshll.u32 %v10537_v20, 16  ;;  %v8914_v10 = vld [vmem:[#allocation2 + $0x30] ss:$8 sps:$4 sm:$0xff]  }
 0x2b1   :  { %8581 = vmatmul.mubr.msk.bf16.gmra.mrb[44].mxu0 %vm1939_vm7, %v7907_v28  ;;  %v6607_v59 = vrot.slane %v6606_v32, 4  ;;  %v6620_v51 = vor.u32 %v6619_v13, %v6616_v42  ;;  %v7138_v23 = vsel %vm1964_vm11, %v10474_v47, 0  ;;  %v6642_v54 = vshrl.u32 %v6561_v48, 16  ;;  %v10557_v47 = vld [vmem:[#allocation2 + $0x44] sm:$0x1] }
 0x2b2   :  { %v6633_v34 = vrot.slane %v6631_v12, 5  ;;  %v6639_v7 = vrot.slane %v6637_v52, 5  ;;  %v6645_v63 = vshll.u32 %v6561_v48, 16  ;;  %v6651_v19 = vshll.u32 %v10544_v1, 16  ;;  %v6569_v61 = vld [vmem:[#allocation2 + $0x60] sm:$0xf] }
 0x2b3   :  { %v6612_v18 = vsel %vm9218_vm1, %v6607_v59, %v6611_v40  ;;  %v6621_v24 = vrot.slane %v6620_v51, 4  ;;  %v6644_v3 = vrot.slane %v6642_v54, 4  ;;  %v6656_v38 = vshrl.u32 %v6563_v26, 16  ;;  %v10574_v42 = vld [vmem:[#allocation2 + $0x64] sm:$0x1] }
 0x2b4   :  { %v7916_v2 = vcombine.low %v6598_v29, %v6612_v18  ;;  %v6634_v57 = vor.u32 %v6633_v34, %v6630_v9  ;;  %v6647_v16 = vrot.slane %v6645_v63, 5  ;;  %v6653_v35 = vrot.slane %v6651_v19, 5  ;;  %v6571_v15 = vld [vmem:[#allocation2 + $0x68] sm:$0xf]  ;;  %v10582_v9 = vld [vmem:[#allocation2 + $0x6c] sm:$0x1] }
 0x2b5   :  { %v6626_v36 = vsel %vm9218_vm1, %v6621_v24, %v6625_v14  ;;  %v6658_v25 = vrot.slane %v6656_v38, 4  ;;  %v6659_v8 = vshll.u32 %v6563_v26, 16  ;;  %v6665_v53 = vshll.u32 %v10552_v30, 16  ;;  %v6573_v34 = vld [vmem:[#allocation2 + $0x70] sm:$0xf] }
 0x2b6   :  { %8586 = vmatprep.mubr.msk.bf16.mxu0 %vm1939_vm7, %v7916_v2  ;;  %v6635_v46 = vrot.slane %v6634_v57, 4  ;;  %v6648_v5 = vor.u32 %v6647_v16, %v6644_v3  ;;  %v5223_v58 = vsel %vm1964_vm11, %v10456_v27, 0  ;;  %v6670_v55 = vshrl.u32 %v6565_v43, 16  ;;  %v10587_v24 = vld [vmem:[#allocation2 + $0x74] sm:$0x1] }
 0x2b7   :  { %v6661_v44 = vrot.slane %v6659_v8, 5  ;;  %v6667_v50 = vrot.slane %v6665_v53, 5  ;;  %8513 = vmatpush3.bf16.msra.mxu1 %v5223_v58  ;;  %v6673_v22 = vshll.u32 %v6565_v43, 16  ;;  %v6679_v37 = vshll.u32 %v10557_v47, 16  ;;  %v8915_v57 = vld [vmem:[#allocation2 + $0x40] ss:$8 sps:$4 sm:$0xff]  }
 0x2b8   :  { %v6640_v0 = vsel %vm9218_vm1, %v6635_v46, %v6639_v7  ;;  %v6649_v6 = vrot.slane %v6648_v5, 4  ;;  %v6672_v39 = vrot.slane %v6670_v55, 4  ;;  %v6684_v40 = vshrl.u32 %v6567_v49, 16  ;;  %8871 = vmatprep.subr.msk.bf16.mxu1 %vm1964_vm11, %v10562_v21  ;;  %v10592_v8 = vld [vmem:[#allocation2 + $0x7c] sm:$0x1] }
 0x2b9   :  { %v7917_v27 = vcombine.low %v6626_v36, %v6640_v0  ;;  %v6662_v4 = vor.u32 %v6661_v44, %v6658_v25  ;;  %v6675_v31 = vrot.slane %v6673_v22, 5  ;;  %v6681_v45 = vrot.slane %v6679_v37, 5  ;;  %v8916_v25 = vld [vmem:[#allocation2 + $0x60] ss:$8 sps:$4 sm:$0xff]   ;;  %v10596_v22 = vld [vmem:[#allocation2 + $0x84] sm:$0x1] }
 0x2ba   :  { %v6654_v48 = vsel %vm9218_vm1, %v6649_v6, %v6653_v35  ;;  %8515 = vmatmul.mubr.msk.bf16.vlgmr.msra.gmra.mrb[32].mxu1 %vm1939_vm7, %v8913_v11  ;;  %v6686_v28 = vrot.slane %v6684_v40, 4  ;;  %v6687_v32 = vshll.u32 %v6567_v49, 16  ;;  %v6693_v13 = vshll.u32 %v10567_v41, 16  ;;  %v6577_v11 = vld [vmem:[#allocation2 + $0x80] sm:$0xf] }
 0x2bb   :  { %8587 = vmatmul.mubr.msk.bf16.vlgmr.msra.gmra.mrb[32].mxu0 %vm1939_vm7, %v7917_v27  ;;  %v6663_v14 = vrot.slane %v6662_v4, 4  ;;  %8518 = vmatprep.mubr.msk.bf16.mxu1 %vm1939_vm7, %v8914_v10  ;;  %v6676_v29 = vor.u32 %v6675_v31, %v6672_v39  ;;  %v6698_v12 = vshrl.u32 %v6569_v61, 16  ;;  %v6701_v52 = vshll.u32 %v6569_v61, 16  ;;  %v6579_v40 = vld [vmem:[#allocation2 + $0x88] sm:$0xf] }
 0x2bc   :  { %8603 = vmatpush3.bf16.msra.mxu0 %v7138_v23  ;;  %v6689_v26 = vrot.slane %v6687_v32, 5  ;;  %v6695_v59 = vrot.slane %v6693_v13, 5  ;;  %v6707_v51 = vshll.u32 %v10574_v42, 16  ;;  %v6712_v54 = vshrl.u32 %v6571_v15, 16  ;;  %v6575_v23 = vld [vmem:[#allocation2 + $0x78] sm:$0xf] }
 0x2bd   :  { %v6668_v7 = vsel %vm9218_vm1, %v6663_v14, %v6667_v50  ;;  %v6677_v63 = vrot.slane %v6676_v29, 4  ;;  %v6700_v19 = vrot.slane %v6698_v12, 4  ;;  %v6703_v18 = vrot.slane %v6701_v52, 5  ;;  %v6581_v52 = vld [vmem:[#allocation2 + $0x90] sm:$0xf] }
 0x2be   :  { %v7918_v3 = vcombine.low %v6654_v48, %v6668_v7  ;;  %v6690_v38 = vor.u32 %v6689_v26, %v6686_v28  ;;  %v6709_v43 = vrot.slane %v6707_v51, 5  ;;  %v6714_v2 = vrot.slane %v6712_v54, 4  ;;  %v10605_v28 = vld [vmem:[#allocation2 + $0x8c] sm:$0x1] }
 0x2bf   :  { %v6682_v16 = vsel %vm9218_vm1, %v6677_v63, %v6681_v45  ;;  %v6704_v35 = vor.u32 %v6703_v18, %v6700_v19  ;;  %v6715_v49 = vshll.u32 %v6571_v15, 16  ;;  %v6721_v36 = vshll.u32 %v10582_v9, 16 }
 0x2c0   :  { %8590 = vmatprep.mubr.msk.bf16.mxu0 %vm1939_vm7, %v7918_v3  ;;  %v6691_v53 = vrot.slane %v6690_v38, 4  ;;  %v6726_v46 = vshrl.u32 %v6573_v34, 16  ;;  %v6729_v5 = vshll.u32 %v6573_v34, 16  ;;  %v6735_v58 = vshll.u32 %v10587_v24, 16  ;;  %v10609_v34 = vld [vmem:[#allocation2 + $0x94] sm:$0x1] }
 0x2c1   :  { %v6705_v55 = vrot.slane %v6704_v35, 4  ;;  %v6717_v44 = vrot.slane %v6715_v49, 5  ;;  %v6723_v50 = vrot.slane %v6721_v36, 5  ;;  %v6740_v10 = vshrl.u32 %v6575_v23, 16  ;;  %v6583_v3 = vld [vmem:[#allocation2 + $0x98] sm:$0xf] }
 0x2c2   :  { %v6696_v37 = vsel %vm9218_vm1, %v6691_v53, %v6695_v59  ;;  %8519 = vmatmul.mubr.msk.bf16.gmra.mrb[36].mxu1 %vm1939_vm7, %v8915_v57  ;;  %v6728_v0 = vrot.slane %v6726_v46, 4  ;;  %v6731_v6 = vrot.slane %v6729_v5, 5  ;;  %v6737_v39 = vrot.slane %v6735_v58, 5  ;;  %v8918_v49 = vld [vmem:[#allocation2 + $0x80] ss:$8 sps:$4 sm:$0xff]  }
 0x2c3   :  { %v7919_v61 = vcombine.low %v6682_v16, %v6696_v37  ;;  %v6710_v27 = vsel %vm9218_vm1, %v6705_v55, %v6709_v43  ;;  %v6718_v4 = vor.u32 %v6717_v44, %v6714_v2  ;;  %8522 = vmatprep.mubr.msk.bf16.mxu1 %vm1939_vm7, %v8916_v25  ;;  %v6742_v31 = vrot.slane %v6740_v10, 4  ;;  %v6975_v10 = vld [vmem:[#allocation2 + $0x10] sm:$0xe] }
 0x2c4   :  { %v6732_v45 = vor.u32 %v6731_v6, %v6728_v0  ;;  %v6743_v15 = vshll.u32 %v6575_v23, 16  ;;  %v6749_v48 = vshll.u32 %v10592_v8, 16  ;;  %v6754_v32 = vshrl.u32 %v6577_v11, 16  ;;  %v8917_v23 = vld [vmem:[#allocation2 + $0x70] ss:$8 sps:$4 sm:$0xff]  }
 0x2c5   :  { %8591 = vmatmul.mubr.msk.bf16.gmra.mrb[36].mxu0 %vm1939_vm7, %v7919_v61  ;;  %v6719_v13 = vrot.slane %v6718_v4, 4  ;;  %v6757_v14 = vshll.u32 %v6577_v11, 16  ;;  %v6763_v29 = vshll.u32 %v10596_v22, 16  ;;  %v6768_v12 = vshrl.u32 %v6579_v40, 16  ;;  %v10624_v4 = vld [vmem:[#allocation2 + $0x9c] sm:$0x1] }
 0x2c6   :  { %v6733_v26 = vrot.slane %v6732_v45, 4  ;;  %v6745_v59 = vrot.slane %v6743_v15, 5  ;;  %v6751_v51 = vrot.slane %v6749_v48, 5  ;;  %v6756_v54 = vrot.slane %v6754_v32, 4  ;;  %v5338_v15 = vld [vmem:[#allocation2 + $0x10] sm:$0xf] }
 0x2c7   :  { %v6724_v7 = vsel %vm9218_vm1, %v6719_v13, %v6723_v50  ;;  %v6759_v63 = vrot.slane %v6757_v14, 5  ;;  %v6765_v19 = vrot.slane %v6763_v29, 5  ;;  %v6770_v18 = vrot.slane %v6768_v12, 4  ;;  %v8919_v29 = vld [vmem:[#allocation2 + $0x90] ss:$8 sps:$4 sm:$0xff]  }
 0x2c8   :  { %v7920_v38 = vcombine.low %v6710_v27, %v6724_v7  ;;  %v6738_v43 = vsel %vm9218_vm1, %v6733_v26, %v6737_v39  ;;  %v6746_v2 = vor.u32 %v6745_v59, %v6742_v31  ;;  %v6771_v57 = vshll.u32 %v6579_v40, 16  ;;  %v6976_v40 = vld [vmem:[#allocation2 + $0x18] sm:$0xe] }
 0x2c9   :  { %v6760_v16 = vor.u32 %v6759_v63, %v6756_v54  ;;  %v6777_v35 = vshll.u32 %v10605_v28, 16  ;;  %v6782_v36 = vshrl.u32 %v6581_v52, 16  ;;  %v6785_v25 = vshll.u32 %v6581_v52, 16 }
 0x2ca   :  { %8594 = vmatprep.mubr.msk.bf16.mxu0 %vm1939_vm7, %v7920_v38  ;;  %v6747_v53 = vrot.slane %v6746_v2, 4  ;;  %v6773_v46 = vrot.slane %v6771_v57, 5  ;;  %8523 = vmatmul.mubr.msk.bf16.gmra.mrb[40].mxu1 %vm1939_vm7, %v8917_v23  ;;  %v6791_v5 = vshll.u32 %v10609_v34, 16  ;;  %v6796_v58 = vshrl.u32 %v6583_v3, 16 }
 0x2cb   :  { %v6761_v11 = vrot.slane %v6760_v16, 4  ;;  %v6779_v55 = vrot.slane %v6777_v35, 5  ;;  %8526 = vmatprep.mubr.msk.bf16.mxu1 %vm1939_vm7, %v8918_v49  ;;  %v6784_v44 = vrot.slane %v6782_v36, 4  ;;  %v6787_v50 = vrot.slane %v6785_v25, 5 }
 0x2cc   :  { %v6752_v37 = vsel %vm9218_vm1, %v6747_v53, %v6751_v51  ;;  %v6774_v0 = vor.u32 %v6773_v46, %v6770_v18  ;;  %v6793_v6 = vrot.slane %v6791_v5, 5  ;;  %v6798_v39 = vrot.slane %v6796_v58, 4  ;;  %v5339_v51 = vld [vmem:[#allocation2 + $0x14] sm:$0x1]  ;;  %v5341_v18 = vld [vmem:[#allocation2 + $0x1c] sm:$0x1] }
 0x2cd   :  { %v7921_v61 = vcombine.low %v6738_v43, %v6752_v37  ;;  %v6766_v27 = vsel %vm9218_vm1, %v6761_v11, %v6765_v19  ;;  %v6788_v31 = vor.u32 %v6787_v50, %v6784_v44  ;;  %v6799_v45 = vshll.u32 %v6583_v3, 16  ;;  %v5340_v19 = vld [vmem:[#allocation2 + $0x18] sm:$0xf]  ;;  %v6978_v46 = vld [vmem:[#allocation2 + $0x28] sm:$0xe] }
 0x2ce   :  { %v6775_v48 = vrot.slane %v6774_v0, 4  ;;  %v6805_v32 = vshll.u32 %v10624_v4, 16  ;;  %v7932_v13 = vrot.slane %v6975_v10, 9  ;;  %v7025_v14 = vrot.slane %v10518_v56, 5  ;;  %v6979_v44 = vld [vmem:[#allocation2 + $0x30] sm:$0xe] }
 0x2cf   :  { %8595 = vmatmul.mubr.msk.bf16.gmra.mrb[40].mxu0 %vm1939_vm7, %v7921_v61  ;;  %v6789_v12 = vrot.slane %v6788_v31, 4  ;;  %v6801_v52 = vrot.slane %v6799_v45, 5  ;;  %v7933_v26 = vrot.slane %v6976_v40, 9  ;;  %v7029_v59 = vrot.slane %v10524_v62, 5  ;;  %v6977_v62 = vld [vmem:[#allocation2 + $0x20] sm:$0xe] }
 0x2d0   :  { %v6780_v54 = vsel %vm9218_vm1, %v6775_v48, %v6779_v55  ;;  %v6807_v7 = vrot.slane %v6805_v32, 5  ;;  %v7026_v63 = vsel %vm9585_vm6, %v7932_v13, %v7025_v14  ;;  %v5371_v3 = vshrl.u32 %v5338_v15, 16  ;;  %v5342_v31 = vld [vmem:[#allocation2 + $0x20] sm:$0xf] }
 0x2d1   :  { %v7922_v56 = vcombine.low %v6766_v27, %v6780_v54  ;;  %v6794_v38 = vsel %vm9218_vm1, %v6789_v12, %v6793_v6  ;;  %v6802_v43 = vor.u32 %v6801_v52, %v6798_v39  ;;  %v7030_v2 = vsel %vm9585_vm6, %v7933_v26, %v7029_v59  ;;  %v6980_v6 = vld [vmem:[#allocation2 + $0x38] sm:$0xe]  ;;  %v5343_v12 = vld [vmem:[#allocation2 + $0x24] sm:$0x1]  ;;  %v5345_v54 = vld [vmem:[#allocation2 + $0x2c] sm:$0x1] }
 0x2d2   :  { %v7948_v57 = vcombine.low %v7026_v63, %v7030_v2  ;;  %8527 = vmatmul.mubr.msk.bf16.gmra.mrb[44].mxu1 %vm1939_vm7, %v8919_v29  ;;  %v5373_v23 = vrot.slane %v5371_v3, 4  ;;  %v5374_v16 = vshll.u32 %v5338_v15, 16  ;;  %v5380_v35 = vshll.u32 %v5339_v51, 16  ;;  %v5346_v63 = vld [vmem:[#allocation2 + $0x30] sm:$0xf] }
 0x2d3   :  { %8598 = vmatprep.mubr.msk.bf16.mxu0 %vm1939_vm7, %v7922_v56  ;;  %v6803_v49 = vrot.slane %v6802_v43, 4  ;;  %v5385_v36 = vshrl.u32 %v5340_v19, 16  ;;  %v5388_v25 = vshll.u32 %v5340_v19, 16  ;;  %v5394_v53 = vshll.u32 %v5341_v18, 16 }
 0x2d4   :  { %v5376_v5 = vrot.slane %v5374_v16, 5  ;;  %v5382_v58 = vrot.slane %v5380_v35, 5  ;;  %v7934_v11 = vrot.slane %v6977_v62, 9  ;;  %v7033_v55 = vrot.slane %v10529_v33, 5 }
 0x2d5   :  { %v6808_v50 = vsel %vm9218_vm1, %v6803_v49, %v6807_v7  ;;  %v5387_v10 = vrot.slane %v5385_v36, 4  ;;  %v5390_v37 = vrot.slane %v5388_v25, 5  ;;  %v5396_v0 = vrot.slane %v5394_v53, 5  ;;  %v5349_v49 = vld [vmem:[#allocation2 + $0x3c] sm:$0x1] }
 0x2d6   :  { %v7923_v39 = vcombine.low %v6794_v38, %v6808_v50  ;;  %v5377_v40 = vor.u32 %v5376_v5, %v5373_v23  ;;  %v7034_v61 = vsel %vm9585_vm6, %v7934_v11, %v7033_v55  ;;  %v7935_v27 = vrot.slane %v6978_v46, 9  ;;  %v5347_v38 = vld [vmem:[#allocation2 + $0x34] sm:$0x1]  ;;  %v5348_v23 = vld [vmem:[#allocation2 + $0x38] sm:$0xf] }
 0x2d7   :  { %v5391_v45 = vor.u32 %v5390_v37, %v5387_v10  ;;  %v7037_v15 = vrot.slane %v10537_v20, 5  ;;  %v7936_v48 = vrot.slane %v6979_v44, 9  ;;  %v7041_v33 = vrot.slane %v10544_v1, 5  ;;  %v5344_v1 = vld [vmem:[#allocation2 + $0x28] sm:$0xf] }
 0x2d8   :  { %8599 = vmatmul.mubr.msk.bf16.gmra.mrb[44].mxu0 %vm1939_vm7, %v7923_v39  ;;  %v5378_v32 = vrot.slane %v5377_v40, 4  ;;  %v7937_v13 = vrot.slane %v6980_v6, 9  ;;  %v7045_v14 = vrot.slane %v10552_v30, 5  ;;  %v5645_v29 = vsel %vm1964_vm11, %v10562_v21, 0  ;;  %v6981_v11 = vld [vmem:[#allocation2 + $0x40] sm:$0xe] }
 0x2d9   :  { %8604 = vmatprep.mubr.msk.bf16.mxu0 %vm1939_vm7, %v7948_v57  ;;  %v5392_v52 = vrot.slane %v5391_v45, 4  ;;  %v7038_v26 = vsel %vm9585_vm6, %v7935_v27, %v7037_v15  ;;  %v7042_v20 = vsel %vm9585_vm6, %v7936_v48, %v7041_v33  ;;  %8531 = vmatpush3.bf16.msra.mxu1 %v5645_v29  ;;  %v5399_v59 = vshrl.u32 %v5342_v31, 16  ;;  %v6982_v40 = vld [vmem:[#allocation2 + $0x48] sm:$0xe]  ;;  %v6983_v15 = vld [vmem:[#allocation2 + $0x60] sm:$0xe] }
 0x2da   :  { %v5383_v51 = vsel %vm9218_vm1, %v5378_v32, %v5382_v58  ;;  %v7949_v30 = vcombine.low %v7034_v61, %v7038_v26  ;;  %v7046_v21 = vsel %vm9585_vm6, %v7937_v13, %v7045_v14  ;;  %v5402_v7 = vshll.u32 %v5342_v31, 16  ;;  %v6984_v26 = vld [vmem:[#allocation2 + $0x68] sm:$0xe] }
 0x2db   :  { %v5397_v19 = vsel %vm9218_vm1, %v5392_v52, %v5396_v0  ;;  %v7950_v18 = vcombine.low %v7042_v20, %v7046_v21  ;;  %v5401_v3 = vrot.slane %v5399_v59, 4  ;;  %v5408_v56 = vshll.u32 %v5343_v12, 16  ;;  %v5351_v21 = vld [vmem:[#allocation2 + $0x44] sm:$0x1] }
 0x2dc   :  { %v7852_v43 = vcombine.low %v5383_v51, %v5397_v19  ;;  %v5404_v2 = vrot.slane %v5402_v7, 5  ;;  %v5413_v62 = vshrl.u32 %v5344_v1, 16  ;;  %v5416_v57 = vshll.u32 %v5344_v1, 16 }
 0x2dd   :  { %v5410_v16 = vrot.slane %v5408_v56, 5  ;;  %v5422_v35 = vshll.u32 %v5345_v54, 16  ;;  %v5427_v36 = vshrl.u32 %v5346_v63, 16  ;;  %v5430_v25 = vshll.u32 %v5346_v63, 16  ;;  %v5352_v63 = vld [vmem:[#allocation2 + $0x48] sm:$0xf] }
 0x2de   :  { %8532 = vmatprep.mubr.msk.bf16.mxu1 %vm1939_vm7, %v7852_v43  ;;  %v5405_v53 = vor.u32 %v5404_v2, %v5401_v3  ;;  %v5415_v46 = vrot.slane %v5413_v62, 4  ;;  %v5418_v5 = vrot.slane %v5416_v57, 5  ;;  %v5436_v58 = vshll.u32 %v5347_v38, 16  ;;  %v5353_v43 = vld [vmem:[#allocation2 + $0x4c] sm:$0x1] }
 0x2df   :  { %v5424_v55 = vrot.slane %v5422_v35, 5  ;;  %v5429_v44 = vrot.slane %v5427_v36, 4  ;;  %v5432_v50 = vrot.slane %v5430_v25, 5  ;;  %v5441_v10 = vshrl.u32 %v5348_v23, 16 }
 0x2e0   :  { %8605 = vmatmul.mubr.msk.bf16.vlgmr.msra.gmra.mrb[32].mxu0 %vm1939_vm7, %v7949_v30  ;;  %v5406_v37 = vrot.slane %v5405_v53, 4  ;;  %v5419_v0 = vor.u32 %v5418_v5, %v5415_v46  ;;  %v5438_v6 = vrot.slane %v5436_v58, 5  ;;  %v5444_v39 = vshll.u32 %v5348_v23, 16  ;;  %v5350_v30 = vld [vmem:[#allocation2 + $0x40] sm:$0xf] }
 0x2e1   :  { %8608 = vmatprep.mubr.msk.bf16.mxu0 %vm1939_vm7, %v7950_v18  ;;  %v5433_v61 = vor.u32 %v5432_v50, %v5429_v44  ;;  %v5443_v27 = vrot.slane %v5441_v10, 4  ;;  %v5450_v31 = vshll.u32 %v5349_v49, 16  ;;  %v7938_v45 = vrot.slane %v6981_v11, 9  ;;  %v5355_v49 = vld [vmem:[#allocation2 + $0x64] sm:$0x1] }
 0x2e2   :  { %v5411_v48 = vsel %vm9218_vm1, %v5406_v37, %v5410_v16  ;;  %v5420_v33 = vrot.slane %v5419_v0, 4  ;;  %v5446_v32 = vrot.slane %v5444_v39, 5  ;;  %v7049_v13 = vrot.slane %v10557_v47, 5  ;;  %v5356_v5 = vld [vmem:[#allocation2 + $0x68] sm:$0xf] }
 0x2e3   :  { %v5434_v14 = vrot.slane %v5433_v61, 4  ;;  %v5452_v29 = vrot.slane %v5450_v31, 5  ;;  %v7939_v12 = vrot.slane %v6982_v40, 9  ;;  %v7053_v52 = vrot.slane %v10567_v41, 5  ;;  %v5357_v10 = vld [vmem:[#allocation2 + $0x6c] sm:$0x1] }
 0x2e4   :  { %v5425_v20 = vsel %vm9218_vm1, %v5420_v33, %v5424_v55  ;;  %v5447_v1 = vor.u32 %v5446_v32, %v5443_v27  ;;  %v7050_v59 = vsel %vm9585_vm6, %v7938_v45, %v7049_v13  ;;  %v7940_v51 = vrot.slane %v6983_v15, 9  ;;  %v6985_v31 = vld [vmem:[#allocation2 + $0x70] sm:$0xe]  ;;  %v6986_v32 = vld [vmem:[#allocation2 + $0x78] sm:$0xe] }
 0x2e5   :  { %v7853_v54 = vcombine.low %v5411_v48, %v5425_v20  ;;  %v5439_v47 = vsel %vm9218_vm1, %v5434_v14, %v5438_v6  ;;  %v7054_v7 = vsel %vm9585_vm6, %v7939_v12, %v7053_v52  ;;  %v7057_v41 = vrot.slane %v10574_v42, 5 }
 0x2e6   :  { %v5448_v19 = vrot.slane %v5447_v1, 4  ;;  %v7951_v18 = vcombine.low %v7050_v59, %v7054_v7  ;;  %v7941_v3 = vrot.slane %v6984_v26, 9  ;;  %v7061_v56 = vrot.slane %v10582_v9, 5  ;;  %v5354_v9 = vld [vmem:[#allocation2 + $0x60] sm:$0xf] }
 0x2e7   :  { %8533 = vmatmul.mubr.msk.bf16.vlgmr.msra.gmra.mrb[32].mxu1 %vm1939_vm7, %v7853_v54  ;;  %v7058_v38 = vsel %vm9585_vm6, %v7940_v51, %v7057_v41  ;;  %v5455_v2 = vshrl.u32 %v5350_v30, 16  ;;  %v5458_v62 = vshll.u32 %v5350_v30, 16  ;;  %v5464_v57 = vshll.u32 %v5351_v21, 16  ;;  %v6987_v59 = vld [vmem:[#allocation2 + $0x80] sm:$0xe] }
 0x2e8   :  { %v5453_v23 = vsel %vm9218_vm1, %v5448_v19, %v5452_v29  ;;  %8609 = vmatmul.mubr.msk.bf16.gmra.mrb[36].mxu0 %vm1939_vm7, %v7951_v18  ;;  %v7062_v42 = vsel %vm9585_vm6, %v7941_v3, %v7061_v56  ;;  %v5469_v16 = vshrl.u32 %v5352_v63, 16  ;;  %v5472_v35 = vshll.u32 %v5352_v63, 16  ;;  %v6988_v51 = vld [vmem:[#allocation2 + $0x88] sm:$0xe]  ;;  %v5358_v7 = vld [vmem:[#allocation2 + $0x70] sm:$0xf] }
 0x2e9   :  { %v7854_v36 = vcombine.low %v5439_v47, %v5453_v23  ;;  %v7952_v25 = vcombine.low %v7058_v38, %v7062_v42  ;;  %v5457_v53 = vrot.slane %v5455_v2, 4  ;;  %v5460_v46 = vrot.slane %v5458_v62, 5  ;;  %v5360_v23 = vld [vmem:[#allocation2 + $0x78] sm:$0xf] }
 0x2ea   :  { %v5466_v58 = vrot.slane %v5464_v57, 5  ;;  %v5471_v11 = vrot.slane %v5469_v16, 4  ;;  %v5474_v55 = vrot.slane %v5472_v35, 5  ;;  %v5478_v44 = vshll.u32 %v5353_v43, 16  ;;  %v5359_v43 = vld [vmem:[#allocation2 + $0x74] sm:$0x1] }
 0x2eb   :  { %8536 = vmatprep.mubr.msk.bf16.mxu1 %vm1939_vm7, %v7854_v36  ;;  %8612 = vmatprep.mubr.msk.bf16.mxu0 %vm1939_vm7, %v7952_v25  ;;  %v5461_v50 = vor.u32 %v5460_v46, %v5457_v53  ;;  %v5483_v37 = vshrl.u32 %v5354_v9, 16  ;;  %v5486_v0 = vshll.u32 %v5354_v9, 16  ;;  %v5492_v6 = vshll.u32 %v5355_v49, 16  ;;  %v5361_v35 = vld [vmem:[#allocation2 + $0x7c] sm:$0x1] }
 0x2ec   :  { %v5475_v39 = vor.u32 %v5474_v55, %v5471_v11  ;;  %v5480_v40 = vrot.slane %v5478_v44, 5  ;;  %v5497_v61 = vshrl.u32 %v5356_v5, 16  ;;  %v5500_v27 = vshll.u32 %v5356_v5, 16  ;;  %v5362_v49 = vld [vmem:[#allocation2 + $0x80] sm:$0xf] }
 0x2ed   :  { %v5462_v45 = vrot.slane %v5461_v50, 4  ;;  %v5485_v15 = vrot.slane %v5483_v37, 4  ;;  %v5488_v48 = vrot.slane %v5486_v0, 5  ;;  %v5494_v33 = vrot.slane %v5492_v6, 5  ;;  %v5363_v5 = vld [vmem:[#allocation2 + $0x84] sm:$0x1] }
 0x2ee   :  { %v5476_v13 = vrot.slane %v5475_v39, 4  ;;  %v5499_v14 = vrot.slane %v5497_v61, 4  ;;  %v5502_v29 = vrot.slane %v5500_v27, 5  ;;  %v5506_v12 = vshll.u32 %v5357_v10, 16  ;;  %v5364_v44 = vld [vmem:[#allocation2 + $0x88] sm:$0xf] }
 0x2ef   :  { %v5467_v52 = vsel %vm9218_vm1, %v5462_v45, %v5466_v58  ;;  %v5489_v26 = vor.u32 %v5488_v48, %v5485_v15  ;;  %v7942_v20 = vrot.slane %v6985_v31, 9  ;;  %v7065_v1 = vrot.slane %v10587_v24, 5  ;;  %v5365_v37 = vld [vmem:[#allocation2 + $0x8c] sm:$0x1]  ;;  %v6989_v31 = vld [vmem:[#allocation2 + $0x90] sm:$0xe] }
 0x2f0   :  { %v5481_v30 = vsel %vm9218_vm1, %v5476_v13, %v5480_v40  ;;  %v5503_v21 = vor.u32 %v5502_v29, %v5499_v14  ;;  %v5508_v54 = vrot.slane %v5506_v12, 5  ;;  %v7943_v47 = vrot.slane %v6986_v32, 9  ;;  %v6990_v12 = vld [vmem:[#allocation2 + $0x98] sm:$0xe] }
 0x2f1   :  { %v7855_v41 = vcombine.low %v5467_v52, %v5481_v30  ;;  %v5490_v63 = vrot.slane %v5489_v26, 4  ;;  %v7066_v19 = vsel %vm9585_vm6, %v7942_v20, %v7065_v1  ;;  %v7069_v18 = vrot.slane %v10592_v8, 5 }
 0x2f2   :  { %v5504_v3 = vrot.slane %v5503_v21, 4  ;;  %v7944_v56 = vrot.slane %v6987_v59, 9  ;;  %v7073_v24 = vrot.slane %v10596_v22, 5  ;;  %v7945_v38 = vrot.slane %v6988_v51, 9  ;;  %v5366_v59 = vld [vmem:[#allocation2 + $0x90] sm:$0xf] }
 0x2f3   :  { %8537 = vmatmul.mubr.msk.bf16.gmra.mrb[36].mxu1 %vm1939_vm7, %v7855_v41  ;;  %v5495_v2 = vsel %vm9218_vm1, %v5490_v63, %v5494_v33  ;;  %v7070_v62 = vsel %vm9585_vm6, %v7943_v47, %v7069_v18  ;;  %v7077_v57 = vrot.slane %v10605_v28, 5  ;;  %v5511_v42 = vshrl.u32 %v5358_v7, 16 }
 0x2f4   :  { %v5509_v8 = vsel %vm9218_vm1, %v5504_v3, %v5508_v54  ;;  %v7953_v16 = vcombine.low %v7066_v19, %v7070_v62  ;;  %v7074_v22 = vsel %vm9585_vm6, %v7944_v56, %v7073_v24  ;;  %v5514_v9 = vshll.u32 %v5358_v7, 16  ;;  %v5367_v7 = vld [vmem:[#allocation2 + $0x94] sm:$0x1]  ;;  %v5369_v62 = vld [vmem:[#allocation2 + $0x9c] sm:$0x1] }
 0x2f5   :  { %v7856_v36 = vcombine.low %v5495_v2, %v5509_v8  ;;  %v7078_v25 = vsel %vm9585_vm6, %v7945_v38, %v7077_v57  ;;  %v5513_v53 = vrot.slane %v5511_v42, 4  ;;  %v5520_v46 = vshll.u32 %v5359_v43, 16  ;;  %v5368_v2 = vld [vmem:[#allocation2 + $0x98] sm:$0xf] }
 0x2f6   :  { %8613 = vmatmul.mubr.msk.bf16.gmra.mrb[40].mxu0 %vm1939_vm7, %v7953_v16  ;;  %v7954_v28 = vcombine.low %v7074_v22, %v7078_v25  ;;  %v5516_v58 = vrot.slane %v5514_v9, 5  ;;  %v5525_v11 = vshrl.u32 %v5360_v23, 16  ;;  %v5528_v55 = vshll.u32 %v5360_v23, 16 }
 0x2f7   :  { %8540 = vmatprep.mubr.msk.bf16.mxu1 %vm1939_vm7, %v7856_v36  ;;  %v5522_v50 = vrot.slane %v5520_v46, 5  ;;  %v5534_v10 = vshll.u32 %v5361_v35, 16  ;;  %v5539_v0 = vshrl.u32 %v5362_v49, 16  ;;  %v5542_v6 = vshll.u32 %v5362_v49, 16 }
 0x2f8   :  { %8616 = vmatprep.mubr.msk.bf16.mxu0 %vm1939_vm7, %v7954_v28  ;;  %v5517_v39 = vor.u32 %v5516_v58, %v5513_v53  ;;  %v5527_v40 = vrot.slane %v5525_v11, 4  ;;  %v5530_v61 = vrot.slane %v5528_v55, 5  ;;  %v5548_v27 = vshll.u32 %v5363_v5, 16 }
 0x2f9   :  { %v5536_v45 = vrot.slane %v5534_v10, 5  ;;  %v5541_v15 = vrot.slane %v5539_v0, 4  ;;  %v5544_v48 = vrot.slane %v5542_v6, 5  ;;  %v5553_v33 = vshrl.u32 %v5364_v44, 16 }
 0x2fa   :  { %v5518_v32 = vrot.slane %v5517_v39, 4  ;;  %v5531_v13 = vor.u32 %v5530_v61, %v5527_v40  ;;  %v5550_v14 = vrot.slane %v5548_v27, 5  ;;  %v5556_v29 = vshll.u32 %v5364_v44, 16 }
 0x2fb   :  { %v5545_v52 = vor.u32 %v5544_v48, %v5541_v15  ;;  %v5555_v26 = vrot.slane %v5553_v33, 4  ;;  %v5562_v20 = vshll.u32 %v5365_v37, 16  ;;  %v7946_v1 = vrot.slane %v6989_v31, 9  ;;  %v10713_v51 = vpop.f32.mrb[16].mxu0 }
 0x2fc   :  { %v5523_v30 = vsel %vm9218_vm1, %v5518_v32, %v5522_v50  ;;  %v5532_v21 = vrot.slane %v5531_v13, 4  ;;  %v5558_v54 = vrot.slane %v5556_v29, 5  ;;  %v7081_v47 = vrot.slane %v10609_v34, 5  ;;  %v10718_v41 = vpop.f32.mrb[17].mxu0 }
 0x2fd   :  { %v5546_v63 = vrot.slane %v5545_v52, 4  ;;  %v5564_v19 = vrot.slane %v5562_v20, 5  ;;  %v7947_v18 = vrot.slane %v6990_v12, 9  ;;  %v7085_v3 = vrot.slane %v10624_v4, 5  ;;  %v10721_v56 = vpop.f32.mrb[18].mxu0 }
 0x2fe   :  { %v5537_v24 = vsel %vm9218_vm1, %v5532_v21, %v5536_v45  ;;  %v5559_v38 = vor.u32 %v5558_v54, %v5555_v26  ;;  %v7082_v43 = vsel %vm9585_vm6, %v7946_v1, %v7081_v47  ;;  %v5567_v34 = vshrl.u32 %v5366_v59, 16  ;;  %v10727_v57 = vpop.f32.mrb[19].mxu0 }
 0x2ff   :  { %v7857_v23 = vcombine.low %v5523_v30, %v5537_v24  ;;  %v5551_v42 = vsel %vm9218_vm1, %v5546_v63, %v5550_v14  ;;  %v7086_v4 = vsel %vm9585_vm6, %v7947_v18, %v7085_v3  ;;  %v5570_v8 = vshll.u32 %v5366_v59, 16 }
 0x300   :  { %v5560_v16 = vrot.slane %v5559_v38, 4  ;;  %v7955_v22 = vcombine.low %v7082_v43, %v7086_v4  ;;  %v5569_v35 = vrot.slane %v5567_v34, 4  ;;  %v5576_v9 = vshll.u32 %v5367_v7, 16 }
 0x301   :  { %8541 = vmatmul.mubr.msk.bf16.gmra.mrb[40].mxu1 %vm1939_vm7, %v7857_v23  ;;  %v5572_v49 = vrot.slane %v5570_v8, 5  ;;  %v5581_v36 = vshrl.u32 %v5368_v2, 16  ;;  %v5584_v25 = vshll.u32 %v5368_v2, 16  ;;  %v5590_v53 = vshll.u32 %v5369_v62, 16 }
 0x302   :  { %v5565_v46 = vsel %vm9218_vm1, %v5560_v16, %v5564_v19  ;;  %8617 = vmatmul.mubr.msk.bf16.gmra.mrb[44].mxu0 %vm1939_vm7, %v7955_v22  ;;  %v10737_v5 = vpop.f32.mrb[16].mxu1  ;;  %v5578_v44 = vrot.slane %v5576_v9, 5  ;;  %v4515_v50 = vmul.f32 %v10713_v51, %v10713_v51  ;;  %v4513_v40 = vmul.f32 %v10718_v41, %v10718_v41 }
 0x303   :  { %v7858_v17 = vcombine.low %v5551_v42, %v5565_v46  ;;  %v5573_v28 = vor.u32 %v5572_v49, %v5569_v35  ;;  %v5583_v58 = vrot.slane %v5581_v36, 4  ;;  %v5586_v11 = vrot.slane %v5584_v25, 5  ;;  %v10739_v55 = vpop.f32.mrb[17].mxu1 }
 0x304   :  { %v10743_v10 = vpop.f32.mrb[18].mxu1  ;;  %v10745_v37 = vpop.f32.mrb[20].mxu0  ;;  %v5592_v39 = vrot.slane %v5590_v53, 5  ;;  %v4475_v31 = vsel %vm2882_vm8, %v10718_v41, 0.0  ;;  %v8050_v45 = vpack.c.bf16 %v10713_v51, %v10713_v51  ;;  %v4476_v15 = vsel %vm2882_vm8, %v10727_v57, 0.0 }
 0x305   :  { %8544 = vmatprep.mubr.msk.bf16.mxu1 %vm1939_vm7, %v7858_v17  ;;  %v5574_v0 = vrot.slane %v5573_v28, 4  ;;  %v5587_v6 = vor.u32 %v5586_v11, %v5583_v58  ;;  %v10750_v61 = vpop.f32.mrb[19].mxu1  ;;  %v10752_v27 = vpop.f32.mrb[21].mxu0  ;;  %v4514_v48 = vmul.f32 %v10727_v57, %v10727_v57  ;;  %v4516_v14 = vmul.f32 %v10721_v56, %v10721_v56 }
 0x306   :  { %v10762_v33 = vpop.f32.mrb[22].mxu0  ;;  %v4477_v29 = vadd.f32 %v4476_v15, %v4475_v31  ;;  %v4478_v52 = vsel %vm2882_vm8, %v10713_v51, 0.0  ;;  %v4529_v26 = vsel %vm2882_vm8, %v4513_v40, 0.0  ;;  %4414 = vrot.lane.b32.xlu1 %v8050_v45, %s9044_s28  ;;  %v8048_v1 = vpack.c.bf16 %v10718_v41, %v10718_v41 }
 0x307   :  { %v5579_v32 = vsel %vm9218_vm1, %v5574_v0, %v5578_v44  ;;  %v5588_v13 = vrot.slane %v5587_v6, 4  ;;  %v10768_v12 = vpop.f32.mrb[23].mxu0  ;;  %v4530_v20 = vsel %vm2882_vm8, %v4514_v48, 0.0  ;;  %v4532_v47 = vsel %vm2882_vm8, %v4515_v50, 0.0 }
 0x308   :  { %v4479_v30 = vadd.f32 %v4478_v52, %v4477_v29  ;;  %v4531_v21 = vadd.f32 %v4530_v20, %v4529_v26  ;;  %4410 = vrot.lane.b32.xlu0 %v8048_v1, %s9044_s28  ;;  %v2923_v51 = vmul.f32 %v10737_v5, %v10737_v5  ;;  %v8051_v7 = vpack.c.bf16 %v10721_v56, %v10721_v56 }
 0x309   :  { %v5593_v59 = vsel %vm9218_vm1, %v5588_v13, %v5592_v39  ;;  %v4480_v63 = vsel %vm2882_vm8, %v10721_v56, 0.0  ;;  %v4534_v41 = vsel %vm2882_vm8, %v4516_v14, 0.0  ;;  %v2921_v19 = vmul.f32 %v10739_v55, %v10739_v55 }
 0x30a   :  { %v7859_v54 = vcombine.low %v5579_v32, %v5593_v59  ;;  %v4533_v60 = vadd.f32 %v4532_v47, %v4531_v21  ;;  %v2851_v18 = vpack.c.bf16 %v10737_v5, %v10737_v5  ;;  %v2886_v3 = vsel %vm2882_vm8, %v10737_v5, 0.0  ;;  %4416 = vrot.lane.b32.xlu1 %v8051_v7, %s9044_s28 }
 0x30b   :  { %v2849_v24 = vpack.c.bf16 %v10739_v55, %v10739_v55  ;;  %v8049_v56 = vpack.c.bf16 %v10727_v57, %v10727_v57  ;;  %v2940_v38 = vsel %vm2882_vm8, %v2923_v51, 0.0  ;;  %v2883_v43 = vsel %vm2882_vm8, %v10739_v55, 0.0 }
 0x30c   :  { %8545 = vmatmul.mubr.msk.bf16.gmra.mrb[44].mxu1 %vm1939_vm7, %v7859_v54  ;;  %v2852_v2 = vpack.c.bf16 %v10743_v10, %v10743_v10  ;;  %v2888_v62 = vsel %vm2882_vm8, %v10743_v10, 0.0  ;;  %v2924_v34 = vmul.f32 %v10743_v10, %v10743_v10  ;;  %v2884_v23 = vsel %vm2882_vm8, %v10750_v61, 0.0 }
 0x30d   :  { %4412 = vrot.lane.b32.xlu0 %v8049_v56, %s9044_s28  ;;  %v2922_v57 = vmul.f32 %v10750_v61, %v10750_v61  ;;  %v4481_v42 = vadd.f32 %v4480_v63, %v4479_v30  ;;  %v2937_v4 = vsel %vm2882_vm8, %v2921_v19, 0.0  ;;  %v2885_v8 = vadd.f32 %v2884_v23, %v2883_v43 }
 0x30e   :  { %v4482_v16 = vsel %vm2882_vm8, %v10752_v27, 0.0  ;;  %v4517_v22 = vmul.f32 %v10752_v27, %v10752_v27  ;;  %v4519_v35 = vmul.f32 %v10745_v37, %v10745_v37  ;;  %v4535_v36 = vadd.f32 %v4534_v41, %v4533_v60 }
 0x30f   :  { %v2938_v9 = vsel %vm2882_vm8, %v2922_v57, 0.0  ;;  %v4483_v49 = vadd.f32 %v4482_v16, %v4481_v42  ;;  %v4486_v53 = vsel %vm2882_vm8, %v10745_v37, 0.0  ;;  %v2887_v46 = vadd.f32 %v2886_v3, %v2885_v8 }
 0x310   :  { %v10822_v25 = vpop.f32.mrb[20].mxu1  ;;  %v2939_v17 = vadd.f32 %v2938_v9, %v2937_v4  ;;  %v4536_v28 = vsel %vm2882_vm8, %v4517_v22, 0.0  ;;  %v4484_v50 = vsel %vm2882_vm8, %v10768_v12, 0.0  ;;  %v4518_v0 = vmul.f32 %v10768_v12, %v10768_v12 }
 0x311   :  { %v10827_v58 = vpop.f32.mrb[21].mxu1  ;;  %v10829_v11 = vpop.f32.mrb[24].mxu0  ;;  %v4537_v44 = vadd.f32 %v4536_v28, %v4535_v36  ;;  %v8054_v6 = vpack.c.bf16 %v10745_v37, %v10745_v37  ;;  %v4520_v45 = vmul.f32 %v10762_v33, %v10762_v33  ;;  %v4485_v15 = vadd.f32 %v4484_v50, %v4483_v49 }
 0x312   :  { %v10837_v39 = vpop.f32.mrb[22].mxu1  ;;  %v10839_v40 = vpop.f32.mrb[25].mxu0  ;;  %v2941_v31 = vadd.f32 %v2940_v38, %v2939_v17  ;;  %v8055_v48 = vpack.c.bf16 %v10762_v33, %v10762_v33  ;;  %v2942_v14 = vsel %vm2882_vm8, %v2924_v34, 0.0  ;;  %v4540_v37 = vsel %vm2882_vm8, %v4519_v35, 0.0 }
 0x313   :  { %v10845_v32 = vpop.f32.mrb[23].mxu1  ;;  %v10847_v13 = vpop.f32.mrb[26].mxu0  ;;  %v2850_v29 = vpack.c.bf16 %v10750_v61, %v10750_v61  ;;  %v4538_v52 = vsel %vm2882_vm8, %v4518_v0, 0.0  ;;  %4422 = vrot.lane.b32.xlu0 %v8054_v6, %s9044_s28  ;;  %v4487_v20 = vadd.f32 %v4486_v53, %v4485_v15  ;;  %v2927_v59 = vmul.f32 %v10822_v25, %v10822_v25 }
 0x314   :  { %v10855_v26 = vpop.f32.mrb[27].mxu0  ;;  %v4539_v1 = vadd.f32 %v4538_v52, %v4537_v44  ;;  %4424 = vrot.lane.b32.xlu1 %v8055_v48, %s9044_s28  ;;  %v2889_v30 = vadd.f32 %v2888_v62, %v2887_v46  ;;  %v4488_v21 = vsel %vm2882_vm8, %v10762_v33, 0.0  ;;  %v2890_v54 = vsel %vm2882_vm8, %v10827_v58, 0.0 }
 0x315   :  { %v2925_v47 = vmul.f32 %v10827_v58, %v10827_v58  ;;  %v2943_v51 = vadd.f32 %v2942_v14, %v2941_v31  ;;  %v4542_v7 = vsel %vm2882_vm8, %v4520_v45, 0.0  ;;  %v8052_v60 = vpack.c.bf16 %v10752_v27, %v10752_v27 }
 0x316   :  { %v4541_v63 = vadd.f32 %v4540_v37, %v4539_v1  ;;  %v2891_v41 = vadd.f32 %v2890_v54, %v2889_v30  ;;  %v2855_v19 = vpack.c.bf16 %v10822_v25, %v10822_v25  ;;  %v2894_v33 = vsel %vm2882_vm8, %v10822_v25, 0.0 }
 0x317   :  { %v2853_v3 = vpack.c.bf16 %v10827_v58, %v10827_v58  ;;  %v2944_v56 = vsel %vm2882_vm8, %v2925_v47, 0.0  ;;  %v2948_v38 = vsel %vm2882_vm8, %v2927_v59, 0.0  ;;  %4418 = vrot.lane.b32.xlu0 %v8052_v60, %s9044_s28  ;;  %v2856_v62 = vpack.c.bf16 %v10837_v39, %v10837_v39 }
 0x318   :  { %v2945_v43 = vadd.f32 %v2944_v56, %v2943_v51  ;;  %v8053_v27 = vpack.c.bf16 %v10768_v12, %v10768_v12  ;;  %v2896_v34 = vsel %vm2882_vm8, %v10837_v39, 0.0  ;;  %v2892_v23 = vsel %vm2882_vm8, %v10845_v32, 0.0 }
 0x319   :  { %v2926_v57 = vmul.f32 %v10845_v32, %v10845_v32  ;;  %v4489_v42 = vadd.f32 %v4488_v21, %v4487_v20  ;;  %v2928_v4 = vmul.f32 %v10837_v39, %v10837_v39  ;;  %v2893_v8 = vadd.f32 %v2892_v23, %v2891_v41 }
 0x31a   :  { %4420 = vrot.lane.b32.xlu1 %v8053_v27, %s9044_s28  ;;  %v4490_v16 = vsel %vm2882_vm8, %v10839_v40, 0.0  ;;  %v4521_v12 = vmul.f32 %v10839_v40, %v10839_v40  ;;  %v4523_v22 = vmul.f32 %v10829_v11, %v10829_v11  ;;  %v4543_v49 = vadd.f32 %v4542_v7, %v4541_v63 }
 0x31b   :  { %v2946_v35 = vsel %vm2882_vm8, %v2926_v57, 0.0  ;;  %v4491_v9 = vadd.f32 %v4490_v16, %v4489_v42  ;;  %v4494_v53 = vsel %vm2882_vm8, %v10829_v11, 0.0  ;;  %v2895_v46 = vadd.f32 %v2894_v33, %v2893_v8 }
 0x31c   :  { %v10898_v36 = vpop.f32.mrb[24].mxu1  ;;  %v2947_v17 = vadd.f32 %v2946_v35, %v2945_v43  ;;  %v4544_v28 = vsel %vm2882_vm8, %v4521_v12, 0.0  ;;  %v4492_v6 = vsel %vm2882_vm8, %v10855_v26, 0.0  ;;  %v4522_v31 = vmul.f32 %v10855_v26, %v10855_v26 }
 0x31d   :  { %v10903_v44 = vpop.f32.mrb[25].mxu1  ;;  %v10905_v50 = vpop.f32.mrb[28].mxu0  ;;  %v4545_v0 = vadd.f32 %v4544_v28, %v4543_v49  ;;  %v8058_v45 = vpack.c.bf16 %v10829_v11, %v10829_v11  ;;  %v4524_v37 = vmul.f32 %v10847_v13, %v10847_v13  ;;  %v4493_v52 = vadd.f32 %v4492_v6, %v4491_v9 }
 0x31e   :  { %v10913_v15 = vpop.f32.mrb[26].mxu1  ;;  %v10915_v48 = vpop.f32.mrb[29].mxu0  ;;  %v2949_v14 = vadd.f32 %v2948_v38, %v2947_v17  ;;  %v8059_v20 = vpack.c.bf16 %v10847_v13, %v10847_v13  ;;  %v2950_v30 = vsel %vm2882_vm8, %v2928_v4, 0.0  ;;  %v4548_v11 = vsel %vm2882_vm8, %v4523_v22, 0.0 }
 0x31f   :  { %v10921_v1 = vpop.f32.mrb[27].mxu1  ;;  %v10923_v59 = vpop.f32.mrb[30].mxu0  ;;  %v2854_v21 = vpack.c.bf16 %v10845_v32, %v10845_v32  ;;  %v4546_v54 = vsel %vm2882_vm8, %v4522_v31, 0.0  ;;  %4430 = vrot.lane.b32.xlu0 %v8058_v45, %s9044_s28  ;;  %v4495_v51 = vadd.f32 %v4494_v53, %v4493_v52  ;;  %v2931_v63 = vmul.f32 %v10898_v36, %v10898_v36 }
 0x320   :  { %v10931_v47 = vpop.f32.mrb[31].mxu0  ;;  %v4547_v7 = vadd.f32 %v4546_v54, %v4545_v0  ;;  %4432 = vrot.lane.b32.xlu1 %v8059_v20, %s9044_s28  ;;  %v2897_v41 = vadd.f32 %v2896_v34, %v2895_v46  ;;  %v4496_v60 = vsel %vm2882_vm8, %v10847_v13, 0.0  ;;  %v2898_v33 = vsel %vm2882_vm8, %v10903_v44, 0.0 }
 0x321   :  { %v2929_v56 = vmul.f32 %v10903_v44, %v10903_v44  ;;  %v2951_v38 = vadd.f32 %v2950_v30, %v2949_v14  ;;  %v4550_v43 = vsel %vm2882_vm8, %v4524_v37, 0.0  ;;  %v8056_v57 = vpack.c.bf16 %v10839_v40, %v10839_v40 }
 0x322   :  { %v4549_v27 = vadd.f32 %v4548_v11, %v4547_v7  ;;  %v2899_v23 = vadd.f32 %v2898_v33, %v2897_v41  ;;  %v2859_v34 = vpack.c.bf16 %v10898_v36, %v10898_v36  ;;  %v2902_v13 = vsel %vm2882_vm8, %v10898_v36, 0.0 }
 0x323   :  { %v2857_v42 = vpack.c.bf16 %v10903_v44, %v10903_v44  ;;  %v2952_v4 = vsel %vm2882_vm8, %v2929_v56, 0.0  ;;  %v2956_v8 = vsel %vm2882_vm8, %v2931_v63, 0.0  ;;  %4426 = vrot.lane.b32.xlu0 %v8056_v57, %s9044_s28  ;;  %v2860_v12 = vpack.c.bf16 %v10913_v15, %v10913_v15 }
 0x324   :  { %v2953_v16 = vadd.f32 %v2952_v4, %v2951_v38  ;;  %v8057_v40 = vpack.c.bf16 %v10855_v26, %v10855_v26  ;;  %v2904_v22 = vsel %vm2882_vm8, %v10913_v15, 0.0  ;;  %v2900_v35 = vsel %vm2882_vm8, %v10921_v1, 0.0 }
 0x325   :  { %v2930_v9 = vmul.f32 %v10921_v1, %v10921_v1  ;;  %v4497_v49 = vadd.f32 %v4496_v60, %v4495_v51  ;;  %v2932_v53 = vmul.f32 %v10913_v15, %v10913_v15  ;;  %v2901_v46 = vadd.f32 %v2900_v35, %v2899_v23 }
 0x326   :  { %4428 = vrot.lane.b32.xlu1 %v8057_v40, %s9044_s28  ;;  %v4498_v17 = vsel %vm2882_vm8, %v10915_v48, 0.0  ;;  %v4525_v26 = vmul.f32 %v10915_v48, %v10915_v48  ;;  %v4527_v28 = vmul.f32 %v10905_v50, %v10905_v50  ;;  %v4551_v31 = vadd.f32 %v4550_v43, %v4549_v27 }
 0x327   :  { %v2954_v0 = vsel %vm2882_vm8, %v2930_v9, 0.0  ;;  %v4499_v6 = vadd.f32 %v4498_v17, %v4497_v49  ;;  %v2903_v14 = vadd.f32 %v2902_v13, %v2901_v46  ;;  %v4528_v20 = vmul.f32 %v10923_v59, %v10923_v59 }
 0x328   :  { %v10974_v45 = vpop.f32.mrb[28].mxu1  ;;  %v2955_v37 = vadd.f32 %v2954_v0, %v2953_v16  ;;  %v4552_v52 = vsel %vm2882_vm8, %v4525_v26, 0.0  ;;  %v4500_v54 = vsel %vm2882_vm8, %v10931_v47, 0.0  ;;  %v4526_v51 = vmul.f32 %v10931_v47, %v10931_v47 }
 0x329   :  { %v2818_v30 = vpop.f32.mrb[29].mxu1  ;;  %v4553_v11 = vadd.f32 %v4552_v52, %v4551_v31  ;;  %v8062_v7 = vpack.c.bf16 %v10905_v50, %v10905_v50  ;;  %v4502_v41 = vsel %vm2882_vm8, %v10905_v50, 0.0  ;;  %v4501_v33 = vadd.f32 %v4500_v54, %v4499_v6 }
 0x32a   :  { %v8403_v63 = vpop.f32.mrb[30].mxu1  ;;  %v2957_v60 = vadd.f32 %v2956_v8, %v2955_v37  ;;  %v8063_v56 = vpack.c.bf16 %v10923_v59, %v10923_v59  ;;  %v2958_v43 = vsel %vm2882_vm8, %v2932_v53, 0.0  ;;  %v4556_v27 = vsel %vm2882_vm8, %v4527_v28, 0.0 }
 0x32b   :  { %v2821_v38 = vpop.f32.mrb[31].mxu1  ;;  %v2858_v23 = vpack.c.bf16 %v10921_v1, %v10921_v1  ;;  %v4554_v57 = vsel %vm2882_vm8, %v4526_v51, 0.0  ;;  %4438 = vrot.lane.b32.xlu0 %v8062_v7, %s9044_s28  ;;  %v4504_v50 = vsel %vm2882_vm8, %v10923_v59, 0.0  ;;  %v4503_v13 = vadd.f32 %v4502_v41, %v4501_v33 }
 0x32c   :  { %v4555_v4 = vadd.f32 %v4554_v57, %v4553_v11  ;;  %4440 = vrot.lane.b32.xlu1 %v8063_v56, %s9044_s28  ;;  %v2905_v8 = vadd.f32 %v2904_v22, %v2903_v14  ;;  %v4558_v16 = vsel %vm2882_vm8, %v4528_v20, 0.0  ;;  %v2906_v40 = vsel %vm2882_vm8, %v2818_v30, 0.0 }
 0x32d   :  { %v2933_v35 = vmul.f32 %v2818_v30, %v2818_v30  ;;  %v2959_v9 = vadd.f32 %v2958_v43, %v2957_v60  ;;  %v11000_v49 = vadd.f32 %v4504_v50, %v4503_v13  ;;  %v8060_v46 = vpack.c.bf16 %v10915_v48, %v10915_v48 }
 0x32e   :  { %v4557_v1 = vadd.f32 %v4556_v27, %v4555_v4  ;;  %v2907_v53 = vadd.f32 %v2906_v40, %v2905_v8  ;;  %v2863_v59 = vpack.c.bf16 %v10974_v45, %v10974_v45  ;;  %v2861_v17 = vpack.c.bf16 %v2818_v30, %v2818_v30 }
 0x32f   :  { %v2960_v26 = vsel %vm2882_vm8, %v2933_v35, 0.0  ;;  %v2864_v22 = vpack.c.bf16 %v8403_v63, %v8403_v63  ;;  %4434 = vrot.lane.b32.xlu0 %v8060_v46, %s9044_s28  ;;  %v8061_v6 = vpack.c.bf16 %v10931_v47, %v10931_v47  ;;  %v2935_v31 = vmul.f32 %v10974_v45, %v10974_v45 }
 0x330   :  { %v11007_v28 = vadd.f32 %v4558_v16, %v4557_v1  ;;  %v2961_v0 = vadd.f32 %v2960_v26, %v2959_v9  ;;  %v2862_v14 = vpack.c.bf16 %v2821_v38, %v2821_v38  ;;  %v2908_v48 = vsel %vm2882_vm8, %v2821_v38, 0.0 }
 0x331   :  { %v2934_v37 = vmul.f32 %v2821_v38, %v2821_v38  ;;  %4436 = vrot.lane.b32.xlu1 %v8061_v6, %s9044_s28  ;;  %v2909_v52 = vadd.f32 %v2908_v48, %v2907_v53  ;;  %vm2865_vm1 = vcmask 27648   ;;  %v2910_v20 = vsel %vm2882_vm8, %v10974_v45, 0.0 }
 0x332   :  { %v2936_v30 = vmul.f32 %v8403_v63, %v8403_v63  ;;  %2868 = vst.msk [vmem:[#allocation9 + $0x10] sm:$0xf] %vm2865_vm1, %v2851_v18  ;;  %2866 = vst.msk [vmem:[#allocation9] sm:$0xf] %vm2865_vm1, %v2849_v24  ;;  %v2964_v10 = vsel %vm2882_vm8, %v2935_v31, 0.0  ;;  %v2912_v61 = vsel %vm2882_vm8, %v8403_v63, 0.0 }
 0x333   :  { %v2962_v11 = vsel %vm2882_vm8, %v2934_v37, 0.0  ;;  %2867 = vst.msk [vmem:[#allocation9 + $0x8] sm:$0xf] %vm2865_vm1, %v2850_v29  ;;  %2869 = vst.msk [vmem:[#allocation9 + $0x18] sm:$0xf] %vm2865_vm1, %v2852_v2  ;;  %v2911_v5 = vadd.f32 %v2910_v20, %v2909_v52  ;;  %v4506_v54 = vrot.slane %v11000_v49, 4 }
 0x334   :  { %2870 = vst.msk [vmem:[#allocation9 + $0x20] sm:$0xf] %vm2865_vm1, %v2853_v3  ;;  %2871 = vst.msk [vmem:[#allocation9 + $0x28] sm:$0xf] %vm2865_vm1, %v2854_v21  ;;  %v2963_v55 = vadd.f32 %v2962_v11, %v2961_v0  ;;  %v2966_v2 = vsel %vm2882_vm8, %v2936_v30, 0.0  ;;  %v4560_v63 = vrot.slane %v11007_v28, 4 }
 0x335   :  { %2872 = vst.msk [vmem:[#allocation9 + $0x30] sm:$0xf] %vm2865_vm1, %v2855_v19  ;;  %2873 = vst.msk [vmem:[#allocation9 + $0x38] sm:$0xf] %vm2865_vm1, %v2856_v62  ;;  %v2913_v18 = vadd.f32 %v2912_v61, %v2911_v5  ;;  %v4507_v51 = vadd.f32 %v4506_v54, %v11000_v49 }
 0x336   :  { %2874 = vst.msk [vmem:[#allocation9 + $0x40] sm:$0xf] %vm2865_vm1, %v2857_v42  ;;  %2875 = vst.msk [vmem:[#allocation9 + $0x48] sm:$0xf] %vm2865_vm1, %v2858_v23  ;;  %v2965_v24 = vadd.f32 %v2964_v10, %v2963_v55  ;;  %v11095_v23 = vadd.f32 %v4560_v63, %v11007_v28 }
 0x337   :  { %2876 = vst.msk [vmem:[#allocation9 + $0x50] sm:$0xf] %vm2865_vm1, %v2859_v34  ;;  %2877 = vst.msk [vmem:[#allocation9 + $0x58] sm:$0xf] %vm2865_vm1, %v2860_v12  ;;  %v4508_v7 = vrot.slane %v4507_v51, 2  ;;  %v2914_v60 = vrot.slane %v2913_v18, 4 }
 0x338   :  { %2878 = vst.msk [vmem:[#allocation9 + $0x60] sm:$0xf] %vm2865_vm1, %v2861_v17  ;;  %2879 = vst.msk [vmem:[#allocation9 + $0x68] sm:$0xf] %vm2865_vm1, %v2862_v14  ;;  %v11071_v25 = vadd.f32 %v2966_v2, %v2965_v24  ;;  %v4562_v17 = vrot.slane %v11095_v23, 2 }
 0x339   :  { %2880 = vst.msk [vmem:[#allocation9 + $0x70] sm:$0xf] %vm2865_vm1, %v2863_v59  ;;  %2881 = vst.msk [vmem:[#allocation9 + $0x78] sm:$0xf] %vm2865_vm1, %v2864_v22  ;;  %v11092_v27 = vadd.f32 %v4508_v7, %v4507_v51  ;;  %v11100_v40 = vadd.f32 %v2914_v60, %v2913_v18 }
 0x33a   :  { %v2968_v35 = vrot.slane %v11071_v25, 4 }
 0x33b   :  { %v4510_v6 = vrot.slane %v11092_v27, 1  ;;  %v2916_v20 = vrot.slane %v11100_v40, 2 }
 0x33c   :  { %v11113_v30 = vadd.f32 %v2968_v35, %v11071_v25 }
 0x378   :  { %v4415_v58 = vpop.permute.xlu1 %4414 }
 0x379   :  { %4461 = vst.msk [vmem:[#allocation9 + $0x10] sm:$0xf] %vm4458_vm9, %v4415_v58 }
 0x37a   :  { %v4411_v39 = vpop.permute.xlu0 %4410 }
 0x37b   :  { %4459 = vst.msk [vmem:[#allocation9] sm:$0xf] %vm4458_vm9, %v4411_v39 }
 0x37c   :  { %v4417_v32 = vpop.permute.xlu1 %4416 }
 0x37d   :  { %4462 = vst.msk [vmem:[#allocation9 + $0x18] sm:$0xf] %vm4458_vm9, %v4417_v32 }
 0x37f   :  { %v4413_v29 = vpop.permute.xlu0 %4412 }
 0x380   :  { %4460 = vst.msk [vmem:[#allocation9 + $0x8] sm:$0xf] %vm4458_vm9, %v4413_v29 }
 0x385   :  { %v4423_v19 = vpop.permute.xlu0 %4422 }
 0x386   :  { %4465 = vst.msk [vmem:[#allocation9 + $0x30] sm:$0xf] %vm4458_vm9, %v4423_v19  ;;  %v4425_v3 = vpop.permute.xlu1 %4424 }
 0x387   :  { %4466 = vst.msk [vmem:[#allocation9 + $0x38] sm:$0xf] %vm4458_vm9, %v4425_v3 }
 0x389   :  { %v4419_v62 = vpop.permute.xlu0 %4418 }
 0x38a   :  { %4463 = vst.msk [vmem:[#allocation9 + $0x20] sm:$0xf] %vm4458_vm9, %v4419_v62 }
 0x38c   :  { %v4421_v36 = vpop.permute.xlu1 %4420 }
 0x38d   :  { %4464 = vst.msk [vmem:[#allocation9 + $0x28] sm:$0xf] %vm4458_vm9, %v4421_v36 }
 0x391   :  { %v4431_v44 = vpop.permute.xlu0 %4430 }
 0x392   :  { %4469 = vst.msk [vmem:[#allocation9 + $0x50] sm:$0xf] %vm4458_vm9, %v4431_v44  ;;  %v4433_v15 = vpop.permute.xlu1 %4432 }
 0x393   :  { %4470 = vst.msk [vmem:[#allocation9 + $0x58] sm:$0xf] %vm4458_vm9, %v4433_v15 }
 0x395   :  { %v4427_v21 = vpop.permute.xlu0 %4426 }
 0x396   :  { %4467 = vst.msk [vmem:[#allocation9 + $0x40] sm:$0xf] %vm4458_vm9, %v4427_v21 }
 0x398   :  { %v4429_v47 = vpop.permute.xlu1 %4428 }
 0x399   :  { %4468 = vst.msk [vmem:[#allocation9 + $0x48] sm:$0xf] %vm4458_vm9, %v4429_v47 }
 0x39d   :  { %v4439_v34 = vpop.permute.xlu0 %4438 }
 0x39e   :  { %4473 = vst.msk [vmem:[#allocation9 + $0x70] sm:$0xf] %vm4458_vm9, %v4439_v34  ;;  %v4441_v42 = vpop.permute.xlu1 %4440 }
 0x39f   :  { %4474 = vst.msk [vmem:[#allocation9 + $0x78] sm:$0xf] %vm4458_vm9, %v4441_v42 }
 0x3a1   :  { %v4435_v12 = vpop.permute.xlu0 %4434 }
 0x3a2   :  { %4471 = vst.msk [vmem:[#allocation9 + $0x60] sm:$0xf] %vm4458_vm9, %v4435_v12 }
 0x3a3   :  { %v4437_v45 = vpop.permute.xlu1 %4436 }
 0x3a4   :  { %4472 = vst.msk [vmem:[#allocation9 + $0x68] sm:$0xf] %vm4458_vm9, %v4437_v45 }
 0x3b3   :  { %v8606_v41 = vpop.f32.mrb[32].mxu0 }
 0x3b4   :  { %v7174_v33 = vpop.f32.mrb[33].mxu0  ;;  %v8066_v56 = vpack.c.bf16 %v8606_v41, %v8606_v41  ;;  %v7421_v13 = vmul.f32 %v8606_v41, %v8606_v41  ;;  %v7384_v1 = vsel %vm2882_vm8, %v8606_v41, 0.0 }
 0x3b5   :  { %v7419_v38 = vmul.f32 %v7174_v33, %v7174_v33  ;;  %v8607_v43 = vpop.f32.mrb[34].mxu0  ;;  %v7381_v4 = vsel %vm2882_vm8, %v7174_v33, 0.0  ;;  %v8064_v49 = vpack.c.bf16 %v7174_v33, %v7174_v33 }
 0x3b6   :  { %7321 = vrot.lane.b32.xlu0 %v8066_v56, %s9044_s28  ;;  %v7177_v57 = vpop.f32.mrb[35].mxu0  ;;  %v8067_v50 = vpack.c.bf16 %v8607_v43, %v8607_v43  ;;  %v7422_v46 = vmul.f32 %v8607_v43, %v8607_v43  ;;  %v7438_v31 = vsel %vm2882_vm8, %v7421_v13, 0.0  ;;  %v7386_v61 = vsel %vm2882_vm8, %v8607_v43, 0.0 }
 0x3b7   :  { %v7382_v8 = vsel %vm2882_vm8, %v7177_v57, 0.0  ;;  %v7420_v16 = vmul.f32 %v7177_v57, %v7177_v57  ;;  %v7435_v53 = vsel %vm2882_vm8, %v7419_v38, 0.0  ;;  %v8065_v0 = vpack.c.bf16 %v7177_v57, %v7177_v57 }
 0x3b8   :  { %v7383_v9 = vadd.f32 %v7382_v8, %v7381_v4  ;;  %7323 = vrot.lane.b32.xlu1 %v8067_v50, %s9044_s28  ;;  %v7440_v18 = vsel %vm2882_vm8, %v7422_v46, 0.0 }
 0x3b9   :  { %v7436_v59 = vsel %vm2882_vm8, %v7420_v16, 0.0 }
 0x3ba   :  { %v7385_v26 = vadd.f32 %v7384_v1, %v7383_v9  ;;  %v7437_v22 = vadd.f32 %v7436_v59, %v7435_v53  ;;  %v8534_v28 = vpop.f32.mrb[32].mxu1  ;;  %7317 = vrot.lane.b32.xlu0 %v8064_v49, %s9044_s28 }
 0x3bb   :  { %v5762_v14 = vpack.c.bf16 %v8534_v28, %v8534_v28  ;;  %v5833_v48 = vmul.f32 %v8534_v28, %v8534_v28  ;;  %v5681_v37 = vpop.f32.mrb[33].mxu1  ;;  %v8610_v52 = vpop.f32.mrb[36].mxu0  ;;  %v5796_v24 = vsel %vm2882_vm8, %v8534_v28, 0.0 }
 0x3bc   :  { %v7439_v11 = vadd.f32 %v7438_v31, %v7437_v22  ;;  %v5760_v5 = vpack.c.bf16 %v5681_v37, %v5681_v37  ;;  %v8535_v55 = vpop.f32.mrb[34].mxu1  ;;  %v7190_v10 = vpop.f32.mrb[37].mxu0  ;;  %7319 = vrot.lane.b32.xlu1 %v8065_v0, %s9044_s28  ;;  %v5793_v32 = vsel %vm2882_vm8, %v5681_v37, 0.0  ;;  %v5831_v29 = vmul.f32 %v5681_v37, %v5681_v37 }
 0x3bd   :  { %5779 = vst.msk [vmem:[#allocation9 + $0x14] sm:$0xf] %vm2865_vm1, %v5762_v14  ;;  %v5763_v2 = vpack.c.bf16 %v8535_v55, %v8535_v55  ;;  %v5684_v58 = vpop.f32.mrb[35].mxu1  ;;  %v8611_v39 = vpop.f32.mrb[38].mxu0  ;;  %v5850_v25 = vsel %vm2882_vm8, %v5833_v48, 0.0  ;;  %v7387_v19 = vadd.f32 %v7386_v61, %v7385_v26  ;;  %v5798_v62 = vsel %vm2882_vm8, %v8535_v55, 0.0 }
 0x3be   :  { %5777 = vst.msk [vmem:[#allocation9 + $0x4] sm:$0xf] %vm2865_vm1, %v5760_v5  ;;  %v7193_v3 = vpop.f32.mrb[39].mxu0  ;;  %v7388_v36 = vsel %vm2882_vm8, %v7190_v10, 0.0  ;;  %v7423_v44 = vmul.f32 %v7190_v10, %v7190_v10  ;;  %v7441_v15 = vadd.f32 %v7440_v18, %v7439_v11  ;;  %v5834_v21 = vmul.f32 %v8535_v55, %v8535_v55 }
 0x3bf   :  { %5780 = vst.msk [vmem:[#allocation9 + $0x1c] sm:$0xf] %vm2865_vm1, %v5763_v2  ;;  %v7389_v47 = vadd.f32 %v7388_v36, %v7387_v19  ;;  %v5761_v34 = vpack.c.bf16 %v5684_v58, %v5684_v58  ;;  %v5794_v42 = vsel %vm2882_vm8, %v5684_v58, 0.0  ;;  %v7425_v12 = vmul.f32 %v8610_v52, %v8610_v52 }
 0x3c0   :  { %v7442_v45 = vsel %vm2882_vm8, %v7423_v44, 0.0  ;;  %v5795_v54 = vadd.f32 %v5794_v42, %v5793_v32  ;;  %v5832_v51 = vmul.f32 %v5684_v58, %v5684_v58  ;;  %v5847_v7 = vsel %vm2882_vm8, %v5831_v29, 0.0 }
 0x3c1   :  { %v7443_v63 = vadd.f32 %v7442_v45, %v7441_v15  ;;  %5778 = vst.msk [vmem:[#allocation9 + $0xc] sm:$0xf] %vm2865_vm1, %v5761_v34  ;;  %v8070_v41 = vpack.c.bf16 %v8610_v52, %v8610_v52  ;;  %v7390_v60 = vsel %vm2882_vm8, %v7193_v3, 0.0  ;;  %v7424_v43 = vmul.f32 %v7193_v3, %v7193_v3 }
 0x3c2   :  { %v5797_v33 = vadd.f32 %v5796_v24, %v5795_v54  ;;  %v5848_v56 = vsel %vm2882_vm8, %v5832_v51, 0.0  ;;  %v7391_v38 = vadd.f32 %v7390_v60, %v7389_v47  ;;  %v5852_v57 = vsel %vm2882_vm8, %v5834_v21, 0.0 }
 0x3c3   :  { %v7392_v50 = vsel %vm2882_vm8, %v8610_v52, 0.0  ;;  %v5849_v13 = vadd.f32 %v5848_v56, %v5847_v7  ;;  %7329 = vrot.lane.b32.xlu0 %v8070_v41, %s9044_s28  ;;  %v8071_v4 = vpack.c.bf16 %v8611_v39, %v8611_v39  ;;  %v7446_v8 = vsel %vm2882_vm8, %v7425_v12, 0.0 }
 0x3c4   :  { %v7393_v16 = vadd.f32 %v7392_v50, %v7391_v38  ;;  %v7444_v35 = vsel %vm2882_vm8, %v7424_v43, 0.0  ;;  %v5799_v9 = vadd.f32 %v5798_v62, %v5797_v33  ;;  %v7394_v1 = vsel %vm2882_vm8, %v8611_v39, 0.0 }
 0x3c5   :  { %v5851_v49 = vadd.f32 %v5850_v25, %v5849_v13  ;;  %v7445_v53 = vadd.f32 %v7444_v35, %v7443_v63  ;;  %7331 = vrot.lane.b32.xlu1 %v8071_v4, %s9044_s28  ;;  %v8068_v59 = vpack.c.bf16 %v7190_v10, %v7190_v10  ;;  %v7426_v26 = vmul.f32 %v8611_v39, %v8611_v39 }
 0x3c6   :  { %v8538_v46 = vpop.f32.mrb[36].mxu1  ;;  %v7395_v0 = vadd.f32 %v7394_v1, %v7393_v16  ;;  %v8069_v31 = vpack.c.bf16 %v7193_v3, %v7193_v3  ;;  %v11145_v2 = vadd.f32 %v4562_v17, %v11095_v23  ;;  %v11150_v58 = vadd.f32 %v2916_v20, %v11100_v40 }
 0x3c7   :  { %v5766_v22 = vpack.c.bf16 %v8538_v46, %v8538_v46  ;;  %v5697_v28 = vpop.f32.mrb[37].mxu1  ;;  %v7447_v14 = vadd.f32 %v7446_v8, %v7445_v53  ;;  %7325 = vrot.lane.b32.xlu0 %v8068_v59, %s9044_s28  ;;  %v5837_v5 = vmul.f32 %v8538_v46, %v8538_v46  ;;  %v5853_v61 = vadd.f32 %v5852_v57, %v5851_v49 }
 0x3c8   :  { %v5764_v48 = vpack.c.bf16 %v5697_v28, %v5697_v28  ;;  %v5800_v37 = vsel %vm2882_vm8, %v5697_v28, 0.0  ;;  %v5835_v52 = vmul.f32 %v5697_v28, %v5697_v28  ;;  %v8539_v11 = vpop.f32.mrb[38].mxu1  ;;  %v2970_v39 = vrot.slane %v11113_v30, 2 }
 0x3c9   :  { %5783 = vst.msk [vmem:[#allocation9 + $0x34] sm:$0xf] %vm2865_vm1, %v5766_v22  ;;  %v5801_v55 = vadd.f32 %v5800_v37, %v5799_v9  ;;  %v5767_v18 = vpack.c.bf16 %v8539_v11, %v8539_v11  ;;  %v8614_v10 = vpop.f32.mrb[40].mxu0  ;;  %v5700_v24 = vpop.f32.mrb[39].mxu1  ;;  %7327 = vrot.lane.b32.xlu1 %v8069_v31, %s9044_s28  ;;  %v7448_v29 = vsel %vm2882_vm8, %v7426_v26, 0.0  ;;  %v5804_v40 = vsel %vm2882_vm8, %v8538_v46, 0.0 }
 0x3ca   :  { %v5854_v25 = vsel %vm2882_vm8, %v5835_v52, 0.0  ;;  %5781 = vst.msk [vmem:[#allocation9 + $0x24] sm:$0xf] %vm2865_vm1, %v5764_v48  ;;  %v7206_v32 = vpop.f32.mrb[41].mxu0  ;;  %v7449_v62 = vadd.f32 %v7448_v29, %v7447_v14  ;;  %v5765_v36 = vpack.c.bf16 %v5700_v24, %v5700_v24  ;;  %v5858_v15 = vsel %vm2882_vm8, %v5837_v5, 0.0 }
 0x3cb   :  { %v5855_v19 = vadd.f32 %v5854_v25, %v5853_v61  ;;  %5784 = vst.msk [vmem:[#allocation9 + $0x3c] sm:$0xf] %vm2865_vm1, %v5767_v18  ;;  %v7396_v23 = vsel %vm2882_vm8, %v7206_v32, 0.0  ;;  %v7427_v17 = vmul.f32 %v7206_v32, %v7206_v32  ;;  %v8615_v3 = vpop.f32.mrb[42].mxu0  ;;  %v5802_v47 = vsel %vm2882_vm8, %v5700_v24, 0.0 }
 0x3cc   :  { %v7397_v20 = vadd.f32 %v7396_v23, %v7395_v0  ;;  %v7209_v44 = vpop.f32.mrb[43].mxu0  ;;  %v5836_v34 = vmul.f32 %v5700_v24, %v5700_v24  ;;  %v5838_v42 = vmul.f32 %v8539_v11, %v8539_v11  ;;  %v7429_v12 = vmul.f32 %v8614_v10, %v8614_v10  ;;  %5782 = vst.msk [vmem:[#allocation9 + $0x2c] sm:$0xf] %vm2865_vm1, %v5765_v36 }
 0x3cd   :  { %v7450_v21 = vsel %vm2882_vm8, %v7427_v17, 0.0  ;;  %v5803_v54 = vadd.f32 %v5802_v47, %v5801_v55  ;;  %v8074_v7 = vpack.c.bf16 %v8614_v10, %v8614_v10  ;;  %v7398_v63 = vsel %vm2882_vm8, %v7209_v44, 0.0 }
 0x3ce   :  { %v7451_v45 = vadd.f32 %v7450_v21, %v7449_v62  ;;  %v5856_v51 = vsel %vm2882_vm8, %v5836_v34, 0.0  ;;  %v7428_v41 = vmul.f32 %v7209_v44, %v7209_v44  ;;  %v5806_v60 = vsel %vm2882_vm8, %v8539_v11, 0.0 }
 0x3cf   :  { %v5805_v33 = vadd.f32 %v5804_v40, %v5803_v54  ;;  %v5857_v56 = vadd.f32 %v5856_v51, %v5855_v19  ;;  %v7399_v38 = vadd.f32 %v7398_v63, %v7397_v20  ;;  %v7400_v43 = vsel %vm2882_vm8, %v8614_v10, 0.0  ;;  %7337 = vrot.lane.b32.xlu0 %v8074_v7, %s9044_s28 }
 0x3d0   :  { %v7430_v57 = vmul.f32 %v8615_v3, %v8615_v3  ;;  %v7452_v50 = vsel %vm2882_vm8, %v7428_v41, 0.0  ;;  %v8075_v13 = vpack.c.bf16 %v8615_v3, %v8615_v3  ;;  %v5860_v9 = vsel %vm2882_vm8, %v5838_v42, 0.0 }
 0x3d1   :  { %v5859_v4 = vadd.f32 %v5858_v15, %v5857_v56  ;;  %v7401_v8 = vadd.f32 %v7400_v43, %v7399_v38  ;;  %v7453_v16 = vadd.f32 %v7452_v50, %v7451_v45  ;;  %v5807_v35 = vadd.f32 %v5806_v60, %v5805_v33 }
 0x3d2   :  { %v7454_v49 = vsel %vm2882_vm8, %v7429_v12, 0.0  ;;  %v7402_v1 = vsel %vm2882_vm8, %v8615_v3, 0.0  ;;  %7339 = vrot.lane.b32.xlu1 %v8075_v13, %s9044_s28  ;;  %v8072_v53 = vpack.c.bf16 %v7206_v32, %v7206_v32  ;;  %v2918_v46 = vrot.slane %v11150_v58, 1 }
 0x3d3   :  { %v7455_v59 = vadd.f32 %v7454_v49, %v7453_v16  ;;  %v5861_v22 = vadd.f32 %v5860_v9, %v5859_v4  ;;  %v7403_v28 = vadd.f32 %v7402_v1, %v7401_v8  ;;  %v11176_v0 = vadd.f32 %v2970_v39, %v11113_v30 }
 0x3d4   :  { %v8542_v26 = vpop.f32.mrb[40].mxu1  ;;  %v7456_v31 = vsel %vm2882_vm8, %v7430_v57, 0.0  ;;  %7333 = vrot.lane.b32.xlu0 %v8072_v53, %s9044_s28  ;;  %v8073_v52 = vpack.c.bf16 %v7209_v44, %v7209_v44  ;;  %v11191_v29 = vadd.f32 %v4510_v6, %v11092_v27 }
 0x3d5   :  { %v5770_v14 = vpack.c.bf16 %v8542_v26, %v8542_v26  ;;  %v5713_v48 = vpop.f32.mrb[41].mxu1  ;;  %v11180_v37 = vpop.f32.mrb[44].mxu0  ;;  %v5841_v11 = vmul.f32 %v8542_v26, %v8542_v26  ;;  %v5812_v24 = vsel %vm2882_vm8, %v8542_v26, 0.0  ;;  %v7457_v44 = vadd.f32 %v7456_v31, %v7455_v59 }
 0x3d6   :  { %v5768_v5 = vpack.c.bf16 %v5713_v48, %v5713_v48  ;;  %v5808_v55 = vsel %vm2882_vm8, %v5713_v48, 0.0  ;;  %v5839_v61 = vmul.f32 %v5713_v48, %v5713_v48  ;;  %v8543_v18 = vpop.f32.mrb[42].mxu1  ;;  %v7222_v10 = vpop.f32.mrb[45].mxu0  ;;  %7335 = vrot.lane.b32.xlu1 %v8073_v52, %s9044_s28  ;;  %v7408_v17 = vsel %vm2882_vm8, %v11180_v37, 0.0 }
 0x3d7   :  { %5787 = vst.msk [vmem:[#allocation9 + $0x54] sm:$0xf] %vm2865_vm1, %v5770_v14  ;;  %v5809_v30 = vadd.f32 %v5808_v55, %v5807_v35  ;;  %v5771_v39 = vpack.c.bf16 %v8543_v18, %v8543_v18  ;;  %v5716_v25 = vpop.f32.mrb[43].mxu1  ;;  %v11186_v32 = vpop.f32.mrb[46].mxu0  ;;  %v5842_v23 = vmul.f32 %v8543_v18, %v8543_v18  ;;  %v7404_v3 = vsel %vm2882_vm8, %v7222_v10, 0.0 }
 0x3d8   :  { %v5862_v19 = vsel %vm2882_vm8, %v5839_v61, 0.0  ;;  %5785 = vst.msk [vmem:[#allocation9 + $0x44] sm:$0xf] %vm2865_vm1, %v5768_v5  ;;  %v7225_v40 = vpop.f32.mrb[47].mxu0  ;;  %v7405_v62 = vadd.f32 %v7404_v3, %v7403_v28  ;;  %v7431_v36 = vmul.f32 %v7222_v10, %v7222_v10  ;;  %v5866_v27 = vsel %vm2882_vm8, %v5841_v11, 0.0 }
 0x3d9   :  { %v5863_v20 = vadd.f32 %v5862_v19, %v5861_v22  ;;  %5788 = vst.msk [vmem:[#allocation9 + $0x5c] sm:$0xf] %vm2865_vm1, %v5771_v39  ;;  %v5814_v6 = vsel %vm2882_vm8, %v8543_v18, 0.0  ;;  %v5769_v15 = vpack.c.bf16 %v5716_v25, %v5716_v25  ;;  %v5810_v21 = vsel %vm2882_vm8, %v5716_v25, 0.0 }
 0x3da   :  { %v7433_v47 = vmul.f32 %v11180_v37, %v11180_v37  ;;  %v7458_v34 = vsel %vm2882_vm8, %v7431_v36, 0.0  ;;  %v5811_v42 = vadd.f32 %v5810_v21, %v5809_v30  ;;  %v5840_v12 = vmul.f32 %v5716_v25, %v5716_v25 }
 0x3db   :  { %v5868_v45 = vsel %vm2882_vm8, %v5842_v23, 0.0  ;;  %v7459_v54 = vadd.f32 %v7458_v34, %v7457_v44  ;;  %5786 = vst.msk [vmem:[#allocation9 + $0x4c] sm:$0xf] %vm2865_vm1, %v5769_v15  ;;  %v7406_v51 = vsel %vm2882_vm8, %v7225_v40, 0.0  ;;  %v7432_v7 = vmul.f32 %v7225_v40, %v7225_v40 }
 0x3dc   :  { %v5813_v63 = vadd.f32 %v5812_v24, %v5811_v42  ;;  %v5864_v41 = vsel %vm2882_vm8, %v5840_v12, 0.0  ;;  %v7407_v60 = vadd.f32 %v7406_v51, %v7405_v62  ;;  %v8076_v33 = vpack.c.bf16 %v7222_v10, %v7222_v10 }
 0x3dd   :  { %v5865_v56 = vadd.f32 %v5864_v41, %v5863_v20  ;;  %v7434_v38 = vmul.f32 %v11186_v32, %v11186_v32  ;;  %v7460_v43 = vsel %vm2882_vm8, %v7432_v7, 0.0  ;;  %v8077_v57 = vpack.c.bf16 %v7225_v40, %v7225_v40 }
 0x3de   :  { %v7462_v50 = vsel %vm2882_vm8, %v7433_v47, 0.0  ;;  %v7409_v13 = vadd.f32 %v7408_v17, %v7407_v60  ;;  %v7461_v4 = vadd.f32 %v7460_v43, %v7459_v54  ;;  %7341 = vrot.lane.b32.xlu0 %v8076_v33, %s9044_s28  ;;  %v5815_v16 = vadd.f32 %v5814_v6, %v5813_v63 }
 0x3df   :  { %v8546_v8 = vpop.f32.mrb[44].mxu1  ;;  %v5867_v35 = vadd.f32 %v5866_v27, %v5865_v56  ;;  %v7410_v9 = vsel %vm2882_vm8, %v11186_v32, 0.0  ;;  %7343 = vrot.lane.b32.xlu1 %v8077_v57, %s9044_s28  ;;  %v8078_v53 = vpack.c.bf16 %v11180_v37, %v11180_v37  ;;  %v7464_v14 = vsel %vm2882_vm8, %v7434_v38, 0.0 }
 0x3e0   :  { %v5774_v49 = vpack.c.bf16 %v8546_v8, %v8546_v8  ;;  %v5729_v1 = vpop.f32.mrb[45].mxu1  ;;  %v7411_v59 = vadd.f32 %v7410_v9, %v7409_v13  ;;  %v7463_v26 = vadd.f32 %v7462_v50, %v7461_v4  ;;  %v2919_v18 = vadd.f32 %v2918_v46, %v11150_v58 }
 0x3e1   :  { %v5772_v22 = vpack.c.bf16 %v5729_v1, %v5729_v1  ;;  %v5816_v28 = vsel %vm2882_vm8, %v5729_v1, 0.0  ;;  %v8547_v31 = vpop.f32.mrb[46].mxu1  ;;  %v5843_v52 = vmul.f32 %v5729_v1, %v5729_v1  ;;  %v5869_v11 = vadd.f32 %v5868_v45, %v5867_v35 }
 0x3e2   :  { %5791 = vst.msk [vmem:[#allocation9 + $0x74] sm:$0xf] %vm2865_vm1, %v5774_v49  ;;  %v5817_v48 = vadd.f32 %v5816_v28, %v5815_v16  ;;  %v5732_v5 = vpop.f32.mrb[47].mxu1  ;;  %v7412_v55 = vrot.slane %v7411_v59, 4  ;;  %v7465_v61 = vadd.f32 %v7464_v14, %v7463_v26  ;;  %7345 = vrot.lane.b32.xlu0 %v8078_v53, %s9044_s28  ;;  %v5775_v37 = vpack.c.bf16 %v8547_v31, %v8547_v31 }
 0x3e3   :  { %5789 = vst.msk [vmem:[#allocation9 + $0x64] sm:$0xf] %vm2865_vm1, %v5772_v22  ;;  %v5870_v10 = vsel %vm2882_vm8, %v5843_v52, 0.0  ;;  %v5773_v24 = vpack.c.bf16 %v5732_v5, %v5732_v5  ;;  %v5818_v30 = vsel %vm2882_vm8, %v5732_v5, 0.0  ;;  %v4564_v39 = vrot.slane %v11145_v2, 1 }
 0x3e4   :  { %v5820_v25 = vsel %vm2882_vm8, %v8546_v8, 0.0  ;;  %v5845_v19 = vmul.f32 %v8546_v8, %v8546_v8  ;;  %v5871_v23 = vadd.f32 %v5870_v10, %v5869_v11  ;;  %5792 = vst.msk [vmem:[#allocation9 + $0x7c] sm:$0xf] %vm2865_vm1, %v5775_v37  ;;  %v5819_v17 = vadd.f32 %v5818_v30, %v5817_v48 }
 0x3e5   :  { %v5822_v3 = vsel %vm2882_vm8, %v8547_v31, 0.0  ;;  %5790 = vst.msk [vmem:[#allocation9 + $0x6c] sm:$0xf] %vm2865_vm1, %v5773_v24  ;;  %v5844_v40 = vmul.f32 %v5732_v5, %v5732_v5  ;;  %v8079_v58 = vpack.c.bf16 %v11186_v32, %v11186_v32  ;;  %v2972_v46 = vrot.slane %v11176_v0, 1 }
 0x3e6   :  { %v7413_v20 = vadd.f32 %v7412_v55, %v7411_v59  ;;  %v7466_v62 = vrot.slane %v7465_v61, 4  ;;  %v5821_v36 = vadd.f32 %v5820_v25, %v5819_v17  ;;  %v4512_v44 = vadd.f32 %v11191_v29, %v2919_v18 }
 0x3e7   :  { %v5846_v27 = vmul.f32 %v8547_v31, %v8547_v31  ;;  %v5872_v6 = vsel %vm2882_vm8, %v5844_v40, 0.0  ;;  %7347 = vrot.lane.b32.xlu1 %v8079_v58, %s9044_s28  ;;  %v2973_v15 = vadd.f32 %v2972_v46, %v11176_v0  ;;  %v4565_v21 = vadd.f32 %v4564_v39, %v11145_v2 }
 0x3e8   :  { %v5823_v47 = vadd.f32 %v5822_v3, %v5821_v36  ;;  %v5873_v34 = vadd.f32 %v5872_v6, %v5871_v23  ;;  %v5874_v32 = vsel %vm2882_vm8, %v5845_v19, 0.0  ;;  %v7414_v12 = vrot.slane %v7413_v20, 2 }
 0x3e9   :  { %v4566_v42 = vadd.f32 %v4565_v21, %v2973_v15  ;;  %v7467_v45 = vadd.f32 %v7466_v62, %v7465_v61  ;;  %v5876_v29 = vsel %vm2882_vm8, %v5846_v27, 0.0 }
 0x3ea   :  { %v5824_v54 = vrot.slane %v5823_v47, 4  ;;  %v5875_v51 = vadd.f32 %v5874_v32, %v5873_v34  ;;  %v7415_v41 = vadd.f32 %v7414_v12, %v7413_v20 }
 0x3eb   :  { %v7468_v60 = vrot.slane %v7467_v45, 2 }
 0x3ec   :  { %v5825_v7 = vadd.f32 %v5824_v54, %v5823_v47  ;;  %v5877_v63 = vadd.f32 %v5876_v29, %v5875_v51  ;;  %v7416_v57 = vrot.slane %v7415_v41, 1 }
 0x3ed   :  { %v7469_v50 = vadd.f32 %v7468_v60, %v7467_v45 }
 0x3ee   :  { %v5826_v33 = vrot.slane %v5825_v7, 2  ;;  %v5878_v56 = vrot.slane %v5877_v63, 4  ;;  %v7417_v35 = vadd.f32 %v7416_v57, %v7415_v41 }
 0x3ef   :  { %v7470_v9 = vrot.slane %v7469_v50, 1 }
 0x3f0   :  { %v5827_v0 = vadd.f32 %v5826_v33, %v5825_v7  ;;  %v5879_v38 = vadd.f32 %v5878_v56, %v5877_v63 }
 0x3f1   :  { %v7471_v59 = vadd.f32 %v7470_v9, %v7469_v50 }
 0x3f2   :  { %v5828_v2 = vrot.slane %v5827_v0, 1  ;;  %v5880_v43 = vrot.slane %v5879_v38, 2 }
 0x3f4   :  { %v5881_v13 = vadd.f32 %v5880_v43, %v5879_v38  ;;  %v5829_v4 = vadd.f32 %v5828_v2, %v5827_v0 }
 0x3f6   :  { %v5830_v8 = vadd.f32 %v5829_v4, %v4512_v44  ;;  %v5882_v16 = vrot.slane %v5881_v13, 1 }
 0x3f8   :  { %v5883_v49 = vadd.f32 %v5882_v16, %v5881_v13  ;;  %v7418_v1 = vadd.f32 %v7417_v35, %v5830_v8 }
 0x3fa   :  { %v5884_v53 = vadd.f32 %v5883_v49, %v4566_v42  ;;  %7474 = vst.msk [vmem:[#allocation10] sm:$0x1] %vm7473_vm10, %v7418_v1 }
 0x3fc   :  { %v7472_v26 = vadd.f32 %v7471_v59, %v5884_v53 }
 0x3fe   :  { %7475 = vst.msk [vmem:[#allocation10 + $0x1] sm:$0x1] %vm7473_vm10, %v7472_v26 }
 0x3ff   :  { %9000 = shalt.err (!%p8997_p0)
}
 0x400   :  { %s9001_s5 = scalar_lea.hbm %s11291_s4, 32 }
 0x401   :  { %p9002_p1 = scmp.ne.s32.totalorder %s11291_s4, %s9001_s5  ;;  %p9005_p2 = scmp.lt.u32.totalorder %s9001_s5, %s11291_s4 }
 0x403   :  { %p9007_p3 = pnand %p9005_p2, %p9002_p1 }
 0x405   :  { %9010 = shalt.err (!%p9007_p3)
}
 0x406   :  { %7497 = dma.vmem_to_hbm [thread:$0]  %s7495_s25, 32, %s11291_s4, [#allocation11]  }
 0x407   :  { %s9048_s4 = smov [#allocation9]  }
 0x408   :  { %s7481_s12 = sshll.u32 %s9048_s4, 4  ;;  %s7482_s12 = int_to_ptr.vmem [resolvable:$true] %s7481_s12 }
 0x409   :  { %s9011_s1 = scalar_lea.vmem %s7482_s12, 2048  ;;  %p9016_p5 = scmp.lt.s32.totalorder %s7482_s12, %s7482_s12 }
 0x40a   :  { %p9012_p4 = scmp.ne.s32.totalorder %s7482_s12, %s9011_s1  ;;  %p9017_p6 = scmp.lt.s32.totalorder %s9011_s1, %s9011_s1 }
 0x40c   :  { %p9018_p7 = por %p9017_p6, %p9016_p5 }
 0x40e   :  { %p9019_p8 = pnand %p9018_p7, %p9012_p4 }
 0x428   :  { %v7322_v22 = vpop.permute.xlu0 %7321 }
 0x429   :  { %7367 = vst.msk [vmem:[#allocation9 + $0x14] sm:$0xf] %vm4458_vm9, %v7322_v22 }
 0x42a   :  { %v7324_v28 = vpop.permute.xlu1 %7323 }
 0x42b   :  { %7368 = vst.msk [vmem:[#allocation9 + $0x1c] sm:$0xf] %vm4458_vm9, %v7324_v28 }
 0x42c   :  { %v7318_v31 = vpop.permute.xlu0 %7317 }
 0x42d   :  { %7365 = vst.msk [vmem:[#allocation9 + $0x4] sm:$0xf] %vm4458_vm9, %v7318_v31 }
 0x42e   :  { %v7320_v14 = vpop.permute.xlu1 %7319 }
 0x42f   :  { %7366 = vst.msk [vmem:[#allocation9 + $0xc] sm:$0xf] %vm4458_vm9, %v7320_v14 }
 0x435   :  { %v7330_v48 = vpop.permute.xlu0 %7329 }
 0x436   :  { %7371 = vst.msk [vmem:[#allocation9 + $0x34] sm:$0xf] %vm4458_vm9, %v7330_v48 }
 0x437   :  { %v7332_v52 = vpop.permute.xlu1 %7331 }
 0x438   :  { %7372 = vst.msk [vmem:[#allocation9 + $0x3c] sm:$0xf] %vm4458_vm9, %v7332_v52 }
 0x439   :  { %v7326_v11 = vpop.permute.xlu0 %7325 }
 0x43a   :  { %7369 = vst.msk [vmem:[#allocation9 + $0x24] sm:$0xf] %vm4458_vm9, %v7326_v11 }
 0x43b   :  { %v7328_v5 = vpop.permute.xlu1 %7327 }
 0x43c   :  { %7370 = vst.msk [vmem:[#allocation9 + $0x2c] sm:$0xf] %vm4458_vm9, %v7328_v5 }
 0x441   :  { %v7338_v55 = vpop.permute.xlu0 %7337 }
 0x442   :  { %7375 = vst.msk [vmem:[#allocation9 + $0x54] sm:$0xf] %vm4458_vm9, %v7338_v55 }
 0x444   :  { %v7340_v61 = vpop.permute.xlu1 %7339 }
 0x445   :  { %7376 = vst.msk [vmem:[#allocation9 + $0x5c] sm:$0xf] %vm4458_vm9, %v7340_v61 }
 0x446   :  { %v7334_v37 = vpop.permute.xlu0 %7333 }
 0x447   :  { %7373 = vst.msk [vmem:[#allocation9 + $0x44] sm:$0xf] %vm4458_vm9, %v7334_v37 }
 0x448   :  { %v7336_v18 = vpop.permute.xlu1 %7335 }
 0x449   :  { %7374 = vst.msk [vmem:[#allocation9 + $0x4c] sm:$0xf] %vm4458_vm9, %v7336_v18 }
 0x450   :  { %v7342_v10 = vpop.permute.xlu0 %7341 }
 0x451   :  { %7377 = vst.msk [vmem:[#allocation9 + $0x64] sm:$0xf] %vm4458_vm9, %v7342_v10  ;;  %v7344_v24 = vpop.permute.xlu1 %7343 }
 0x452   :  { %7378 = vst.msk [vmem:[#allocation9 + $0x6c] sm:$0xf] %vm4458_vm9, %v7344_v24 }
 0x454   :  { %v7346_v30 = vpop.permute.xlu0 %7345 }
 0x455   :  { %7379 = vst.msk [vmem:[#allocation9 + $0x74] sm:$0xf] %vm4458_vm9, %v7346_v30 }
 0x459   :  { %v7348_v39 = vpop.permute.xlu1 %7347 }
 0x45a   :  { %7380 = vst.msk [vmem:[#allocation9 + $0x7c] sm:$0xf] %vm4458_vm9, %v7348_v39 }
 0x45b   :  { %9022 = shalt.err (!%p9019_p8)
}
 0x45c   :  { %s9023_s15 = scalar_lea.hbm %s11290_s3, 2048 }
 0x45d   :  { %p9024_p9 = scmp.ne.s32.totalorder %s11290_s3, %s9023_s15  ;;  %p9027_p10 = scmp.lt.u32.totalorder %s9023_s15, %s11290_s3 }
 0x45f   :  { %p9029_p11 = pnand %p9027_p10, %p9024_p9 }
 0x461   :  { %9032 = shalt.err (!%p9029_p11)
}
 0x462   :  { %7487 = dma.vmem_to_hbm [thread:$0]  %s7482_s12, 2048, %s11290_s3, [#allocation5], %s9043_s27, %s9043_s27, %s9044_s28  }
 0x463   :  { %9037 = dma.done.wait [#allocation5], 2048  }
 0x464   :  { %9038 = vsyncadd [#allocation5], 4294965248 }
 0x465   :  { %9039 = dma.done.wait [#allocation11], 32  }
 0x466   :  { %9040 = vsyncadd [#allocation11], 4294967264 }
 0x467   :  { %7504 = vsyncpa [#allocation4], 1 }
 0x468   :  { %7505 = vsyncpa [#allocation7], 1 }
 0x469   :  { %7506 = vsyncpa [#allocation5], 1 }
 0x46a   :  { %7507 = vsyncpa [#allocation11], 1 }

</bundles_post_ra>
